<compile_context>
chip_gen: v7x
topology: tpu7x:2x2x1
jax: 0.10.0
libtpu: 0.0.40
codegen_flags: <defaults>
</compile_context>

<pallas_src>
import functools

import jax
import jax.numpy as jnp
from jax.experimental import pallas as pl
from jax.experimental.pallas import tpu as pltpu

HIDDEN = 32          # hidden_dim of each ConcatSquashLinear
CTX_DIM = 32         # context feature dim
G3_PAD = 8           # padded row count for each of the g3 / hb3 blocks
PROJ_ROWS = 4 * HIDDEN + 2 * G3_PAD     # 144 fused ctx-projection rows / layer
TN_DEFAULT = 2048    # points (lanes) per grid step


# --------------------------------------------------------------------------
# Fused Pallas kernel: the whole coupling-layer chain on one (.., TN) tile
# --------------------------------------------------------------------------
def _flow_kernel(*refs, layer_meta, layer_order, reverse):
    n_layers = len(layer_meta)
    x_ref, ctx_ref, lp_ref, wctx_ref, bctx_ref = refs[:5]
    lw = refs[5:5 + 6 * n_layers]                 # per layer: w1,b1,w2,b2,w3,b3
    y_ref, lpo_ref = refs[5 + 6 * n_layers], refs[6 + 6 * n_layers]

    H = HIDDEN
    ctx = ctx_ref[...]                            # (CTX_DIM, TN) bf16

    # ONE MXU push for every layer's six ctx projections.  Row layout per
    # layer: [g1(H) | g2(H) | hb1(H) | hb2(H) | g3(pad G3_PAD) | hb3(pad G3_PAD)]
    # Gate biases and the +2.0 scale-logit offset are folded into bctx.
    proj_all = jnp.dot(wctx_ref[...], ctx,
                       preferred_element_type=jnp.float32) + bctx_ref[...]

    x = x_ref[...]                                # (3, TN) f32
    rows = [x[d:d + 1, :] for d in range(3)]      # (1, TN) each, stay in VMEM
    lp = lp_ref[...]                              # (1, TN) f32

    for li in layer_order:                        # static loop over layers
        warp_dims, keep_dim = layer_meta[li]
        nw = len(warp_dims)
        w1, b1, w2, b2, w3, b3 = lw[6 * li:6 * li + 6]

        base = li * PROJ_ROWS
        p = proj_all[base:base + PROJ_ROWS, :]
        g1 = jax.nn.sigmoid(p[0:H, :])
        g2 = jax.nn.sigmoid(p[H:2 * H, :])
        hb1 = p[2 * H:3 * H, :]
        hb2 = p[3 * H:4 * H, :]
        g3 = jax.nn.sigmoid(p[4 * H:4 * H + 2 * nw, :])
        hb3 = p[4 * H + G3_PAD:4 * H + G3_PAD + 2 * nw, :]   # +2.0 already folded

        # fc1: contraction dim is 1 -> VPU broadcast multiply, no matmul.
        h = w1[...] * rows[keep_dim] + b1[...]                # (H, TN) f32
        h = jnp.maximum(h * g1 + hb1, 0.0)

        # fc2 / fc3: bf16 operands, f32 accumulation.
        h = jnp.dot(w2[...], h.astype(jnp.bfloat16),
                    preferred_element_type=jnp.float32) + b2[...]
        h = jnp.maximum(h * g2 + hb2, 0.0)

        s_t = jnp.dot(w3[...], h.astype(jnp.bfloat16),
                      preferred_element_type=jnp.float32) + b3[...]
        s_t = s_t * g3 + hb3                                   # (2*nw, TN)

        z = s_t[0:nw, :]                                       # scale logits (incl. +2)
        shift = s_t[nw:2 * nw, :]

        # One exp(-|z|) feeds sigmoid, log-sigmoid and (reverse) 1/sigmoid.
        e = jnp.exp(-jnp.abs(z))
        log_scale = jnp.minimum(z, 0.0) - jnp.log(1.0 + e)     # log(sigmoid(z)), stable
        logdet = jnp.sum(log_scale, axis=0, keepdims=True)     # (1, TN)

        if not reverse:
            r = pl.reciprocal(1.0 + e, approx=True)            # EUP slot
            scale = jnp.where(z >= 0.0, r, e * r)              # sigmoid(z)
            lp = lp - logdet
            for i, d in enumerate(warp_dims):
                rows[d] = rows[d] * scale[i:i + 1, :] + shift[i:i + 1, :]
        else:
            inv_scale = jnp.exp(-log_scale)                    # 1/sigmoid(z), one exp
            lp = lp + logdet
            for i, d in enumerate(warp_dims):
                rows[d] = (rows[d] - shift[i:i + 1, :]) * inv_scale[i:i + 1, :]

    for d in range(3):                           # static row stores, no concatenates
        y_ref[d:d + 1, :] = rows[d]
    lpo_ref[...] = lp


# --------------------------------------------------------------------------
# SequentialFlow forward: a single pallas_call over the whole chain
# --------------------------------------------------------------------------
def pack_context(ctx, tn=TN_DEFAULT):
    """(N, CTX_DIM) f32 -> (CTX_DIM, Np) bf16, padded to a multiple of tn.
    Do this once and reuse across forward / reverse calls."""
    n = ctx.shape[0]
    pad = (-n) % tn
    return jnp.pad(ctx, ((0, pad), (0, 0))).T.astype(jnp.bfloat16)


@functools.partial(jax.jit,
                   static_argnames=("warp_dims_chain", "reverse", "inds", "tn"))
def sequential_flow_forward(x, ctx_t, logpx, chain_params, warp_dims_chain,
                            reverse=False, inds=None, tn=TN_DEFAULT):
    """x: (N,3) f32, ctx_t: pre-packed (CTX_DIM, Np) bf16, logpx: (N,1) or None."""
    n = x.shape[0]
    pad = (-n) % tn
    np_ = n + pad
    if ctx_t.shape != (CTX_DIM, np_):
        raise ValueError("ctx_t must be pack_context(ctx, tn) with matching N/tn")

    x_t = jnp.pad(x, ((0, pad), (0, 0))).T                   # (3, Np)   lane-dense
    if logpx is None:
        lp_t = jnp.zeros((1, np_), jnp.float32)
    else:
        lp_t = jnp.pad(logpx, ((0, pad), (0, 0))).T          # (1, Np)

    wctx_all, bctx_all, flat_xw = chain_params
    n_layers = len(warp_dims_chain)
    layer_meta = tuple(
        (wd, [k for k in range(3) if k not in wd][0]) for wd in warp_dims_chain)
    if inds is None:
        order = tuple(range(n_layers - 1, -1, -1)) if reverse else tuple(range(n_layers))
    else:
        order = tuple(inds)

    kernel = functools.partial(_flow_kernel, layer_meta=layer_meta,
                               layer_order=order, reverse=reverse)

    def col_spec(rows):
        return pl.BlockSpec((rows, tn), lambda i: (0, i))

    def full_spec(a):
        return pl.BlockSpec(a.shape, lambda i: (0, 0))

    flops = 2 * np_ * (wctx_all.shape[0] * CTX_DIM
                       + sum(HIDDEN * HIDDEN + 2 * len(wd) * HIDDEN
                             for wd in warp_dims_chain))
    transcendentals = np_ * sum(2 * HIDDEN + 5 * len(wd) for wd in warp_dims_chain)
    bytes_accessed = np_ * (4 * (3 + 1 + 3 + 1) + 2 * CTX_DIM)

    y_t, lpo_t = pl.pallas_call(
        kernel,
        out_shape=(jax.ShapeDtypeStruct((3, np_), jnp.float32),
                   jax.ShapeDtypeStruct((1, np_), jnp.float32)),
        grid=(np_ // tn,),
        in_specs=[col_spec(3), col_spec(CTX_DIM), col_spec(1),
                  full_spec(wctx_all), full_spec(bctx_all)]
                 + [full_spec(a) for a in flat_xw],
        out_specs=[col_spec(3), col_spec(1)],
        compiler_params=pltpu.CompilerParams(
            dimension_semantics=("parallel",)),
        cost_estimate=pl.CostEstimate(flops=int(flops),
                                      transcendentals=int(transcendentals),
                                      bytes_accessed=int(bytes_accessed)),
    )(x_t, ctx_t, lp_t, wctx_all, bctx_all, *flat_xw)

    y = y_t.T[:n]
    if logpx is None:
        return y
    return y, lpo_t.T[:n]


# --------------------------------------------------------------------------
# Parameter init (PyTorch-like layout) and packing for the fused kernel
# --------------------------------------------------------------------------
def init_layer_params(key, warp_dims):
    """Weights stored as (in_dim, out_dim), biases as (1, out_dim)."""
    nw = len(warp_dims)
    nk = 3 - nw
    shapes = [
        # fc1: ConcatSquashLinear(nk, HIDDEN, CTX_DIM)
        (nk, HIDDEN), (1, HIDDEN), (CTX_DIM, HIDDEN), (1, HIDDEN), (CTX_DIM, HIDDEN),
        # fc2: ConcatSquashLinear(HIDDEN, HIDDEN, CTX_DIM)
        (HIDDEN, HIDDEN), (1, HIDDEN), (CTX_DIM, HIDDEN), (1, HIDDEN), (CTX_DIM, HIDDEN),
        # fc3: ConcatSquashLinear(HIDDEN, 2*nw, CTX_DIM)
        (HIDDEN, 2 * nw), (1, 2 * nw), (CTX_DIM, 2 * nw), (1, 2 * nw), (CTX_DIM, 2 * nw),
    ]
    keys = jax.random.split(key, len(shapes))
    return [0.1 * jax.random.normal(k, s, dtype=jnp.float32)
            for k, s in zip(keys, shapes)]


def _pack_layer(raw, warp_dims):
    """Feature-major transpose + fuse the 6 ctx projections and their biases."""
    (w1, b1, wg1, bg1, wb1,
     w2, b2, wg2, bg2, wb2,
     w3, b3, wg3, bg3, wb3) = raw
    nw = len(warp_dims)
    assert nw == 2 and 2 * nw <= G3_PAD            # fc1 broadcast path needs nk == 1
    H = w2.shape[0]
    pad = G3_PAD - 2 * nw

    def padrows(a):                                # (2*nw, .) -> (G3_PAD, .)
        return jnp.pad(a, ((0, pad), (0, 0)))

    # fused ctx weight rows: [g1 | g2 | hb1 | hb2 | g3(pad) | hb3(pad)]
    wctx = jnp.concatenate(
        [wg1.T, wg2.T, wb1.T, wb2.T, padrows(wg3.T), padrows(wb3.T)], axis=0)
    hb3_bias = jnp.zeros((G3_PAD, 1), jnp.float32).at[:nw, 0].set(2.0)  # fold +2.0
    bctx = jnp.concatenate(
        [bg1.T, bg2.T, jnp.zeros((2 * H, 1), jnp.float32),
         padrows(bg3.T), hb3_bias], axis=0)
    assert wctx.shape[0] == PROJ_ROWS and bctx.shape[0] == PROJ_ROWS

    xw = (w1.T, b1.T,                              # (H,1) f32 fc1 broadcast path
          w2.T.astype(jnp.bfloat16), b2.T,         # (H,H) bf16, (H,1) f32
          w3.T.astype(jnp.bfloat16), b3.T)         # (2*nw,H) bf16, (2*nw,1) f32
    return wctx, bctx, xw


def pack_chain_params(raw_chain, warp_dims_chain):
    """Stack all layers' ctx projections into one (L*144, 32) bf16 weight."""
    wctx_l, bctx_l, xw_flat = [], [], []
    for raw, wd in zip(raw_chain, warp_dims_chain):
        wctx, bctx, xw = _pack_layer(raw, wd)
        wctx_l.append(wctx)
        bctx_l.append(bctx)
        xw_flat.extend(xw)
    wctx_all = jnp.concatenate(wctx_l, axis=0).astype(jnp.bfloat16)   # (L*144, 32)
    bctx_all = jnp.concatenate(bctx_l, axis=0)                        # (L*144, 1) f32
    return wctx_all, bctx_all, tuple(xw_flat)


# --------------------------------------------------------------------------
# Pure-JAX reference (mirrors the PyTorch modules)
# --------------------------------------------------------------------------
def _csl_ref(x, ctx, w, b, wg, bg, wb):
    return (x @ w + b) * jax.nn.sigmoid(ctx @ wg + bg) + ctx @ wb


def cond3dacl_ref(x, ctx, logpx, raw, warp_dims, reverse=False):
    (w1, b1, wg1, bg1, wb1,
     w2, b2, wg2, bg2, wb2,
     w3, b3, wg3, bg3, wb3) = raw
    nw = len(warp_dims)
    keep_dims = [i for i in range(3) if i not in warp_dims]
    x_keep = x[:, keep_dims]
    h = jax.nn.relu(_csl_ref(x_keep, ctx, w1, b1, wg1, bg1, wb1))
    h = jax.nn.relu(_csl_ref(h, ctx, w2, b2, wg2, bg2, wb2))
    s_t = _csl_ref(h, ctx, w3, b3, wg3, bg3, wb3)
    scale = jax.nn.sigmoid(s_t[:, :nw] + 2.0)
    shift = s_t[:, nw:]
    logdetjac = jnp.sum(jnp.log(scale), axis=1, keepdims=True)
    x_warp = x[:, list(warp_dims)]
    if not reverse:
        y_warp = x_warp * scale + shift
        delta_logp = -logdetjac
    else:
        y_warp = (x_warp - shift) / scale
        delta_logp = logdetjac
    cols = [None, None, None]
    for i, d in enumerate(warp_dims):
        cols[d] = y_warp[:, i:i + 1]
    for d in keep_dims:
        cols[d] = x[:, d:d + 1]
    return jnp.concatenate(cols, axis=1), logpx + delta_logp


def sequential_flow_ref(x, ctx, logpx, chain_raw, warp_dims_chain, reverse=False):
    n_layers = len(chain_raw)
    inds = range(n_layers - 1, -1, -1) if reverse else range(n_layers)
    for i in inds:
        x, logpx = cond3dacl_ref(x, ctx, logpx, chain_raw[i],
                                 warp_dims_chain[i], reverse)
    return x, logpx


# --------------------------------------------------------------------------
if __name__ == "__main__":
    key = jax.random.PRNGKey(0)
    kp, kx, kc, kl = jax.random.split(key, 4)

    N = 4096                                  # points (B*Nk)
    TN = 1024                                 # 4 column tiles: even -> both v7x cores busy
    warp_chain = ((0, 2), (0, 1), (1, 2))     # 3-layer SequentialFlow
    layer_keys = jax.random.split(kp, len(warp_chain))
    raw_chain = [init_layer_params(k, wd) for k, wd in zip(layer_keys, warp_chain)]
    chain_params = pack_chain_params(raw_chain, warp_chain)

    x = jax.random.normal(kx, (N, 3), dtype=jnp.float32)
    ctx = jax.random.normal(kc, (N, CTX_DIM), dtype=jnp.float32)
    logpx = jax.random.normal(kl, (N, 1), dtype=jnp.float32)

    # ctx packed once (bf16, feature-major) and reused by forward and reverse.
    ctx_t = pack_context(ctx, tn=TN)
    # Reference sees the same bf16-rounded context the kernel streams.
    ctx_q = ctx.astype(jnp.bfloat16).astype(jnp.float32)

    # forward
    y, lp = sequential_flow_forward(x, ctx_t, logpx, chain_params,
                                    warp_dims_chain=warp_chain,
                                    reverse=False, tn=TN)
    jax.block_until_ready((y, lp))
    y_ref, lp_ref = sequential_flow_ref(x, ctx_q, logpx, raw_chain, warp_chain,
                                        reverse=False)
    # bf16 matmul operands -> tolerances loosened per the perf review.
    assert jnp.allclose(y, y_ref, rtol=2e-2, atol=2e-2), "forward y mismatch"
    assert jnp.allclose(lp, lp_ref, rtol=2e-2, atol=2e-2), "forward logp mismatch"

    # reverse (chain applied in reversed order)
    xr, lpr = sequential_flow_forward(y, ctx_t, lp, chain_params,
                                      warp_dims_chain=warp_chain,
                                      reverse=True, tn=TN)
    jax.block_until_ready((xr, lpr))
    xr_ref, lpr_ref = sequential_flow_ref(y, ctx_q, lp, raw_chain, warp_chain,
                                          reverse=True)
    assert jnp.allclose(xr, xr_ref, rtol=2e-2, atol=2e-2), "reverse y mismatch"
    assert jnp.allclose(lpr, lpr_ref, rtol=2e-2, atol=2e-2), "reverse logp mismatch"

    print("KERNEL_OK")
</pallas_src>

<mosaic_0001>
module attributes {stable_mosaic.version = 11 : i64} {
  func.func @_flow_kernel(%arg0: i32, %arg1: memref<3x1024xf32, #tpu.memory_space<vmem>>, %arg2: memref<32x1024xbf16, #tpu.memory_space<vmem>>, %arg3: memref<1x1024xf32, #tpu.memory_space<vmem>>, %arg4: memref<432x32xbf16, #tpu.memory_space<vmem>>, %arg5: memref<432x1xf32, #tpu.memory_space<vmem>>, %arg6: memref<32x1xf32, #tpu.memory_space<vmem>>, %arg7: memref<32x1xf32, #tpu.memory_space<vmem>>, %arg8: memref<32x32xbf16, #tpu.memory_space<vmem>>, %arg9: memref<32x1xf32, #tpu.memory_space<vmem>>, %arg10: memref<4x32xbf16, #tpu.memory_space<vmem>>, %arg11: memref<4x1xf32, #tpu.memory_space<vmem>>, %arg12: memref<32x1xf32, #tpu.memory_space<vmem>>, %arg13: memref<32x1xf32, #tpu.memory_space<vmem>>, %arg14: memref<32x32xbf16, #tpu.memory_space<vmem>>, %arg15: memref<32x1xf32, #tpu.memory_space<vmem>>, %arg16: memref<4x32xbf16, #tpu.memory_space<vmem>>, %arg17: memref<4x1xf32, #tpu.memory_space<vmem>>, %arg18: memref<32x1xf32, #tpu.memory_space<vmem>>, %arg19: memref<32x1xf32, #tpu.memory_space<vmem>>, %arg20: memref<32x32xbf16, #tpu.memory_space<vmem>>, %arg21: memref<32x1xf32, #tpu.memory_space<vmem>>, %arg22: memref<4x32xbf16, #tpu.memory_space<vmem>>, %arg23: memref<4x1xf32, #tpu.memory_space<vmem>>, %arg24: memref<3x1024xf32, #tpu.memory_space<vmem>>, %arg25: memref<1x1024xf32, #tpu.memory_space<vmem>>) attributes {dimension_semantics = [#tpu.dimension_semantics<parallel>], iteration_bounds = array<i64: 4>, scalar_prefetch = 0 : i64, scratch_operands = 0 : i64, tpu.core_type = #tpu.core_type<tc>, window_params = [{transform_indices = @transform_0, window_bounds = array<i64: 3, 1024>}, {transform_indices = @transform_1, window_bounds = array<i64: 32, 1024>}, {transform_indices = @transform_2, window_bounds = array<i64: 1, 1024>}, {pipeline_mode = #tpu.pipeline_mode<synchronous>, transform_indices = @transform_3, window_bounds = array<i64: 432, 32>}, {pipeline_mode = #tpu.pipeline_mode<synchronous>, transform_indices = @transform_4, window_bounds = array<i64: 432, 1>}, {pipeline_mode = #tpu.pipeline_mode<synchronous>, transform_indices = @transform_5, window_bounds = array<i64: 32, 1>}, {pipeline_mode = #tpu.pipeline_mode<synchronous>, transform_indices = @transform_6, window_bounds = array<i64: 32, 1>}, {pipeline_mode = #tpu.pipeline_mode<synchronous>, transform_indices = @transform_7, window_bounds = array<i64: 32, 32>}, {pipeline_mode = #tpu.pipeline_mode<synchronous>, transform_indices = @transform_8, window_bounds = array<i64: 32, 1>}, {pipeline_mode = #tpu.pipeline_mode<synchronous>, transform_indices = @transform_9, window_bounds = array<i64: 4, 32>}, {pipeline_mode = #tpu.pipeline_mode<synchronous>, transform_indices = @transform_10, window_bounds = array<i64: 4, 1>}, {pipeline_mode = #tpu.pipeline_mode<synchronous>, transform_indices = @transform_11, window_bounds = array<i64: 32, 1>}, {pipeline_mode = #tpu.pipeline_mode<synchronous>, transform_indices = @transform_12, window_bounds = array<i64: 32, 1>}, {pipeline_mode = #tpu.pipeline_mode<synchronous>, transform_indices = @transform_13, window_bounds = array<i64: 32, 32>}, {pipeline_mode = #tpu.pipeline_mode<synchronous>, transform_indices = @transform_14, window_bounds = array<i64: 32, 1>}, {pipeline_mode = #tpu.pipeline_mode<synchronous>, transform_indices = @transform_15, window_bounds = array<i64: 4, 32>}, {pipeline_mode = #tpu.pipeline_mode<synchronous>, transform_indices = @transform_16, window_bounds = array<i64: 4, 1>}, {pipeline_mode = #tpu.pipeline_mode<synchronous>, transform_indices = @transform_17, window_bounds = array<i64: 32, 1>}, {pipeline_mode = #tpu.pipeline_mode<synchronous>, transform_indices = @transform_18, window_bounds = array<i64: 32, 1>}, {pipeline_mode = #tpu.pipeline_mode<synchronous>, transform_indices = @transform_19, window_bounds = array<i64: 32, 32>}, {pipeline_mode = #tpu.pipeline_mode<synchronous>, transform_indices = @transform_20, window_bounds = array<i64: 32, 1>}, {pipeline_mode = #tpu.pipeline_mode<synchronous>, transform_indices = @transform_21, window_bounds = array<i64: 4, 32>}, {pipeline_mode = #tpu.pipeline_mode<synchronous>, transform_indices = @transform_22, window_bounds = array<i64: 4, 1>}, {transform_indices = @transform_23, window_bounds = array<i64: 3, 1024>}, {transform_indices = @transform_24, window_bounds = array<i64: 1, 1024>}]} {
    %c0 = arith.constant 0 : index
    %c0_0 = arith.constant 0 : index
    %0 = vector.load %arg2[%c0, %c0_0] : memref<32x1024xbf16, #tpu.memory_space<vmem>>, vector<32x1024xbf16>
    %c0_1 = arith.constant 0 : index
    %c0_2 = arith.constant 0 : index
    %1 = vector.load %arg4[%c0_1, %c0_2] : memref<432x32xbf16, #tpu.memory_space<vmem>>, vector<432x32xbf16>
    %cst = arith.constant dense<0.000000e+00> : vector<432x1024xf32>
    %2 = tpu.matmul %1, %0, %cst {dimension_numbers = #tpu.dot_dimension_numbers<[1], [0], [0], [1], [0, 0, 1, 1], [], []>} : vector<432x32xbf16>, vector<32x1024xbf16>, vector<432x1024xf32> -> vector<432x1024xf32>
    %c0_3 = arith.constant 0 : index
    %c0_4 = arith.constant 0 : index
    %3 = vector.load %arg5[%c0_3, %c0_4] : memref<432x1xf32, #tpu.memory_space<vmem>>, vector<432x1xf32>
    %4 = vector.broadcast %3 : vector<432x1xf32> to vector<432x1024xf32>
    %5 = arith.addf %2, %4 : vector<432x1024xf32>
    %c0_5 = arith.constant 0 : index
    %c0_6 = arith.constant 0 : index
    %6 = vector.load %arg1[%c0_5, %c0_6] : memref<3x1024xf32, #tpu.memory_space<vmem>>, vector<3x1024xf32>
    %7 = vector.extract_strided_slice %6 {offsets = [0, 0], sizes = [1, 1024], strides = [1, 1]} : vector<3x1024xf32> to vector<1x1024xf32>
    %8 = vector.extract_strided_slice %6 {offsets = [1, 0], sizes = [1, 1024], strides = [1, 1]} : vector<3x1024xf32> to vector<1x1024xf32>
    %9 = vector.extract_strided_slice %6 {offsets = [2, 0], sizes = [1, 1024], strides = [1, 1]} : vector<3x1024xf32> to vector<1x1024xf32>
    %c0_7 = arith.constant 0 : index
    %c0_8 = arith.constant 0 : index
    %10 = vector.load %arg3[%c0_7, %c0_8] : memref<1x1024xf32, #tpu.memory_space<vmem>>, vector<1x1024xf32>
    %11 = vector.extract_strided_slice %5 {offsets = [0, 0], sizes = [144, 1024], strides = [1, 1]} : vector<432x1024xf32> to vector<144x1024xf32>
    %12 = vector.extract_strided_slice %11 {offsets = [0, 0], sizes = [32, 1024], strides = [1, 1]} : vector<144x1024xf32> to vector<32x1024xf32>
    %13 = arith.negf %12 : vector<32x1024xf32>
    %14 = math.exp %13 : vector<32x1024xf32>
    %cst_9 = arith.constant 1.000000e+00 : f32
    %15 = vector.broadcast %cst_9 : f32 to vector<32x1024xf32>
    %16 = arith.addf %15, %14 : vector<32x1024xf32>
    %17 = arith.divf %15, %16 : vector<32x1024xf32>
    %18 = vector.extract_strided_slice %11 {offsets = [32, 0], sizes = [32, 1024], strides = [1, 1]} : vector<144x1024xf32> to vector<32x1024xf32>
    %19 = arith.negf %18 : vector<32x1024xf32>
    %20 = math.exp %19 : vector<32x1024xf32>
    %cst_10 = arith.constant 1.000000e+00 : f32
    %21 = vector.broadcast %cst_10 : f32 to vector<32x1024xf32>
    %22 = arith.addf %21, %20 : vector<32x1024xf32>
    %23 = arith.divf %21, %22 : vector<32x1024xf32>
    %24 = vector.extract_strided_slice %11 {offsets = [64, 0], sizes = [32, 1024], strides = [1, 1]} : vector<144x1024xf32> to vector<32x1024xf32>
    %25 = vector.extract_strided_slice %11 {offsets = [96, 0], sizes = [32, 1024], strides = [1, 1]} : vector<144x1024xf32> to vector<32x1024xf32>
    %26 = vector.extract_strided_slice %11 {offsets = [128, 0], sizes = [4, 1024], strides = [1, 1]} : vector<144x1024xf32> to vector<4x1024xf32>
    %27 = arith.negf %26 : vector<4x1024xf32>
    %28 = math.exp %27 : vector<4x1024xf32>
    %cst_11 = arith.constant 1.000000e+00 : f32
    %29 = vector.broadcast %cst_11 : f32 to vector<4x1024xf32>
    %30 = arith.addf %29, %28 : vector<4x1024xf32>
    %31 = arith.divf %29, %30 : vector<4x1024xf32>
    %32 = vector.extract_strided_slice %11 {offsets = [136, 0], sizes = [4, 1024], strides = [1, 1]} : vector<144x1024xf32> to vector<4x1024xf32>
    %c0_12 = arith.constant 0 : index
    %c0_13 = arith.constant 0 : index
    %33 = vector.load %arg6[%c0_12, %c0_13] : memref<32x1xf32, #tpu.memory_space<vmem>>, vector<32x1xf32>
    %34 = vector.broadcast %33 : vector<32x1xf32> to vector<32x1024xf32>
    %35 = vector.broadcast %8 : vector<1x1024xf32> to vector<32x1024xf32>
    %36 = arith.mulf %34, %35 : vector<32x1024xf32>
    %c0_14 = arith.constant 0 : index
    %c0_15 = arith.constant 0 : index
    %37 = vector.load %arg7[%c0_14, %c0_15] : memref<32x1xf32, #tpu.memory_space<vmem>>, vector<32x1xf32>
    %38 = vector.broadcast %37 : vector<32x1xf32> to vector<32x1024xf32>
    %39 = arith.addf %36, %38 : vector<32x1024xf32>
    %40 = arith.mulf %39, %17 : vector<32x1024xf32>
    %41 = arith.addf %40, %24 : vector<32x1024xf32>
    %cst_16 = arith.constant 0.000000e+00 : f32
    %42 = vector.broadcast %cst_16 : f32 to vector<32x1024xf32>
    %43 = arith.maximumf %41, %42 : vector<32x1024xf32>
    %c0_17 = arith.constant 0 : index
    %c0_18 = arith.constant 0 : index
    %44 = vector.load %arg8[%c0_17, %c0_18] : memref<32x32xbf16, #tpu.memory_space<vmem>>, vector<32x32xbf16>
    %45 = arith.truncf %43 : vector<32x1024xf32> to vector<32x1024xbf16>
    %cst_19 = arith.constant dense<0.000000e+00> : vector<32x1024xf32>
    %46 = tpu.matmul %44, %45, %cst_19 {dimension_numbers = #tpu.dot_dimension_numbers<[1], [0], [0], [1], [0, 0, 1, 1], [], []>} : vector<32x32xbf16>, vector<32x1024xbf16>, vector<32x1024xf32> -> vector<32x1024xf32>
    %c0_20 = arith.constant 0 : index
    %c0_21 = arith.constant 0 : index
    %47 = vector.load %arg9[%c0_20, %c0_21] : memref<32x1xf32, #tpu.memory_space<vmem>>, vector<32x1xf32>
    %48 = vector.broadcast %47 : vector<32x1xf32> to vector<32x1024xf32>
    %49 = arith.addf %46, %48 : vector<32x1024xf32>
    %50 = arith.mulf %49, %23 : vector<32x1024xf32>
    %51 = arith.addf %50, %25 : vector<32x1024xf32>
    %cst_22 = arith.constant 0.000000e+00 : f32
    %52 = vector.broadcast %cst_22 : f32 to vector<32x1024xf32>
    %53 = arith.maximumf %51, %52 : vector<32x1024xf32>
    %c0_23 = arith.constant 0 : index
    %c0_24 = arith.constant 0 : index
    %54 = vector.load %arg10[%c0_23, %c0_24] : memref<4x32xbf16, #tpu.memory_space<vmem>>, vector<4x32xbf16>
    %55 = arith.truncf %53 : vector<32x1024xf32> to vector<32x1024xbf16>
    %cst_25 = arith.constant dense<0.000000e+00> : vector<4x1024xf32>
    %56 = tpu.matmul %54, %55, %cst_25 {dimension_numbers = #tpu.dot_dimension_numbers<[1], [0], [0], [1], [0, 0, 1, 1], [], []>} : vector<4x32xbf16>, vector<32x1024xbf16>, vector<4x1024xf32> -> vector<4x1024xf32>
    %c0_26 = arith.constant 0 : index
    %c0_27 = arith.constant 0 : index
    %57 = vector.load %arg11[%c0_26, %c0_27] : memref<4x1xf32, #tpu.memory_space<vmem>>, vector<4x1xf32>
    %58 = vector.broadcast %57 : vector<4x1xf32> to vector<4x1024xf32>
    %59 = arith.addf %56, %58 : vector<4x1024xf32>
    %60 = arith.mulf %59, %31 : vector<4x1024xf32>
    %61 = arith.addf %60, %32 : vector<4x1024xf32>
    %62 = vector.extract_strided_slice %61 {offsets = [0, 0], sizes = [2, 1024], strides = [1, 1]} : vector<4x1024xf32> to vector<2x1024xf32>
    %63 = vector.extract_strided_slice %61 {offsets = [2, 0], sizes = [2, 1024], strides = [1, 1]} : vector<4x1024xf32> to vector<2x1024xf32>
    %64 = math.absf %62 : vector<2x1024xf32>
    %cst_28 = arith.constant 0.000000e+00 : f32
    %65 = vector.broadcast %cst_28 : f32 to vector<2x1024xf32>
    %66 = arith.subf %65, %64 : vector<2x1024xf32>
    %67 = math.exp %66 : vector<2x1024xf32>
    %cst_29 = arith.constant 0.000000e+00 : f32
    %68 = vector.broadcast %cst_29 : f32 to vector<2x1024xf32>
    %69 = arith.minimumf %62, %68 : vector<2x1024xf32>
    %cst_30 = arith.constant 1.000000e+00 : f32
    %70 = vector.broadcast %cst_30 : f32 to vector<2x1024xf32>
    %71 = arith.addf %70, %67 : vector<2x1024xf32>
    %72 = math.log %71 : vector<2x1024xf32>
    %73 = arith.subf %69, %72 : vector<2x1024xf32>
    %cst_31 = arith.constant dense<0.000000e+00> : vector<1024xf32>
    %74 = vector.multi_reduction <add>, %73, %cst_31 [0] : vector<2x1024xf32> to vector<1024xf32>
    %75 = vector.shape_cast %74 : vector<1024xf32> to vector<1x1024xf32>
    %cst_32 = arith.constant 1.000000e+00 : f32
    %76 = vector.broadcast %cst_32 : f32 to vector<2x1024xf32>
    %77 = arith.addf %76, %67 : vector<2x1024xf32>
    %78 = tpu.reciprocal %77 {approx = true} : vector<2x1024xf32> -> vector<2x1024xf32>
    %cst_33 = arith.constant 0.000000e+00 : f32
    %79 = vector.broadcast %cst_33 : f32 to vector<2x1024xf32>
    %80 = arith.cmpf oge, %62, %79 : vector<2x1024xf32>
    %81 = arith.mulf %67, %78 : vector<2x1024xf32>
    %82 = arith.select %80, %78, %81 : vector<2x1024xi1>, vector<2x1024xf32>
    %83 = arith.subf %10, %75 : vector<1x1024xf32>
    %84 = vector.extract_strided_slice %82 {offsets = [0, 0], sizes = [1, 1024], strides = [1, 1]} : vector<2x1024xf32> to vector<1x1024xf32>
    %85 = arith.mulf %7, %84 : vector<1x1024xf32>
    %86 = vector.extract_strided_slice %63 {offsets = [0, 0], sizes = [1, 1024], strides = [1, 1]} : vector<2x1024xf32> to vector<1x1024xf32>
    %87 = arith.addf %85, %86 : vector<1x1024xf32>
    %88 = vector.extract_strided_slice %82 {offsets = [1, 0], sizes = [1, 1024], strides = [1, 1]} : vector<2x1024xf32> to vector<1x1024xf32>
    %89 = arith.mulf %9, %88 : vector<1x1024xf32>
    %90 = vector.extract_strided_slice %63 {offsets = [1, 0], sizes = [1, 1024], strides = [1, 1]} : vector<2x1024xf32> to vector<1x1024xf32>
    %91 = arith.addf %89, %90 : vector<1x1024xf32>
    %92 = vector.extract_strided_slice %5 {offsets = [144, 0], sizes = [144, 1024], strides = [1, 1]} : vector<432x1024xf32> to vector<144x1024xf32>
    %93 = vector.extract_strided_slice %92 {offsets = [0, 0], sizes = [32, 1024], strides = [1, 1]} : vector<144x1024xf32> to vector<32x1024xf32>
    %94 = arith.negf %93 : vector<32x1024xf32>
    %95 = math.exp %94 : vector<32x1024xf32>
    %cst_34 = arith.constant 1.000000e+00 : f32
    %96 = vector.broadcast %cst_34 : f32 to vector<32x1024xf32>
    %97 = arith.addf %96, %95 : vector<32x1024xf32>
    %98 = arith.divf %96, %97 : vector<32x1024xf32>
    %99 = vector.extract_strided_slice %92 {offsets = [32, 0], sizes = [32, 1024], strides = [1, 1]} : vector<144x1024xf32> to vector<32x1024xf32>
    %100 = arith.negf %99 : vector<32x1024xf32>
    %101 = math.exp %100 : vector<32x1024xf32>
    %cst_35 = arith.constant 1.000000e+00 : f32
    %102 = vector.broadcast %cst_35 : f32 to vector<32x1024xf32>
    %103 = arith.addf %102, %101 : vector<32x1024xf32>
    %104 = arith.divf %102, %103 : vector<32x1024xf32>
    %105 = vector.extract_strided_slice %92 {offsets = [64, 0], sizes = [32, 1024], strides = [1, 1]} : vector<144x1024xf32> to vector<32x1024xf32>
    %106 = vector.extract_strided_slice %92 {offsets = [96, 0], sizes = [32, 1024], strides = [1, 1]} : vector<144x1024xf32> to vector<32x1024xf32>
    %107 = vector.extract_strided_slice %92 {offsets = [128, 0], sizes = [4, 1024], strides = [1, 1]} : vector<144x1024xf32> to vector<4x1024xf32>
    %108 = arith.negf %107 : vector<4x1024xf32>
    %109 = math.exp %108 : vector<4x1024xf32>
    %cst_36 = arith.constant 1.000000e+00 : f32
    %110 = vector.broadcast %cst_36 : f32 to vector<4x1024xf32>
    %111 = arith.addf %110, %109 : vector<4x1024xf32>
    %112 = arith.divf %110, %111 : vector<4x1024xf32>
    %113 = vector.extract_strided_slice %92 {offsets = [136, 0], sizes = [4, 1024], strides = [1, 1]} : vector<144x1024xf32> to vector<4x1024xf32>
    %c0_37 = arith.constant 0 : index
    %c0_38 = arith.constant 0 : index
    %114 = vector.load %arg12[%c0_37, %c0_38] : memref<32x1xf32, #tpu.memory_space<vmem>>, vector<32x1xf32>
    %115 = vector.broadcast %114 : vector<32x1xf32> to vector<32x1024xf32>
    %116 = vector.broadcast %91 : vector<1x1024xf32> to vector<32x1024xf32>
    %117 = arith.mulf %115, %116 : vector<32x1024xf32>
    %c0_39 = arith.constant 0 : index
    %c0_40 = arith.constant 0 : index
    %118 = vector.load %arg13[%c0_39, %c0_40] : memref<32x1xf32, #tpu.memory_space<vmem>>, vector<32x1xf32>
    %119 = vector.broadcast %118 : vector<32x1xf32> to vector<32x1024xf32>
    %120 = arith.addf %117, %119 : vector<32x1024xf32>
    %121 = arith.mulf %120, %98 : vector<32x1024xf32>
    %122 = arith.addf %121, %105 : vector<32x1024xf32>
    %cst_41 = arith.constant 0.000000e+00 : f32
    %123 = vector.broadcast %cst_41 : f32 to vector<32x1024xf32>
    %124 = arith.maximumf %122, %123 : vector<32x1024xf32>
    %c0_42 = arith.constant 0 : index
    %c0_43 = arith.constant 0 : index
    %125 = vector.load %arg14[%c0_42, %c0_43] : memref<32x32xbf16, #tpu.memory_space<vmem>>, vector<32x32xbf16>
    %126 = arith.truncf %124 : vector<32x1024xf32> to vector<32x1024xbf16>
    %cst_44 = arith.constant dense<0.000000e+00> : vector<32x1024xf32>
    %127 = tpu.matmul %125, %126, %cst_44 {dimension_numbers = #tpu.dot_dimension_numbers<[1], [0], [0], [1], [0, 0, 1, 1], [], []>} : vector<32x32xbf16>, vector<32x1024xbf16>, vector<32x1024xf32> -> vector<32x1024xf32>
    %c0_45 = arith.constant 0 : index
    %c0_46 = arith.constant 0 : index
    %128 = vector.load %arg15[%c0_45, %c0_46] : memref<32x1xf32, #tpu.memory_space<vmem>>, vector<32x1xf32>
    %129 = vector.broadcast %128 : vector<32x1xf32> to vector<32x1024xf32>
    %130 = arith.addf %127, %129 : vector<32x1024xf32>
    %131 = arith.mulf %130, %104 : vector<32x1024xf32>
    %132 = arith.addf %131, %106 : vector<32x1024xf32>
    %cst_47 = arith.constant 0.000000e+00 : f32
    %133 = vector.broadcast %cst_47 : f32 to vector<32x1024xf32>
    %134 = arith.maximumf %132, %133 : vector<32x1024xf32>
    %c0_48 = arith.constant 0 : index
    %c0_49 = arith.constant 0 : index
    %135 = vector.load %arg16[%c0_48, %c0_49] : memref<4x32xbf16, #tpu.memory_space<vmem>>, vector<4x32xbf16>
    %136 = arith.truncf %134 : vector<32x1024xf32> to vector<32x1024xbf16>
    %cst_50 = arith.constant dense<0.000000e+00> : vector<4x1024xf32>
    %137 = tpu.matmul %135, %136, %cst_50 {dimension_numbers = #tpu.dot_dimension_numbers<[1], [0], [0], [1], [0, 0, 1, 1], [], []>} : vector<4x32xbf16>, vector<32x1024xbf16>, vector<4x1024xf32> -> vector<4x1024xf32>
    %c0_51 = arith.constant 0 : index
    %c0_52 = arith.constant 0 : index
    %138 = vector.load %arg17[%c0_51, %c0_52] : memref<4x1xf32, #tpu.memory_space<vmem>>, vector<4x1xf32>
    %139 = vector.broadcast %138 : vector<4x1xf32> to vector<4x1024xf32>
    %140 = arith.addf %137, %139 : vector<4x1024xf32>
    %141 = arith.mulf %140, %112 : vector<4x1024xf32>
    %142 = arith.addf %141, %113 : vector<4x1024xf32>
    %143 = vector.extract_strided_slice %142 {offsets = [0, 0], sizes = [2, 1024], strides = [1, 1]} : vector<4x1024xf32> to vector<2x1024xf32>
    %144 = vector.extract_strided_slice %142 {offsets = [2, 0], sizes = [2, 1024], strides = [1, 1]} : vector<4x1024xf32> to vector<2x1024xf32>
    %145 = math.absf %143 : vector<2x1024xf32>
    %cst_53 = arith.constant 0.000000e+00 : f32
    %146 = vector.broadcast %cst_53 : f32 to vector<2x1024xf32>
    %147 = arith.subf %146, %145 : vector<2x1024xf32>
    %148 = math.exp %147 : vector<2x1024xf32>
    %cst_54 = arith.constant 0.000000e+00 : f32
    %149 = vector.broadcast %cst_54 : f32 to vector<2x1024xf32>
    %150 = arith.minimumf %143, %149 : vector<2x1024xf32>
    %cst_55 = arith.constant 1.000000e+00 : f32
    %151 = vector.broadcast %cst_55 : f32 to vector<2x1024xf32>
    %152 = arith.addf %151, %148 : vector<2x1024xf32>
    %153 = math.log %152 : vector<2x1024xf32>
    %154 = arith.subf %150, %153 : vector<2x1024xf32>
    %cst_56 = arith.constant dense<0.000000e+00> : vector<1024xf32>
    %155 = vector.multi_reduction <add>, %154, %cst_56 [0] : vector<2x1024xf32> to vector<1024xf32>
    %156 = vector.shape_cast %155 : vector<1024xf32> to vector<1x1024xf32>
    %cst_57 = arith.constant 1.000000e+00 : f32
    %157 = vector.broadcast %cst_57 : f32 to vector<2x1024xf32>
    %158 = arith.addf %157, %148 : vector<2x1024xf32>
    %159 = tpu.reciprocal %158 {approx = true} : vector<2x1024xf32> -> vector<2x1024xf32>
    %cst_58 = arith.constant 0.000000e+00 : f32
    %160 = vector.broadcast %cst_58 : f32 to vector<2x1024xf32>
    %161 = arith.cmpf oge, %143, %160 : vector<2x1024xf32>
    %162 = arith.mulf %148, %159 : vector<2x1024xf32>
    %163 = arith.select %161, %159, %162 : vector<2x1024xi1>, vector<2x1024xf32>
    %164 = arith.subf %83, %156 : vector<1x1024xf32>
    %165 = vector.extract_strided_slice %163 {offsets = [0, 0], sizes = [1, 1024], strides = [1, 1]} : vector<2x1024xf32> to vector<1x1024xf32>
    %166 = arith.mulf %87, %165 : vector<1x1024xf32>
    %167 = vector.extract_strided_slice %144 {offsets = [0, 0], sizes = [1, 1024], strides = [1, 1]} : vector<2x1024xf32> to vector<1x1024xf32>
    %168 = arith.addf %166, %167 : vector<1x1024xf32>
    %169 = vector.extract_strided_slice %163 {offsets = [1, 0], sizes = [1, 1024], strides = [1, 1]} : vector<2x1024xf32> to vector<1x1024xf32>
    %170 = arith.mulf %8, %169 : vector<1x1024xf32>
    %171 = vector.extract_strided_slice %144 {offsets = [1, 0], sizes = [1, 1024], strides = [1, 1]} : vector<2x1024xf32> to vector<1x1024xf32>
    %172 = arith.addf %170, %171 : vector<1x1024xf32>
    %173 = vector.extract_strided_slice %5 {offsets = [288, 0], sizes = [144, 1024], strides = [1, 1]} : vector<432x1024xf32> to vector<144x1024xf32>
    %174 = vector.extract_strided_slice %173 {offsets = [0, 0], sizes = [32, 1024], strides = [1, 1]} : vector<144x1024xf32> to vector<32x1024xf32>
    %175 = arith.negf %174 : vector<32x1024xf32>
    %176 = math.exp %175 : vector<32x1024xf32>
    %cst_59 = arith.constant 1.000000e+00 : f32
    %177 = vector.broadcast %cst_59 : f32 to vector<32x1024xf32>
    %178 = arith.addf %177, %176 : vector<32x1024xf32>
    %179 = arith.divf %177, %178 : vector<32x1024xf32>
    %180 = vector.extract_strided_slice %173 {offsets = [32, 0], sizes = [32, 1024], strides = [1, 1]} : vector<144x1024xf32> to vector<32x1024xf32>
    %181 = arith.negf %180 : vector<32x1024xf32>
    %182 = math.exp %181 : vector<32x1024xf32>
    %cst_60 = arith.constant 1.000000e+00 : f32
    %183 = vector.broadcast %cst_60 : f32 to vector<32x1024xf32>
    %184 = arith.addf %183, %182 : vector<32x1024xf32>
    %185 = arith.divf %183, %184 : vector<32x1024xf32>
    %186 = vector.extract_strided_slice %173 {offsets = [64, 0], sizes = [32, 1024], strides = [1, 1]} : vector<144x1024xf32> to vector<32x1024xf32>
    %187 = vector.extract_strided_slice %173 {offsets = [96, 0], sizes = [32, 1024], strides = [1, 1]} : vector<144x1024xf32> to vector<32x1024xf32>
    %188 = vector.extract_strided_slice %173 {offsets = [128, 0], sizes = [4, 1024], strides = [1, 1]} : vector<144x1024xf32> to vector<4x1024xf32>
    %189 = arith.negf %188 : vector<4x1024xf32>
    %190 = math.exp %189 : vector<4x1024xf32>
    %cst_61 = arith.constant 1.000000e+00 : f32
    %191 = vector.broadcast %cst_61 : f32 to vector<4x1024xf32>
    %192 = arith.addf %191, %190 : vector<4x1024xf32>
    %193 = arith.divf %191, %192 : vector<4x1024xf32>
    %194 = vector.extract_strided_slice %173 {offsets = [136, 0], sizes = [4, 1024], strides = [1, 1]} : vector<144x1024xf32> to vector<4x1024xf32>
    %c0_62 = arith.constant 0 : index
    %c0_63 = arith.constant 0 : index
    %195 = vector.load %arg18[%c0_62, %c0_63] : memref<32x1xf32, #tpu.memory_space<vmem>>, vector<32x1xf32>
    %196 = vector.broadcast %195 : vector<32x1xf32> to vector<32x1024xf32>
    %197 = vector.broadcast %168 : vector<1x1024xf32> to vector<32x1024xf32>
    %198 = arith.mulf %196, %197 : vector<32x1024xf32>
    %c0_64 = arith.constant 0 : index
    %c0_65 = arith.constant 0 : index
    %199 = vector.load %arg19[%c0_64, %c0_65] : memref<32x1xf32, #tpu.memory_space<vmem>>, vector<32x1xf32>
    %200 = vector.broadcast %199 : vector<32x1xf32> to vector<32x1024xf32>
    %201 = arith.addf %198, %200 : vector<32x1024xf32>
    %202 = arith.mulf %201, %179 : vector<32x1024xf32>
    %203 = arith.addf %202, %186 : vector<32x1024xf32>
    %cst_66 = arith.constant 0.000000e+00 : f32
    %204 = vector.broadcast %cst_66 : f32 to vector<32x1024xf32>
    %205 = arith.maximumf %203, %204 : vector<32x1024xf32>
    %c0_67 = arith.constant 0 : index
    %c0_68 = arith.constant 0 : index
    %206 = vector.load %arg20[%c0_67, %c0_68] : memref<32x32xbf16, #tpu.memory_space<vmem>>, vector<32x32xbf16>
    %207 = arith.truncf %205 : vector<32x1024xf32> to vector<32x1024xbf16>
    %cst_69 = arith.constant dense<0.000000e+00> : vector<32x1024xf32>
    %208 = tpu.matmul %206, %207, %cst_69 {dimension_numbers = #tpu.dot_dimension_numbers<[1], [0], [0], [1], [0, 0, 1, 1], [], []>} : vector<32x32xbf16>, vector<32x1024xbf16>, vector<32x1024xf32> -> vector<32x1024xf32>
    %c0_70 = arith.constant 0 : index
    %c0_71 = arith.constant 0 : index
    %209 = vector.load %arg21[%c0_70, %c0_71] : memref<32x1xf32, #tpu.memory_space<vmem>>, vector<32x1xf32>
    %210 = vector.broadcast %209 : vector<32x1xf32> to vector<32x1024xf32>
    %211 = arith.addf %208, %210 : vector<32x1024xf32>
    %212 = arith.mulf %211, %185 : vector<32x1024xf32>
    %213 = arith.addf %212, %187 : vector<32x1024xf32>
    %cst_72 = arith.constant 0.000000e+00 : f32
    %214 = vector.broadcast %cst_72 : f32 to vector<32x1024xf32>
    %215 = arith.maximumf %213, %214 : vector<32x1024xf32>
    %c0_73 = arith.constant 0 : index
    %c0_74 = arith.constant 0 : index
    %216 = vector.load %arg22[%c0_73, %c0_74] : memref<4x32xbf16, #tpu.memory_space<vmem>>, vector<4x32xbf16>
    %217 = arith.truncf %215 : vector<32x1024xf32> to vector<32x1024xbf16>
    %cst_75 = arith.constant dense<0.000000e+00> : vector<4x1024xf32>
    %218 = tpu.matmul %216, %217, %cst_75 {dimension_numbers = #tpu.dot_dimension_numbers<[1], [0], [0], [1], [0, 0, 1, 1], [], []>} : vector<4x32xbf16>, vector<32x1024xbf16>, vector<4x1024xf32> -> vector<4x1024xf32>
    %c0_76 = arith.constant 0 : index
    %c0_77 = arith.constant 0 : index
    %219 = vector.load %arg23[%c0_76, %c0_77] : memref<4x1xf32, #tpu.memory_space<vmem>>, vector<4x1xf32>
    %220 = vector.broadcast %219 : vector<4x1xf32> to vector<4x1024xf32>
    %221 = arith.addf %218, %220 : vector<4x1024xf32>
    %222 = arith.mulf %221, %193 : vector<4x1024xf32>
    %223 = arith.addf %222, %194 : vector<4x1024xf32>
    %224 = vector.extract_strided_slice %223 {offsets = [0, 0], sizes = [2, 1024], strides = [1, 1]} : vector<4x1024xf32> to vector<2x1024xf32>
    %225 = vector.extract_strided_slice %223 {offsets = [2, 0], sizes = [2, 1024], strides = [1, 1]} : vector<4x1024xf32> to vector<2x1024xf32>
    %226 = math.absf %224 : vector<2x1024xf32>
    %cst_78 = arith.constant 0.000000e+00 : f32
    %227 = vector.broadcast %cst_78 : f32 to vector<2x1024xf32>
    %228 = arith.subf %227, %226 : vector<2x1024xf32>
    %229 = math.exp %228 : vector<2x1024xf32>
    %cst_79 = arith.constant 0.000000e+00 : f32
    %230 = vector.broadcast %cst_79 : f32 to vector<2x1024xf32>
    %231 = arith.minimumf %224, %230 : vector<2x1024xf32>
    %cst_80 = arith.constant 1.000000e+00 : f32
    %232 = vector.broadcast %cst_80 : f32 to vector<2x1024xf32>
    %233 = arith.addf %232, %229 : vector<2x1024xf32>
    %234 = math.log %233 : vector<2x1024xf32>
    %235 = arith.subf %231, %234 : vector<2x1024xf32>
    %cst_81 = arith.constant dense<0.000000e+00> : vector<1024xf32>
    %236 = vector.multi_reduction <add>, %235, %cst_81 [0] : vector<2x1024xf32> to vector<1024xf32>
    %237 = vector.shape_cast %236 : vector<1024xf32> to vector<1x1024xf32>
    %cst_82 = arith.constant 1.000000e+00 : f32
    %238 = vector.broadcast %cst_82 : f32 to vector<2x1024xf32>
    %239 = arith.addf %238, %229 : vector<2x1024xf32>
    %240 = tpu.reciprocal %239 {approx = true} : vector<2x1024xf32> -> vector<2x1024xf32>
    %cst_83 = arith.constant 0.000000e+00 : f32
    %241 = vector.broadcast %cst_83 : f32 to vector<2x1024xf32>
    %242 = arith.cmpf oge, %224, %241 : vector<2x1024xf32>
    %243 = arith.mulf %229, %240 : vector<2x1024xf32>
    %244 = arith.select %242, %240, %243 : vector<2x1024xi1>, vector<2x1024xf32>
    %245 = arith.subf %164, %237 : vector<1x1024xf32>
    %246 = vector.extract_strided_slice %244 {offsets = [0, 0], sizes = [1, 1024], strides = [1, 1]} : vector<2x1024xf32> to vector<1x1024xf32>
    %247 = arith.mulf %172, %246 : vector<1x1024xf32>
    %248 = vector.extract_strided_slice %225 {offsets = [0, 0], sizes = [1, 1024], strides = [1, 1]} : vector<2x1024xf32> to vector<1x1024xf32>
    %249 = arith.addf %247, %248 : vector<1x1024xf32>
    %250 = vector.extract_strided_slice %244 {offsets = [1, 0], sizes = [1, 1024], strides = [1, 1]} : vector<2x1024xf32> to vector<1x1024xf32>
    %251 = arith.mulf %91, %250 : vector<1x1024xf32>
    %252 = vector.extract_strided_slice %225 {offsets = [1, 0], sizes = [1, 1024], strides = [1, 1]} : vector<2x1024xf32> to vector<1x1024xf32>
    %253 = arith.addf %251, %252 : vector<1x1024xf32>
    %c0_84 = arith.constant 0 : index
    %c0_85 = arith.constant 0 : index
    %254 = vector.load %arg24[%c0_84, %c0_85] : memref<3x1024xf32, #tpu.memory_space<vmem>>, vector<1x1024xf32>
    tpu.vector_store %arg24[%c0_84, %c0_85], %168 {strides = array<i32>} : memref<3x1024xf32, #tpu.memory_space<vmem>>, vector<1x1024xf32>,
    %c1 = arith.constant 1 : index
    %c0_86 = arith.constant 0 : index
    %255 = vector.load %arg24[%c1, %c0_86] : memref<3x1024xf32, #tpu.memory_space<vmem>>, vector<1x1024xf32>
    tpu.vector_store %arg24[%c1, %c0_86], %249 {strides = array<i32>} : memref<3x1024xf32, #tpu.memory_space<vmem>>, vector<1x1024xf32>,
    %c2 = arith.constant 2 : index
    %c0_87 = arith.constant 0 : index
    %256 = vector.load %arg24[%c2, %c0_87] : memref<3x1024xf32, #tpu.memory_space<vmem>>, vector<1x1024xf32>
    tpu.vector_store %arg24[%c2, %c0_87], %253 {strides = array<i32>} : memref<3x1024xf32, #tpu.memory_space<vmem>>, vector<1x1024xf32>,
    %c0_88 = arith.constant 0 : index
    %c0_89 = arith.constant 0 : index
    %257 = vector.load %arg25[%c0_88, %c0_89] : memref<1x1024xf32, #tpu.memory_space<vmem>>, vector<1x1024xf32>
    tpu.vector_store %arg25[%c0_88, %c0_89], %245 {strides = array<i32>} : memref<1x1024xf32, #tpu.memory_space<vmem>>, vector<1x1024xf32>,
    return
  }
  func.func @transform_0(%arg0: i32) -> (i32, i32) {
    %c0_i32 = arith.constant 0 : i32
    %c0_i32_0 = arith.constant 0 : i32
    return %c0_i32, %arg0 : i32, i32
  }
  func.func @transform_1(%arg0: i32) -> (i32, i32) {
    %c0_i32 = arith.constant 0 : i32
    %c0_i32_0 = arith.constant 0 : i32
    return %c0_i32, %arg0 : i32, i32
  }
  func.func @transform_2(%arg0: i32) -> (i32, i32) {
    %c0_i32 = arith.constant 0 : i32
    %c0_i32_0 = arith.constant 0 : i32
    return %c0_i32, %arg0 : i32, i32
  }
  func.func @transform_3(%arg0: i32) -> (i32, i32) {
    %c0_i32 = arith.constant 0 : i32
    %c0_i32_0 = arith.constant 0 : i32
    %c0_i32_1 = arith.constant 0 : i32
    return %c0_i32, %c0_i32_0 : i32, i32
  }
  func.func @transform_4(%arg0: i32) -> (i32, i32) {
    %c0_i32 = arith.constant 0 : i32
    %c0_i32_0 = arith.constant 0 : i32
    %c0_i32_1 = arith.constant 0 : i32
    return %c0_i32, %c0_i32_0 : i32, i32
  }
  func.func @transform_5(%arg0: i32) -> (i32, i32) {
    %c0_i32 = arith.constant 0 : i32
    %c0_i32_0 = arith.constant 0 : i32
    %c0_i32_1 = arith.constant 0 : i32
    return %c0_i32, %c0_i32_0 : i32, i32
  }
  func.func @transform_6(%arg0: i32) -> (i32, i32) {
    %c0_i32 = arith.constant 0 : i32
    %c0_i32_0 = arith.constant 0 : i32
    %c0_i32_1 = arith.constant 0 : i32
    return %c0_i32, %c0_i32_0 : i32, i32
  }
  func.func @transform_7(%arg0: i32) -> (i32, i32) {
    %c0_i32 = arith.constant 0 : i32
    %c0_i32_0 = arith.constant 0 : i32
    %c0_i32_1 = arith.constant 0 : i32
    return %c0_i32, %c0_i32_0 : i32, i32
  }
  func.func @transform_8(%arg0: i32) -> (i32, i32) {
    %c0_i32 = arith.constant 0 : i32
    %c0_i32_0 = arith.constant 0 : i32
    %c0_i32_1 = arith.constant 0 : i32
    return %c0_i32, %c0_i32_0 : i32, i32
  }
  func.func @transform_9(%arg0: i32) -> (i32, i32) {
    %c0_i32 = arith.constant 0 : i32
    %c0_i32_0 = arith.constant 0 : i32
    %c0_i32_1 = arith.constant 0 : i32
    return %c0_i32, %c0_i32_0 : i32, i32
  }
  func.func @transform_10(%arg0: i32) -> (i32, i32) {
    %c0_i32 = arith.constant 0 : i32
    %c0_i32_0 = arith.constant 0 : i32
    %c0_i32_1 = arith.constant 0 : i32
    return %c0_i32, %c0_i32_0 : i32, i32
  }
  func.func @transform_11(%arg0: i32) -> (i32, i32) {
    %c0_i32 = arith.constant 0 : i32
    %c0_i32_0 = arith.constant 0 : i32
    %c0_i32_1 = arith.constant 0 : i32
    return %c0_i32, %c0_i32_0 : i32, i32
  }
  func.func @transform_12(%arg0: i32) -> (i32, i32) {
    %c0_i32 = arith.constant 0 : i32
    %c0_i32_0 = arith.constant 0 : i32
    %c0_i32_1 = arith.constant 0 : i32
    return %c0_i32, %c0_i32_0 : i32, i32
  }
  func.func @transform_13(%arg0: i32) -> (i32, i32) {
    %c0_i32 = arith.constant 0 : i32
    %c0_i32_0 = arith.constant 0 : i32
    %c0_i32_1 = arith.constant 0 : i32
    return %c0_i32, %c0_i32_0 : i32, i32
  }
  func.func @transform_14(%arg0: i32) -> (i32, i32) {
    %c0_i32 = arith.constant 0 : i32
    %c0_i32_0 = arith.constant 0 : i32
    %c0_i32_1 = arith.constant 0 : i32
    return %c0_i32, %c0_i32_0 : i32, i32
  }
  func.func @transform_15(%arg0: i32) -> (i32, i32) {
    %c0_i32 = arith.constant 0 : i32
    %c0_i32_0 = arith.constant 0 : i32
    %c0_i32_1 = arith.constant 0 : i32
    return %c0_i32, %c0_i32_0 : i32, i32
  }
  func.func @transform_16(%arg0: i32) -> (i32, i32) {
    %c0_i32 = arith.constant 0 : i32
    %c0_i32_0 = arith.constant 0 : i32
    %c0_i32_1 = arith.constant 0 : i32
    return %c0_i32, %c0_i32_0 : i32, i32
  }
  func.func @transform_17(%arg0: i32) -> (i32, i32) {
    %c0_i32 = arith.constant 0 : i32
    %c0_i32_0 = arith.constant 0 : i32
    %c0_i32_1 = arith.constant 0 : i32
    return %c0_i32, %c0_i32_0 : i32, i32
  }
  func.func @transform_18(%arg0: i32) -> (i32, i32) {
    %c0_i32 = arith.constant 0 : i32
    %c0_i32_0 = arith.constant 0 : i32
    %c0_i32_1 = arith.constant 0 : i32
    return %c0_i32, %c0_i32_0 : i32, i32
  }
  func.func @transform_19(%arg0: i32) -> (i32, i32) {
    %c0_i32 = arith.constant 0 : i32
    %c0_i32_0 = arith.constant 0 : i32
    %c0_i32_1 = arith.constant 0 : i32
    return %c0_i32, %c0_i32_0 : i32, i32
  }
  func.func @transform_20(%arg0: i32) -> (i32, i32) {
    %c0_i32 = arith.constant 0 : i32
    %c0_i32_0 = arith.constant 0 : i32
    %c0_i32_1 = arith.constant 0 : i32
    return %c0_i32, %c0_i32_0 : i32, i32
  }
  func.func @transform_21(%arg0: i32) -> (i32, i32) {
    %c0_i32 = arith.constant 0 : i32
    %c0_i32_0 = arith.constant 0 : i32
    %c0_i32_1 = arith.constant 0 : i32
    return %c0_i32, %c0_i32_0 : i32, i32
  }
  func.func @transform_22(%arg0: i32) -> (i32, i32) {
    %c0_i32 = arith.constant 0 : i32
    %c0_i32_0 = arith.constant 0 : i32
    %c0_i32_1 = arith.constant 0 : i32
    return %c0_i32, %c0_i32_0 : i32, i32
  }
  func.func @transform_23(%arg0: i32) -> (i32, i32) {
    %c0_i32 = arith.constant 0 : i32
    %c0_i32_0 = arith.constant 0 : i32
    return %c0_i32, %arg0 : i32, i32
  }
  func.func @transform_24(%arg0: i32) -> (i32, i32) {
    %c0_i32 = arith.constant 0 : i32
    %c0_i32_0 = arith.constant 0 : i32
    return %c0_i32, %arg0 : i32, i32
  }
}

</mosaic_0001>

<bundles_post_ra>
// kernel: sequential_flow_forward.1
= control target key start
LH: loop header
LB: loop body
LE: loop exit
PB: predicated region body
PF: predicated region fallthrough
CT: control target
= control target key end

     0   :  { %s14195_s0 = inlined_call_operand.vmem [shape: f32[3,4096], index: 0, kind: input, shape index: {}]   ;;  %s14196_s1 = inlined_call_operand.vmem [shape: bf16[32,4096], index: 1, kind: input, shape index: {}]   ;;  %s14197_s2 = inlined_call_operand.vmem [shape: f32[1,4096], index: 2, kind: input, shape index: {}]   ;;  %s14198_s3 = inlined_call_operand.vmem [shape: bf16[432,32], index: 3, kind: input, shape index: {}]   ;;  %s14199_s4 = inlined_call_operand.vmem [shape: f32[432,1], index: 4, kind: input, shape index: {}]   ;;  %s14200_s5 = inlined_call_operand.vmem [shape: f32[32,1], index: 5, kind: input, shape index: {}]   ;;  %s14201_s6 = inlined_call_operand.vmem [shape: f32[32,1], index: 6, kind: input, shape index: {}]   ;;  %s14202_s7 = inlined_call_operand.vmem [shape: bf16[32,32], index: 7, kind: input, shape index: {}]   ;;  %s14203_s8 = inlined_call_operand.vmem [shape: f32[32,1], index: 8, kind: input, shape index: {}]   ;;  %s14204_s9 = inlined_call_operand.vmem [shape: bf16[4,32], index: 9, kind: input, shape index: {}]   ;;  %s14205_s10 = inlined_call_operand.vmem [shape: f32[4,1], index: 10, kind: input, shape index: {}]   ;;  %s14206_s11 = inlined_call_operand.vmem [shape: f32[32,1], index: 11, kind: input, shape index: {}]   ;;  %s14207_s12 = inlined_call_operand.vmem [shape: f32[32,1], index: 12, kind: input, shape index: {}]   ;;  %s14208_s13 = inlined_call_operand.vmem [shape: bf16[32,32], index: 13, kind: input, shape index: {}]   ;;  %s14209_s14 = inlined_call_operand.vmem [shape: f32[32,1], index: 14, kind: input, shape index: {}]   ;;  %s14210_s15 = inlined_call_operand.vmem [shape: bf16[4,32], index: 15, kind: input, shape index: {}]   ;;  %s14211_s16 = inlined_call_operand.vmem [shape: f32[4,1], index: 16, kind: input, shape index: {}]   ;;  %s14212_s17 = inlined_call_operand.vmem [shape: f32[32,1], index: 17, kind: input, shape index: {}]   ;;  %s14213_s18 = inlined_call_operand.vmem [shape: f32[32,1], index: 18, kind: input, shape index: {}]   ;;  %s14214_s19 = inlined_call_operand.vmem [shape: bf16[32,32], index: 19, kind: input, shape index: {}]   ;;  %s14215_s20 = inlined_call_operand.vmem [shape: f32[32,1], index: 20, kind: input, shape index: {}]   ;;  %s14216_s21 = inlined_call_operand.vmem [shape: bf16[4,32], index: 21, kind: input, shape index: {}]   ;;  %s14217_s22 = inlined_call_operand.vmem [shape: f32[4,1], index: 22, kind: input, shape index: {}]   ;;  %s14218_s23 = inlined_call_operand.hbm [shape: f32[3,4096], index: 23, kind: output, shape index: {0}]   ;;  %s14219_s24 = inlined_call_operand.hbm [shape: f32[1,4096], index: 24, kind: output, shape index: {1}]  }
   0x1   :  { %14293 = sst [smem:[#allocation368_spill]] %s14195_s0 }
   0x2   :  { %14294 = sst [smem:[#allocation369_spill]] %s14196_s1 }
   0x3   :  { %14295 = sst [smem:[#allocation370_spill]] %s14197_s2 }
   0x4   :  { %14296 = sst [smem:[#allocation371_spill]] %s14198_s3 }
   0x5   :  { %14297 = sst [smem:[#allocation372_spill]] %s14199_s4 }
   0x6   :  { %14298 = sst [smem:[#allocation373_spill]] %s14200_s5 }
   0x7   :  { %14299 = sst [smem:[#allocation374_spill]] %s14201_s6 }
   0x8   :  { %14300 = sst [smem:[#allocation375_spill]] %s14202_s7 }
   0x9   :  { %14301 = sst [smem:[#allocation376_spill]] %s14203_s8 }
   0xa   :  { %14302 = sst [smem:[#allocation377_spill]] %s14219_s24 }
   0xb   :  { %30 = vsyncpa [#allocation4], 0 }
   0xc   :  { %32 = vsyncpa [#allocation4 + $0x1], 0 }
   0xd   :  { %33 = vsyncpa [#allocation6], 0 }
   0xe   :  { %35 = vsyncpa [#allocation6 + $0x1], 0  ;;  %s9562_s5 = smov 0   ;;  %s9564_s26 = smov 0  }
   0xf   :  { %s9566_s27 = smov 0   ;;  %s9568_s28 = smov 0  }
  0x10 LB: > { %14303 = sst [smem:[#allocation9_spill]] %s9419_s5  ;;  %s9583_s6 = sadd.s32 4294967295, %s9431_s28   ;;  %s9431_s28 = sphi %s9568_s28, %s15286_s28   ;;  %s9427_s27 = sphi %s9566_s27, %s15289_s27   ;;  %s9423_s26 = sphi %s9564_s26, %s15288_s26   ;;  %s9419_s5 = sphi %s9562_s5, %s15287_s5  }
  0x11   : > { %14304 = sst [smem:[#allocation10_spill]] %s9423_s26  ;;  %s7774_s2 = sadd.s32 4294967294, %s9431_s28  }
  0x12   : > { %14305 = sst [smem:[#allocation11_spill]] %s9427_s27  ;;  %s9587_s29 = sadd.s32 1, %s9431_s28  }
  0x13   : > { %14306 = sst [smem:[#allocation12_spill]] %s9431_s28  ;;  %s74_s0 = sadd.s32 1, %s9427_s27 }
  0x14   : > { %14307 = sst [smem:[#allocation13_spill]] %s9587_s29  ;;  %s71_s7 = ssub.s32 %s9431_s28, %s9587_s29 }
  0x15   : > { %p81_p0 = scmp.ne.s32.totalorder %s9427_s27, %s9423_s26  ;;  %p72_p1 = scmp.eq.s32.totalorder %s71_s7, 0 }
  0x16   : > { %p82_p2 = scmp.eq.s32.totalorder %s9431_s28, 0  ;;  %p557_p3 = scmp.eq.s32.totalorder %s9583_s6, 3 }
  0x17   : > { %p562_p4 = scmp.ne.s32.totalorder %s9423_s26, %s9419_s5  ;;  %p563_p7 = scmp.eq.s32.totalorder %s7774_s2, 3 }
  0x18   : > { %s9599_s30 = scalar_select %p72_p1, %s9427_s27, %s74_s0  }
  0x19   : > { %p83_p5 = por %p82_p2, %p81_p0  ;;  %p9601_p6 = por %p557_p3, %p81_p0 }
  0x1a   : > { %14308 = sst [smem:[#allocation14_spill]] %s9599_s30  ;;  %p9605_p8 = por %p563_p7, %p562_p4 }
  0x1b   : > { %p7776_p9 = scmp.ge.s32.totalorder %s9431_s28, 4 }
  0x1c   : > { %s14310_s25 = scalar_select %p9605_p8, 1, 0 }
  0x1d   : > { %665 = sbr.rel (%p7776_p9) target bundleno = 54 (0x36), region = 96 }
  0x1e   : > { %14311 = sst [smem:[#allocation15_spill]] %s14310_s25 }
  0x24   : > { %677 = sbr.rel (!%p83_p5) target bundleno = 54 (0x36), region = 104  ;;  %s679_s8 = sand.u32 (%p83_p5), 1, %s9427_s27  }
  0x25   : > { %s8214_s4 = sshll.u32 (%p83_p5), %s9431_s28, 5  ;;  %s7777_s1 = sshll.u32 (%p83_p5), %s679_s8, 7 }
  0x26   : > { %s14312_s30 = sld [smem:[#allocation369_spill]] (%p83_p5)  ;;  %s681_s2 = scalar_lea.vmem (%p83_p5), [#allocation2], %s7777_s1 }
  0x2c   : > { %s9615_s29 = scalar_lea.vmem %s14312_s30, %s8214_s4 }
  0x2d   : > { %v697_v0 = vld [vmem:[%s9615_s29] sm:$0xff]  ;;  %v699_v1 = vld [vmem:[%s9615_s29 + $0x8] sm:$0xff]  ;;  %v701_v2 = vld [vmem:[%s9615_s29 + $0x10] sm:$0xff] }
  0x2e   : > { %698 = vst [vmem:[%s681_s2] sm:$0xff] %v697_v0  ;;  %700 = vst [vmem:[%s681_s2 + $0x8] sm:$0xff] %v699_v1  ;;  %v703_v3 = vld [vmem:[%s9615_s29 + $0x18] sm:$0xff]  ;;  %v705_v4 = vld [vmem:[%s9615_s29 + $0x80] sm:$0xff] }
  0x2f   : > { %702 = vst [vmem:[%s681_s2 + $0x10] sm:$0xff] %v701_v2  ;;  %v707_v5 = vld [vmem:[%s9615_s29 + $0x88] sm:$0xff]  ;;  %704 = vst [vmem:[%s681_s2 + $0x18] sm:$0xff] %v703_v3  ;;  %v709_v6 = vld [vmem:[%s9615_s29 + $0x90] sm:$0xff] }
  0x30   : > { %706 = vst [vmem:[%s681_s2 + $0x20] sm:$0xff] %v705_v4  ;;  %708 = vst [vmem:[%s681_s2 + $0x28] sm:$0xff] %v707_v5  ;;  %v711_v7 = vld [vmem:[%s9615_s29 + $0x98] sm:$0xff]  ;;  %v713_v8 = vld [vmem:[%s9615_s29 + $0x100] sm:$0xff] }
  0x31   : > { %710 = vst [vmem:[%s681_s2 + $0x30] sm:$0xff] %v709_v6  ;;  %712 = vst [vmem:[%s681_s2 + $0x38] sm:$0xff] %v711_v7  ;;  %v715_v9 = vld [vmem:[%s9615_s29 + $0x108] sm:$0xff]  ;;  %v717_v10 = vld [vmem:[%s9615_s29 + $0x110] sm:$0xff] }
  0x32   : > { %714 = vst [vmem:[%s681_s2 + $0x40] sm:$0xff] %v713_v8  ;;  %v719_v11 = vld [vmem:[%s9615_s29 + $0x118] sm:$0xff]  ;;  %716 = vst [vmem:[%s681_s2 + $0x48] sm:$0xff] %v715_v9  ;;  %v721_v12 = vld [vmem:[%s9615_s29 + $0x180] sm:$0xff] }
  0x33   : > { %718 = vst [vmem:[%s681_s2 + $0x50] sm:$0xff] %v717_v10  ;;  %720 = vst [vmem:[%s681_s2 + $0x58] sm:$0xff] %v719_v11  ;;  %v723_v13 = vld [vmem:[%s9615_s29 + $0x188] sm:$0xff]  ;;  %v725_v14 = vld [vmem:[%s9615_s29 + $0x190] sm:$0xff] }
  0x34   : > { %722 = vst [vmem:[%s681_s2 + $0x60] sm:$0xff] %v721_v12  ;;  %724 = vst [vmem:[%s681_s2 + $0x68] sm:$0xff] %v723_v13  ;;  %v727_v15 = vld [vmem:[%s9615_s29 + $0x198] sm:$0xff] }
  0x35   : > { %726 = vst [vmem:[%s681_s2 + $0x70] sm:$0xff] %v725_v14  ;;  %728 = vst [vmem:[%s681_s2 + $0x78] sm:$0xff] %v727_v15 }
  0x36 PF: > { %p7780_p10 = scmp.ge.s32.totalorder %s9431_s28, 1  ;;  %p741_p11 = scmp.lt.s32.totalorder %s9431_s28, 5 }
  0x38   : > { %p742_p12 = pnand %p7780_p10, %p741_p11 }
  0x3a   : > { %745 = sbr.rel (%p742_p12) target bundleno = 2213 (0x8a5), region = 131 }
  0x41   : > { %s14313_s4 = sld [smem:[#allocation372_spill]]  ;;  %s9642_s7 = sand.u32 1, %s9423_s26   ;;  %v14236_v18 = vmov 0   ;;  %vm1451_vm0 = vcmask 261120   ;;  %vm4112_vm1 = vcmask 1041408  }
  0x42   : > { %8264 = vset.pattern.permute.xlu1 %v14236_v18  ;;  %8263 = vset.pattern.permute.xlu0 %v14236_v18  ;;  %s7781_s29 = sshll.u32 %s9642_s7, 7  ;;  %s14315_s27 = sld [smem:[#allocation374_spill]] }
  0x43   : > { %s9653_s1 = scalar_lea.vmem [#allocation2], %s7781_s29  ;;  %1565 = vmatprep.mubr.bf16.mxu0 %v14236_v18  ;;  %1868 = vmatprep.mubr.bf16.mxu1 %v14236_v18  ;;  %s14314_s29 = sld [smem:[#allocation373_spill]] }
  0x44   : > { %v842_v21 = vld [vmem:[%s9653_s1] sm:$0xff]  ;;  %v843_v23 = vld [vmem:[%s9653_s1 + $0x8] sm:$0xff]  ;;  %v844_v39 = vld [vmem:[%s9653_s1 + $0x10] sm:$0xff]  ;;  %s14317_s28 = sld [smem:[#allocation371_spill]]  ;;  %s14321_s2 = sld [smem:[#allocation368_spill]] }
  0x45   : > { %v846_v22 = vld [vmem:[%s9653_s1 + $0x20] sm:$0xff]  ;;  %v847_v25 = vld [vmem:[%s9653_s1 + $0x28] sm:$0xff]  ;;  %v848_v40 = vld [vmem:[%s9653_s1 + $0x30] sm:$0xff] }
  0x46   : > { %v7815_v24 = vcombine.high %v842_v21, %v846_v22  ;;  %v7814_v26 = vcombine.low %v842_v21, %v846_v22  ;;  %v850_v27 = vld [vmem:[%s9653_s1 + $0x40] sm:$0xff]  ;;  %v7817_v29 = vcombine.high %v843_v23, %v847_v25  ;;  %v7816_v30 = vcombine.low %v843_v23, %v847_v25  ;;  %v851_v32 = vld [vmem:[%s9653_s1 + $0x48] sm:$0xff]  ;;  %v845_v41 = vld [vmem:[%s9653_s1 + $0x18] sm:$0xff] }
  0x47   : > { %v914_v16 = vld [vmem:[%s14313_s4 + $0x10] sm:$0xff]  ;;  %v912_v17 = vld [vmem:[%s14313_s4] sm:$0xff]  ;;  %v915_v19 = vld [vmem:[%s14313_s4 + $0x18] sm:$0xff]  ;;  %v7819_v45 = vcombine.high %v844_v39, %v848_v40  ;;  %v7818_v48 = vcombine.low %v844_v39, %v848_v40 }
  0x48   : > { %978 = vperm.xlu1 %8264, %v914_v16   ;;  %968 = vperm.xlu0 %8263, %v912_v17   ;;  %v913_v20 = vld [vmem:[%s14313_s4 + $0x8] sm:$0xff]  ;;  %v854_v28 = vld [vmem:[%s9653_s1 + $0x60] sm:$0xff]  ;;  %v849_v42 = vld [vmem:[%s9653_s1 + $0x38] sm:$0xff]  ;;  %s14316_s0 = smov %s14315_s27 }
  0x49   : > { %v7823_v31 = vcombine.high %v850_v27, %v854_v28  ;;  %v855_v33 = vld [vmem:[%s9653_s1 + $0x68] sm:$0xff]  ;;  %1533 = vmatprep.subr.bf16.mxu0 %v7815_v24  ;;  %1836 = vmatprep.subr.bf16.mxu1 %v7817_v29  ;;  %v3182_v36 = vld [vmem:[%s14314_s29] sm:$0xff]  ;;  %v7822_v37 = vcombine.low %v850_v27, %v854_v28  ;;  %v7821_v47 = vcombine.high %v845_v41, %v849_v42  ;;  %v3185_v52 = vld [vmem:[%s14314_s29 + $0x18] sm:$0xff] }
  0x4a   : > { %v7825_v34 = vcombine.high %v851_v32, %v855_v33  ;;  %v3183_v35 = vld [vmem:[%s14314_s29 + $0x8] sm:$0xff]  ;;  %1534 = vmatpush1.bf16.msra.mxu0 %v7814_v26  ;;  %1837 = vmatpush1.bf16.msra.mxu1 %v7816_v30  ;;  %v7824_v38 = vcombine.low %v851_v32, %v855_v33  ;;  %v3314_v44 = vld [vmem:[%s14316_s0] sm:$0xff]  ;;  %s14318_s24 = smov %s14317_s28  ;;  %v7820_v49 = vcombine.low %v845_v41, %v849_v42  ;;  %v3184_v53 = vld [vmem:[%s14314_s29 + $0x10] sm:$0xff] }
  0x4b   : > { %1535 = vmatprep.subr.bf16.mxu0 %v7823_v31  ;;  %v3315_v43 = vld [vmem:[%s14315_s27 + $0x8] sm:$0xff]  ;;  %v9684_v46 = vld [vmem:[%s14317_s28] sm:$0xff]   ;;  %v3317_v55 = vld [vmem:[%s14316_s0 + $0x18] sm:$0xff]  ;;  %s7784_s28 = sshll.u32 %s9583_s6, 3 }
  0x4c   : > { %983 = vperm.xlu1 %8264, %v915_v19   ;;  %973 = vperm.xlu0 %8263, %v913_v20   ;;  %v921_v50 = vld [vmem:[%s14313_s4 + $0x48] sm:$0xff]  ;;  %v920_v51 = vld [vmem:[%s14313_s4 + $0x40] sm:$0xff]  ;;  %v3316_v56 = vld [vmem:[%s14316_s0 + $0x10] sm:$0xff]  ;;  %s14319_s0 = sld [smem:[#allocation376_spill]]  ;;  %p828_p13 = scmp.lt.s32.totalorder %s7784_s28, 31 }
  0x4d   : > { %1838 = vmatprep.subr.bf16.mxu1 %v7825_v34  ;;  %v9707_v54 = vld [vmem:[%s14318_s24 + $0x8] sm:$0xff]   ;;  %v923_v57 = vld [vmem:[%s14313_s4 + $0x58] sm:$0xff]  ;;  %v922_v58 = vld [vmem:[%s14313_s4 + $0x50] sm:$0xff] }
  0x4e   : > { %1536 = vmatpush1.bf16.msra.mxu0 %v7822_v37  ;;  %1839 = vmatpush1.bf16.msra.mxu1 %v7824_v38  ;;  %v9730_v59 = vld [vmem:[%s14318_s24 + $0x10] sm:$0xff]   ;;  %v917_v60 = vld [vmem:[%s14313_s4 + $0x28] sm:$0xff]  ;;  %v916_v61 = vld [vmem:[%s14313_s4 + $0x20] sm:$0xff]  ;;  %s15291_s28 = smov (!%p828_p13, %s7784_s28), 31 }
  0x4f   : > { %2139 = vmatprep.subr.bf16.mxu0 %v7819_v45  ;;  %2442 = vmatprep.subr.bf16.mxu1 %v7821_v47  ;;  %v919_v62 = vld [vmem:[%s14313_s4 + $0x38] sm:$0xff]  ;;  %v918_v63 = vld [vmem:[%s14313_s4 + $0x30] sm:$0xff]  ;;  %v925_v6 = vld [vmem:[%s14313_s4 + $0x68] sm:$0xff]  ;;  %s7785_s25 = sshll.u32 %s15291_s28, 2 }
  0x50   : > { %3193 = vperm.xlu1 %8264, %v3183_v35   ;;  %3188 = vperm.xlu0 %8263, %v3182_v36   ;;  %v9753_v0 = vld [vmem:[%s14318_s24 + $0x18] sm:$0xff]   ;;  %v852_v3 = vld [vmem:[%s9653_s1 + $0x50] sm:$0xff]  ;;  %v924_v7 = vld [vmem:[%s14313_s4 + $0x60] sm:$0xff]  ;;  %s10182_s30 = scalar_lea.vmem %s14321_s2, %s7785_s25  ;;  %s15179_s25 = sld [smem:[#allocation370_spill]] }
  0x51   : > { %7830 = vmatmul.mubr.msk.bf16.vlgmr.msra.gmra.mrb[0].mxu0 %vm1451_vm0, %v9684_v46  ;;  %7857 = vmatmul.mubr.msk.bf16.vlgmr.msra.gmra.mrb[0].mxu1 %vm1451_vm0, %v9684_v46  ;;  %v856_v4 = vld [vmem:[%s9653_s1 + $0x70] sm:$0xff]  ;;  %v853_v5 = vld [vmem:[%s9653_s1 + $0x58] sm:$0xff]  ;;  %v9780_v11 = vld [vmem:[%s14318_s24 + $0x20] sm:$0xff]   ;;  %s8215_s2 = sshll.u32 %s9583_s6, 9 }
  0x52   : > { %1575 = vmatprep.mubr.bf16.mxu0 %v14236_v18  ;;  %1878 = vmatprep.mubr.bf16.mxu1 %v14236_v18  ;;  %v3487_v1 = vld [vmem:[%s14319_s0 + $0x8] sm:$0xff]  ;;  %v3486_v2 = vld [vmem:[%s14319_s0] sm:$0xff]  ;;  %v7826_v8 = vcombine.low %v852_v3, %v856_v4  ;;  %v7827_v9 = vcombine.high %v852_v3, %v856_v4  ;;  %v857_v10 = vld [vmem:[%s9653_s1 + $0x78] sm:$0xff]  ;;  %s9435_s1 = smov [#allocation3]  }
  0x53   : > { %2140 = vmatpush1.bf16.msra.mxu0 %v7818_v48  ;;  %2443 = vmatpush1.bf16.msra.mxu1 %v7820_v49  ;;  %v7829_v12 = vcombine.high %v853_v5, %v857_v10  ;;  %v7828_v13 = vcombine.low %v853_v5, %v857_v10  ;;  %v3489_v14 = vld [vmem:[%s14319_s0 + $0x18] sm:$0xff]  ;;  %v3488_v15 = vld [vmem:[%s14319_s0 + $0x10] sm:$0xff]  ;;  %v8270_v19 = vld [vmem:[%s14318_s24 + $0x28] sm:$0xff]   ;;  %s14499_s0 = sld [smem:[#allocation375_spill]] }
  0x54   : > { %3325 = vperm.xlu1 %8264, %v3315_v43   ;;  %3320 = vperm.xlu0 %8263, %v3314_v44   ;;  %v927_v16 = vld [vmem:[%s14313_s4 + $0x78] sm:$0xff]  ;;  %v926_v17 = vld [vmem:[%s14313_s4 + $0x70] sm:$0xff]  ;;  %v3851_v20 = vld [vmem:[%s14205_s10] sm:$0xf] }
  0x55   : > { %2141 = vmatprep.subr.bf16.mxu0 %v7827_v9  ;;  %2444 = vmatprep.subr.bf16.mxu1 %v7829_v12  ;;  %v928_v21 = vld [vmem:[%s14313_s4 + $0x80] sm:$0xff]  ;;  %v930_v22 = vld [vmem:[%s14313_s4 + $0x90] sm:$0xff]  ;;  %v929_v23 = vld [vmem:[%s14313_s4 + $0x88] sm:$0xff] }
  0x56   : > { %v8271_v24 = vld [vmem:[%s14318_s24 + $0x30] sm:$0xff]   ;;  %v932_v25 = vld [vmem:[%s14313_s4 + $0xa0] sm:$0xff]  ;;  %v931_v26 = vld [vmem:[%s14313_s4 + $0x98] sm:$0xff]  ;;  %s837_s8 = scalar_lea.vmem %s15179_s25, %s15291_s28  ;;  %s7623_s28 = scalar_lea.sflag [#allocation4], %s9642_s7 }
  0x57   : > { %2142 = vmatpush1.bf16.msra.mxu0 %v7826_v8  ;;  %2445 = vmatpush1.bf16.msra.mxu1 %v7828_v13  ;;  %v4768_v27 = vld [vmem:[%s14206_s11] sm:$0xff]  ;;  %v933_v28 = vld [vmem:[%s14313_s4 + $0xa8] sm:$0xff]  ;;  %v8272_v29 = vld [vmem:[%s14318_s24 + $0x38] sm:$0xff]  }
  0x58   : > { %1013 = vperm.xlu1 %8264, %v921_v50   ;;  %1008 = vperm.xlu0 %8263, %v920_v51   ;;  %v4900_v30 = vld [vmem:[%s14207_s12] sm:$0xff]  ;;  %v4769_v31 = vld [vmem:[%s14206_s11 + $0x8] sm:$0xff]  ;;  %v938_v32 = vld [vmem:[%s14313_s4 + $0xd0] sm:$0xff] }
  0x59   : > { %7831 = vmatmul.mubr.msk.bf16.gmra.mrb[4].mxu0 %vm1451_vm0, %v9707_v54  ;;  %7858 = vmatmul.mubr.msk.bf16.gmra.mrb[4].mxu1 %vm1451_vm0, %v9707_v54  ;;  %v4901_v33 = vld [vmem:[%s14207_s12 + $0x8] sm:$0xff]  ;;  %v8273_v34 = vld [vmem:[%s14318_s24 + $0x40] sm:$0xff]   ;;  %v4770_v35 = vld [vmem:[%s14206_s11 + $0x10] sm:$0xff] }
  0x5a   : > { %1585 = vmatprep.mubr.bf16.mxu0 %v14236_v18  ;;  %1888 = vmatprep.mubr.bf16.mxu1 %v14236_v18  ;;  %v939_v36 = vld [vmem:[%s14313_s4 + $0xd8] sm:$0xff]  ;;  %v4902_v37 = vld [vmem:[%s14207_s12 + $0x10] sm:$0xff]  ;;  %v8274_v39 = vld [vmem:[%s14318_s24 + $0x48] sm:$0xff]  }
  0x5b   : > { %v4771_v38 = vld [vmem:[%s14206_s11 + $0x18] sm:$0xff]  ;;  %v940_v40 = vld [vmem:[%s14313_s4 + $0xe0] sm:$0xff]  ;;  %v934_v42 = vld [vmem:[%s14313_s4 + $0xb0] sm:$0xff] }
  0x5c   : > { %3203 = vperm.xlu1 %8264, %v3185_v52   ;;  %3198 = vperm.xlu0 %8263, %v3184_v53   ;;  %v4903_v41 = vld [vmem:[%s14207_s12 + $0x18] sm:$0xff]  ;;  %v941_v43 = vld [vmem:[%s14313_s4 + $0xe8] sm:$0xff]  ;;  %v8275_v44 = vld [vmem:[%s14318_s24 + $0x50] sm:$0xff]  }
  0x5d   : > { %v936_v45 = vld [vmem:[%s14313_s4 + $0xc0] sm:$0xff]  ;;  %v935_v47 = vld [vmem:[%s14313_s4 + $0xb8] sm:$0xff]  ;;  %v937_v49 = vld [vmem:[%s14313_s4 + $0xc8] sm:$0xff] }
  0x5e   : > { %v5072_v48 = vld [vmem:[%s14209_s14] sm:$0xff]  ;;  %v8276_v50 = vld [vmem:[%s14318_s24 + $0x58] sm:$0xff]   ;;  %v942_v51 = vld [vmem:[%s14313_s4 + $0xf0] sm:$0xff] }
  0x5f   : > { %v5073_v52 = vld [vmem:[%s14209_s14 + $0x8] sm:$0xff]  ;;  %v5074_v53 = vld [vmem:[%s14209_s14 + $0x10] sm:$0xff]  ;;  %v948_v3 = vld [vmem:[%s14313_s4 + $0x120] sm:$0xff] }
  0x60   : > { %3335 = vperm.xlu1 %8264, %v3317_v55   ;;  %3330 = vperm.xlu0 %8263, %v3316_v56   ;;  %v943_v55 = vld [vmem:[%s14313_s4 + $0xf8] sm:$0xff]  ;;  %v8277_v56 = vld [vmem:[%s14318_s24 + $0x60] sm:$0xff]   ;;  %v8279_v4 = vld [vmem:[%s14318_s24 + $0x70] sm:$0xff]  }
  0x61   : > { %7832 = vmatmul.mubr.msk.bf16.gmra.mrb[8].mxu0 %vm1451_vm0, %v9730_v59  ;;  %7859 = vmatmul.mubr.msk.bf16.gmra.mrb[8].mxu1 %vm1451_vm0, %v9730_v59  ;;  %v951_v5 = vld [vmem:[%s14313_s4 + $0x138] sm:$0xff]  ;;  %v6333_v8 = vld [vmem:[%s14212_s17] sm:$0xff]  ;;  %v6466_v10 = vld [vmem:[%s14213_s18 + $0x8] sm:$0xff] }
  0x62   : > { %1595 = vmatprep.mubr.bf16.mxu0 %v14236_v18  ;;  %1898 = vmatprep.mubr.bf16.mxu1 %v14236_v18  ;;  %v8280_v9 = vld [vmem:[%s14318_s24 + $0x78] sm:$0xff]   ;;  %v6465_v12 = vld [vmem:[%s14213_s18] sm:$0xff]  ;;  %v957_v13 = vld [vmem:[%s14313_s4 + $0x168] sm:$0xff] }
  0x64   : > { %1023 = vperm.xlu1 %8264, %v923_v57   ;;  %1018 = vperm.xlu0 %8263, %v922_v58   ;;  %v944_v57 = vld [vmem:[%s14313_s4 + $0x100] sm:$0xff]  ;;  %v5075_v58 = vld [vmem:[%s14209_s14 + $0x18] sm:$0xff] }
  0x68   : > { %993 = vperm.xlu1 %8264, %v917_v60   ;;  %988 = vperm.xlu0 %8263, %v916_v61   ;;  %v946_v60 = vld [vmem:[%s14313_s4 + $0x110] sm:$0xff]  ;;  %v945_v61 = vld [vmem:[%s14313_s4 + $0x108] sm:$0xff] }
  0x69   : > { %7833 = vmatmul.mubr.msk.bf16.gmra.mrb[12].mxu0 %vm1451_vm0, %v9753_v0  ;;  %7860 = vmatmul.mubr.msk.bf16.gmra.mrb[12].mxu1 %vm1451_vm0, %v9753_v0 }
  0x6a   : > { %1605 = vmatprep.mubr.bf16.mxu0 %v14236_v18  ;;  %1908 = vmatprep.mubr.bf16.mxu1 %v14236_v18 }
  0x6c   : > { %1003 = vperm.xlu1 %8264, %v919_v62   ;;  %998 = vperm.xlu0 %8263, %v918_v63   ;;  %v8278_v62 = vld [vmem:[%s14318_s24 + $0x68] sm:$0xff]   ;;  %v947_v63 = vld [vmem:[%s14313_s4 + $0x118] sm:$0xff] }
  0x70   : > { %3497 = vperm.xlu1 %8264, %v3487_v1   ;;  %3492 = vperm.xlu0 %8263, %v3486_v2   ;;  %v5437_v1 = vld [vmem:[%s14211_s16] sm:$0xf]  ;;  %v949_v2 = vld [vmem:[%s14313_s4 + $0x128] sm:$0xff] }
  0x71   : > { %7834 = vmatmul.mubr.msk.bf16.gmra.mrb[16].mxu0 %vm1451_vm0, %v9780_v11  ;;  %7861 = vmatmul.mubr.msk.bf16.gmra.mrb[16].mxu1 %vm1451_vm0, %v9780_v11 }
  0x72   : > { %1615 = vmatprep.mubr.bf16.mxu0 %v14236_v18  ;;  %1918 = vmatprep.mubr.bf16.mxu1 %v14236_v18 }
  0x74   : > { %1033 = vperm.xlu1 %8264, %v925_v6   ;;  %1028 = vperm.xlu0 %8263, %v924_v7   ;;  %v950_v6 = vld [vmem:[%s14313_s4 + $0x130] sm:$0xff]  ;;  %v6334_v7 = vld [vmem:[%s14212_s17 + $0x8] sm:$0xff] }
  0x78   : > { %3507 = vperm.xlu1 %8264, %v3489_v14   ;;  %3502 = vperm.xlu0 %8263, %v3488_v15   ;;  %v956_v14 = vld [vmem:[%s14313_s4 + $0x160] sm:$0xff] }
  0x79   : > { %7835 = vmatmul.mubr.msk.bf16.gmra.mrb[20].mxu0 %vm1451_vm0, %v8270_v19  ;;  %7862 = vmatmul.mubr.msk.bf16.gmra.mrb[20].mxu1 %vm1451_vm0, %v8270_v19  ;;  %v8281_v15 = vld [vmem:[%s14318_s24 + $0x80] sm:$0xff]   ;;  %v6468_v19 = vld [vmem:[%s14213_s18 + $0x18] sm:$0xff] }
  0x7a   : > { %1625 = vmatprep.mubr.bf16.mxu0 %v14236_v18  ;;  %1928 = vmatprep.mubr.bf16.mxu1 %v14236_v18 }
  0x7c   : > { %1043 = vperm.xlu1 %8264, %v927_v16   ;;  %1038 = vperm.xlu0 %8263, %v926_v17   ;;  %v6336_v16 = vld [vmem:[%s14212_s17 + $0x18] sm:$0xff]  ;;  %v6335_v17 = vld [vmem:[%s14212_s17 + $0x10] sm:$0xff] }
  0x80   : > { %3854 = vperm.xlu1 %8264, %v3851_v20   ;;  %1048 = vperm.xlu0 %8263, %v928_v21   ;;  %v6467_v20 = vld [vmem:[%s14213_s18 + $0x10] sm:$0xff]  ;;  %v8282_v21 = vld [vmem:[%s14318_s24 + $0x88] sm:$0xff]  }
  0x81   : > { %7836 = vmatmul.mubr.msk.bf16.gmra.mrb[24].mxu0 %vm1451_vm0, %v8271_v24  ;;  %7863 = vmatmul.mubr.msk.bf16.gmra.mrb[24].mxu1 %vm1451_vm0, %v8271_v24  ;;  %v953_v24 = vld [vmem:[%s14313_s4 + $0x148] sm:$0xff] }
  0x82   : > { %1635 = vmatprep.mubr.bf16.mxu0 %v14236_v18  ;;  %1938 = vmatprep.mubr.bf16.mxu1 %v14236_v18 }
  0x84   : > { %1058 = vperm.xlu1 %8264, %v930_v22   ;;  %1053 = vperm.xlu0 %8263, %v929_v23   ;;  %v959_v22 = vld [vmem:[%s14313_s4 + $0x178] sm:$0xff]  ;;  %v958_v23 = vld [vmem:[%s14313_s4 + $0x170] sm:$0xff] }
  0x88   : > { %1068 = vperm.xlu1 %8264, %v932_v25   ;;  %1063 = vperm.xlu0 %8263, %v931_v26   ;;  %v952_v25 = vld [vmem:[%s14313_s4 + $0x140] sm:$0xff]  ;;  %v8283_v26 = vld [vmem:[%s14318_s24 + $0x90] sm:$0xff]  }
  0x89   : > { %7837 = vmatmul.mubr.msk.bf16.gmra.mrb[28].mxu0 %vm1451_vm0, %v8272_v29  ;;  %7864 = vmatmul.mubr.msk.bf16.gmra.mrb[28].mxu1 %vm1451_vm0, %v8272_v29  ;;  %v6638_v29 = vld [vmem:[%s14215_s20 + $0x8] sm:$0xff] }
  0x8a   : > { %1645 = vmatprep.mubr.bf16.mxu0 %v14236_v18  ;;  %1948 = vmatprep.mubr.bf16.mxu1 %v14236_v18 }
  0x8c   : > { %4774 = vperm.xlu1 %8264, %v4768_v27   ;;  %1073 = vperm.xlu0 %8263, %v933_v28   ;;  %v955_v27 = vld [vmem:[%s14313_s4 + $0x158] sm:$0xff]  ;;  %v954_v28 = vld [vmem:[%s14313_s4 + $0x150] sm:$0xff] }
  0x90   : > { %4906 = vperm.xlu1 %8264, %v4900_v30   ;;  %4779 = vperm.xlu0 %8263, %v4769_v31   ;;  %v6637_v30 = vld [vmem:[%s14215_s20] sm:$0xff]  ;;  %v8284_v31 = vld [vmem:[%s14318_s24 + $0x98] sm:$0xff]  }
  0x91   : > { %7838 = vmatmul.mubr.msk.bf16.gmra.mrb[32].mxu0 %vm1451_vm0, %v8273_v34  ;;  %7865 = vmatmul.mubr.msk.bf16.gmra.mrb[32].mxu1 %vm1451_vm0, %v8273_v34  ;;  %v6640_v34 = vld [vmem:[%s14215_s20 + $0x18] sm:$0xff] }
  0x92   : > { %1655 = vmatprep.mubr.bf16.mxu0 %v14236_v18  ;;  %1958 = vmatprep.mubr.bf16.mxu1 %v14236_v18 }
  0x94   : > { %1098 = vperm.xlu1 %8264, %v938_v32   ;;  %4911 = vperm.xlu0 %8263, %v4901_v33   ;;  %v961_v32 = vld [vmem:[%s14313_s4 + $0x188] sm:$0xff]  ;;  %v960_v33 = vld [vmem:[%s14313_s4 + $0x180] sm:$0xff] }
  0x98   : > { %4784 = vperm.xlu1 %8264, %v4770_v35   ;;  %1103 = vperm.xlu0 %8263, %v939_v36   ;;  %v6639_v35 = vld [vmem:[%s14215_s20 + $0x10] sm:$0xff]  ;;  %v8285_v36 = vld [vmem:[%s14318_s24 + $0xa0] sm:$0xff]  }
  0x99   : > { %7839 = vmatmul.mubr.msk.bf16.gmra.mrb[36].mxu0 %vm1451_vm0, %v8274_v39  ;;  %7866 = vmatmul.mubr.msk.bf16.gmra.mrb[36].mxu1 %vm1451_vm0, %v8274_v39  ;;  %v7002_v39 = vld [vmem:[%s14217_s22] sm:$0xf] }
  0x9a   : > { %1665 = vmatprep.mubr.bf16.mxu0 %v14236_v18  ;;  %1968 = vmatprep.mubr.bf16.mxu1 %v14236_v18 }
  0x9c   : > { %4916 = vperm.xlu1 %8264, %v4902_v37   ;;  %4789 = vperm.xlu0 %8263, %v4771_v38   ;;  %v963_v37 = vld [vmem:[%s14313_s4 + $0x198] sm:$0xff]  ;;  %v962_v38 = vld [vmem:[%s14313_s4 + $0x190] sm:$0xff] }
  0xa0   : > { %1108 = vperm.xlu1 %8264, %v940_v40   ;;  %4921 = vperm.xlu0 %8263, %v4903_v41   ;;  %v964_v40 = vld [vmem:[%s14313_s4 + $0x1a0] sm:$0xff]  ;;  %v8286_v41 = vld [vmem:[%s14318_s24 + $0xa8] sm:$0xff]  }
  0xa1   : > { %7840 = vmatmul.mubr.msk.bf16.gmra.mrb[40].mxu0 %vm1451_vm0, %v8275_v44  ;;  %7867 = vmatmul.mubr.msk.bf16.gmra.mrb[40].mxu1 %vm1451_vm0, %v8275_v44  ;;  %v8288_v44 = vld [vmem:[%s14318_s24 + $0xb8] sm:$0xff]  }
  0xa2   : > { %1675 = vmatprep.mubr.bf16.mxu0 %v14236_v18  ;;  %1978 = vmatprep.mubr.bf16.mxu1 %v14236_v18 }
  0xa4   : > { %1078 = vperm.xlu1 %8264, %v934_v42   ;;  %1113 = vperm.xlu0 %8263, %v941_v43   ;;  %v965_v42 = vld [vmem:[%s14313_s4 + $0x1a8] sm:$0xff]  ;;  %v8287_v43 = vld [vmem:[%s14318_s24 + $0xb0] sm:$0xff]  }
  0xa8   : > { %1088 = vperm.xlu1 %8264, %v936_v45   ;;  %1083 = vperm.xlu0 %8263, %v935_v47   ;;  %v8289_v45 = vld [vmem:[%s14318_s24 + $0xc0] sm:$0xff]   ;;  %v8290_v47 = vld [vmem:[%s14318_s24 + $0xc8] sm:$0xff]  }
  0xa9   : > { %7841 = vmatmul.mubr.msk.bf16.gmra.mrb[44].mxu0 %vm1451_vm0, %v8276_v50  ;;  %7868 = vmatmul.mubr.msk.bf16.gmra.mrb[44].mxu1 %vm1451_vm0, %v8276_v50 }
  0xaa   : > { %1685 = vmatprep.mubr.bf16.mxu0 %v14236_v18  ;;  %1988 = vmatprep.mubr.bf16.mxu1 %v14236_v18 }
  0xac   : > { %5078 = vperm.xlu1 %8264, %v5072_v48   ;;  %1093 = vperm.xlu0 %8263, %v937_v49   ;;  %v8291_v49 = vld [vmem:[%s14318_s24 + $0xd0] sm:$0xff]  }
  0xb0   : > { %1118 = vperm.xlu1 %8264, %v942_v51   ;;  %5083 = vperm.xlu0 %8263, %v5073_v52  }
  0xb1   : > { %7842 = vmatmul.mubr.msk.bf16.gmra.mrb[48].mxu0 %vm1451_vm0, %v8277_v56  ;;  %7869 = vmatmul.mubr.msk.bf16.gmra.mrb[48].mxu1 %vm1451_vm0, %v8277_v56 }
  0xb2   : > { %1695 = vmatprep.mubr.bf16.mxu0 %v14236_v18  ;;  %1998 = vmatprep.mubr.bf16.mxu1 %v14236_v18 }
  0xb4   : > { %5088 = vperm.xlu1 %8264, %v5074_v53   ;;  %1123 = vperm.xlu0 %8263, %v943_v55  }
  0xb8   : > { %1128 = vperm.xlu1 %8264, %v944_v57   ;;  %5093 = vperm.xlu0 %8263, %v5075_v58  }
  0xb9   : > { %7843 = vmatmul.mubr.msk.bf16.gmra.mrb[52].mxu0 %vm1451_vm0, %v8278_v62  ;;  %7870 = vmatmul.mubr.msk.bf16.gmra.mrb[52].mxu1 %vm1451_vm0, %v8278_v62 }
  0xba   : > { %1705 = vmatprep.mubr.bf16.mxu0 %v14236_v18  ;;  %2008 = vmatprep.mubr.bf16.mxu1 %v14236_v18 }
  0xbc   : > { %1138 = vperm.xlu1 %8264, %v946_v60   ;;  %1133 = vperm.xlu0 %8263, %v945_v61  }
  0xc0   : > { %1143 = vperm.xlu1 %8264, %v947_v63   ;;  %5440 = vperm.xlu0 %8263, %v5437_v1   ;;  %v3210_v1 = vlaneseq }
  0xc1   : > { %7844 = vmatmul.mubr.msk.bf16.gmra.mrb[56].mxu0 %vm1451_vm0, %v8279_v4  ;;  %7871 = vmatmul.mubr.msk.bf16.gmra.mrb[56].mxu1 %vm1451_vm0, %v8279_v4 }
  0xc2   : > { %1715 = vmatprep.mubr.bf16.mxu0 %v14236_v18  ;;  %2018 = vmatprep.mubr.bf16.mxu1 %v14236_v18 }
  0xc4   : > { %1153 = vperm.xlu1 %8264, %v949_v2   ;;  %1148 = vperm.xlu0 %8263, %v948_v3  }
  0xc7   : > { %v10142_v48 = vpop.permute.xlu0 %968  ;;  %v10152_v50 = vpop.permute.xlu1 %978 }
  0xc8   : > { %1163 = vperm.xlu1 %8264, %v951_v5   ;;  %1158 = vperm.xlu0 %8263, %v950_v6  }
  0xc9   : > { %7845 = vmatmul.mubr.msk.bf16.gmra.mrb[60].mxu0 %vm1451_vm0, %v8280_v9  ;;  %7872 = vmatmul.mubr.msk.bf16.gmra.mrb[60].mxu1 %vm1451_vm0, %v8280_v9 }
  0xca   : > { %1725 = vmatprep.mubr.bf16.mxu0 %v14236_v18  ;;  %2028 = vmatprep.mubr.bf16.mxu1 %v14236_v18 }
  0xcb   : > { %v10154_v51 = vpop.permute.xlu0 %973 }
  0xcc   : > { %6344 = vperm.xlu1 %8264, %v6334_v7   ;;  %6339 = vperm.xlu0 %8263, %v6333_v8  }
  0xd0   : > { %6476 = vperm.xlu1 %8264, %v6466_v10   ;;  %6471 = vperm.xlu0 %8263, %v6465_v12  }
  0xd1   : > { %7846 = vmatmul.mubr.msk.bf16.gmra.mrb[64].mxu0 %vm1451_vm0, %v8281_v15  ;;  %7873 = vmatmul.mubr.msk.bf16.gmra.mrb[64].mxu1 %vm1451_vm0, %v8281_v15  ;;  %v10173_v15 = vshrl.u32 %v3210_v1, 7 }
  0xd2   : > { %1735 = vmatprep.mubr.bf16.mxu0 %v14236_v18  ;;  %2038 = vmatprep.mubr.bf16.mxu1 %v14236_v18 }
  0xd3   : > { %14320 = vst [vmem:[#allocation16_spill] sm:$0xff] %v10173_v15 }
  0xd4   : > { %1193 = vperm.xlu1 %8264, %v957_v13   ;;  %1188 = vperm.xlu0 %8263, %v956_v14  }
  0xd8   : > { %6354 = vperm.xlu1 %8264, %v6336_v16   ;;  %6349 = vperm.xlu0 %8263, %v6335_v17   ;;  %v10175_v16 = vpop.permute.xlu1 %983 }
  0xd9   : > { %7847 = vmatmul.mubr.msk.bf16.gmra.mrb[68].mxu0 %vm1451_vm0, %v8282_v21  ;;  %7874 = vmatmul.mubr.msk.bf16.gmra.mrb[68].mxu1 %vm1451_vm0, %v8282_v21 }
  0xda   : > { %1745 = vmatprep.mubr.bf16.mxu0 %v14236_v18  ;;  %2048 = vmatprep.mubr.bf16.mxu1 %v14236_v18 }
  0xdc   : > { %6486 = vperm.xlu1 %8264, %v6468_v19   ;;  %6481 = vperm.xlu0 %8263, %v6467_v20   ;;  %v10177_v19 = vpop.permute.xlu0 %3188 }
  0xe0   : > { %1203 = vperm.xlu1 %8264, %v959_v22   ;;  %1198 = vperm.xlu0 %8263, %v958_v23  }
  0xe1   : > { %7848 = vmatmul.mubr.msk.bf16.gmra.mrb[72].mxu0 %vm1451_vm0, %v8283_v26  ;;  %7875 = vmatmul.mubr.msk.bf16.gmra.mrb[72].mxu1 %vm1451_vm0, %v8283_v26  ;;  %v10187_v26 = vsub.s32 1, %v10173_v15 }
  0xe2   : > { %1755 = vmatprep.mubr.bf16.mxu0 %v14236_v18  ;;  %2058 = vmatprep.mubr.bf16.mxu1 %v14236_v18 }
  0xe4   : > { %1173 = vperm.xlu1 %8264, %v953_v24   ;;  %1168 = vperm.xlu0 %8263, %v952_v25  }
  0xe8   : > { %1183 = vperm.xlu1 %8264, %v955_v27   ;;  %1178 = vperm.xlu0 %8263, %v954_v28  }
  0xe9   : > { %7849 = vmatmul.mubr.msk.bf16.gmra.mrb[76].mxu0 %vm1451_vm0, %v8284_v31  ;;  %7876 = vmatmul.mubr.msk.bf16.gmra.mrb[76].mxu1 %vm1451_vm0, %v8284_v31  ;;  %v2745_v31 = vld [vmem:[%s10182_s30] sm:$0x77] }
  0xea   : > { %1765 = vmatprep.mubr.bf16.mxu0 %v14236_v18  ;;  %2068 = vmatprep.mubr.bf16.mxu1 %v14236_v18 }
  0xec   : > { %6648 = vperm.xlu1 %8264, %v6638_v29   ;;  %6643 = vperm.xlu0 %8263, %v6637_v30  }
  0xf0   : > { %1213 = vperm.xlu1 %8264, %v961_v32   ;;  %1208 = vperm.xlu0 %8263, %v960_v33   ;;  %v10195_v32 = vsub.s32 5, %v10173_v15 }
  0xf1   : > { %7850 = vmatmul.mubr.msk.bf16.gmra.mrb[80].mxu0 %vm1451_vm0, %v8285_v36  ;;  %7877 = vmatmul.mubr.msk.bf16.gmra.mrb[80].mxu1 %vm1451_vm0, %v8285_v36 }
  0xf2   : > { %1775 = vmatprep.mubr.bf16.mxu0 %v14236_v18  ;;  %2078 = vmatprep.mubr.bf16.mxu1 %v14236_v18 }
  0xf4   : > { %6658 = vperm.xlu1 %8264, %v6640_v34   ;;  %6653 = vperm.xlu0 %8263, %v6639_v35  }
  0xf8   : > { %1223 = vperm.xlu1 %8264, %v963_v37   ;;  %1218 = vperm.xlu0 %8263, %v962_v38   ;;  %v10201_v37 = vpop.permute.xlu1 %3193 }
  0xf9   : > { %7851 = vmatmul.mubr.msk.bf16.gmra.mrb[84].mxu0 %vm1451_vm0, %v8286_v41  ;;  %7878 = vmatmul.mubr.msk.bf16.gmra.mrb[84].mxu1 %vm1451_vm0, %v8286_v41 }
  0xfa   : > { %1785 = vmatprep.mubr.bf16.mxu0 %v14236_v18  ;;  %2088 = vmatprep.mubr.bf16.mxu1 %v14236_v18 }
  0xfc   : > { %7005 = vperm.xlu1 %8264, %v7002_v39   ;;  %1228 = vperm.xlu0 %8263, %v964_v40   ;;  %v2746_v40 = vld [vmem:[%s10182_s30 + $0x8] sm:$0x77]  ;;  %v10225_v1 = vpop.permute.xlu1 %3325 }
 0x100   : > { %1233 = vperm.xlu0 %8263, %v965_v42   ;;  %v10210_v42 = vpop.permute.xlu0 %3320 }
 0x101   : > { %7852 = vmatmul.mubr.msk.bf16.gmra.mrb[88].mxu0 %vm1451_vm0, %v8287_v43  ;;  %7879 = vmatmul.mubr.msk.bf16.gmra.mrb[88].mxu1 %vm1451_vm0, %v8287_v43  ;;  %v3213_v43 = vrot.slane %v2745_v31, %v10187_v26 }
 0x102   : > { %1795 = vmatprep.mubr.bf16.mxu0 %v14236_v18  ;;  %2098 = vmatprep.mubr.bf16.mxu1 %v14236_v18 }
 0x109   : > { %7853 = vmatmul.mubr.msk.bf16.gmra.mrb[92].mxu0 %vm1451_vm0, %v8288_v44  ;;  %7880 = vmatmul.mubr.msk.bf16.gmra.mrb[92].mxu1 %vm1451_vm0, %v8288_v44 }
 0x10a   : > { %1805 = vmatprep.mubr.bf16.mxu0 %v14236_v18  ;;  %2108 = vmatprep.mubr.bf16.mxu1 %v14236_v18 }
 0x111   : > { %7854 = vmatmul.mubr.msk.bf16.gmra.mrb[96].mxu0 %vm1451_vm0, %v8289_v45  ;;  %7881 = vmatmul.mubr.msk.bf16.gmra.mrb[96].mxu1 %vm1451_vm0, %v8289_v45 }
 0x112   : > { %1815 = vmatprep.mubr.bf16.mxu0 %v14236_v18  ;;  %2118 = vmatprep.mubr.bf16.mxu1 %v14236_v18 }
 0x119   : > { %7855 = vmatmul.mubr.msk.bf16.gmra.mrb[100].mxu0 %vm1451_vm0, %v8290_v47  ;;  %7882 = vmatmul.mubr.msk.bf16.gmra.mrb[100].mxu1 %vm1451_vm0, %v8290_v47 }
 0x11a   : > { %1825 = vmatprep.mubr.bf16.mxu0 %v14236_v18  ;;  %2128 = vmatprep.mubr.bf16.mxu1 %v14236_v18 }
 0x121   : > { %7856 = vmatmul.mubr.msk.bf16.gmra.mrb[104].mxu0 %vm1451_vm0, %v8291_v49  ;;  %7883 = vmatmul.mubr.msk.bf16.gmra.mrb[104].mxu1 %vm1451_vm0, %v8291_v49 }
 0x122   : > { %2171 = vmatprep.mubr.bf16.mxu0 %v14236_v18  ;;  %2474 = vmatprep.mubr.bf16.mxu1 %v14236_v18 }
 0x124   : > { %v1567_v52 = vpop.f32.mrb[0].mxu0  ;;  %v1870_v53 = vpop.f32.mrb[0].mxu1 }
 0x125   : > { %v1568_v55 = vadd.f32 %v1567_v52, %v10142_v48  ;;  %v1871_v56 = vadd.f32 %v1870_v53, %v10142_v48  ;;  %v1569_v57 = vpop.f32.mrb[1].mxu0  ;;  %v1872_v58 = vpop.f32.mrb[1].mxu1  ;;  %v3217_v52 = vrot.slane %v2745_v31, %v10195_v32 }
 0x126   : > { %v1570_v60 = vadd.f32 %v1569_v57, %v10142_v48  ;;  %v1873_v61 = vadd.f32 %v1872_v58, %v10142_v48  ;;  %v1571_v62 = vpop.f32.mrb[2].mxu0  ;;  %v1874_v63 = vpop.f32.mrb[2].mxu1 }
 0x127   : > { %v7938_v2 = vmul.f32 -1.442695, %v1568_v55  ;;  %v7940_v3 = vmul.f32 -1.442695, %v1871_v56  ;;  %v1572_v4 = vadd.f32 %v1571_v62, %v10154_v51  ;;  %v1875_v5 = vadd.f32 %v1874_v63, %v10154_v51  ;;  %v1573_v6 = vpop.f32.mrb[3].mxu0  ;;  %v1876_v7 = vpop.f32.mrb[3].mxu1 }
 0x128   : > { %v7939_v8 = vmul.f32 -1.442695, %v1570_v60  ;;  %v7941_v9 = vmul.f32 -1.442695, %v1873_v61  ;;  %v1574_v10 = vadd.f32 %v1573_v6, %v10154_v51  ;;  %v1877_v12 = vadd.f32 %v1876_v7, %v10154_v51 }
 0x129   : > { %8298 = vpow2.f32 %v7938_v2  ;;  %v7946_v13 = vmul.f32 -1.442695, %v1572_v4  ;;  %7884 = vmatmul.mubr.msk.bf16.vlgmr.msra.gmra.mrb[108].mxu0 %vm1451_vm0, %v9684_v46  ;;  %7911 = vmatmul.mubr.msk.bf16.vlgmr.msra.gmra.mrb[108].mxu1 %vm1451_vm0, %v9684_v46  ;;  %v7948_v14 = vmul.f32 -1.442695, %v1875_v5  ;;  %v3225_v56 = vrot.slane %v2746_v40, %v10195_v32 }
 0x12a   : > { %8300 = vpow2.f32 %v7940_v3  ;;  %2181 = vmatprep.mubr.bf16.mxu0 %v14236_v18  ;;  %2484 = vmatprep.mubr.bf16.mxu1 %v14236_v18  ;;  %v7947_v17 = vmul.f32 -1.442695, %v1574_v10  ;;  %v7949_v20 = vmul.f32 -1.442695, %v1877_v12  ;;  %v10230_v4 = vrot.slane %v3213_v43, %v10187_v26 }
 0x12b   : > { %8302 = vpow2.f32 %v7939_v8  ;;  %v10240_v10 = vrot.slane %v3217_v52, %v10187_v26 }
 0x12c   : > { %8304 = vpow2.f32 %v7941_v9  ;;  %v1577_v46 = vpop.f32.mrb[4].mxu0  ;;  %v1880_v21 = vpop.f32.mrb[4].mxu1 }
 0x12d   : > { %8306 = vpow2.f32 %v7946_v13  ;;  %v1578_v22 = vadd.f32 %v1577_v46, %v10152_v50  ;;  %v1881_v23 = vadd.f32 %v1880_v21, %v10152_v50  ;;  %v1579_v24 = vpop.f32.mrb[5].mxu0  ;;  %v1882_v25 = vpop.f32.mrb[5].mxu1 }
 0x12e   : > { %8308 = vpow2.f32 %v7948_v14  ;;  %v1580_v27 = vadd.f32 %v1579_v24, %v10152_v50  ;;  %v1883_v28 = vadd.f32 %v1882_v25, %v10152_v50  ;;  %v1581_v29 = vpop.f32.mrb[6].mxu0  ;;  %v10191_v30 = vpop.f32.mrb[6].mxu1  ;;  %v3282_v25 = vmul.f32 %v10230_v4, %v10177_v19 }
 0x12f   : > { %8310 = vpow2.f32 %v7947_v17  ;;  %v7954_v33 = vmul.f32 -1.442695, %v1578_v22  ;;  %v7956_v34 = vmul.f32 -1.442695, %v1881_v23  ;;  %v10197_v35 = vpop.f32.mrb[7].mxu0  ;;  %v10199_v36 = vpop.f32.mrb[7].mxu1  ;;  %v1582_v60 = vadd.f32 %v1581_v29, %v10175_v16 }
 0x130   : > { %8312 = vpow2.f32 %v7949_v20  ;;  %v7955_v38 = vmul.f32 -1.442695, %v1580_v27  ;;  %v7957_v39 = vmul.f32 -1.442695, %v1883_v28  ;;  %v10242_v13 = vpop.permute.xlu0 %1008  ;;  %v10251_v20 = vrot.slane %v3225_v56, %v10187_v26 }
 0x131   : > { %7885 = vmatmul.mubr.msk.bf16.gmra.mrb[112].mxu0 %vm1451_vm0, %v9707_v54  ;;  %7912 = vmatmul.mubr.msk.bf16.gmra.mrb[112].mxu1 %vm1451_vm0, %v9707_v54  ;;  %8314 = vpow2.f32 %v7954_v33  ;;  %v3221_v54 = vrot.slane %v2746_v40, %v10187_v26  ;;  %v7962_v22 = vmul.f32 -1.442695, %v1582_v60  ;;  %v1885_v24 = vadd.f32 %v10191_v30, %v10175_v16 }
 0x132   : > { %2191 = vmatprep.mubr.bf16.mxu0 %v14236_v18  ;;  %2494 = vmatprep.mubr.bf16.mxu1 %v14236_v18  ;;  %8316 = vpow2.f32 %v7956_v34  ;;  %v1584_v27 = vadd.f32 %v10197_v35, %v10175_v16  ;;  %v3283_v33 = vmul.f32 %v10240_v10, %v10177_v19  ;;  %v3285_v35 = vmul.f32 %v10251_v20, %v10177_v19 }
 0x133   : > { %v8299_v41 = vpop.eup %8298  ;;  %8318 = vpow2.f32 %v7955_v38  ;;  %v10237_v9 = vrot.slane %v3221_v54, %v10187_v26  ;;  %v1887_v38 = vadd.f32 %v10199_v36, %v10175_v16 }
 0x134   : > { %v8301_v44 = vpop.eup %8300  ;;  %v2846_v45 = vadd.f32 1.0, %v8299_v41  ;;  %v10213_v47 = vpop.f32.mrb[8].mxu0  ;;  %8320 = vpow2.f32 %v7957_v39 }
 0x135   : > { %v10215_v49 = vpop.f32.mrb[8].mxu1  ;;  %v8303_v53 = vpop.eup %8302  ;;  %v2848_v55 = vadd.f32 1.0, %v8301_v44  ;;  %v3284_v31 = vmul.f32 %v10237_v9, %v10177_v19  ;;  %v3292_v54 = vmul.f32 %v10237_v9, %v10201_v37 }
 0x136   : > { %v8305_v57 = vpop.eup %8304  ;;  %v2847_v58 = vadd.f32 1.0, %v8303_v53  ;;  %v10221_v61 = vpop.f32.mrb[9].mxu0  ;;  %8322 = vrcp.f32 %v2846_v45  ;;  %v3290_v45 = vmul.f32 %v10230_v4, %v10201_v37 }
 0x137   : > { %v10223_v62 = vpop.f32.mrb[9].mxu1  ;;  %v8307_v63 = vpop.eup %8306  ;;  %v2849_v2 = vadd.f32 1.0, %v8305_v57  ;;  %8324 = vrcp.f32 %v2848_v55  ;;  %v7964_v55 = vmul.f32 -1.442695, %v1885_v24  ;;  %v3291_v57 = vmul.f32 %v10240_v10, %v10201_v37 }
 0x138   : > { %v10227_v3 = vpop.f32.mrb[10].mxu0  ;;  %v8309_v5 = vpop.eup %8308  ;;  %v2854_v6 = vadd.f32 1.0, %v8307_v63  ;;  %8326 = vrcp.f32 %v2847_v58  ;;  %v7963_v58 = vmul.f32 -1.442695, %v1584_v27  ;;  %v3341_v24 = vadd.f32 %v10210_v42, %v3285_v35 }
 0x139   : > { %v10232_v7 = vpop.f32.mrb[10].mxu1  ;;  %v10234_v8 = vpop.f32.mrb[11].mxu0  ;;  %v2856_v14 = vadd.f32 1.0, %v8309_v5  ;;  %7886 = vmatmul.mubr.msk.bf16.gmra.mrb[116].mxu0 %vm1451_vm0, %v9730_v59  ;;  %7913 = vmatmul.mubr.msk.bf16.gmra.mrb[116].mxu1 %vm1451_vm0, %v9730_v59  ;;  %8328 = vrcp.f32 %v2849_v2  ;;  %v3338_v2 = vadd.f32 %v10210_v42, %v3282_v25  ;;  %v3293_v5 = vmul.f32 %v10251_v20, %v10201_v37 }
 0x13a   : > { %v8311_v12 = vpop.eup %8310  ;;  %v10244_v17 = vpop.f32.mrb[11].mxu1  ;;  %2201 = vmatprep.mubr.bf16.mxu0 %v14236_v18  ;;  %2504 = vmatprep.mubr.bf16.mxu1 %v14236_v18  ;;  %8330 = vrcp.f32 %v2854_v6  ;;  %v3348_v27 = vadd.f32 %v10225_v1, %v3292_v54 }
 0x13b   : > { %v8313_v46 = vpop.eup %8312  ;;  %v2855_v21 = vadd.f32 1.0, %v8311_v12  ;;  %8332 = vrcp.f32 %v2856_v14  ;;  %v10275_v41 = vpop.permute.xlu1 %1013  ;;  %v7965_v12 = vmul.f32 -1.442695, %v1887_v38 }
 0x13c   : > { %v2857_v23 = vadd.f32 1.0, %v8313_v46  ;;  %v8315_v59 = vpop.eup %8314  ;;  %v10261_v28 = vpop.f32.mrb[12].mxu0  ;;  %v3340_v46 = vadd.f32 %v10210_v42, %v3284_v31 }
 0x13d   : > { %14322 = vst [vmem:[#allocation17_spill] sm:$0xff] %v10261_v28  ;;  %v10263_v29 = vpop.f32.mrb[12].mxu1  ;;  %v8317_v34 = vpop.eup %8316  ;;  %8334 = vrcp.f32 %v2855_v21  ;;  %v2862_v30 = vadd.f32 1.0, %v8315_v59  ;;  %v3346_v59 = vadd.f32 %v10225_v1, %v3290_v45 }
 0x13e   : > { %14323 = vst [vmem:[#allocation18_spill] sm:$0xff] %v10263_v29  ;;  %v10271_v39 = vpop.f32.mrb[13].mxu0  ;;  %v8319_v40 = vpop.eup %8318  ;;  %v2864_v43 = vadd.f32 1.0, %v8317_v34  ;;  %8336 = vpow2.f32 %v7962_v22 }
 0x13f   : > { %14324 = vst [vmem:[#allocation19_spill] sm:$0xff] %v10271_v39  ;;  %v10277_v44 = vpop.f32.mrb[13].mxu1  ;;  %v8321_v52 = vpop.eup %8320  ;;  %8338 = vrcp.f32 %v2857_v23  ;;  %v2863_v53 = vadd.f32 1.0, %v8319_v40  ;;  %v3339_v23 = vadd.f32 %v10210_v42, %v3283_v33  ;;  %v3349_v33 = vadd.f32 %v10225_v1, %v3293_v5 }
 0x140   : > { %14325 = vst [vmem:[#allocation20_spill] sm:$0xff] %v10277_v44  ;;  %v10283_v36 = vpop.permute.xlu0 %3198  ;;  %v10285_v56 = vpop.f32.mrb[14].mxu0  ;;  %8340 = vrcp.f32 %v2862_v30  ;;  %v2865_v22 = vadd.f32 1.0, %v8321_v52 }
 0x141   : > { %14326 = vst [vmem:[#allocation21_spill] sm:$0xff] %v10285_v56  ;;  %v10289_v60 = vpop.f32.mrb[14].mxu1  ;;  %v10291_v63 = vpop.f32.mrb[15].mxu0  ;;  %8342 = vrcp.f32 %v2864_v43  ;;  %7887 = vmatmul.mubr.msk.bf16.gmra.mrb[120].mxu0 %vm1451_vm0, %v9753_v0  ;;  %7914 = vmatmul.mubr.msk.bf16.gmra.mrb[120].mxu1 %vm1451_vm0, %v9753_v0  ;;  %v3347_v0 = vadd.f32 %v10225_v1, %v3291_v57  ;;  %v3298_v35 = vmul.f32 %v10230_v4, %v10283_v36 }
 0x142   : > { %14327 = vst [vmem:[#allocation22_spill] sm:$0xff] %v10289_v60  ;;  %14328 = vst [vmem:[#allocation23_spill] sm:$0xff] %v10291_v63  ;;  %v8323_v6 = vpop.eup %8322  ;;  %v10296_v14 = vpop.f32.mrb[15].mxu1  ;;  %8344 = vrcp.f32 %v2863_v53  ;;  %2211 = vmatprep.mubr.bf16.mxu0 %v14236_v18  ;;  %2514 = vmatprep.mubr.bf16.mxu1 %v14236_v18 }
 0x143   : > { %14329 = vst [vmem:[#allocation24_spill] sm:$0xff] %v10296_v14  ;;  %v8325_v21 = vpop.eup %8324  ;;  %8346 = vpow2.f32 %v7964_v55  ;;  %v3370_v30 = vmul.f32 %v8323_v6, %v3338_v2  ;;  %v10317_v57 = vpop.permute.xlu1 %3203  ;;  %v3300_v6 = vmul.f32 %v10237_v9, %v10283_v36 }
 0x144   : > { %v8327_v25 = vpop.eup %8326  ;;  %8348 = vpow2.f32 %v7963_v58  ;;  %v1607_v34 = vpop.f32.mrb[16].mxu0  ;;  %v3372_v52 = vmul.f32 %v8325_v21, %v3340_v46 }
 0x145   : > { %v8329_v31 = vpop.eup %8328  ;;  %v1910_v38 = vpop.f32.mrb[16].mxu1  ;;  %8350 = vpow2.f32 %v7965_v12  ;;  %v1608_v45 = vadd.f32 %v1607_v34, %v10242_v13  ;;  %v3371_v2 = vmul.f32 %v8327_v25, %v3339_v23 }
 0x146   : > { %v8331_v40 = vpop.eup %8330  ;;  %v10313_v43 = vpop.permute.xlu0 %3330  ;;  %v1911_v54 = vadd.f32 %v1910_v38, %v10242_v13  ;;  %8352 = vrcp.f32 %v2865_v22  ;;  %v3373_v46 = vmul.f32 %v8329_v31, %v3341_v24  ;;  %v9306_v24 = vld [vmem:[%s14318_s24 + $0x20] sm:$0xff]  }
 0x147   : > { %v1609_v53 = vpop.f32.mrb[17].mxu0  ;;  %v8333_v55 = vpop.eup %8332  ;;  %v10322_v15 = vadd.f32 %v3370_v30, %v1608_v45  ;;  %v3378_v23 = vmul.f32 %v8331_v40, %v3346_v59  ;;  %v3354_v31 = vadd.f32 %v10313_v43, %v3298_v35  ;;  %v3299_v59 = vmul.f32 %v10240_v10, %v10283_v36 }
 0x148   : > { %v1610_v58 = vadd.f32 %v1609_v53, %v10242_v13  ;;  %v1912_v5 = vpop.f32.mrb[17].mxu1  ;;  %v8335_v18 = vpop.eup %8334  ;;  %v10324_v12 = vadd.f32 %v3372_v52, %v1911_v54  ;;  %v3301_v40 = vmul.f32 %v10251_v20, %v10283_v36  ;;  %v14330_v52 = vmov 0  }
 0x149   : > { %v1913_v34 = vadd.f32 %v1912_v5, %v10242_v13  ;;  %v1611_v21 = vpop.f32.mrb[18].mxu0  ;;  %v1914_v38 = vpop.f32.mrb[18].mxu1  ;;  %7888 = vmatmul.mubr.msk.bf16.gmra.mrb[124].mxu0 %vm1451_vm0, %v9780_v11  ;;  %7915 = vmatmul.mubr.msk.bf16.gmra.mrb[124].mxu1 %vm1451_vm0, %v9306_v24  ;;  %v3380_v11 = vmul.f32 %v8333_v55, %v3348_v27  ;;  %v3379_v5 = vmul.f32 %v8335_v18, %v3347_v0 }
 0x14a   : > { %v8337_v14 = vpop.eup %8336  ;;  %v10327_v63 = vadd.f32 %v3371_v2, %v1610_v58  ;;  %v1612_v22 = vadd.f32 %v1611_v21, %v10275_v41  ;;  %v1915_v25 = vadd.f32 %v1914_v38, %v10275_v41  ;;  %v1613_v53 = vpop.f32.mrb[19].mxu0  ;;  %2221 = vmatprep.mubr.bf16.mxu0 %v14330_v52  ;;  %2524 = vmatprep.mubr.bf16.mxu1 %v14330_v52 }
 0x14b   : > { %v1916_v60 = vpop.f32.mrb[19].mxu1  ;;  %v8339_v56 = vpop.eup %8338  ;;  %v2870_v30 = vadd.f32 1.0, %v8337_v14  ;;  %v10342_v54 = vadd.f32 %v3373_v46, %v1913_v34  ;;  %v1614_v35 = vadd.f32 %v1613_v53, %v10275_v41  ;;  %v3356_v27 = vadd.f32 %v10313_v43, %v3300_v6 }
 0x14c   : > { %v8341_v45 = vpop.eup %8340  ;;  %v10344_v14 = vadd.f32 %v3378_v23, %v1612_v22  ;;  %v10348_v2 = vpop.permute.xlu0 %1018  ;;  %v1917_v21 = vadd.f32 %v1916_v60, %v10275_v41  ;;  %v10352_v24 = vadd.f32 %v3380_v11, %v1915_v25  ;;  %v3381_v34 = vmul.f32 %v8339_v56, %v3349_v33 }
 0x14d   : > { %v8343_v58 = vpop.eup %8342  ;;  %8354 = vrcp.f32 %v2870_v30  ;;  %v1617_v46 = vpop.f32.mrb[20].mxu0  ;;  %v10357_v44 = vadd.f32 %v3379_v5, %v1614_v35  ;;  %v3386_v39 = vmul.f32 %v8341_v45, %v3354_v31  ;;  %v3355_v18 = vadd.f32 %v10313_v43, %v3299_v59 }
 0x14e   : > { %v8345_v38 = vpop.eup %8344  ;;  %v1920_v22 = vpop.f32.mrb[20].mxu1  ;;  %v1618_v30 = vadd.f32 %v1617_v46, %v10348_v2  ;;  %v10361_v25 = vadd.f32 %v3381_v34, %v1917_v21  ;;  %v3306_v33 = vmul.f32 %v10230_v4, %v10317_v57  ;;  %v3357_v5 = vadd.f32 %v10313_v43, %v3301_v40 }
 0x14f   : > { %v8347_v55 = vpop.eup %8346  ;;  %v10355_v23 = vpop.permute.xlu1 %3335  ;;  %v1921_v35 = vadd.f32 %v1920_v22, %v10348_v2  ;;  %v3387_v4 = vmul.f32 %v8345_v38, %v3355_v18  ;;  %v9307_v22 = vld [vmem:[%s14318_s24 + $0x28] sm:$0xff]  }
 0x150   : > { %v1619_v53 = vpop.f32.mrb[21].mxu0  ;;  %v8349_v60 = vpop.eup %8348  ;;  %v2872_v0 = vadd.f32 1.0, %v8347_v55  ;;  %v10365_v29 = vadd.f32 %v3386_v39, %v1618_v30  ;;  %v3388_v55 = vmul.f32 %v8343_v58, %v3356_v27  ;;  %v3308_v39 = vmul.f32 %v10237_v9, %v10317_v57 }
 0x151   : > { %v1922_v56 = vpop.f32.mrb[21].mxu1  ;;  %v8351_v6 = vpop.eup %8350  ;;  %v2871_v11 = vadd.f32 1.0, %v8349_v60  ;;  %v1620_v21 = vadd.f32 %v1619_v53, %v10348_v2  ;;  %7889 = vmatmul.mubr.msk.bf16.gmra.mrb[128].mxu0 %vm1451_vm0, %v9307_v22  ;;  %7916 = vmatmul.mubr.msk.bf16.gmra.mrb[128].mxu1 %vm1451_vm0, %v9307_v22  ;;  %v3362_v27 = vadd.f32 %v10355_v23, %v3306_v33  ;;  %v3307_v53 = vmul.f32 %v10240_v10, %v10317_v57 }
 0x152   : > { %v1621_v31 = vpop.f32.mrb[22].mxu0  ;;  %v1924_v45 = vpop.f32.mrb[22].mxu1  ;;  %8356 = vrcp.f32 %v2872_v0  ;;  %v2873_v59 = vadd.f32 1.0, %v8351_v6  ;;  %v10377_v40 = vadd.f32 %v3388_v55, %v1921_v35  ;;  %v1923_v58 = vadd.f32 %v1922_v56, %v10348_v2  ;;  %2231 = vmatprep.mubr.bf16.mxu0 %v14330_v52  ;;  %2534 = vmatprep.mubr.bf16.mxu1 %v14330_v52 }
 0x153   : > { %v8353_v46 = vpop.eup %8352  ;;  %v1623_v34 = vpop.f32.mrb[23].mxu0  ;;  %8358 = vrcp.f32 %v2871_v11  ;;  %v10385_v38 = vadd.f32 %v3387_v4, %v1620_v21  ;;  %v3309_v60 = vmul.f32 %v10251_v20, %v10317_v57  ;;  %v3442_v35 = vmax.f32 %v10344_v14, 0.0 }
 0x154   : > { %v1926_v28 = vpop.f32.mrb[23].mxu1  ;;  %8360 = vrcp.f32 %v2873_v59  ;;  %v10383_v9 = vpop.permute.xlu1 %1023  ;;  %v3389_v30 = vmul.f32 %v8353_v46, %v3357_v5  ;;  %v3364_v46 = vadd.f32 %v10355_v23, %v3308_v39  ;;  %v3363_v20 = vadd.f32 %v10355_v23, %v3307_v53 }
 0x155   : > { %v1622_v18 = vadd.f32 %v1621_v31, %v10383_v9  ;;  %v10392_v0 = vpop.f32.mrb[24].mxu0  ;;  %v10394_v56 = vpop.f32.mrb[24].mxu1  ;;  %v3444_v31 = vmax.f32 %v10352_v24, 0.0  ;;  %v3435_v59 = vmax.f32 %v10327_v63, 0.0  ;;  %v3443_v55 = vmax.f32 %v10357_v44, 0.0 }
 0x156   : > { %14331 = vst [vmem:[#allocation25_spill] sm:$0xff] %v10392_v0  ;;  %14332 = vst [vmem:[#allocation26_spill] sm:$0xff] %v10394_v56  ;;  %v10396_v6 = vadd.f32 %v3389_v30, %v1923_v58  ;;  %v10398_v11 = vpop.f32.mrb[25].mxu0  ;;  %v10402_v10 = vpop.f32.mrb[25].mxu1  ;;  %v3434_v22 = vmax.f32 %v10322_v15, 0.0  ;;  %v3436_v14 = vmax.f32 %v10324_v12, 0.0  ;;  %v3365_v39 = vadd.f32 %v10355_v23, %v3309_v60 }
 0x157   : > { %v8355_v33 = vpop.eup %8354  ;;  %14333 = vst [vmem:[#allocation27_spill] sm:$0xff] %v10398_v11  ;;  %14334 = vst [vmem:[#allocation28_spill] sm:$0xff] %v10402_v10  ;;  %v10408_v21 = vpop.f32.mrb[26].mxu0  ;;  %v1925_v30 = vadd.f32 %v1924_v45, %v10383_v9  ;;  %v3471_v63 = vpack.c.bf16 %v3443_v55, %v3435_v59  ;;  %v3437_v44 = vmax.f32 %v10342_v54, 0.0  ;;  %v3445_v53 = vmax.f32 %v10361_v25, 0.0  ;;  %v9308_v15 = vld [vmem:[%s14318_s24 + $0x30] sm:$0xff]  }
 0x158   : > { %v3394_v5 = vmul.f32 %v8355_v33, %v3362_v27  ;;  %14335 = vst [vmem:[#allocation29_spill] sm:$0xff] %v10408_v21  ;;  %v10410_v4 = vpop.f32.mrb[26].mxu1  ;;  %v10415_v27 = vpop.f32.mrb[27].mxu0  ;;  %v3470_v60 = vpack.c.bf16 %v3442_v35, %v3434_v22  ;;  %v1927_v25 = vadd.f32 %v1926_v28, %v10383_v9 }
 0x159   : > { %14336 = vst [vmem:[#allocation30_spill] sm:$0xff] %v10410_v4  ;;  %14337 = vst [vmem:[#allocation31_spill] sm:$0xff] %v10415_v27  ;;  %v10417_v24 = vpop.f32.mrb[27].mxu1  ;;  %7890 = vmatmul.mubr.msk.bf16.gmra.mrb[132].mxu0 %vm1451_vm0, %v9308_v15  ;;  %7917 = vmatmul.mubr.msk.bf16.gmra.mrb[132].mxu1 %vm1451_vm0, %v9308_v15  ;;  %v3473_v33 = vpack.c.bf16 %v3445_v53, %v3437_v44  ;;  %v3452_v44 = vmax.f32 %v10377_v40, 0.0 }
 0x15a   : > { %v3426_v58 = vadd.f32 %v3394_v5, %v1622_v18  ;;  %14338 = vst [vmem:[#allocation32_spill] sm:$0xff] %v10417_v24  ;;  %v1624_v18 = vadd.f32 %v1623_v34, %v10383_v9  ;;  %2241 = vmatprep.mubr.bf16.mxu0 %v14330_v52  ;;  %2544 = vmatprep.mubr.bf16.mxu1 %v14330_v52 }
 0x15b   : > { %3526 = vmatprep.subr.bf16.mxu0 %v3471_v63  ;;  %v3472_v5 = vpack.c.bf16 %v3444_v31, %v3436_v14  ;;  %3579 = vmatprep.subr.bf16.mxu1 %v3473_v33  ;;  %v3450_v14 = vmax.f32 %v10365_v29, 0.0 }
 0x15c   : > { %v8357_v12 = vpop.eup %8356  ;;  %3527 = vmatpush1.bf16.msra.mxu0 %v3470_v60  ;;  %v10431_v24 = vpop.f32.mrb[28].mxu0  ;;  %v3458_v27 = vmax.f32 %v3426_v58, 0.0  ;;  %v3451_v58 = vmax.f32 %v10385_v38, 0.0  ;;  %v9309_v60 = vld [vmem:[%s14318_s24 + $0x38] sm:$0xff]  }
 0x15d   : > { %v8359_v45 = vpop.eup %8358  ;;  %v3396_v54 = vmul.f32 %v8357_v12, %v3364_v46  ;;  %14339 = vst [vmem:[#allocation33_spill] sm:$0xff] %v10431_v24  ;;  %v10433_v15 = vpop.f32.mrb[28].mxu1  ;;  %3580 = vmatpush1.bf16.msra.mxu1 %v3472_v5  ;;  %v3453_v12 = vmax.f32 %v10396_v6, 0.0 }
 0x15e   : > { %v8361_v59 = vpop.eup %8360  ;;  %v3395_v55 = vmul.f32 %v8359_v45, %v3363_v20  ;;  %14340 = vst [vmem:[#allocation34_spill] sm:$0xff] %v10433_v15  ;;  %v10435_v22 = vpop.f32.mrb[29].mxu0  ;;  %v3478_v29 = vpack.c.bf16 %v3458_v27, %v3450_v14 }
 0x15f   : > { %v3428_v34 = vadd.f32 %v3396_v54, %v1925_v30  ;;  %v3397_v35 = vmul.f32 %v8361_v59, %v3365_v39  ;;  %14341 = vst [vmem:[#allocation35_spill] sm:$0xff] %v10435_v22  ;;  %v10437_v46 = vpop.f32.mrb[29].mxu1  ;;  %v10439_v31 = vpop.f32.mrb[30].mxu0 }
 0x160   : > { %v3427_v4 = vadd.f32 %v3395_v55, %v1624_v18  ;;  %14342 = vst [vmem:[#allocation36_spill] sm:$0xff] %v10437_v46  ;;  %14343 = vst [vmem:[#allocation37_spill] sm:$0xff] %v10439_v31  ;;  %v10441_v20 = vpop.f32.mrb[30].mxu1  ;;  %v10445_v30 = vpop.f32.mrb[31].mxu0  ;;  %v9310_v55 = vld [vmem:[%s14318_s24 + $0x40] sm:$0xff]  }
 0x161   : > { %v3460_v28 = vmax.f32 %v3428_v34, 0.0  ;;  %v3429_v63 = vadd.f32 %v3397_v35, %v1927_v25  ;;  %14344 = vst [vmem:[#allocation38_spill] sm:$0xff] %v10441_v20  ;;  %14345 = vst [vmem:[#allocation39_spill] sm:$0xff] %v10445_v30  ;;  %v10447_v39 = vpop.f32.mrb[31].mxu1  ;;  %7891 = vmatmul.mubr.msk.bf16.gmra.mrb[136].mxu0 %vm1451_vm0, %v9309_v60  ;;  %7918 = vmatmul.mubr.msk.bf16.gmra.mrb[136].mxu1 %vm1451_vm0, %v9309_v60 }
 0x162   : > { %14346 = vst [vmem:[#allocation40_spill] sm:$0xff] %v10447_v39  ;;  %v3459_v53 = vmax.f32 %v3427_v4, 0.0  ;;  %2251 = vmatprep.mubr.bf16.mxu0 %v14330_v52  ;;  %2554 = vmatprep.mubr.bf16.mxu1 %v14330_v52 }
 0x163   : > { %v3461_v18 = vmax.f32 %v3429_v63, 0.0  ;;  %v3480_v40 = vpack.c.bf16 %v3460_v28, %v3452_v44 }
 0x164   : > { %v3479_v45 = vpack.c.bf16 %v3459_v53, %v3451_v58  ;;  %v10458_v4 = vpop.f32.mrb[32].mxu0  ;;  %v10460_v6 = vpop.f32.mrb[32].mxu1 }
 0x165   : > { %v3481_v38 = vpack.c.bf16 %v3461_v18, %v3453_v12  ;;  %14347 = vst [vmem:[#allocation41_spill] sm:$0xff] %v10458_v4  ;;  %14348 = vst [vmem:[#allocation42_spill] sm:$0xff] %v10460_v6  ;;  %v10462_v54 = vpop.f32.mrb[33].mxu0  ;;  %v10464_v25 = vpop.f32.mrb[33].mxu1  ;;  %v9311_v12 = vld [vmem:[%s14318_s24 + $0x48] sm:$0xff]  }
 0x166   : > { %3528 = vmatprep.subr.bf16.mxu0 %v3479_v45  ;;  %14349 = vst [vmem:[#allocation43_spill] sm:$0xff] %v10462_v54  ;;  %14350 = vst [vmem:[#allocation44_spill] sm:$0xff] %v10464_v25  ;;  %v10466_v27 = vpop.f32.mrb[34].mxu0  ;;  %v10468_v33 = vpop.f32.mrb[34].mxu1  ;;  %v2747_v4 = vld [vmem:[%s10182_s30 + $0x10] sm:$0x77] }
 0x167   : > { %3581 = vmatprep.subr.bf16.mxu1 %v3481_v38  ;;  %3529 = vmatpush1.bf16.msra.mxu0 %v3478_v29  ;;  %14351 = vst [vmem:[#allocation45_spill] sm:$0xff] %v10466_v27  ;;  %14352 = vst [vmem:[#allocation46_spill] sm:$0xff] %v10468_v33  ;;  %v10470_v5 = vpop.f32.mrb[35].mxu0  ;;  %v10472_v59 = vpop.f32.mrb[35].mxu1 }
 0x168   : > { %3582 = vmatpush1.bf16.msra.mxu1 %v3480_v40  ;;  %14353 = vst [vmem:[#allocation47_spill] sm:$0xff] %v10470_v5  ;;  %14354 = vst [vmem:[#allocation48_spill] sm:$0xff] %v10472_v59 }
 0x169   : > { %7892 = vmatmul.mubr.msk.bf16.gmra.mrb[140].mxu0 %vm1451_vm0, %v9310_v55  ;;  %7919 = vmatmul.mubr.msk.bf16.gmra.mrb[140].mxu1 %vm1451_vm0, %v9310_v55 }
 0x16a   : > { %2261 = vmatprep.mubr.bf16.mxu0 %v14330_v52  ;;  %2564 = vmatprep.mubr.bf16.mxu1 %v14330_v52 }
 0x16c   : > { %v10481_v34 = vpop.f32.mrb[36].mxu0  ;;  %v10483_v35 = vpop.f32.mrb[36].mxu1 }
 0x16d   : > { %14355 = vst [vmem:[#allocation49_spill] sm:$0xff] %v10481_v34  ;;  %14356 = vst [vmem:[#allocation50_spill] sm:$0xff] %v10483_v35  ;;  %v10485_v28 = vpop.f32.mrb[37].mxu0  ;;  %v10487_v63 = vpop.f32.mrb[37].mxu1 }
 0x16e   : > { %14357 = vst [vmem:[#allocation51_spill] sm:$0xff] %v10485_v28  ;;  %14358 = vst [vmem:[#allocation52_spill] sm:$0xff] %v10487_v63  ;;  %v10489_v14 = vpop.f32.mrb[38].mxu0  ;;  %v10491_v44 = vpop.f32.mrb[38].mxu1  ;;  %v10914_v28 = vld [vmem:[%s14499_s0 + $0x8] sm:$0xff]  }
 0x16f   : > { %14359 = vst [vmem:[#allocation53_spill] sm:$0xff] %v10489_v14  ;;  %14360 = vst [vmem:[#allocation54_spill] sm:$0xff] %v10491_v44  ;;  %v10493_v58 = vpop.f32.mrb[39].mxu0  ;;  %v10495_v53 = vpop.f32.mrb[39].mxu1 }
 0x170   : > { %14361 = vst [vmem:[#allocation55_spill] sm:$0xff] %v10493_v58  ;;  %14362 = vst [vmem:[#allocation56_spill] sm:$0xff] %v10495_v53 }
 0x171   : > { %7893 = vmatmul.mubr.msk.bf16.gmra.mrb[144].mxu0 %vm1451_vm0, %v9311_v12  ;;  %7920 = vmatmul.mubr.msk.bf16.gmra.mrb[144].mxu1 %vm1451_vm0, %v9311_v12  ;;  %v9312_v12 = vld [vmem:[%s14318_s24 + $0x50] sm:$0xff]  }
 0x172   : > { %2271 = vmatprep.mubr.bf16.mxu0 %v14330_v52  ;;  %2574 = vmatprep.mubr.bf16.mxu1 %v14330_v52 }
 0x174   : > { %v10504_v18 = vpop.f32.mrb[40].mxu0  ;;  %v10506_v60 = vpop.f32.mrb[40].mxu1 }
 0x175   : > { %14363 = vst [vmem:[#allocation57_spill] sm:$0xff] %v10504_v18  ;;  %14364 = vst [vmem:[#allocation58_spill] sm:$0xff] %v10506_v60  ;;  %v10508_v29 = vpop.f32.mrb[41].mxu0  ;;  %v10510_v40 = vpop.f32.mrb[41].mxu1 }
 0x176   : > { %14365 = vst [vmem:[#allocation59_spill] sm:$0xff] %v10508_v29  ;;  %14366 = vst [vmem:[#allocation60_spill] sm:$0xff] %v10510_v40  ;;  %v10512_v45 = vpop.f32.mrb[42].mxu0  ;;  %v10514_v38 = vpop.f32.mrb[42].mxu1 }
 0x177   : > { %14367 = vst [vmem:[#allocation61_spill] sm:$0xff] %v10512_v45  ;;  %14368 = vst [vmem:[#allocation62_spill] sm:$0xff] %v10514_v38  ;;  %v10516_v55 = vpop.f32.mrb[43].mxu0  ;;  %v10518_v59 = vpop.f32.mrb[43].mxu1 }
 0x178   : > { %14369 = vst [vmem:[#allocation63_spill] sm:$0xff] %v10516_v55  ;;  %14370 = vst [vmem:[#allocation64_spill] sm:$0xff] %v10518_v59 }
 0x179   : > { %7894 = vmatmul.mubr.msk.bf16.gmra.mrb[148].mxu0 %vm1451_vm0, %v9312_v12  ;;  %7921 = vmatmul.mubr.msk.bf16.gmra.mrb[148].mxu1 %vm1451_vm0, %v9312_v12  ;;  %v9313_v12 = vld [vmem:[%s14318_s24 + $0x58] sm:$0xff]  }
 0x17a   : > { %2281 = vmatprep.mubr.bf16.mxu0 %v14330_v52  ;;  %2584 = vmatprep.mubr.bf16.mxu1 %v14330_v52 }
 0x17c   : > { %v10527_v5 = vpop.f32.mrb[44].mxu0  ;;  %v10529_v33 = vpop.f32.mrb[44].mxu1 }
 0x17d   : > { %14371 = vst [vmem:[#allocation65_spill] sm:$0xff] %v10527_v5  ;;  %14372 = vst [vmem:[#allocation66_spill] sm:$0xff] %v10529_v33  ;;  %v10531_v27 = vpop.f32.mrb[45].mxu0  ;;  %v10533_v55 = vpop.f32.mrb[45].mxu1 }
 0x17e   : > { %14373 = vst [vmem:[#allocation67_spill] sm:$0xff] %v10531_v27  ;;  %14374 = vst [vmem:[#allocation68_spill] sm:$0xff] %v10533_v55  ;;  %v10535_v59 = vpop.f32.mrb[46].mxu0  ;;  %v10537_v38 = vpop.f32.mrb[46].mxu1 }
 0x17f   : > { %14375 = vst [vmem:[#allocation69_spill] sm:$0xff] %v10535_v59  ;;  %14376 = vst [vmem:[#allocation70_spill] sm:$0xff] %v10537_v38  ;;  %v10539_v45 = vpop.f32.mrb[47].mxu0  ;;  %v10541_v40 = vpop.f32.mrb[47].mxu1 }
 0x180   : > { %14377 = vst [vmem:[#allocation71_spill] sm:$0xff] %v10539_v45  ;;  %14378 = vst [vmem:[#allocation72_spill] sm:$0xff] %v10541_v40 }
 0x181   : > { %7895 = vmatmul.mubr.msk.bf16.gmra.mrb[152].mxu0 %vm1451_vm0, %v9313_v12  ;;  %7922 = vmatmul.mubr.msk.bf16.gmra.mrb[152].mxu1 %vm1451_vm0, %v9313_v12  ;;  %v9314_v12 = vld [vmem:[%s14318_s24 + $0x60] sm:$0xff]  }
 0x182   : > { %2291 = vmatprep.mubr.bf16.mxu0 %v14330_v52  ;;  %2594 = vmatprep.mubr.bf16.mxu1 %v14330_v52 }
 0x184   : > { %v10550_v55 = vpop.f32.mrb[48].mxu0  ;;  %v10552_v59 = vpop.f32.mrb[48].mxu1 }
 0x185   : > { %14379 = vst [vmem:[#allocation73_spill] sm:$0xff] %v10550_v55  ;;  %14380 = vst [vmem:[#allocation74_spill] sm:$0xff] %v10552_v59  ;;  %v10554_v38 = vpop.f32.mrb[49].mxu0  ;;  %v10556_v45 = vpop.f32.mrb[49].mxu1 }
 0x186   : > { %14381 = vst [vmem:[#allocation75_spill] sm:$0xff] %v10554_v38  ;;  %14382 = vst [vmem:[#allocation76_spill] sm:$0xff] %v10556_v45  ;;  %v10558_v40 = vpop.f32.mrb[50].mxu0  ;;  %v10560_v27 = vpop.f32.mrb[50].mxu1 }
 0x187   : > { %14383 = vst [vmem:[#allocation77_spill] sm:$0xff] %v10558_v40  ;;  %14384 = vst [vmem:[#allocation78_spill] sm:$0xff] %v10560_v27  ;;  %v10562_v33 = vpop.f32.mrb[51].mxu0  ;;  %v10564_v5 = vpop.f32.mrb[51].mxu1 }
 0x188   : > { %14385 = vst [vmem:[#allocation79_spill] sm:$0xff] %v10562_v33  ;;  %14386 = vst [vmem:[#allocation80_spill] sm:$0xff] %v10564_v5 }
 0x189   : > { %7896 = vmatmul.mubr.msk.bf16.gmra.mrb[156].mxu0 %vm1451_vm0, %v9314_v12  ;;  %7923 = vmatmul.mubr.msk.bf16.gmra.mrb[156].mxu1 %vm1451_vm0, %v9314_v12  ;;  %v9315_v12 = vld [vmem:[%s14318_s24 + $0x68] sm:$0xff]  }
 0x18a   : > { %2301 = vmatprep.mubr.bf16.mxu0 %v14330_v52  ;;  %2604 = vmatprep.mubr.bf16.mxu1 %v14330_v52 }
 0x18c   : > { %v10573_v45 = vpop.f32.mrb[52].mxu0  ;;  %v10575_v40 = vpop.f32.mrb[52].mxu1 }
 0x18d   : > { %14387 = vst [vmem:[#allocation81_spill] sm:$0xff] %v10573_v45  ;;  %14388 = vst [vmem:[#allocation82_spill] sm:$0xff] %v10575_v40  ;;  %v10577_v27 = vpop.f32.mrb[53].mxu0  ;;  %v10579_v33 = vpop.f32.mrb[53].mxu1 }
 0x18e   : > { %14389 = vst [vmem:[#allocation83_spill] sm:$0xff] %v10577_v27  ;;  %14390 = vst [vmem:[#allocation84_spill] sm:$0xff] %v10579_v33  ;;  %v10581_v5 = vpop.f32.mrb[54].mxu0  ;;  %v10583_v38 = vpop.f32.mrb[54].mxu1 }
 0x18f   : > { %14391 = vst [vmem:[#allocation85_spill] sm:$0xff] %v10581_v5  ;;  %14392 = vst [vmem:[#allocation86_spill] sm:$0xff] %v10583_v38  ;;  %v10585_v59 = vpop.f32.mrb[55].mxu0  ;;  %v10587_v55 = vpop.f32.mrb[55].mxu1 }
 0x190   : > { %14393 = vst [vmem:[#allocation87_spill] sm:$0xff] %v10585_v59  ;;  %14394 = vst [vmem:[#allocation88_spill] sm:$0xff] %v10587_v55 }
 0x191   : > { %7897 = vmatmul.mubr.msk.bf16.gmra.mrb[160].mxu0 %vm1451_vm0, %v9315_v12  ;;  %7924 = vmatmul.mubr.msk.bf16.gmra.mrb[160].mxu1 %vm1451_vm0, %v9315_v12  ;;  %v9316_v12 = vld [vmem:[%s14318_s24 + $0x70] sm:$0xff]  }
 0x192   : > { %2311 = vmatprep.mubr.bf16.mxu0 %v14330_v52  ;;  %2614 = vmatprep.mubr.bf16.mxu1 %v14330_v52 }
 0x194   : > { %v10596_v33 = vpop.f32.mrb[56].mxu0  ;;  %v10598_v5 = vpop.f32.mrb[56].mxu1 }
 0x195   : > { %14395 = vst [vmem:[#allocation89_spill] sm:$0xff] %v10596_v33  ;;  %14396 = vst [vmem:[#allocation90_spill] sm:$0xff] %v10598_v5  ;;  %v10600_v38 = vpop.f32.mrb[57].mxu0  ;;  %v10602_v59 = vpop.f32.mrb[57].mxu1 }
 0x196   : > { %14397 = vst [vmem:[#allocation91_spill] sm:$0xff] %v10600_v38  ;;  %14398 = vst [vmem:[#allocation92_spill] sm:$0xff] %v10602_v59  ;;  %v10604_v55 = vpop.f32.mrb[58].mxu0  ;;  %v10606_v27 = vpop.f32.mrb[58].mxu1 }
 0x197   : > { %14399 = vst [vmem:[#allocation93_spill] sm:$0xff] %v10604_v55  ;;  %14400 = vst [vmem:[#allocation94_spill] sm:$0xff] %v10606_v27  ;;  %v10608_v40 = vpop.f32.mrb[59].mxu0  ;;  %v10610_v45 = vpop.f32.mrb[59].mxu1 }
 0x198   : > { %14401 = vst [vmem:[#allocation95_spill] sm:$0xff] %v10608_v40  ;;  %14402 = vst [vmem:[#allocation96_spill] sm:$0xff] %v10610_v45 }
 0x199   : > { %7898 = vmatmul.mubr.msk.bf16.gmra.mrb[164].mxu0 %vm1451_vm0, %v9316_v12  ;;  %7925 = vmatmul.mubr.msk.bf16.gmra.mrb[164].mxu1 %vm1451_vm0, %v9316_v12  ;;  %v9317_v12 = vld [vmem:[%s14318_s24 + $0x78] sm:$0xff]  }
 0x19a   : > { %2321 = vmatprep.mubr.bf16.mxu0 %v14330_v52  ;;  %2624 = vmatprep.mubr.bf16.mxu1 %v14330_v52 }
 0x19c   : > { %v10619_v59 = vpop.f32.mrb[60].mxu0  ;;  %v10621_v55 = vpop.f32.mrb[60].mxu1 }
 0x19d   : > { %14403 = vst [vmem:[#allocation97_spill] sm:$0xff] %v10619_v59  ;;  %14404 = vst [vmem:[#allocation98_spill] sm:$0xff] %v10621_v55  ;;  %v10623_v27 = vpop.f32.mrb[61].mxu0  ;;  %v10625_v40 = vpop.f32.mrb[61].mxu1 }
 0x19e   : > { %14405 = vst [vmem:[#allocation99_spill] sm:$0xff] %v10623_v27  ;;  %14406 = vst [vmem:[#allocation100_spill] sm:$0xff] %v10625_v40  ;;  %v10627_v45 = vpop.f32.mrb[62].mxu0  ;;  %v10629_v38 = vpop.f32.mrb[62].mxu1 }
 0x19f   : > { %14407 = vst [vmem:[#allocation101_spill] sm:$0xff] %v10627_v45  ;;  %14408 = vst [vmem:[#allocation102_spill] sm:$0xff] %v10629_v38  ;;  %v10631_v5 = vpop.f32.mrb[63].mxu0  ;;  %v10633_v33 = vpop.f32.mrb[63].mxu1 }
 0x1a0   : > { %14409 = vst [vmem:[#allocation103_spill] sm:$0xff] %v10631_v5  ;;  %14410 = vst [vmem:[#allocation104_spill] sm:$0xff] %v10633_v33 }
 0x1a1   : > { %7899 = vmatmul.mubr.msk.bf16.gmra.mrb[168].mxu0 %vm1451_vm0, %v9317_v12  ;;  %7926 = vmatmul.mubr.msk.bf16.gmra.mrb[168].mxu1 %vm1451_vm0, %v9317_v12  ;;  %v9318_v12 = vld [vmem:[%s14318_s24 + $0x80] sm:$0xff]  }
 0x1a2   : > { %2331 = vmatprep.mubr.bf16.mxu0 %v14330_v52  ;;  %2634 = vmatprep.mubr.bf16.mxu1 %v14330_v52 }
 0x1a4   : > { %v10642_v40 = vpop.f32.mrb[64].mxu0  ;;  %v10644_v45 = vpop.f32.mrb[64].mxu1 }
 0x1a5   : > { %14411 = vst [vmem:[#allocation105_spill] sm:$0xff] %v10642_v40  ;;  %14412 = vst [vmem:[#allocation106_spill] sm:$0xff] %v10644_v45  ;;  %v10646_v38 = vpop.f32.mrb[65].mxu0  ;;  %v10648_v5 = vpop.f32.mrb[65].mxu1 }
 0x1a6   : > { %14413 = vst [vmem:[#allocation107_spill] sm:$0xff] %v10646_v38  ;;  %14414 = vst [vmem:[#allocation108_spill] sm:$0xff] %v10648_v5  ;;  %v10650_v33 = vpop.f32.mrb[66].mxu0  ;;  %v10652_v27 = vpop.f32.mrb[66].mxu1 }
 0x1a7   : > { %14415 = vst [vmem:[#allocation109_spill] sm:$0xff] %v10650_v33  ;;  %14416 = vst [vmem:[#allocation110_spill] sm:$0xff] %v10652_v27  ;;  %v10654_v55 = vpop.f32.mrb[67].mxu0  ;;  %v10656_v59 = vpop.f32.mrb[67].mxu1 }
 0x1a8   : > { %14417 = vst [vmem:[#allocation111_spill] sm:$0xff] %v10654_v55  ;;  %14418 = vst [vmem:[#allocation112_spill] sm:$0xff] %v10656_v59 }
 0x1a9   : > { %7900 = vmatmul.mubr.msk.bf16.gmra.mrb[172].mxu0 %vm1451_vm0, %v9318_v12  ;;  %7927 = vmatmul.mubr.msk.bf16.gmra.mrb[172].mxu1 %vm1451_vm0, %v9318_v12  ;;  %v9319_v12 = vld [vmem:[%s14318_s24 + $0x88] sm:$0xff]  }
 0x1aa   : > { %2341 = vmatprep.mubr.bf16.mxu0 %v14330_v52  ;;  %2644 = vmatprep.mubr.bf16.mxu1 %v14330_v52 }
 0x1ac   : > { %v10665_v5 = vpop.f32.mrb[68].mxu0  ;;  %v10667_v33 = vpop.f32.mrb[68].mxu1 }
 0x1ad   : > { %14419 = vst [vmem:[#allocation113_spill] sm:$0xff] %v10665_v5  ;;  %14420 = vst [vmem:[#allocation114_spill] sm:$0xff] %v10667_v33  ;;  %v10669_v27 = vpop.f32.mrb[69].mxu0  ;;  %v10671_v55 = vpop.f32.mrb[69].mxu1 }
 0x1ae   : > { %14421 = vst [vmem:[#allocation115_spill] sm:$0xff] %v10669_v27  ;;  %14422 = vst [vmem:[#allocation116_spill] sm:$0xff] %v10671_v55  ;;  %v10673_v59 = vpop.f32.mrb[70].mxu0  ;;  %v10675_v38 = vpop.f32.mrb[70].mxu1 }
 0x1af   : > { %14423 = vst [vmem:[#allocation117_spill] sm:$0xff] %v10673_v59  ;;  %14424 = vst [vmem:[#allocation118_spill] sm:$0xff] %v10675_v38  ;;  %v10677_v45 = vpop.f32.mrb[71].mxu0  ;;  %v10679_v40 = vpop.f32.mrb[71].mxu1 }
 0x1b0   : > { %14425 = vst [vmem:[#allocation119_spill] sm:$0xff] %v10677_v45  ;;  %14426 = vst [vmem:[#allocation120_spill] sm:$0xff] %v10679_v40 }
 0x1b1   : > { %7901 = vmatmul.mubr.msk.bf16.gmra.mrb[176].mxu0 %vm1451_vm0, %v9319_v12  ;;  %7928 = vmatmul.mubr.msk.bf16.gmra.mrb[176].mxu1 %vm1451_vm0, %v9319_v12  ;;  %v9320_v12 = vld [vmem:[%s14318_s24 + $0x90] sm:$0xff]  }
 0x1b2   : > { %2351 = vmatprep.mubr.bf16.mxu0 %v14330_v52  ;;  %2654 = vmatprep.mubr.bf16.mxu1 %v14330_v52 }
 0x1b4   : > { %v10688_v55 = vpop.f32.mrb[72].mxu0  ;;  %v10690_v59 = vpop.f32.mrb[72].mxu1 }
 0x1b5   : > { %14427 = vst [vmem:[#allocation121_spill] sm:$0xff] %v10688_v55  ;;  %14428 = vst [vmem:[#allocation122_spill] sm:$0xff] %v10690_v59  ;;  %v10692_v38 = vpop.f32.mrb[73].mxu0  ;;  %v10694_v45 = vpop.f32.mrb[73].mxu1 }
 0x1b6   : > { %14429 = vst [vmem:[#allocation123_spill] sm:$0xff] %v10692_v38  ;;  %14430 = vst [vmem:[#allocation124_spill] sm:$0xff] %v10694_v45  ;;  %v10696_v40 = vpop.f32.mrb[74].mxu0  ;;  %v10698_v27 = vpop.f32.mrb[74].mxu1 }
 0x1b7   : > { %14431 = vst [vmem:[#allocation125_spill] sm:$0xff] %v10696_v40  ;;  %14432 = vst [vmem:[#allocation126_spill] sm:$0xff] %v10698_v27  ;;  %v10700_v33 = vpop.f32.mrb[75].mxu0  ;;  %v10702_v5 = vpop.f32.mrb[75].mxu1 }
 0x1b8   : > { %14433 = vst [vmem:[#allocation127_spill] sm:$0xff] %v10700_v33  ;;  %14434 = vst [vmem:[#allocation128_spill] sm:$0xff] %v10702_v5 }
 0x1b9   : > { %7902 = vmatmul.mubr.msk.bf16.gmra.mrb[180].mxu0 %vm1451_vm0, %v9320_v12  ;;  %7929 = vmatmul.mubr.msk.bf16.gmra.mrb[180].mxu1 %vm1451_vm0, %v9320_v12  ;;  %v9321_v12 = vld [vmem:[%s14318_s24 + $0x98] sm:$0xff]  }
 0x1ba   : > { %2361 = vmatprep.mubr.bf16.mxu0 %v14330_v52  ;;  %2664 = vmatprep.mubr.bf16.mxu1 %v14330_v52 }
 0x1bc   : > { %v10711_v45 = vpop.f32.mrb[76].mxu0  ;;  %v10713_v40 = vpop.f32.mrb[76].mxu1 }
 0x1bd   : > { %14435 = vst [vmem:[#allocation129_spill] sm:$0xff] %v10711_v45  ;;  %14436 = vst [vmem:[#allocation130_spill] sm:$0xff] %v10713_v40  ;;  %v10715_v27 = vpop.f32.mrb[77].mxu0  ;;  %v10717_v33 = vpop.f32.mrb[77].mxu1 }
 0x1be   : > { %14437 = vst [vmem:[#allocation131_spill] sm:$0xff] %v10715_v27  ;;  %14438 = vst [vmem:[#allocation132_spill] sm:$0xff] %v10717_v33  ;;  %v10719_v5 = vpop.f32.mrb[78].mxu0  ;;  %v10721_v38 = vpop.f32.mrb[78].mxu1 }
 0x1bf   : > { %14439 = vst [vmem:[#allocation133_spill] sm:$0xff] %v10719_v5  ;;  %14440 = vst [vmem:[#allocation134_spill] sm:$0xff] %v10721_v38  ;;  %v10723_v59 = vpop.f32.mrb[79].mxu0  ;;  %v10725_v55 = vpop.f32.mrb[79].mxu1 }
 0x1c0   : > { %14441 = vst [vmem:[#allocation135_spill] sm:$0xff] %v10723_v59  ;;  %14442 = vst [vmem:[#allocation136_spill] sm:$0xff] %v10725_v55 }
 0x1c1   : > { %7903 = vmatmul.mubr.msk.bf16.gmra.mrb[184].mxu0 %vm1451_vm0, %v9321_v12  ;;  %7930 = vmatmul.mubr.msk.bf16.gmra.mrb[184].mxu1 %vm1451_vm0, %v9321_v12  ;;  %v9322_v12 = vld [vmem:[%s14318_s24 + $0xa0] sm:$0xff]  }
 0x1c2   : > { %2371 = vmatprep.mubr.bf16.mxu0 %v14330_v52  ;;  %2674 = vmatprep.mubr.bf16.mxu1 %v14330_v52 }
 0x1c4   : > { %v10734_v33 = vpop.f32.mrb[80].mxu0  ;;  %v10736_v5 = vpop.f32.mrb[80].mxu1 }
 0x1c5   : > { %14443 = vst [vmem:[#allocation137_spill] sm:$0xff] %v10734_v33  ;;  %14444 = vst [vmem:[#allocation138_spill] sm:$0xff] %v10736_v5  ;;  %v10738_v38 = vpop.f32.mrb[81].mxu0  ;;  %v10740_v59 = vpop.f32.mrb[81].mxu1 }
 0x1c6   : > { %14445 = vst [vmem:[#allocation139_spill] sm:$0xff] %v10738_v38  ;;  %14446 = vst [vmem:[#allocation140_spill] sm:$0xff] %v10740_v59  ;;  %v10742_v55 = vpop.f32.mrb[82].mxu0  ;;  %v10744_v27 = vpop.f32.mrb[82].mxu1 }
 0x1c7   : > { %14447 = vst [vmem:[#allocation141_spill] sm:$0xff] %v10742_v55  ;;  %14448 = vst [vmem:[#allocation142_spill] sm:$0xff] %v10744_v27  ;;  %v10746_v40 = vpop.f32.mrb[83].mxu0  ;;  %v10748_v45 = vpop.f32.mrb[83].mxu1 }
 0x1c8   : > { %14449 = vst [vmem:[#allocation143_spill] sm:$0xff] %v10746_v40  ;;  %14450 = vst [vmem:[#allocation144_spill] sm:$0xff] %v10748_v45 }
 0x1c9   : > { %7904 = vmatmul.mubr.msk.bf16.gmra.mrb[188].mxu0 %vm1451_vm0, %v9322_v12  ;;  %7931 = vmatmul.mubr.msk.bf16.gmra.mrb[188].mxu1 %vm1451_vm0, %v9322_v12  ;;  %v9323_v12 = vld [vmem:[%s14318_s24 + $0xa8] sm:$0xff]  }
 0x1ca   : > { %2381 = vmatprep.mubr.bf16.mxu0 %v14330_v52  ;;  %2684 = vmatprep.mubr.bf16.mxu1 %v14330_v52 }
 0x1cc   : > { %v10757_v59 = vpop.f32.mrb[84].mxu0  ;;  %v10759_v55 = vpop.f32.mrb[84].mxu1 }
 0x1cd   : > { %14451 = vst [vmem:[#allocation145_spill] sm:$0xff] %v10757_v59  ;;  %14452 = vst [vmem:[#allocation146_spill] sm:$0xff] %v10759_v55  ;;  %v10761_v27 = vpop.f32.mrb[85].mxu0  ;;  %v10763_v40 = vpop.f32.mrb[85].mxu1 }
 0x1ce   : > { %14453 = vst [vmem:[#allocation147_spill] sm:$0xff] %v10761_v27  ;;  %14454 = vst [vmem:[#allocation148_spill] sm:$0xff] %v10763_v40  ;;  %v10765_v45 = vpop.f32.mrb[86].mxu0  ;;  %v10767_v38 = vpop.f32.mrb[86].mxu1 }
 0x1cf   : > { %14455 = vst [vmem:[#allocation149_spill] sm:$0xff] %v10765_v45  ;;  %14456 = vst [vmem:[#allocation150_spill] sm:$0xff] %v10767_v38  ;;  %v10769_v5 = vpop.f32.mrb[87].mxu0  ;;  %v10771_v33 = vpop.f32.mrb[87].mxu1 }
 0x1d0   : > { %14457 = vst [vmem:[#allocation151_spill] sm:$0xff] %v10769_v5  ;;  %14458 = vst [vmem:[#allocation152_spill] sm:$0xff] %v10771_v33 }
 0x1d1   : > { %7905 = vmatmul.mubr.msk.bf16.gmra.mrb[192].mxu0 %vm1451_vm0, %v9323_v12  ;;  %7932 = vmatmul.mubr.msk.bf16.gmra.mrb[192].mxu1 %vm1451_vm0, %v9323_v12  ;;  %v9324_v12 = vld [vmem:[%s14318_s24 + $0xb0] sm:$0xff]  }
 0x1d2   : > { %2391 = vmatprep.mubr.bf16.mxu0 %v14330_v52  ;;  %2694 = vmatprep.mubr.bf16.mxu1 %v14330_v52 }
 0x1d4   : > { %v10780_v40 = vpop.f32.mrb[88].mxu0  ;;  %v10782_v45 = vpop.f32.mrb[88].mxu1 }
 0x1d5   : > { %14459 = vst [vmem:[#allocation153_spill] sm:$0xff] %v10780_v40  ;;  %14460 = vst [vmem:[#allocation154_spill] sm:$0xff] %v10782_v45  ;;  %v10784_v38 = vpop.f32.mrb[89].mxu0  ;;  %v10786_v5 = vpop.f32.mrb[89].mxu1 }
 0x1d6   : > { %14461 = vst [vmem:[#allocation155_spill] sm:$0xff] %v10784_v38  ;;  %14462 = vst [vmem:[#allocation156_spill] sm:$0xff] %v10786_v5  ;;  %v10788_v33 = vpop.f32.mrb[90].mxu0  ;;  %v10790_v27 = vpop.f32.mrb[90].mxu1 }
 0x1d7   : > { %14463 = vst [vmem:[#allocation157_spill] sm:$0xff] %v10788_v33  ;;  %14464 = vst [vmem:[#allocation158_spill] sm:$0xff] %v10790_v27  ;;  %v10792_v55 = vpop.f32.mrb[91].mxu0  ;;  %v10794_v59 = vpop.f32.mrb[91].mxu1 }
 0x1d8   : > { %14465 = vst [vmem:[#allocation159_spill] sm:$0xff] %v10792_v55  ;;  %14466 = vst [vmem:[#allocation160_spill] sm:$0xff] %v10794_v59 }
 0x1d9   : > { %7906 = vmatmul.mubr.msk.bf16.gmra.mrb[196].mxu0 %vm1451_vm0, %v9324_v12  ;;  %7933 = vmatmul.mubr.msk.bf16.gmra.mrb[196].mxu1 %vm1451_vm0, %v9324_v12  ;;  %v9325_v12 = vld [vmem:[%s14318_s24 + $0xb8] sm:$0xff]  }
 0x1da   : > { %2401 = vmatprep.mubr.bf16.mxu0 %v14330_v52  ;;  %2704 = vmatprep.mubr.bf16.mxu1 %v14330_v52 }
 0x1dc   : > { %v10803_v5 = vpop.f32.mrb[92].mxu0  ;;  %v10805_v33 = vpop.f32.mrb[92].mxu1 }
 0x1dd   : > { %14467 = vst [vmem:[#allocation161_spill] sm:$0xff] %v10803_v5  ;;  %14468 = vst [vmem:[#allocation162_spill] sm:$0xff] %v10805_v33  ;;  %v10807_v27 = vpop.f32.mrb[93].mxu0  ;;  %v10809_v55 = vpop.f32.mrb[93].mxu1 }
 0x1de   : > { %14469 = vst [vmem:[#allocation163_spill] sm:$0xff] %v10807_v27  ;;  %14470 = vst [vmem:[#allocation164_spill] sm:$0xff] %v10809_v55  ;;  %v10811_v59 = vpop.f32.mrb[94].mxu0  ;;  %v10813_v38 = vpop.f32.mrb[94].mxu1 }
 0x1df   : > { %14471 = vst [vmem:[#allocation165_spill] sm:$0xff] %v10811_v59  ;;  %14472 = vst [vmem:[#allocation166_spill] sm:$0xff] %v10813_v38  ;;  %v10815_v45 = vpop.f32.mrb[95].mxu0  ;;  %v10817_v40 = vpop.f32.mrb[95].mxu1 }
 0x1e0   : > { %14473 = vst [vmem:[#allocation167_spill] sm:$0xff] %v10815_v45  ;;  %14474 = vst [vmem:[#allocation168_spill] sm:$0xff] %v10817_v40 }
 0x1e1   : > { %7907 = vmatmul.mubr.msk.bf16.gmra.mrb[200].mxu0 %vm1451_vm0, %v9325_v12  ;;  %7934 = vmatmul.mubr.msk.bf16.gmra.mrb[200].mxu1 %vm1451_vm0, %v9325_v12  ;;  %v9326_v12 = vld [vmem:[%s14318_s24 + $0xc0] sm:$0xff]  }
 0x1e2   : > { %2411 = vmatprep.mubr.bf16.mxu0 %v14330_v52  ;;  %2714 = vmatprep.mubr.bf16.mxu1 %v14330_v52 }
 0x1e4   : > { %v10826_v55 = vpop.f32.mrb[96].mxu0  ;;  %v10828_v59 = vpop.f32.mrb[96].mxu1 }
 0x1e5   : > { %14475 = vst [vmem:[#allocation169_spill] sm:$0xff] %v10826_v55  ;;  %14476 = vst [vmem:[#allocation170_spill] sm:$0xff] %v10828_v59  ;;  %v10830_v38 = vpop.f32.mrb[97].mxu0  ;;  %v10832_v45 = vpop.f32.mrb[97].mxu1 }
 0x1e6   : > { %14477 = vst [vmem:[#allocation171_spill] sm:$0xff] %v10830_v38  ;;  %14478 = vst [vmem:[#allocation172_spill] sm:$0xff] %v10832_v45  ;;  %v10834_v40 = vpop.f32.mrb[98].mxu0  ;;  %v10836_v27 = vpop.f32.mrb[98].mxu1 }
 0x1e7   : > { %14479 = vst [vmem:[#allocation173_spill] sm:$0xff] %v10834_v40  ;;  %14480 = vst [vmem:[#allocation174_spill] sm:$0xff] %v10836_v27  ;;  %v10838_v33 = vpop.f32.mrb[99].mxu0  ;;  %v10840_v5 = vpop.f32.mrb[99].mxu1 }
 0x1e8   : > { %14481 = vst [vmem:[#allocation175_spill] sm:$0xff] %v10838_v33  ;;  %14482 = vst [vmem:[#allocation176_spill] sm:$0xff] %v10840_v5 }
 0x1e9   : > { %7908 = vmatmul.mubr.msk.bf16.gmra.mrb[204].mxu0 %vm1451_vm0, %v9326_v12  ;;  %7935 = vmatmul.mubr.msk.bf16.gmra.mrb[204].mxu1 %vm1451_vm0, %v9326_v12  ;;  %v9327_v12 = vld [vmem:[%s14318_s24 + $0xc8] sm:$0xff]  }
 0x1ea   : > { %2421 = vmatprep.mubr.bf16.mxu0 %v14330_v52  ;;  %2724 = vmatprep.mubr.bf16.mxu1 %v14330_v52 }
 0x1ec   : > { %v10849_v45 = vpop.f32.mrb[100].mxu0  ;;  %v10851_v40 = vpop.f32.mrb[100].mxu1 }
 0x1ed   : > { %14483 = vst [vmem:[#allocation177_spill] sm:$0xff] %v10849_v45  ;;  %14484 = vst [vmem:[#allocation178_spill] sm:$0xff] %v10851_v40  ;;  %v10853_v27 = vpop.f32.mrb[101].mxu0  ;;  %v10855_v33 = vpop.f32.mrb[101].mxu1 }
 0x1ee   : > { %14485 = vst [vmem:[#allocation179_spill] sm:$0xff] %v10853_v27  ;;  %14486 = vst [vmem:[#allocation180_spill] sm:$0xff] %v10855_v33  ;;  %v10857_v5 = vpop.f32.mrb[102].mxu0  ;;  %v10859_v38 = vpop.f32.mrb[102].mxu1 }
 0x1ef   : > { %14487 = vst [vmem:[#allocation181_spill] sm:$0xff] %v10857_v5  ;;  %14488 = vst [vmem:[#allocation182_spill] sm:$0xff] %v10859_v38  ;;  %v10861_v59 = vpop.f32.mrb[103].mxu0  ;;  %v10863_v55 = vpop.f32.mrb[103].mxu1 }
 0x1f0   : > { %14489 = vst [vmem:[#allocation183_spill] sm:$0xff] %v10861_v59  ;;  %14490 = vst [vmem:[#allocation184_spill] sm:$0xff] %v10863_v55 }
 0x1f1   : > { %7909 = vmatmul.mubr.msk.bf16.gmra.mrb[208].mxu0 %vm1451_vm0, %v9327_v12  ;;  %7936 = vmatmul.mubr.msk.bf16.gmra.mrb[208].mxu1 %vm1451_vm0, %v9327_v12  ;;  %v9328_v12 = vld [vmem:[%s14318_s24 + $0xd0] sm:$0xff]  }
 0x1f2   : > { %2431 = vmatprep.mubr.bf16.mxu0 %v14330_v52  ;;  %2734 = vmatprep.mubr.bf16.mxu1 %v14330_v52 }
 0x1f4   : > { %v10872_v33 = vpop.f32.mrb[104].mxu0  ;;  %v10874_v5 = vpop.f32.mrb[104].mxu1 }
 0x1f5   : > { %14491 = vst [vmem:[#allocation185_spill] sm:$0xff] %v10872_v33  ;;  %14492 = vst [vmem:[#allocation186_spill] sm:$0xff] %v10874_v5  ;;  %v10876_v38 = vpop.f32.mrb[105].mxu0  ;;  %v10878_v59 = vpop.f32.mrb[105].mxu1 }
 0x1f6   : > { %14493 = vst [vmem:[#allocation187_spill] sm:$0xff] %v10876_v38  ;;  %14494 = vst [vmem:[#allocation188_spill] sm:$0xff] %v10878_v59  ;;  %v10880_v55 = vpop.f32.mrb[106].mxu0  ;;  %v10882_v27 = vpop.f32.mrb[106].mxu1 }
 0x1f7   : > { %14495 = vst [vmem:[#allocation189_spill] sm:$0xff] %v10880_v55  ;;  %14496 = vst [vmem:[#allocation190_spill] sm:$0xff] %v10882_v27  ;;  %v10884_v40 = vpop.f32.mrb[107].mxu0  ;;  %v10886_v45 = vpop.f32.mrb[107].mxu1 }
 0x1f8   : > { %14497 = vst [vmem:[#allocation191_spill] sm:$0xff] %v10884_v40  ;;  %14498 = vst [vmem:[#allocation192_spill] sm:$0xff] %v10886_v45  ;;  %v10898_v45 = vld [vmem:[%s14499_s0] sm:$0xff]   ;;  %s9341_s0 = sshll.u32 %s9435_s1, 4  ;;  %s9342_s0 = int_to_ptr.vmem [resolvable:$false] %s9341_s0 }
 0x1f9   : > { %7910 = vmatmul.mubr.msk.bf16.gmra.mrb[212].mxu0 %vm1451_vm0, %v9328_v12  ;;  %7937 = vmatmul.mubr.msk.bf16.gmra.mrb[212].mxu1 %vm1451_vm0, %v9328_v12 }
 0x1fa   : > { %3558 = vmatprep.mubr.bf16.mxu0 %v14330_v52  ;;  %3611 = vmatprep.mubr.bf16.mxu1 %v14330_v52 }
 0x1fc   : > { %v2173_v59 = vpop.f32.mrb[108].mxu0  ;;  %v2476_v55 = vpop.f32.mrb[108].mxu1 }
 0x1fd   : > { %v2175_v38 = vpop.f32.mrb[109].mxu0  ;;  %v2478_v27 = vpop.f32.mrb[109].mxu1  ;;  %v2174_v60 = vadd.f32 %v2173_v59, %v10142_v48  ;;  %v2477_v12 = vadd.f32 %v2476_v55, %v10142_v48 }
 0x1fe   : > { %v2177_v40 = vpop.f32.mrb[110].mxu0  ;;  %v2480_v5 = vpop.f32.mrb[110].mxu1  ;;  %v2176_v18 = vadd.f32 %v2175_v38, %v10142_v48  ;;  %v2479_v53 = vadd.f32 %v2478_v27, %v10142_v48 }
 0x1ff   : > { %v2179_v33 = vpop.f32.mrb[111].mxu0  ;;  %v2482_v29 = vpop.f32.mrb[111].mxu1  ;;  %v7942_v44 = vmul.f32 -1.442695, %v2174_v60  ;;  %v2178_v59 = vadd.f32 %v2177_v40, %v10154_v51  ;;  %v7944_v55 = vmul.f32 -1.442695, %v2477_v12  ;;  %v2481_v35 = vadd.f32 %v2480_v5, %v10154_v51 }
 0x200   : > { %v7943_v48 = vmul.f32 -1.442695, %v2176_v18  ;;  %v2180_v27 = vadd.f32 %v2179_v33, %v10154_v51  ;;  %v7945_v25 = vmul.f32 -1.442695, %v2479_v53  ;;  %v2483_v54 = vadd.f32 %v2482_v29, %v10154_v51  ;;  %v2748_v33 = vld [vmem:[%s10182_s30 + $0x18] sm:$0x77] }
 0x201   : > { %8012 = vmatmul.mubr.msk.bf16.vlgmr.msra.gmra.mrb[216].mxu0 %vm1451_vm0, %v10898_v45  ;;  %8014 = vmatmul.mubr.msk.bf16.vlgmr.msra.gmra.mrb[216].mxu1 %vm1451_vm0, %v10898_v45  ;;  %8362 = vpow2.f32 %v7942_v44  ;;  %v7950_v12 = vmul.f32 -1.442695, %v2178_v59  ;;  %v7952_v18 = vmul.f32 -1.442695, %v2481_v35  ;;  %v3229_v53 = vrot.slane %v2747_v4, %v10187_v26 }
 0x202   : > { %3568 = vmatprep.mubr.bf16.mxu0 %v14330_v52  ;;  %3621 = vmatprep.mubr.bf16.mxu1 %v14330_v52  ;;  %8364 = vpow2.f32 %v7944_v55  ;;  %v7951_v51 = vmul.f32 -1.442695, %v2180_v27  ;;  %v3237_v35 = vrot.slane %v2748_v33, %v10187_v26 }
 0x203   : > { %8366 = vpow2.f32 %v7943_v48 }
 0x204   : > { %v2183_v58 = vpop.f32.mrb[112].mxu0  ;;  %v2486_v14 = vpop.f32.mrb[112].mxu1  ;;  %8368 = vpow2.f32 %v7945_v25 }
 0x205   : > { %v2185_v63 = vpop.f32.mrb[113].mxu0  ;;  %v2488_v34 = vpop.f32.mrb[113].mxu1  ;;  %v2184_v5 = vadd.f32 %v2183_v58, %v10152_v50  ;;  %v2487_v44 = vadd.f32 %v2486_v14, %v10152_v50  ;;  %v7953_v58 = vmul.f32 -1.442695, %v2483_v54  ;;  %8370 = vpow2.f32 %v7950_v12 }
 0x206   : > { %v10917_v38 = vpop.f32.mrb[114].mxu0  ;;  %v10920_v60 = vpop.f32.mrb[114].mxu1  ;;  %v2186_v29 = vadd.f32 %v2185_v63, %v10152_v50  ;;  %v2489_v30 = vadd.f32 %v2488_v34, %v10152_v50  ;;  %v3233_v14 = vrot.slane %v2747_v4, %v10195_v32  ;;  %8372 = vpow2.f32 %v7952_v18 }
 0x207   : > { %v10922_v40 = vpop.f32.mrb[115].mxu0  ;;  %v10925_v6 = vpop.f32.mrb[115].mxu1  ;;  %v7958_v55 = vmul.f32 -1.442695, %v2184_v5  ;;  %8374 = vpow2.f32 %v7951_v51  ;;  %v7960_v63 = vmul.f32 -1.442695, %v2487_v44  ;;  %v10959_v50 = vrot.slane %v3229_v53, %v10187_v26 }
 0x208   : > { %8376 = vpow2.f32 %v7953_v58  ;;  %v7959_v12 = vmul.f32 -1.442695, %v2186_v29  ;;  %v10962_v34 = vrot.slane %v3237_v35, %v10187_v26  ;;  %v7961_v4 = vmul.f32 -1.442695, %v2489_v30  ;;  %v10968_v44 = vpop.permute.xlu1 %993 }
 0x209   : > { %8013 = vmatmul.mubr.msk.bf16.gmra.mrb[220].mxu0 %vm1451_vm0, %v10914_v28  ;;  %8015 = vmatmul.mubr.msk.bf16.gmra.mrb[220].mxu1 %vm1451_vm0, %v10914_v28  ;;  %8378 = vpow2.f32 %v7958_v55  ;;  %v10965_v5 = vrot.slane %v3233_v14, %v10187_v26  ;;  %v3241_v18 = vrot.slane %v2748_v33, %v10195_v32  ;;  %v3286_v30 = vmul.f32 %v10959_v50, %v10177_v19 }
 0x20a   : > { %3664 = vmatprep.mubr.bf16.mxu0 %v14330_v52  ;;  %3717 = vmatprep.mubr.bf16.mxu1 %v14330_v52  ;;  %8380 = vpow2.f32 %v7960_v63  ;;  %v3288_v55 = vmul.f32 %v10962_v34, %v10177_v19 }
 0x20b   : > { %v8363_v51 = vpop.eup %8362  ;;  %8382 = vpow2.f32 %v7959_v12  ;;  %v3287_v63 = vmul.f32 %v10965_v5, %v10177_v19  ;;  %v10987_v12 = vrot.slane %v3241_v18, %v10187_v26  ;;  %v11001_v26 = vmul.f32 %v10959_v50, %v10283_v36 }
 0x20c   : > { %v10939_v59 = vpop.f32.mrb[116].mxu0  ;;  %v10941_v39 = vpop.f32.mrb[116].mxu1  ;;  %v2850_v29 = vadd.f32 1.0, %v8363_v51  ;;  %8384 = vpow2.f32 %v7961_v4  ;;  %v3295_v31 = vmul.f32 %v10965_v5, %v10201_v37 }
 0x20d   : > { %14500 = vst [vmem:[#allocation193_spill] sm:$0xff] %v10939_v59  ;;  %14501 = vst [vmem:[#allocation194_spill] sm:$0xff] %v10941_v39  ;;  %v10945_v48 = vpop.f32.mrb[117].mxu0  ;;  %v10947_v27 = vpop.f32.mrb[117].mxu1 }
 0x20e   : > { %14502 = vst [vmem:[#allocation195_spill] sm:$0xff] %v10945_v48  ;;  %14503 = vst [vmem:[#allocation196_spill] sm:$0xff] %v10947_v27  ;;  %v10950_v54 = vpop.f32.mrb[118].mxu0  ;;  %v10952_v25 = vpop.f32.mrb[118].mxu1  ;;  %8386 = vrcp.f32 %v2850_v29  ;;  %v3289_v27 = vmul.f32 %v10987_v12, %v10177_v19 }
 0x20f   : > { %14504 = vst [vmem:[#allocation197_spill] sm:$0xff] %v10950_v54  ;;  %14505 = vst [vmem:[#allocation198_spill] sm:$0xff] %v10952_v25  ;;  %v10954_v39 = vpop.f32.mrb[119].mxu0  ;;  %v10956_v59 = vpop.f32.mrb[119].mxu1 }
 0x210   : > { %14506 = vst [vmem:[#allocation199_spill] sm:$0xff] %v10954_v39  ;;  %14507 = vst [vmem:[#allocation200_spill] sm:$0xff] %v10956_v59  ;;  %v10970_v39 = vpop.permute.xlu0 %988  ;;  %v8365_v58 = vpop.eup %8364 }
 0x211   : > { %v8367_v32 = vpop.eup %8366  ;;  %v2852_v33 = vadd.f32 1.0, %v8365_v58  ;;  %v10993_v58 = vpop.permute.xlu1 %1003 }
 0x212   : > { %v8369_v51 = vpop.eup %8368 }
 0x213   : > { %v8371_v54 = vpop.eup %8370  ;;  %8388 = vrcp.f32 %v2852_v33  ;;  %v2853_v4 = vadd.f32 1.0, %v8369_v51  ;;  %v3344_v33 = vadd.f32 %v10210_v42, %v3288_v55 }
 0x214   : > { %v10972_v53 = vpop.f32.mrb[120].mxu0  ;;  %v10974_v35 = vpop.f32.mrb[120].mxu1 }
 0x215   : > { %14508 = vst [vmem:[#allocation201_spill] sm:$0xff] %v10972_v53  ;;  %14509 = vst [vmem:[#allocation202_spill] sm:$0xff] %v10974_v35  ;;  %v10980_v14 = vpop.f32.mrb[121].mxu0  ;;  %v10982_v59 = vpop.f32.mrb[121].mxu1  ;;  %v2851_v35 = vadd.f32 1.0, %v8367_v32  ;;  %v2858_v32 = vadd.f32 1.0, %v8371_v54  ;;  %v3294_v54 = vmul.f32 %v10959_v50, %v10201_v37 }
 0x216   : > { %14510 = vst [vmem:[#allocation203_spill] sm:$0xff] %v10980_v14  ;;  %14511 = vst [vmem:[#allocation204_spill] sm:$0xff] %v10982_v59  ;;  %v10989_v53 = vpop.f32.mrb[122].mxu0  ;;  %v10991_v25 = vpop.f32.mrb[122].mxu1  ;;  %v2188_v59 = vadd.f32 %v10917_v38, %v10175_v16 }
 0x217   : > { %14512 = vst [vmem:[#allocation205_spill] sm:$0xff] %v10989_v53  ;;  %14513 = vst [vmem:[#allocation206_spill] sm:$0xff] %v10991_v25  ;;  %v10997_v14 = vpop.f32.mrb[123].mxu0  ;;  %v8373_v18 = vpop.eup %8372  ;;  %8390 = vrcp.f32 %v2851_v35  ;;  %v3342_v53 = vadd.f32 %v10210_v42, %v3286_v30  ;;  %v3296_v35 = vmul.f32 %v10962_v34, %v10201_v37  ;;  %v3350_v24 = vadd.f32 %v10225_v1, %v3294_v54 }
 0x218   : > { %14514 = vst [vmem:[#allocation207_spill] sm:$0xff] %v10997_v14  ;;  %v11003_v29 = vpop.permute.xlu0 %998  ;;  %v11005_v25 = vpop.f32.mrb[123].mxu1  ;;  %8392 = vrcp.f32 %v2853_v4  ;;  %v2860_v38 = vadd.f32 1.0, %v8373_v18  ;;  %v3343_v14 = vadd.f32 %v10210_v42, %v3287_v63  ;;  %v7966_v4 = vmul.f32 -1.442695, %v2188_v59 }
 0x219   : > { %14515 = vst [vmem:[#allocation208_spill] sm:$0xff] %v11005_v25  ;;  %v8375_v51 = vpop.eup %8374  ;;  %8394 = vrcp.f32 %v2858_v32  ;;  %v11016_v25 = vpop.permute.xlu1 %3497  ;;  %v2491_v63 = vadd.f32 %v10920_v60, %v10175_v16  ;;  %v2190_v32 = vadd.f32 %v10922_v40, %v10175_v16  ;;  %v3345_v60 = vadd.f32 %v10210_v42, %v3289_v27 }
 0x21a   : > { %v8377_v48 = vpop.eup %8376  ;;  %v2859_v20 = vadd.f32 1.0, %v8375_v51  ;;  %14516 = vst [vmem:[#allocation209_spill] sm:$0xff] %v11016_v25  ;;  %8396 = vrcp.f32 %v2860_v38  ;;  %v3352_v25 = vadd.f32 %v10225_v1, %v3296_v35 }
 0x21b   : > { %v8379_v30 = vpop.eup %8378  ;;  %v2861_v55 = vadd.f32 1.0, %v8377_v48  ;;  %v2493_v48 = vadd.f32 %v10925_v6, %v10175_v16  ;;  %v7968_v16 = vmul.f32 -1.442695, %v2491_v63  ;;  %v7967_v10 = vmul.f32 -1.442695, %v2190_v32 }
 0x21c   : > { %v11020_v18 = vpop.permute.xlu0 %3492  ;;  %8398 = vrcp.f32 %v2859_v20  ;;  %v2866_v19 = vadd.f32 1.0, %v8379_v30  ;;  %v2213_v51 = vpop.f32.mrb[124].mxu0  ;;  %v3297_v20 = vmul.f32 %v10987_v12, %v10201_v37 }
 0x21d   : > { %14517 = vst [vmem:[#allocation210_spill] sm:$0xff] %v11020_v18  ;;  %v8381_v46 = vpop.eup %8380  ;;  %8400 = vrcp.f32 %v2861_v55  ;;  %v2516_v59 = vpop.f32.mrb[124].mxu1  ;;  %v2214_v6 = vadd.f32 %v2213_v51, %v10242_v13  ;;  %v7969_v54 = vmul.f32 -1.442695, %v2493_v48  ;;  %v3351_v51 = vadd.f32 %v10225_v1, %v3295_v31 }
 0x21e   : > { %v2215_v38 = vpop.f32.mrb[125].mxu0  ;;  %v8383_v30 = vpop.eup %8382  ;;  %8402 = vrcp.f32 %v2866_v19  ;;  %v2868_v22 = vadd.f32 1.0, %v8381_v46  ;;  %v2517_v46 = vadd.f32 %v2516_v59, %v10242_v13 }
 0x21f   : > { %v2518_v40 = vpop.f32.mrb[125].mxu1  ;;  %v2217_v15 = vpop.f32.mrb[126].mxu0  ;;  %v2867_v18 = vadd.f32 1.0, %v8383_v30  ;;  %8404 = vpow2.f32 %v7966_v4  ;;  %v2216_v35 = vadd.f32 %v2215_v38, %v10242_v13 }
 0x220   : > { %v8385_v55 = vpop.eup %8384  ;;  %v2520_v21 = vpop.f32.mrb[126].mxu1  ;;  %8406 = vrcp.f32 %v2868_v22  ;;  %v2519_v63 = vadd.f32 %v2518_v40, %v10242_v13 }
 0x221   : > { %v2219_v42 = vpop.f32.mrb[127].mxu0  ;;  %v8387_v27 = vpop.eup %8386  ;;  %v2869_v37 = vadd.f32 1.0, %v8385_v55  ;;  %8408 = vrcp.f32 %v2867_v18  ;;  %v2218_v18 = vadd.f32 %v2217_v15, %v10275_v41 }
 0x222   : > { %v2522_v19 = vpop.f32.mrb[127].mxu1  ;;  %v8389_v11 = vpop.eup %8388  ;;  %v3374_v56 = vmul.f32 %v8387_v27, %v3342_v53 }
 0x223   : > { %v8391_v30 = vpop.eup %8390  ;;  %8410 = vrcp.f32 %v2869_v37  ;;  %v3376_v4 = vmul.f32 %v8389_v11, %v3344_v33  ;;  %v11038_v22 = vpop.permute.xlu1 %1033  ;;  %v2521_v11 = vadd.f32 %v2520_v21, %v10275_v41  ;;  %v2220_v37 = vadd.f32 %v2219_v42, %v10275_v41 }
 0x224   : > { %v8393_v0 = vpop.eup %8392  ;;  %14518 = vst [vmem:[#allocation211_spill] sm:$0xff] %v11038_v22  ;;  %v11040_v32 = vpop.permute.xlu0 %1028  ;;  %8412 = vpow2.f32 %v7968_v16  ;;  %v3406_v59 = vadd.f32 %v3374_v56, %v2214_v6  ;;  %v3375_v55 = vmul.f32 %v8391_v30, %v3343_v14  ;;  %v3304_v42 = vmul.f32 %v10962_v34, %v10283_v36 }
 0x225   : > { %14519 = vst [vmem:[#allocation212_spill] sm:$0xff] %v11040_v32  ;;  %v8395_v53 = vpop.eup %8394  ;;  %8414 = vpow2.f32 %v7967_v10  ;;  %v3408_v48 = vadd.f32 %v3376_v4, %v2517_v46  ;;  %v3377_v38 = vmul.f32 %v8393_v0, %v3345_v60  ;;  %v2223_v33 = vpop.f32.mrb[128].mxu0  ;;  %v2523_v10 = vadd.f32 %v2522_v19, %v10275_v41 }
 0x226   : > { %v2526_v13 = vpop.f32.mrb[128].mxu1  ;;  %v8397_v40 = vpop.eup %8396  ;;  %8416 = vpow2.f32 %v7969_v54  ;;  %v11044_v31 = vadd.f32 %v3375_v55, %v2216_v35  ;;  %v3382_v27 = vmul.f32 %v8395_v53, %v3350_v24  ;;  %v3353_v0 = vadd.f32 %v10225_v1, %v3297_v20 }
 0x227   : > { %v2225_v16 = vpop.f32.mrb[129].mxu0  ;;  %v2528_v56 = vpop.f32.mrb[129].mxu1  ;;  %v11047_v6 = vadd.f32 %v3377_v38, %v2519_v63  ;;  %v3384_v15 = vmul.f32 %v8397_v40, %v3352_v25  ;;  %v3358_v24 = vadd.f32 %v10313_v43, %v11001_v26  ;;  %v3303_v20 = vmul.f32 %v10965_v5, %v10283_v36 }
 0x228   : > { %v8399_v14 = vpop.eup %8398  ;;  %v11051_v21 = vpop.f32.mrb[130].mxu0  ;;  %v3414_v54 = vadd.f32 %v3382_v27, %v2218_v18  ;;  %v3305_v4 = vmul.f32 %v10987_v12, %v10283_v36  ;;  %v2224_v18 = vadd.f32 %v2223_v33, %v10348_v2  ;;  %v3440_v40 = vmax.f32 %v3408_v48, 0.0 }
 0x229   : > { %v11053_v60 = vpop.f32.mrb[130].mxu1  ;;  %v8401_v46 = vpop.eup %8400  ;;  %v3383_v35 = vmul.f32 %v8399_v14, %v3351_v51  ;;  %v3416_v19 = vadd.f32 %v3384_v15, %v2521_v11  ;;  %v3438_v51 = vmax.f32 %v3406_v59, 0.0  ;;  %v3360_v36 = vadd.f32 %v10313_v43, %v3304_v42 }
 0x22a   : > { %v11059_v30 = vpop.f32.mrb[131].mxu0  ;;  %v11061_v25 = vpop.f32.mrb[131].mxu1  ;;  %v3385_v1 = vmul.f32 %v8401_v46, %v3353_v0  ;;  %v3446_v55 = vmax.f32 %v3414_v54, 0.0  ;;  %v3359_v33 = vadd.f32 %v10313_v43, %v3303_v20  ;;  %v3361_v20 = vadd.f32 %v10313_v43, %v3305_v4 }
 0x22b   : > { %v8403_v41 = vpop.eup %8402  ;;  %v3415_v26 = vadd.f32 %v3383_v35, %v2220_v37  ;;  %v3448_v27 = vmax.f32 %v3416_v19, 0.0  ;;  %v11068_v11 = vpop.permute.xlu1 %3507  ;;  %v2527_v37 = vadd.f32 %v2526_v13, %v10348_v2  ;;  %v2529_v13 = vadd.f32 %v2528_v56, %v10348_v2 }
 0x22c   : > { %v8405_v63 = vpop.eup %8404  ;;  %v3417_v14 = vadd.f32 %v3385_v1, %v2523_v10  ;;  %v11070_v15 = vpop.permute.xlu0 %3502  ;;  %v3474_v0 = vpack.c.bf16 %v3446_v55, %v3438_v51  ;;  %v3390_v46 = vmul.f32 %v8403_v41, %v3358_v24  ;;  %v2226_v1 = vadd.f32 %v2225_v16, %v10348_v2 }
 0x22d   : > { %v8407_v53 = vpop.eup %8406  ;;  %v2874_v38 = vadd.f32 1.0, %v8405_v63  ;;  %v3476_v59 = vpack.c.bf16 %v3448_v27, %v3440_v40  ;;  %v11075_v54 = vpop.f32.mrb[132].mxu0  ;;  %v3447_v2 = vmax.f32 %v3415_v26, 0.0  ;;  %v3310_v56 = vmul.f32 %v10959_v50, %v10317_v57 }
 0x22e   : > { %v8409_v22 = vpop.eup %8408  ;;  %v11077_v48 = vpop.f32.mrb[132].mxu1  ;;  %v11079_v35 = vadd.f32 %v3390_v46, %v2224_v18  ;;  %v3392_v19 = vmul.f32 %v8407_v53, %v3360_v36  ;;  %v3449_v43 = vmax.f32 %v3417_v14, 0.0  ;;  %v2228_v50 = vadd.f32 %v11051_v21, %v10383_v9 }
 0x22f   : > { %v8411_v32 = vpop.eup %8410  ;;  %8418 = vrcp.f32 %v2874_v38  ;;  %v11082_v24 = vpop.f32.mrb[133].mxu0  ;;  %v3391_v51 = vmul.f32 %v8409_v22, %v3359_v33  ;;  %v3366_v14 = vadd.f32 %v10355_v23, %v3310_v56 }
 0x230   : > { %v8413_v10 = vpop.eup %8412  ;;  %v11084_v42 = vpop.f32.mrb[133].mxu1  ;;  %v11092_v53 = vadd.f32 %v3392_v19, %v2527_v37  ;;  %v3393_v22 = vmul.f32 %v8411_v32, %v3361_v20  ;;  %v3441_v19 = vmax.f32 %v11047_v6, 0.0  ;;  %v3312_v32 = vmul.f32 %v10962_v34, %v10317_v57 }
 0x231   : > { %v8415_v41 = vpop.eup %8414  ;;  %v2876_v63 = vadd.f32 1.0, %v8413_v10  ;;  %v11088_v55 = vpop.f32.mrb[134].mxu0  ;;  %v11098_v36 = vadd.f32 %v3391_v51, %v2226_v1  ;;  %v3439_v10 = vmax.f32 %v11044_v31, 0.0  ;;  %v3311_v6 = vmul.f32 %v10965_v5, %v10317_v57 }
 0x232   : > { %v11090_v38 = vpop.f32.mrb[134].mxu1  ;;  %v8417_v18 = vpop.eup %8416  ;;  %v2875_v40 = vadd.f32 1.0, %v8415_v41  ;;  %v11102_v4 = vadd.f32 %v3393_v22, %v2529_v13  ;;  %v3313_v34 = vmul.f32 %v10987_v12, %v10317_v57  ;;  %v2531_v5 = vadd.f32 %v11053_v60, %v10383_v9 }
 0x233   : > { %v11094_v16 = vpop.f32.mrb[135].mxu0  ;;  %v11096_v27 = vpop.f32.mrb[135].mxu1  ;;  %8420 = vrcp.f32 %v2876_v63  ;;  %v2877_v46 = vadd.f32 1.0, %v8417_v18  ;;  %v3475_v41 = vpack.c.bf16 %v3447_v2, %v3439_v10  ;;  %v3477_v63 = vpack.c.bf16 %v3449_v43, %v3441_v19 }
 0x234   : > { %8422 = vrcp.f32 %v2875_v40  ;;  %v11104_v37 = vpop.permute.xlu1 %1043  ;;  %v11106_v33 = vpop.permute.xlu0 %1038  ;;  %v3368_v2 = vadd.f32 %v10355_v23, %v3312_v32  ;;  %v2230_v12 = vadd.f32 %v11059_v30, %v10383_v9  ;;  %v3367_v43 = vadd.f32 %v10355_v23, %v3311_v6 }
 0x235   : > { %8424 = vrcp.f32 %v2877_v46  ;;  %v11112_v1 = vpop.f32.mrb[136].mxu0  ;;  %v11114_v26 = vpop.f32.mrb[136].mxu1  ;;  %3632 = vmatprep.subr.bf16.mxu0 %v3475_v41  ;;  %3685 = vmatprep.subr.bf16.mxu1 %v3477_v63  ;;  %v3369_v56 = vadd.f32 %v10355_v23, %v3313_v34  ;;  %v2533_v60 = vadd.f32 %v11061_v25, %v10383_v9  ;;  %v3456_v9 = vmax.f32 %v11092_v53, 0.0 }
 0x236   : > { %v11119_v51 = vpop.f32.mrb[137].mxu0  ;;  %v11121_v13 = vpop.f32.mrb[137].mxu1  ;;  %3633 = vmatpush1.bf16.msra.mxu0 %v3474_v0  ;;  %3686 = vmatpush1.bf16.msra.mxu1 %v3476_v59  ;;  %v3454_v0 = vmax.f32 %v11079_v35, 0.0 }
 0x237   : > { %v11127_v20 = vpop.f32.mrb[138].mxu0  ;;  %v11129_v18 = vpop.f32.mrb[138].mxu1 }
 0x238   : > { %14520 = vst [vmem:[#allocation213_spill] sm:$0xff] %v11127_v20  ;;  %14521 = vst [vmem:[#allocation214_spill] sm:$0xff] %v11129_v18  ;;  %v11131_v40 = vpop.f32.mrb[139].mxu0  ;;  %v11133_v46 = vpop.f32.mrb[139].mxu1 }
 0x239   : > { %v8419_v31 = vpop.eup %8418  ;;  %14522 = vst [vmem:[#allocation215_spill] sm:$0xff] %v11131_v40  ;;  %14523 = vst [vmem:[#allocation216_spill] sm:$0xff] %v11133_v46  ;;  %v11142_v19 = vpop.permute.xlu1 %3854 }
 0x23a   : > { %v3398_v21 = vmul.f32 %v8419_v31, %v3366_v14  ;;  %14524 = vst [vmem:[#allocation217_spill] sm:$0xff] %v11142_v19  ;;  %v11144_v14 = vpop.permute.xlu0 %1048 }
 0x23b   : > { %14525 = vst [vmem:[#allocation218_spill] sm:$0xff] %v11144_v14 }
 0x23c   : > { %v3430_v22 = vadd.f32 %v3398_v21, %v2228_v50  ;;  %v11149_v63 = vpop.f32.mrb[140].mxu0  ;;  %v11151_v30 = vpop.f32.mrb[140].mxu1 }
 0x23d   : > { %v8421_v57 = vpop.eup %8420  ;;  %14526 = vst [vmem:[#allocation219_spill] sm:$0xff] %v11149_v63  ;;  %14527 = vst [vmem:[#allocation220_spill] sm:$0xff] %v11151_v30  ;;  %v11153_v34 = vpop.f32.mrb[141].mxu0 }
 0x23e   : > { %v8423_v10 = vpop.eup %8422  ;;  %v3462_v59 = vmax.f32 %v3430_v22, 0.0  ;;  %v3400_v50 = vmul.f32 %v8421_v57, %v3368_v2  ;;  %14528 = vst [vmem:[#allocation221_spill] sm:$0xff] %v11153_v34  ;;  %v11155_v21 = vpop.f32.mrb[141].mxu1 }
 0x23f   : > { %v8425_v32 = vpop.eup %8424  ;;  %v3399_v41 = vmul.f32 %v8423_v10, %v3367_v43  ;;  %14529 = vst [vmem:[#allocation222_spill] sm:$0xff] %v11155_v21  ;;  %v11157_v35 = vpop.f32.mrb[142].mxu0  ;;  %v3457_v10 = vmax.f32 %v11102_v4, 0.0 }
 0x240   : > { %v3482_v31 = vpack.c.bf16 %v3462_v59, %v3454_v0  ;;  %v3432_v23 = vadd.f32 %v3400_v50, %v2531_v5  ;;  %v3401_v6 = vmul.f32 %v8425_v32, %v3369_v56  ;;  %14530 = vst [vmem:[#allocation223_spill] sm:$0xff] %v11157_v35  ;;  %v11159_v22 = vpop.f32.mrb[142].mxu1  ;;  %v11162_v57 = vpop.f32.mrb[143].mxu0  ;;  %v3455_v5 = vmax.f32 %v11098_v36, 0.0 }
 0x241   : > { %v3431_v19 = vadd.f32 %v3399_v41, %v2230_v12  ;;  %14531 = vst [vmem:[#allocation224_spill] sm:$0xff] %v11159_v22  ;;  %14532 = vst [vmem:[#allocation225_spill] sm:$0xff] %v11162_v57  ;;  %v11164_v43 = vpop.f32.mrb[143].mxu1  ;;  %v11168_v50 = vpop.permute.xlu1 %1058 }
 0x242   : > { %v3464_v25 = vmax.f32 %v3432_v23, 0.0  ;;  %v3433_v2 = vadd.f32 %v3401_v6, %v2533_v60  ;;  %14533 = vst [vmem:[#allocation226_spill] sm:$0xff] %v11164_v43  ;;  %14534 = vst [vmem:[#allocation227_spill] sm:$0xff] %v11168_v50  ;;  %v11170_v32 = vpop.permute.xlu0 %1053 }
 0x243   : > { %v3463_v56 = vmax.f32 %v3431_v19, 0.0  ;;  %14535 = vst [vmem:[#allocation228_spill] sm:$0xff] %v11170_v32  ;;  %v14701_v32 = vld [vmem:[#allocation210_spill] sm:$0xff] }
 0x244   : > { %v3484_v0 = vpack.c.bf16 %v3464_v25, %v3456_v9  ;;  %v3465_v59 = vmax.f32 %v3433_v2, 0.0  ;;  %v11172_v53 = vpop.f32.mrb[144].mxu0  ;;  %v11174_v60 = vpop.f32.mrb[144].mxu1 }
 0x245   : > { %v3483_v12 = vpack.c.bf16 %v3463_v56, %v3455_v5  ;;  %14536 = vst [vmem:[#allocation229_spill] sm:$0xff] %v11172_v53  ;;  %14537 = vst [vmem:[#allocation230_spill] sm:$0xff] %v11174_v60  ;;  %v11176_v23 = vpop.f32.mrb[145].mxu0  ;;  %v11178_v36 = vpop.f32.mrb[145].mxu1 }
 0x246   : > { %v3485_v41 = vpack.c.bf16 %v3465_v59, %v3457_v10  ;;  %14538 = vst [vmem:[#allocation231_spill] sm:$0xff] %v11176_v23  ;;  %14539 = vst [vmem:[#allocation232_spill] sm:$0xff] %v11178_v36  ;;  %v11180_v4 = vpop.f32.mrb[146].mxu0  ;;  %v11182_v19 = vpop.f32.mrb[146].mxu1 }
 0x247   : > { %3634 = vmatprep.subr.bf16.mxu0 %v3483_v12  ;;  %14540 = vst [vmem:[#allocation233_spill] sm:$0xff] %v11180_v4  ;;  %14541 = vst [vmem:[#allocation234_spill] sm:$0xff] %v11182_v19  ;;  %v11184_v6 = vpop.f32.mrb[147].mxu0  ;;  %v11186_v9 = vpop.f32.mrb[147].mxu1 }
 0x248   : > { %3687 = vmatprep.subr.bf16.mxu1 %v3485_v41  ;;  %3635 = vmatpush1.bf16.msra.mxu0 %v3482_v31  ;;  %14542 = vst [vmem:[#allocation235_spill] sm:$0xff] %v11184_v6  ;;  %14543 = vst [vmem:[#allocation236_spill] sm:$0xff] %v11186_v9  ;;  %v11193_v31 = vpop.permute.xlu0 %1063  ;;  %v11196_v25 = vpop.permute.xlu1 %1068  ;;  %v14696_v9 = vld [vmem:[#allocation211_spill] sm:$0xff] }
 0x249   : > { %3688 = vmatpush1.bf16.msra.mxu1 %v3484_v0  ;;  %14544 = vst [vmem:[#allocation237_spill] sm:$0xff] %v11193_v31  ;;  %14545 = vst [vmem:[#allocation238_spill] sm:$0xff] %v11196_v25  ;;  %v14699_v6 = vld [vmem:[#allocation31_spill] sm:$0xff] }
 0x24a   : > { %v11526_v19 = vadd.f32 %v14699_v6, %v14696_v9 }
 0x24b   : > { %8016 = vmatmul.mubr.msk.bf16.vlgmr.msra.gmra.mrb[224].mxu0 %vm1451_vm0, %v10898_v45 }
 0x24c   : > { %8018 = vmatmul.mubr.msk.bf16.vlgmr.msra.gmra.mrb[224].mxu1 %vm1451_vm0, %v10898_v45  ;;  %3674 = vmatprep.mubr.bf16.mxu0 %v14330_v52  ;;  %v11198_v2 = vpop.f32.mrb[148].mxu0  ;;  %v2576_v5 = vpop.f32.mrb[148].mxu1 }
 0x24d   : > { %3727 = vmatprep.mubr.bf16.mxu1 %v14330_v52  ;;  %14546 = vst [vmem:[#allocation239_spill] sm:$0xff] %v11198_v2  ;;  %v11200_v56 = vpop.f32.mrb[149].mxu0  ;;  %v11202_v10 = vpop.f32.mrb[149].mxu1  ;;  %v11205_v0 = vadd.f32 %v2576_v5, %v11196_v25 }
 0x24e   : > { %14547 = vst [vmem:[#allocation240_spill] sm:$0xff] %v11200_v56  ;;  %14548 = vst [vmem:[#allocation241_spill] sm:$0xff] %v11202_v10  ;;  %v11207_v59 = vpop.f32.mrb[150].mxu0  ;;  %v2580_v45 = vpop.f32.mrb[150].mxu1 }
 0x24f   : > { %14549 = vst [vmem:[#allocation242_spill] sm:$0xff] %v11205_v0  ;;  %14550 = vst [vmem:[#allocation243_spill] sm:$0xff] %v11207_v59  ;;  %v11209_v12 = vpop.f32.mrb[151].mxu0  ;;  %v11211_v41 = vpop.f32.mrb[151].mxu1 }
 0x250   : > { %14551 = vst [vmem:[#allocation244_spill] sm:$0xff] %v11209_v12  ;;  %14552 = vst [vmem:[#allocation245_spill] sm:$0xff] %v11211_v41  ;;  %v11213_v43 = vpop.permute.xlu0 %1073 }
 0x251   : > { %14553 = vst [vmem:[#allocation246_spill] sm:$0xff] %v11213_v43  ;;  %v11220_v57 = vadd.f32 %v2580_v45, %v11213_v43 }
 0x253   : > { %8017 = vmatmul.mubr.msk.bf16.gmra.mrb[228].mxu0 %vm1451_vm0, %v10914_v28  ;;  %14554 = vst [vmem:[#allocation247_spill] sm:$0xff] %v11220_v57 }
 0x254   : > { %8019 = vmatmul.mubr.msk.bf16.gmra.mrb[228].mxu1 %vm1451_vm0, %v10914_v28  ;;  %3892 = vmatprep.mubr.bf16.mxu0 %v14330_v52  ;;  %v11224_v5 = vpop.f32.mrb[152].mxu0  ;;  %v11226_v22 = vpop.f32.mrb[152].mxu1 }
 0x255   : > { %3933 = vmatprep.mubr.bf16.mxu1 %v14330_v52  ;;  %14555 = vst [vmem:[#allocation248_spill] sm:$0xff] %v11224_v5  ;;  %14556 = vst [vmem:[#allocation249_spill] sm:$0xff] %v11226_v22  ;;  %v11228_v41 = vpop.f32.mrb[153].mxu0  ;;  %v11230_v35 = vpop.f32.mrb[153].mxu1 }
 0x256   : > { %14557 = vst [vmem:[#allocation250_spill] sm:$0xff] %v11228_v41  ;;  %14558 = vst [vmem:[#allocation251_spill] sm:$0xff] %v11230_v35  ;;  %v11232_v12 = vpop.f32.mrb[154].mxu0  ;;  %v11234_v59 = vpop.f32.mrb[154].mxu1 }
 0x257   : > { %14559 = vst [vmem:[#allocation252_spill] sm:$0xff] %v11232_v12  ;;  %14560 = vst [vmem:[#allocation253_spill] sm:$0xff] %v11234_v59  ;;  %v11236_v28 = vpop.f32.mrb[155].mxu0  ;;  %v11238_v45 = vpop.f32.mrb[155].mxu1 }
 0x258   : > { %14561 = vst [vmem:[#allocation254_spill] sm:$0xff] %v11236_v28  ;;  %14562 = vst [vmem:[#allocation255_spill] sm:$0xff] %v11238_v45 }
 0x25c   : > { %v11240_v57 = vpop.f32.mrb[156].mxu0  ;;  %v11242_v0 = vpop.f32.mrb[156].mxu1 }
 0x25d   : > { %14563 = vst [vmem:[#allocation256_spill] sm:$0xff] %v11240_v57  ;;  %14564 = vst [vmem:[#allocation257_spill] sm:$0xff] %v11242_v0  ;;  %v11244_v10 = vpop.f32.mrb[157].mxu0  ;;  %v11246_v5 = vpop.f32.mrb[157].mxu1 }
 0x25e   : > { %14565 = vst [vmem:[#allocation258_spill] sm:$0xff] %v11244_v10  ;;  %14566 = vst [vmem:[#allocation259_spill] sm:$0xff] %v11246_v5  ;;  %v11248_v22 = vpop.f32.mrb[158].mxu0  ;;  %v11250_v41 = vpop.f32.mrb[158].mxu1 }
 0x25f   : > { %14567 = vst [vmem:[#allocation260_spill] sm:$0xff] %v11248_v22  ;;  %14568 = vst [vmem:[#allocation261_spill] sm:$0xff] %v11250_v41  ;;  %v11252_v35 = vpop.f32.mrb[159].mxu0  ;;  %v11254_v12 = vpop.f32.mrb[159].mxu1 }
 0x260   : > { %14569 = vst [vmem:[#allocation262_spill] sm:$0xff] %v11252_v35  ;;  %14570 = vst [vmem:[#allocation263_spill] sm:$0xff] %v11254_v12 }
 0x264   : > { %v11256_v59 = vpop.f32.mrb[160].mxu0  ;;  %v11258_v28 = vpop.f32.mrb[160].mxu1 }
 0x265   : > { %14571 = vst [vmem:[#allocation264_spill] sm:$0xff] %v11256_v59  ;;  %14572 = vst [vmem:[#allocation265_spill] sm:$0xff] %v11258_v28  ;;  %v11260_v45 = vpop.f32.mrb[161].mxu0  ;;  %v11262_v57 = vpop.f32.mrb[161].mxu1 }
 0x266   : > { %14573 = vst [vmem:[#allocation266_spill] sm:$0xff] %v11260_v45  ;;  %14574 = vst [vmem:[#allocation267_spill] sm:$0xff] %v11262_v57  ;;  %v11264_v0 = vpop.f32.mrb[162].mxu0  ;;  %v11266_v10 = vpop.f32.mrb[162].mxu1 }
 0x267   : > { %14575 = vst [vmem:[#allocation268_spill] sm:$0xff] %v11264_v0  ;;  %14576 = vst [vmem:[#allocation269_spill] sm:$0xff] %v11266_v10  ;;  %v11268_v5 = vpop.f32.mrb[163].mxu0  ;;  %v11270_v22 = vpop.f32.mrb[163].mxu1 }
 0x268   : > { %14577 = vst [vmem:[#allocation270_spill] sm:$0xff] %v11268_v5  ;;  %14578 = vst [vmem:[#allocation271_spill] sm:$0xff] %v11270_v22 }
 0x26c   : > { %v11272_v41 = vpop.f32.mrb[164].mxu0  ;;  %v11274_v35 = vpop.f32.mrb[164].mxu1 }
 0x26d   : > { %14579 = vst [vmem:[#allocation272_spill] sm:$0xff] %v11272_v41  ;;  %14580 = vst [vmem:[#allocation273_spill] sm:$0xff] %v11274_v35  ;;  %v11276_v12 = vpop.f32.mrb[165].mxu0  ;;  %v11278_v59 = vpop.f32.mrb[165].mxu1 }
 0x26e   : > { %14581 = vst [vmem:[#allocation274_spill] sm:$0xff] %v11276_v12  ;;  %14582 = vst [vmem:[#allocation275_spill] sm:$0xff] %v11278_v59  ;;  %v11280_v28 = vpop.f32.mrb[166].mxu0  ;;  %v11282_v45 = vpop.f32.mrb[166].mxu1 }
 0x26f   : > { %14583 = vst [vmem:[#allocation276_spill] sm:$0xff] %v11280_v28  ;;  %14584 = vst [vmem:[#allocation277_spill] sm:$0xff] %v11282_v45  ;;  %v11284_v57 = vpop.f32.mrb[167].mxu0  ;;  %v11286_v0 = vpop.f32.mrb[167].mxu1 }
 0x270   : > { %14585 = vst [vmem:[#allocation278_spill] sm:$0xff] %v11284_v57  ;;  %14586 = vst [vmem:[#allocation279_spill] sm:$0xff] %v11286_v0 }
 0x274   : > { %v11288_v10 = vpop.f32.mrb[168].mxu0  ;;  %v11290_v5 = vpop.f32.mrb[168].mxu1 }
 0x275   : > { %14587 = vst [vmem:[#allocation280_spill] sm:$0xff] %v11288_v10  ;;  %14588 = vst [vmem:[#allocation281_spill] sm:$0xff] %v11290_v5  ;;  %v11292_v22 = vpop.f32.mrb[169].mxu0  ;;  %v11294_v41 = vpop.f32.mrb[169].mxu1 }
 0x276   : > { %14589 = vst [vmem:[#allocation282_spill] sm:$0xff] %v11292_v22  ;;  %14590 = vst [vmem:[#allocation283_spill] sm:$0xff] %v11294_v41  ;;  %v11296_v35 = vpop.f32.mrb[170].mxu0  ;;  %v11298_v12 = vpop.f32.mrb[170].mxu1 }
 0x277   : > { %14591 = vst [vmem:[#allocation284_spill] sm:$0xff] %v11296_v35  ;;  %14592 = vst [vmem:[#allocation285_spill] sm:$0xff] %v11298_v12  ;;  %v11300_v59 = vpop.f32.mrb[171].mxu0  ;;  %v11302_v28 = vpop.f32.mrb[171].mxu1 }
 0x278   : > { %14593 = vst [vmem:[#allocation286_spill] sm:$0xff] %v11300_v59  ;;  %14594 = vst [vmem:[#allocation287_spill] sm:$0xff] %v11302_v28 }
 0x27c   : > { %v11304_v45 = vpop.f32.mrb[172].mxu0  ;;  %v11306_v57 = vpop.f32.mrb[172].mxu1 }
 0x27d   : > { %14595 = vst [vmem:[#allocation288_spill] sm:$0xff] %v11304_v45  ;;  %14596 = vst [vmem:[#allocation289_spill] sm:$0xff] %v11306_v57  ;;  %v11308_v0 = vpop.f32.mrb[173].mxu0  ;;  %v11310_v10 = vpop.f32.mrb[173].mxu1 }
 0x27e   : > { %14597 = vst [vmem:[#allocation290_spill] sm:$0xff] %v11308_v0  ;;  %14598 = vst [vmem:[#allocation291_spill] sm:$0xff] %v11310_v10  ;;  %v11312_v5 = vpop.f32.mrb[174].mxu0  ;;  %v11314_v22 = vpop.f32.mrb[174].mxu1 }
 0x27f   : > { %14599 = vst [vmem:[#allocation292_spill] sm:$0xff] %v11312_v5  ;;  %14600 = vst [vmem:[#allocation293_spill] sm:$0xff] %v11314_v22  ;;  %v11316_v41 = vpop.f32.mrb[175].mxu0  ;;  %v11318_v35 = vpop.f32.mrb[175].mxu1 }
 0x280   : > { %14601 = vst [vmem:[#allocation294_spill] sm:$0xff] %v11316_v41  ;;  %14602 = vst [vmem:[#allocation295_spill] sm:$0xff] %v11318_v35 }
 0x284   : > { %v11320_v12 = vpop.f32.mrb[176].mxu0  ;;  %v11322_v59 = vpop.f32.mrb[176].mxu1 }
 0x285   : > { %14603 = vst [vmem:[#allocation296_spill] sm:$0xff] %v11320_v12  ;;  %14604 = vst [vmem:[#allocation297_spill] sm:$0xff] %v11322_v59  ;;  %v11324_v28 = vpop.f32.mrb[177].mxu0  ;;  %v11326_v45 = vpop.f32.mrb[177].mxu1 }
 0x286   : > { %14605 = vst [vmem:[#allocation298_spill] sm:$0xff] %v11324_v28  ;;  %14606 = vst [vmem:[#allocation299_spill] sm:$0xff] %v11326_v45  ;;  %v11328_v57 = vpop.f32.mrb[178].mxu0  ;;  %v11330_v0 = vpop.f32.mrb[178].mxu1 }
 0x287   : > { %14607 = vst [vmem:[#allocation300_spill] sm:$0xff] %v11328_v57  ;;  %14608 = vst [vmem:[#allocation301_spill] sm:$0xff] %v11330_v0  ;;  %v11332_v10 = vpop.f32.mrb[179].mxu0  ;;  %v11334_v5 = vpop.f32.mrb[179].mxu1 }
 0x288   : > { %14609 = vst [vmem:[#allocation302_spill] sm:$0xff] %v11332_v10  ;;  %14610 = vst [vmem:[#allocation303_spill] sm:$0xff] %v11334_v5 }
 0x28c   : > { %v11336_v22 = vpop.f32.mrb[180].mxu0  ;;  %v11338_v41 = vpop.f32.mrb[180].mxu1 }
 0x28d   : > { %14611 = vst [vmem:[#allocation304_spill] sm:$0xff] %v11336_v22  ;;  %14612 = vst [vmem:[#allocation305_spill] sm:$0xff] %v11338_v41  ;;  %v11340_v35 = vpop.f32.mrb[181].mxu0  ;;  %v11342_v12 = vpop.f32.mrb[181].mxu1 }
 0x28e   : > { %14613 = vst [vmem:[#allocation306_spill] sm:$0xff] %v11340_v35  ;;  %14614 = vst [vmem:[#allocation307_spill] sm:$0xff] %v11342_v12  ;;  %v11344_v59 = vpop.f32.mrb[182].mxu0  ;;  %v11346_v28 = vpop.f32.mrb[182].mxu1 }
 0x28f   : > { %14615 = vst [vmem:[#allocation308_spill] sm:$0xff] %v11344_v59  ;;  %14616 = vst [vmem:[#allocation309_spill] sm:$0xff] %v11346_v28  ;;  %v11348_v45 = vpop.f32.mrb[183].mxu0  ;;  %v11350_v57 = vpop.f32.mrb[183].mxu1 }
 0x290   : > { %14617 = vst [vmem:[#allocation310_spill] sm:$0xff] %v11348_v45  ;;  %14618 = vst [vmem:[#allocation311_spill] sm:$0xff] %v11350_v57 }
 0x294   : > { %v11352_v0 = vpop.f32.mrb[184].mxu0  ;;  %v11354_v10 = vpop.f32.mrb[184].mxu1 }
 0x295   : > { %14619 = vst [vmem:[#allocation312_spill] sm:$0xff] %v11352_v0  ;;  %14620 = vst [vmem:[#allocation313_spill] sm:$0xff] %v11354_v10  ;;  %v11356_v5 = vpop.f32.mrb[185].mxu0  ;;  %v11358_v22 = vpop.f32.mrb[185].mxu1 }
 0x296   : > { %14621 = vst [vmem:[#allocation314_spill] sm:$0xff] %v11356_v5  ;;  %14622 = vst [vmem:[#allocation315_spill] sm:$0xff] %v11358_v22  ;;  %v11360_v41 = vpop.f32.mrb[186].mxu0  ;;  %v11362_v35 = vpop.f32.mrb[186].mxu1 }
 0x297   : > { %14623 = vst [vmem:[#allocation316_spill] sm:$0xff] %v11360_v41  ;;  %14624 = vst [vmem:[#allocation317_spill] sm:$0xff] %v11362_v35  ;;  %v11364_v12 = vpop.f32.mrb[187].mxu0  ;;  %v11366_v59 = vpop.f32.mrb[187].mxu1 }
 0x298   : > { %14625 = vst [vmem:[#allocation318_spill] sm:$0xff] %v11364_v12  ;;  %14626 = vst [vmem:[#allocation319_spill] sm:$0xff] %v11366_v59 }
 0x29c   : > { %v11368_v28 = vpop.f32.mrb[188].mxu0  ;;  %v11370_v45 = vpop.f32.mrb[188].mxu1 }
 0x29d   : > { %14627 = vst [vmem:[#allocation320_spill] sm:$0xff] %v11368_v28  ;;  %14628 = vst [vmem:[#allocation321_spill] sm:$0xff] %v11370_v45  ;;  %v11372_v57 = vpop.f32.mrb[189].mxu0  ;;  %v11374_v0 = vpop.f32.mrb[189].mxu1 }
 0x29e   : > { %14629 = vst [vmem:[#allocation322_spill] sm:$0xff] %v11372_v57  ;;  %14630 = vst [vmem:[#allocation323_spill] sm:$0xff] %v11374_v0  ;;  %v11376_v10 = vpop.f32.mrb[190].mxu0  ;;  %v11378_v5 = vpop.f32.mrb[190].mxu1 }
 0x29f   : > { %14631 = vst [vmem:[#allocation324_spill] sm:$0xff] %v11376_v10  ;;  %14632 = vst [vmem:[#allocation325_spill] sm:$0xff] %v11378_v5  ;;  %v11380_v22 = vpop.f32.mrb[191].mxu0  ;;  %v11382_v41 = vpop.f32.mrb[191].mxu1 }
 0x2a0   : > { %14633 = vst [vmem:[#allocation326_spill] sm:$0xff] %v11380_v22  ;;  %14634 = vst [vmem:[#allocation327_spill] sm:$0xff] %v11382_v41  ;;  %v1588_v22 = vadd.f32 %v10213_v47, %v10970_v39 }
 0x2a4   : > { %v11384_v35 = vpop.f32.mrb[192].mxu0  ;;  %v11386_v12 = vpop.f32.mrb[192].mxu1 }
 0x2a5   : > { %14635 = vst [vmem:[#allocation328_spill] sm:$0xff] %v11384_v35  ;;  %14636 = vst [vmem:[#allocation329_spill] sm:$0xff] %v11386_v12  ;;  %v11388_v59 = vpop.f32.mrb[193].mxu0  ;;  %v11390_v28 = vpop.f32.mrb[193].mxu1 }
 0x2a6   : > { %14637 = vst [vmem:[#allocation330_spill] sm:$0xff] %v11388_v59  ;;  %14638 = vst [vmem:[#allocation331_spill] sm:$0xff] %v11390_v28  ;;  %v11392_v45 = vpop.f32.mrb[194].mxu0  ;;  %v11394_v57 = vpop.f32.mrb[194].mxu1  ;;  %v1891_v59 = vadd.f32 %v10215_v49, %v10970_v39  ;;  %v1893_v49 = vadd.f32 %v10223_v62, %v10970_v39 }
 0x2a7   : > { %14639 = vst [vmem:[#allocation332_spill] sm:$0xff] %v11392_v45  ;;  %14640 = vst [vmem:[#allocation333_spill] sm:$0xff] %v11394_v57  ;;  %v11396_v0 = vpop.f32.mrb[195].mxu0  ;;  %v11398_v10 = vpop.f32.mrb[195].mxu1  ;;  %v7970_v45 = vmul.f32 -1.442695, %v1588_v22  ;;  %v1592_v22 = vadd.f32 %v10227_v3, %v10968_v44  ;;  %v1594_v3 = vadd.f32 %v10234_v8, %v10968_v44 }
 0x2a8   : > { %14641 = vst [vmem:[#allocation334_spill] sm:$0xff] %v11396_v0  ;;  %14642 = vst [vmem:[#allocation335_spill] sm:$0xff] %v11398_v10  ;;  %v1590_v0 = vadd.f32 %v10221_v61, %v10970_v39  ;;  %v7973_v62 = vmul.f32 -1.442695, %v1893_v49 }
 0x2a9   : > { %8426 = vpow2.f32 %v7970_v45 }
 0x2ac   : > { %v11402_v41 = vpop.f32.mrb[196].mxu0  ;;  %v11404_v35 = vpop.f32.mrb[196].mxu1 }
 0x2ad   : > { %14643 = vst [vmem:[#allocation336_spill] sm:$0xff] %v11402_v41  ;;  %14644 = vst [vmem:[#allocation337_spill] sm:$0xff] %v11404_v35  ;;  %v11408_v12 = vpop.f32.mrb[197].mxu0  ;;  %v11410_v28 = vpop.f32.mrb[197].mxu1  ;;  %v7972_v35 = vmul.f32 -1.442695, %v1891_v59  ;;  %v1895_v59 = vadd.f32 %v10232_v7, %v10968_v44 }
 0x2ae   : > { %14645 = vst [vmem:[#allocation338_spill] sm:$0xff] %v11408_v12  ;;  %14646 = vst [vmem:[#allocation339_spill] sm:$0xff] %v11410_v28  ;;  %v11414_v57 = vpop.f32.mrb[198].mxu0  ;;  %v11416_v10 = vpop.f32.mrb[198].mxu1  ;;  %v7971_v41 = vmul.f32 -1.442695, %v1590_v0 }
 0x2af   : > { %14647 = vst [vmem:[#allocation340_spill] sm:$0xff] %v11414_v57  ;;  %14648 = vst [vmem:[#allocation341_spill] sm:$0xff] %v11416_v10  ;;  %v11418_v47 = vpop.f32.mrb[199].mxu0  ;;  %v11420_v5 = vpop.f32.mrb[199].mxu1  ;;  %8428 = vpow2.f32 %v7972_v35  ;;  %v7978_v35 = vmul.f32 -1.442695, %v1592_v22 }
 0x2b0   : > { %14649 = vst [vmem:[#allocation342_spill] sm:$0xff] %v11418_v47  ;;  %14650 = vst [vmem:[#allocation343_spill] sm:$0xff] %v11420_v5  ;;  %8430 = vpow2.f32 %v7971_v41  ;;  %v14659_v41 = vld [vmem:[#allocation17_spill] sm:$0xff]  ;;  %v7980_v7 = vmul.f32 -1.442695, %v1895_v59 }
 0x2b1   : > { %8432 = vpow2.f32 %v7973_v62 }
 0x2b2   : > { %8434 = vpow2.f32 %v7978_v35 }
 0x2b3   : > { %v8427_v5 = vpop.eup %8426  ;;  %8436 = vpow2.f32 %v7980_v7  ;;  %v14671_v7 = vld [vmem:[#allocation21_spill] sm:$0xff] }
 0x2b4   : > { %v11426_v28 = vpop.f32.mrb[200].mxu0  ;;  %v11428_v61 = vpop.f32.mrb[200].mxu1 }
 0x2b5   : > { %14651 = vst [vmem:[#allocation344_spill] sm:$0xff] %v11426_v28  ;;  %14652 = vst [vmem:[#allocation345_spill] sm:$0xff] %v11428_v61  ;;  %v11430_v57 = vpop.f32.mrb[201].mxu0  ;;  %v11432_v10 = vpop.f32.mrb[201].mxu1 }
 0x2b6   : > { %14653 = vst [vmem:[#allocation346_spill] sm:$0xff] %v11430_v57  ;;  %14654 = vst [vmem:[#allocation347_spill] sm:$0xff] %v11432_v10  ;;  %v11436_v0 = vpop.f32.mrb[202].mxu0  ;;  %v11438_v45 = vpop.f32.mrb[202].mxu1  ;;  %v1897_v10 = vadd.f32 %v10244_v17, %v10968_v44  ;;  %v1598_v57 = vadd.f32 %v14659_v41, %v11003_v29 }
 0x2b7   : > { %14655 = vst [vmem:[#allocation348_spill] sm:$0xff] %v11436_v0  ;;  %14656 = vst [vmem:[#allocation349_spill] sm:$0xff] %v11438_v45  ;;  %v11442_v28 = vpop.f32.mrb[203].mxu0  ;;  %v11444_v61 = vpop.f32.mrb[203].mxu1  ;;  %v7979_v0 = vmul.f32 -1.442695, %v1594_v3 }
 0x2b8   : > { %14657 = vst [vmem:[#allocation350_spill] sm:$0xff] %v11442_v28  ;;  %14658 = vst [vmem:[#allocation351_spill] sm:$0xff] %v11444_v61  ;;  %v7981_v49 = vmul.f32 -1.442695, %v1897_v10  ;;  %v14660_v45 = vld [vmem:[#allocation18_spill] sm:$0xff]  ;;  %v14663_v61 = vld [vmem:[#allocation19_spill] sm:$0xff] }
 0x2b9   : > { %v1901_v8 = vadd.f32 %v14660_v45, %v11003_v29  ;;  %v7986_v22 = vmul.f32 -1.442695, %v1598_v57  ;;  %v1600_v17 = vadd.f32 %v14663_v61, %v11003_v29  ;;  %v8429_v10 = vpop.eup %8428  ;;  %v3038_v3 = vadd.f32 1.0, %v8427_v5  ;;  %v14670_v61 = vld [vmem:[#allocation20_spill] sm:$0xff] }
 0x2ba   : > { %8438 = vpow2.f32 %v7979_v0  ;;  %v8431_v57 = vpop.eup %8430 }
 0x2bb   : > { %8440 = vpow2.f32 %v7981_v49  ;;  %v3039_v0 = vadd.f32 1.0, %v8431_v57 }
 0x2bc   : > { %v11452_v47 = vpop.f32.mrb[204].mxu0  ;;  %v11454_v28 = vpop.f32.mrb[204].mxu1  ;;  %8442 = vpow2.f32 %v7986_v22 }
 0x2bd   : > { %14661 = vst [vmem:[#allocation17_spill] sm:$0xff] %v11452_v47  ;;  %14662 = vst [vmem:[#allocation18_spill] sm:$0xff] %v11454_v28  ;;  %v11458_v12 = vpop.f32.mrb[205].mxu0  ;;  %v11460_v41 = vpop.f32.mrb[205].mxu1  ;;  %v7988_v28 = vmul.f32 -1.442695, %v1901_v8  ;;  %8444 = vrcp.f32 %v3038_v3 }
 0x2be   : > { %14664 = vst [vmem:[#allocation19_spill] sm:$0xff] %v11458_v12  ;;  %14665 = vst [vmem:[#allocation352_spill] sm:$0xff] %v11460_v41  ;;  %v11462_v59 = vpop.f32.mrb[206].mxu0  ;;  %v11464_v62 = vpop.f32.mrb[206].mxu1  ;;  %v1903_v12 = vadd.f32 %v14670_v61, %v11003_v29  ;;  %v7987_v41 = vmul.f32 -1.442695, %v1600_v17 }
 0x2bf   : > { %14666 = vst [vmem:[#allocation353_spill] sm:$0xff] %v11462_v59  ;;  %14667 = vst [vmem:[#allocation354_spill] sm:$0xff] %v11464_v62  ;;  %v11466_v45 = vpop.f32.mrb[207].mxu0  ;;  %v11468_v35 = vpop.f32.mrb[207].mxu1  ;;  %v1602_v59 = vadd.f32 %v14671_v7, %v10993_v58  ;;  %v3040_v47 = vadd.f32 1.0, %v8429_v10  ;;  %v14672_v62 = vld [vmem:[#allocation22_spill] sm:$0xff]  ;;  %8446 = vpow2.f32 %v7988_v28 }
 0x2c0   : > { %14668 = vst [vmem:[#allocation355_spill] sm:$0xff] %v11466_v45  ;;  %14669 = vst [vmem:[#allocation356_spill] sm:$0xff] %v11468_v35  ;;  %v1905_v5 = vadd.f32 %v14672_v62, %v10993_v58  ;;  %v14673_v45 = vld [vmem:[#allocation23_spill] sm:$0xff]  ;;  %v7989_v49 = vmul.f32 -1.442695, %v1903_v12  ;;  %v8433_v22 = vpop.eup %8432  ;;  %8448 = vpow2.f32 %v7987_v41  ;;  %v14678_v3 = vld [vmem:[#allocation24_spill] sm:$0xff] }
 0x2c1   : > { %v1604_v35 = vadd.f32 %v14673_v45, %v10993_v58  ;;  %v7994_v17 = vmul.f32 -1.442695, %v1602_v59  ;;  %v8435_v7 = vpop.eup %8434  ;;  %8450 = vrcp.f32 %v3040_v47  ;;  %v1907_v57 = vadd.f32 %v14678_v3, %v10993_v58 }
 0x2c2   : > { %v7996_v62 = vmul.f32 -1.442695, %v1905_v5  ;;  %8452 = vrcp.f32 %v3039_v0  ;;  %v8437_v59 = vpop.eup %8436 }
 0x2c3   : > { %v7995_v28 = vmul.f32 -1.442695, %v1604_v35  ;;  %8454 = vpow2.f32 %v7989_v49  ;;  %v7997_v5 = vmul.f32 -1.442695, %v1907_v57  ;;  %v3048_v2 = vadd.f32 1.0, %v8437_v59 }
 0x2c4   : > { %v11478_v8 = vpop.f32.mrb[208].mxu0  ;;  %v11480_v56 = vpop.f32.mrb[208].mxu1  ;;  %8456 = vpow2.f32 %v7994_v17 }
 0x2c5   : > { %14674 = vst [vmem:[#allocation20_spill] sm:$0xff] %v11478_v8  ;;  %14675 = vst [vmem:[#allocation21_spill] sm:$0xff] %v11480_v56  ;;  %v11482_v61 = vpop.f32.mrb[209].mxu0  ;;  %v11484_v10 = vpop.f32.mrb[209].mxu1  ;;  %v3046_v8 = vadd.f32 1.0, %v8435_v7  ;;  %8458 = vpow2.f32 %v7996_v62 }
 0x2c6   : > { %14676 = vst [vmem:[#allocation22_spill] sm:$0xff] %v11482_v61  ;;  %14677 = vst [vmem:[#allocation23_spill] sm:$0xff] %v11484_v10  ;;  %v11488_v45 = vpop.f32.mrb[210].mxu0  ;;  %v11490_v12 = vpop.f32.mrb[210].mxu1  ;;  %v3041_v61 = vadd.f32 1.0, %v8433_v22  ;;  %8460 = vpow2.f32 %v7995_v28 }
 0x2c7   : > { %14679 = vst [vmem:[#allocation24_spill] sm:$0xff] %v11488_v45  ;;  %14680 = vst [vmem:[#allocation357_spill] sm:$0xff] %v11490_v12  ;;  %v11492_v56 = vpop.f32.mrb[211].mxu0  ;;  %v11494_v41 = vpop.f32.mrb[211].mxu1 }
 0x2c8   : > { %14681 = vst [vmem:[#allocation358_spill] sm:$0xff] %v11492_v56  ;;  %14682 = vst [vmem:[#allocation359_spill] sm:$0xff] %v11494_v41  ;;  %v8439_v10 = vpop.eup %8438  ;;  %8462 = vrcp.f32 %v3041_v61 }
 0x2c9   : > { %v8441_v47 = vpop.eup %8440  ;;  %v3047_v12 = vadd.f32 1.0, %v8439_v10  ;;  %8464 = vrcp.f32 %v3046_v8 }
 0x2ca   : > { %v8443_v3 = vpop.eup %8442  ;;  %v3049_v41 = vadd.f32 1.0, %v8441_v47  ;;  %8466 = vpow2.f32 %v7997_v5  ;;  %v14691_v5 = vld [vmem:[#allocation212_spill] sm:$0xff] }
 0x2cb   : > { %v8445_v56 = vpop.eup %8444  ;;  %v3054_v7 = vadd.f32 1.0, %v8443_v3  ;;  %8468 = vrcp.f32 %v3048_v2  ;;  %v14694_v2 = vld [vmem:[#allocation27_spill] sm:$0xff] }
 0x2cc   : > { %v11496_v0 = vpop.f32.mrb[212].mxu0  ;;  %v11498_v35 = vpop.f32.mrb[212].mxu1  ;;  %8470 = vrcp.f32 %v3047_v12  ;;  %v14695_v12 = vld [vmem:[#allocation28_spill] sm:$0xff] }
 0x2cd   : > { %14683 = vst [vmem:[#allocation360_spill] sm:$0xff] %v11496_v0  ;;  %14684 = vst [vmem:[#allocation361_spill] sm:$0xff] %v11498_v35  ;;  %v11500_v22 = vpop.f32.mrb[213].mxu0  ;;  %v11502_v49 = vpop.f32.mrb[213].mxu1  ;;  %8472 = vrcp.f32 %v3049_v41  ;;  %v14692_v35 = vld [vmem:[#allocation25_spill] sm:$0xff]  ;;  %v1933_v45 = vadd.f32 %v14695_v12, %v14691_v5 }
 0x2ce   : > { %14685 = vst [vmem:[#allocation362_spill] sm:$0xff] %v11500_v22  ;;  %14686 = vst [vmem:[#allocation363_spill] sm:$0xff] %v11502_v49  ;;  %v8447_v17 = vpop.eup %8446  ;;  %v11504_v62 = vpop.f32.mrb[214].mxu0  ;;  %8474 = vrcp.f32 %v3054_v7  ;;  %v14697_v41 = vld [vmem:[#allocation29_spill] sm:$0xff]  ;;  %v14698_v7 = vld [vmem:[#allocation30_spill] sm:$0xff] }
 0x2cf   : > { %14687 = vst [vmem:[#allocation364_spill] sm:$0xff] %v11504_v62  ;;  %v11506_v57 = vpop.f32.mrb[214].mxu1  ;;  %v8449_v61 = vpop.eup %8448  ;;  %v3056_v47 = vadd.f32 1.0, %v8447_v17  ;;  %v1628_v62 = vadd.f32 %v14692_v35, %v14691_v5  ;;  %v1632_v17 = vadd.f32 %v14697_v41, %v14696_v9  ;;  %v14700_v35 = vld [vmem:[#allocation32_spill] sm:$0xff] }
 0x2d0   : > { %14688 = vst [vmem:[#allocation365_spill] sm:$0xff] %v11506_v57  ;;  %v11508_v10 = vpop.f32.mrb[215].mxu0  ;;  %v8451_v28 = vpop.eup %8450  ;;  %v3055_v49 = vadd.f32 1.0, %v8449_v61  ;;  %v14693_v57 = vld [vmem:[#allocation26_spill] sm:$0xff]  ;;  %v1935_v61 = vadd.f32 %v14698_v7, %v14696_v9 }
 0x2d1   : > { %14689 = vst [vmem:[#allocation366_spill] sm:$0xff] %v11508_v10  ;;  %v11510_v59 = vpop.f32.mrb[215].mxu1  ;;  %v8453_v8 = vpop.eup %8452  ;;  %v1931_v0 = vadd.f32 %v14693_v57, %v14691_v5  ;;  %v1630_v10 = vadd.f32 %v14694_v2, %v14691_v5  ;;  %v11530_v57 = vadd.f32 %v14700_v35, %v14696_v9  ;;  %8476 = vrcp.f32 %v3056_v47 }
 0x2d2   : > { %14690 = vst [vmem:[#allocation367_spill] sm:$0xff] %v11510_v59  ;;  %v8455_v22 = vpop.eup %8454  ;;  %8478 = vrcp.f32 %v3055_v49 }
 0x2d3   : > { %v8457_v3 = vpop.eup %8456  ;;  %v3057_v12 = vadd.f32 1.0, %v8455_v22  ;;  %v14702_v22 = vld [vmem:[#allocation209_spill] sm:$0xff] }
 0x2d4   : > { %v8459_v59 = vpop.eup %8458  ;;  %v3560_v4 = vpop.f32.mrb[216].mxu0  ;;  %v3062_v21 = vadd.f32 1.0, %v8457_v3 }
 0x2d5   : > { %v3613_v2 = vpop.f32.mrb[216].mxu1  ;;  %v8461_v36 = vpop.eup %8460  ;;  %v3561_v23 = vadd.f32 %v3560_v4, %v14701_v32  ;;  %v3064_v43 = vadd.f32 1.0, %v8459_v59  ;;  %8480 = vrcp.f32 %v3057_v12 }
 0x2d6   : > { %v3614_v41 = vadd.f32 %v3613_v2, %v14701_v32  ;;  %v3562_v60 = vpop.f32.mrb[217].mxu0  ;;  %v3615_v53 = vpop.f32.mrb[217].mxu1  ;;  %v3063_v14 = vadd.f32 1.0, %v8461_v36  ;;  %8482 = vrcp.f32 %v3062_v21  ;;  %v14703_v36 = vld [vmem:[#allocation33_spill] sm:$0xff] }
 0x2d7   : > { %v8463_v7 = vpop.eup %8462  ;;  %v3563_v6 = vadd.f32 %v3562_v60, %v14701_v32  ;;  %v3616_v34 = vadd.f32 %v3615_v53, %v14701_v32  ;;  %v3564_v35 = vpop.f32.mrb[218].mxu0  ;;  %v3738_v25 = vmul.f32 %v8445_v56, %v3561_v23  ;;  %8484 = vrcp.f32 %v3064_v43 }
 0x2d8   : > { %v3617_v30 = vpop.f32.mrb[218].mxu1  ;;  %v8465_v63 = vpop.eup %8464  ;;  %v3740_v47 = vmul.f32 %v8451_v28, %v3614_v41  ;;  %v3565_v31 = vadd.f32 %v3564_v35, %v14702_v22  ;;  %8486 = vrcp.f32 %v3063_v14 }
 0x2d9   : > { %v3566_v4 = vpop.f32.mrb[219].mxu0  ;;  %v3619_v50 = vpop.f32.mrb[219].mxu1  ;;  %v3739_v46 = vmul.f32 %v8453_v8, %v3563_v6  ;;  %v3741_v40 = vmul.f32 %v8463_v7, %v3616_v34  ;;  %v3618_v49 = vadd.f32 %v3617_v30, %v14702_v22  ;;  %v3770_v60 = vadd.f32 %v3738_v25, %v1628_v62  ;;  %v14704_v25 = vld [vmem:[#allocation34_spill] sm:$0xff] }
 0x2da   : > { %v8467_v2 = vpop.eup %8466  ;;  %v3772_v53 = vadd.f32 %v3740_v47, %v1931_v0  ;;  %v3746_v18 = vmul.f32 %v8465_v63, %v3565_v31  ;;  %v1638_v34 = vadd.f32 %v14703_v36, %v11106_v33  ;;  %v1941_v0 = vadd.f32 %v14704_v25, %v11106_v33 }
 0x2db   : > { %v8469_v3 = vpop.eup %8468  ;;  %v11538_v59 = vadd.f32 %v3739_v46, %v1630_v10  ;;  %v11540_v23 = vadd.f32 %v3741_v40, %v1933_v45  ;;  %v3065_v41 = vadd.f32 1.0, %v8467_v2  ;;  %v3802_v63 = vmax.f32 %v3770_v60, 0.0 }
 0x2dc   : > { %v8471_v20 = vpop.eup %8470  ;;  %v3748_v56 = vmul.f32 %v8469_v3, %v3618_v49  ;;  %v3778_v8 = vadd.f32 %v3746_v18, %v1632_v17  ;;  %v3570_v21 = vpop.f32.mrb[220].mxu0  ;;  %v3804_v62 = vmax.f32 %v3772_v53, 0.0  ;;  %v3567_v45 = vadd.f32 %v3566_v4, %v14702_v22 }
 0x2dd   : > { %v8473_v28 = vpop.eup %8472  ;;  %v3623_v46 = vpop.f32.mrb[220].mxu1  ;;  %v3620_v43 = vadd.f32 %v3619_v50, %v14702_v22  ;;  %v3571_v18 = vadd.f32 %v3570_v21, %v11070_v15  ;;  %8488 = vrcp.f32 %v3065_v41  ;;  %v14705_v50 = vld [vmem:[#allocation35_spill] sm:$0xff] }
 0x2de   : > { %v8475_v30 = vpop.eup %8474  ;;  %v3780_v31 = vadd.f32 %v3748_v56, %v1935_v61  ;;  %v3810_v40 = vmax.f32 %v3778_v8, 0.0  ;;  %v3572_v10 = vpop.f32.mrb[221].mxu0  ;;  %v3624_v14 = vadd.f32 %v3623_v46, %v11070_v15  ;;  %v3747_v2 = vmul.f32 %v8471_v20, %v3567_v45 }
 0x2df   : > { %v3625_v12 = vpop.f32.mrb[221].mxu1  ;;  %v3573_v17 = vadd.f32 %v3572_v10, %v11070_v15  ;;  %v3574_v6 = vpop.f32.mrb[222].mxu0  ;;  %v3749_v49 = vmul.f32 %v8473_v28, %v3620_v43  ;;  %v1640_v53 = vadd.f32 %v14705_v50, %v11106_v33  ;;  %v3754_v36 = vmul.f32 %v8475_v30, %v3571_v18  ;;  %v14706_v43 = vld [vmem:[#allocation36_spill] sm:$0xff] }
 0x2e0   : > { %v3812_v7 = vmax.f32 %v3780_v31, 0.0  ;;  %v3627_v35 = vpop.f32.mrb[222].mxu1  ;;  %v8477_v61 = vpop.eup %8476  ;;  %v3835_v47 = vpack.c.bf16 %v3810_v40, %v3802_v63  ;;  %v3779_v25 = vadd.f32 %v3747_v2, %v11526_v19  ;;  %v3626_v46 = vadd.f32 %v3625_v12, %v11070_v15 }
 0x2e1   : > { %v3576_v3 = vpop.f32.mrb[223].mxu0  ;;  %v3629_v4 = vpop.f32.mrb[223].mxu1  ;;  %v3756_v8 = vmul.f32 %v8477_v61, %v3624_v14  ;;  %v3781_v31 = vadd.f32 %v3749_v49, %v11530_v57  ;;  %v3786_v41 = vadd.f32 %v3754_v36, %v1638_v34  ;;  %v3575_v20 = vadd.f32 %v3574_v6, %v11068_v11 }
 0x2e2   : > { %v8479_v60 = vpop.eup %8478  ;;  %v3837_v56 = vpack.c.bf16 %v3812_v7, %v3804_v62  ;;  %v1943_v10 = vadd.f32 %v14706_v43, %v11106_v33  ;;  %v14707_v7 = vld [vmem:[#allocation37_spill] sm:$0xff]  ;;  %v3811_v18 = vmax.f32 %v3779_v25, 0.0  ;;  %v3628_v34 = vadd.f32 %v3627_v35, %v11068_v11 }
 0x2e3   : > { %v3755_v21 = vmul.f32 %v8479_v60, %v3573_v17  ;;  %v3788_v63 = vadd.f32 %v3756_v8, %v1941_v0  ;;  %v8481_v28 = vpop.eup %8480  ;;  %v1642_v19 = vadd.f32 %v14707_v7, %v11104_v37  ;;  %v3813_v17 = vmax.f32 %v3781_v31, 0.0  ;;  %v14708_v0 = vld [vmem:[#allocation38_spill] sm:$0xff]  ;;  %v14709_v60 = vld [vmem:[#allocation39_spill] sm:$0xff] }
 0x2e4   : > { %v8483_v45 = vpop.eup %8482  ;;  %v3757_v62 = vmul.f32 %v8481_v28, %v3626_v46  ;;  %v1945_v6 = vadd.f32 %v14708_v0, %v11104_v37  ;;  %v3803_v61 = vmax.f32 %v11538_v59, 0.0  ;;  %v3577_v49 = vadd.f32 %v3576_v3, %v11068_v11  ;;  %v14714_v0 = vld [vmem:[#allocation196_spill] sm:$0xff] }
 0x2e5   : > { %v3787_v40 = vadd.f32 %v3755_v21, %v1640_v53  ;;  %v8485_v30 = vpop.eup %8484  ;;  %v3762_v57 = vmul.f32 %v8483_v45, %v3575_v20  ;;  %v1644_v50 = vadd.f32 %v14709_v60, %v11104_v37  ;;  %v3805_v53 = vmax.f32 %v11540_v23, 0.0  ;;  %v14710_v20 = vld [vmem:[#allocation40_spill] sm:$0xff] }
 0x2e6   : > { %v8487_v14 = vpop.eup %8486  ;;  %v3789_v12 = vadd.f32 %v3757_v62, %v1943_v10  ;;  %v3764_v36 = vmul.f32 %v8485_v30, %v3628_v34  ;;  %v3630_v8 = vadd.f32 %v3629_v4, %v11068_v11  ;;  %v3818_v31 = vmax.f32 %v3786_v41, 0.0 }
 0x2e7   : > { %v3794_v2 = vadd.f32 %v3762_v57, %v1642_v19  ;;  %v8489_v25 = vpop.eup %8488  ;;  %v3763_v35 = vmul.f32 %v8487_v14, %v3577_v49  ;;  %v3836_v46 = vpack.c.bf16 %v3811_v18, %v3803_v61  ;;  %v1947_v28 = vadd.f32 %v14710_v20, %v11104_v37 }
 0x2e8   : > { %v3796_v59 = vadd.f32 %v3764_v36, %v1945_v6  ;;  %v3765_v45 = vmul.f32 %v8489_v25, %v3630_v8  ;;  %v3838_v43 = vpack.c.bf16 %v3813_v17, %v3805_v53  ;;  %v3820_v62 = vmax.f32 %v3788_v63, 0.0  ;;  %v11575_v17 = vld [vmem:[%s14204_s9] sm:$0x3]  ;;  %v14717_v8 = vld [vmem:[#allocation199_spill] sm:$0xff] }
 0x2e9   : > { %v3826_v21 = vmax.f32 %v3794_v2, 0.0  ;;  %v3795_v10 = vadd.f32 %v3763_v35, %v1644_v50  ;;  %3860 = vmatprep.subr.bf16.mxu0 %v3836_v46  ;;  %v3819_v4 = vmax.f32 %v3787_v40, 0.0  ;;  %v3821_v41 = vmax.f32 %v3789_v12, 0.0  ;;  %v14712_v63 = vld [vmem:[#allocation194_spill] sm:$0xff]  ;;  %v14713_v12 = vld [vmem:[#allocation195_spill] sm:$0xff]  ;;  %v14715_v2 = vld [vmem:[#allocation197_spill] sm:$0xff] }
 0x2ea   : > { %v3828_v7 = vmax.f32 %v3796_v59, 0.0  ;;  %v3797_v23 = vadd.f32 %v3765_v45, %v1947_v28  ;;  %3901 = vmatprep.subr.bf16.mxu1 %v3838_v43  ;;  %3861 = vmatpush1.bf16.msra.mxu0 %v3835_v47  ;;  %v14711_v47 = vld [vmem:[#allocation193_spill] sm:$0xff]  ;;  %v2497_v40 = vadd.f32 %v14712_v63, %v10970_v39  ;;  %v2196_v34 = vadd.f32 %v14713_v12, %v10970_v39  ;;  %v14716_v50 = vld [vmem:[#allocation198_spill] sm:$0xff]  ;;  %v14726_v63 = vld [vmem:[#allocation208_spill] sm:$0xff] }
 0x2eb   : > { %v3843_v3 = vpack.c.bf16 %v3826_v21, %v3818_v31  ;;  %v3827_v30 = vmax.f32 %v3795_v10, 0.0  ;;  %3902 = vmatpush1.bf16.msra.mxu1 %v3837_v56  ;;  %v2194_v56 = vadd.f32 %v14711_v47, %v10970_v39  ;;  %v2499_v6 = vadd.f32 %v14714_v0, %v10970_v39  ;;  %v14718_v21 = vld [vmem:[#allocation200_spill] sm:$0xff]  ;;  %v14719_v39 = vld [vmem:[#allocation201_spill] sm:$0xff]  ;;  %v14720_v59 = vld [vmem:[#allocation202_spill] sm:$0xff] }
 0x2ec   : > { %v3845_v19 = vpack.c.bf16 %v3828_v7, %v3820_v62  ;;  %v3829_v18 = vmax.f32 %v3797_v23, 0.0  ;;  %v2198_v49 = vadd.f32 %v14715_v2, %v10968_v44  ;;  %v7976_v60 = vmul.f32 -1.442695, %v2497_v40  ;;  %v14722_v7 = vld [vmem:[#allocation204_spill] sm:$0xff] }
 0x2ed   : > { %v3844_v57 = vpack.c.bf16 %v3827_v30, %v3819_v4  ;;  %v7974_v61 = vmul.f32 -1.442695, %v2194_v56  ;;  %v2501_v53 = vadd.f32 %v14716_v50, %v10968_v44  ;;  %v7975_v36 = vmul.f32 -1.442695, %v2196_v34  ;;  %v14723_v4 = vld [vmem:[#allocation205_spill] sm:$0xff] }
 0x2ee   : > { %v3846_v14 = vpack.c.bf16 %v3829_v18, %v3821_v41  ;;  %v2200_v25 = vadd.f32 %v14717_v8, %v10968_v44  ;;  %v7977_v31 = vmul.f32 -1.442695, %v2499_v6  ;;  %v2503_v35 = vadd.f32 %v14718_v21, %v10968_v44 }
 0x2ef   : > { %3862 = vmatprep.subr.bf16.mxu0 %v3844_v57  ;;  %8490 = vpow2.f32 %v7974_v61  ;;  %v7982_v46 = vmul.f32 -1.442695, %v2198_v49  ;;  %v2204_v20 = vadd.f32 %v14719_v39, %v11003_v29  ;;  %v7984_v28 = vmul.f32 -1.442695, %v2501_v53 }
 0x2f0   : > { %3903 = vmatprep.subr.bf16.mxu1 %v3846_v14  ;;  %3863 = vmatpush1.bf16.msra.mxu0 %v3843_v3  ;;  %8492 = vpow2.f32 %v7976_v60  ;;  %v2507_v45 = vadd.f32 %v14720_v59, %v11003_v29  ;;  %v7983_v43 = vmul.f32 -1.442695, %v2200_v25  ;;  %v14721_v3 = vld [vmem:[#allocation203_spill] sm:$0xff]  ;;  %v7985_v62 = vmul.f32 -1.442695, %v2503_v35 }
 0x2f1   : > { %3904 = vmatpush1.bf16.msra.mxu1 %v3845_v19  ;;  %8494 = vpow2.f32 %v7975_v36  ;;  %v2206_v10 = vadd.f32 %v14721_v3, %v11003_v29  ;;  %v2509_v44 = vadd.f32 %v14722_v7, %v11003_v29  ;;  %v7990_v23 = vmul.f32 -1.442695, %v2204_v20  ;;  %v14724_v19 = vld [vmem:[#allocation206_spill] sm:$0xff]  ;;  %v14725_v14 = vld [vmem:[#allocation207_spill] sm:$0xff] }
 0x2f2   : > { %8496 = vpow2.f32 %v7977_v31  ;;  %v2208_v30 = vadd.f32 %v14723_v4, %v10993_v58  ;;  %v7992_v41 = vmul.f32 -1.442695, %v2507_v45  ;;  %v2511_v18 = vadd.f32 %v14724_v19, %v10993_v58 }
 0x2f3   : > { %8020 = vmatmul.mubr.msk.bf16.vlgmr.msra.gmra.mrb[232].mxu0 %vm1451_vm0, %v11575_v17  ;;  %8498 = vpow2.f32 %v7982_v46  ;;  %v7991_v57 = vmul.f32 -1.442695, %v2206_v10  ;;  %v2210_v47 = vadd.f32 %v14725_v14, %v10993_v58  ;;  %v7993_v56 = vmul.f32 -1.442695, %v2509_v44 }
 0x2f4   : > { %8021 = vmatmul.mubr.msk.bf16.vlgmr.msra.gmra.mrb[232].mxu1 %vm1451_vm0, %v11575_v17  ;;  %3974 = vmatprep.mubr.bf16.mxu0 %v14330_v52  ;;  %8500 = vpow2.f32 %v7984_v28  ;;  %v2513_v29 = vadd.f32 %v14726_v63, %v10993_v58  ;;  %v7998_v40 = vmul.f32 -1.442695, %v2208_v30  ;;  %v8000_v12 = vmul.f32 -1.442695, %v2511_v18 }
 0x2f5   : > { %4015 = vmatprep.mubr.bf16.mxu1 %v14330_v52  ;;  %8502 = vpow2.f32 %v7983_v43  ;;  %v7999_v0 = vmul.f32 -1.442695, %v2210_v47  ;;  %v2537_v18 = vadd.f32 %v11077_v48, %v14691_v5  ;;  %v2238_v63 = vadd.f32 %v11088_v55, %v14696_v9 }
 0x2f6   : > { %8504 = vpow2.f32 %v7985_v62  ;;  %v8001_v61 = vmul.f32 -1.442695, %v2513_v29  ;;  %v2240_v48 = vadd.f32 %v11094_v16, %v14696_v9  ;;  %v11637_v55 = vadd.f32 %v11114_v26, %v11106_v33  ;;  %v14727_v26 = vld [vmem:[#allocation213_spill] sm:$0xff] }
 0x2f7   : > { %8506 = vpow2.f32 %v7990_v23  ;;  %v11645_v16 = vadd.f32 %v11121_v13, %v11106_v33 }
 0x2f8   : > { %8508 = vpow2.f32 %v7992_v41  ;;  %v2234_v41 = vadd.f32 %v11075_v54, %v14691_v5 }
 0x2f9   : > { %v8491_v34 = vpop.eup %8490  ;;  %8510 = vpow2.f32 %v7991_v57  ;;  %v2236_v57 = vadd.f32 %v11082_v24, %v14691_v5  ;;  %v2543_v24 = vadd.f32 %v11096_v27, %v14696_v9 }
 0x2fa   : > { %v8493_v6 = vpop.eup %8492  ;;  %8512 = vpow2.f32 %v7993_v56  ;;  %v3042_v60 = vadd.f32 1.0, %v8491_v34  ;;  %v2539_v56 = vadd.f32 %v11084_v42, %v14691_v5  ;;  %v11633_v42 = vadd.f32 %v11112_v1, %v11106_v33 }
 0x2fb   : > { %v8495_v2 = vpop.eup %8494  ;;  %8514 = vpow2.f32 %v7998_v40  ;;  %v3044_v53 = vadd.f32 1.0, %v8493_v6  ;;  %v2541_v40 = vadd.f32 %v11090_v38, %v14696_v9  ;;  %v11641_v38 = vadd.f32 %v11119_v51, %v11106_v33 }
 0x2fc   : > { %v8497_v49 = vpop.eup %8496  ;;  %8516 = vpow2.f32 %v8000_v12  ;;  %v3043_v58 = vadd.f32 1.0, %v8495_v2  ;;  %v11650_v6 = vadd.f32 %v14727_v26, %v11104_v37 }
 0x2fd   : > { %v8499_v50 = vpop.eup %8498  ;;  %8518 = vpow2.f32 %v7999_v0  ;;  %v3045_v25 = vadd.f32 1.0, %v8497_v49 }
 0x2fe   : > { %v8501_v36 = vpop.eup %8500  ;;  %8520 = vpow2.f32 %v8001_v61  ;;  %v3050_v21 = vadd.f32 1.0, %v8499_v50 }
 0x2ff   : > { %v8503_v8 = vpop.eup %8502  ;;  %8522 = vrcp.f32 %v3042_v60  ;;  %v3052_v46 = vadd.f32 1.0, %v8501_v36 }
 0x300   : > { %v8505_v31 = vpop.eup %8504  ;;  %8524 = vrcp.f32 %v3044_v53  ;;  %v3051_v20 = vadd.f32 1.0, %v8503_v8 }
 0x301   : > { %v8507_v35 = vpop.eup %8506  ;;  %8526 = vrcp.f32 %v3043_v58  ;;  %v3053_v59 = vadd.f32 1.0, %v8505_v31 }
 0x302   : > { %v8509_v39 = vpop.eup %8508  ;;  %8528 = vrcp.f32 %v3045_v25  ;;  %v3058_v43 = vadd.f32 1.0, %v8507_v35 }
 0x303   : > { %v8511_v28 = vpop.eup %8510  ;;  %8530 = vrcp.f32 %v3050_v21  ;;  %v3060_v10 = vadd.f32 1.0, %v8509_v39 }
 0x304   : > { %v8513_v45 = vpop.eup %8512  ;;  %8532 = vrcp.f32 %v3052_v46  ;;  %v3059_v7 = vadd.f32 1.0, %v8511_v28 }
 0x305   : > { %v8515_v3 = vpop.eup %8514  ;;  %8534 = vrcp.f32 %v3051_v20  ;;  %v3061_v23 = vadd.f32 1.0, %v8513_v45 }
 0x306   : > { %v8517_v62 = vpop.eup %8516  ;;  %8536 = vrcp.f32 %v3053_v59  ;;  %v3066_v30 = vadd.f32 1.0, %v8515_v3 }
 0x307   : > { %v8519_v44 = vpop.eup %8518  ;;  %8538 = vrcp.f32 %v3058_v43  ;;  %v3068_v19 = vadd.f32 1.0, %v8517_v62 }
 0x308   : > { %v8521_v4 = vpop.eup %8520  ;;  %8540 = vrcp.f32 %v3060_v10  ;;  %v3067_v47 = vadd.f32 1.0, %v8519_v44 }
 0x309   : > { %v8523_v14 = vpop.eup %8522  ;;  %8542 = vrcp.f32 %v3059_v7  ;;  %v3069_v54 = vadd.f32 1.0, %v8521_v4  ;;  %v14728_v7 = vld [vmem:[#allocation214_spill] sm:$0xff] }
 0x30a   : > { %v8525_v29 = vpop.eup %8524  ;;  %8544 = vrcp.f32 %v3061_v23  ;;  %v2551_v44 = vadd.f32 %v14728_v7, %v11104_v37 }
 0x30b   : > { %v8527_v12 = vpop.eup %8526  ;;  %8546 = vrcp.f32 %v3066_v30 }
 0x30c   : > { %v8529_v34 = vpop.eup %8528  ;;  %8548 = vrcp.f32 %v3068_v19 }
 0x30d   : > { %v8531_v0 = vpop.eup %8530  ;;  %8550 = vrcp.f32 %v3067_v47 }
 0x30e   : > { %v8533_v60 = vpop.eup %8532  ;;  %8552 = vrcp.f32 %v3069_v54 }
 0x30f   : > { %v8535_v58 = vpop.eup %8534 }
 0x310   : > { %v8537_v46 = vpop.eup %8536 }
 0x311   : > { %v8539_v45 = vpop.eup %8538 }
 0x312   : > { %v8541_v62 = vpop.eup %8540 }
 0x313   : > { %v8543_v19 = vpop.eup %8542 }
 0x31e   : > { %v3666_v5 = vpop.f32.mrb[224].mxu0 }
 0x31f   : > { %v3667_v27 = vadd.f32 %v3666_v5, %v14701_v32  ;;  %v3719_v9 = vpop.f32.mrb[224].mxu1  ;;  %v3668_v1 = vpop.f32.mrb[225].mxu0 }
 0x320   : > { %v3720_v61 = vadd.f32 %v3719_v9, %v14701_v32  ;;  %v3669_v2 = vadd.f32 %v3668_v1, %v14701_v32  ;;  %v3721_v51 = vpop.f32.mrb[225].mxu1  ;;  %v3670_v49 = vpop.f32.mrb[226].mxu0 }
 0x321   : > { %v3742_v33 = vmul.f32 %v8523_v14, %v3667_v27  ;;  %v3722_v13 = vadd.f32 %v3721_v51, %v14701_v32  ;;  %v3671_v50 = vadd.f32 %v3670_v49, %v14702_v22  ;;  %v3723_v53 = vpop.f32.mrb[226].mxu1  ;;  %v3672_v36 = vpop.f32.mrb[227].mxu0  ;;  %v14729_v14 = vld [vmem:[#allocation215_spill] sm:$0xff] }
 0x322   : > { %v3744_v8 = vmul.f32 %v8525_v29, %v3720_v61  ;;  %v3743_v25 = vmul.f32 %v8527_v12, %v3669_v2  ;;  %v3724_v31 = vadd.f32 %v3723_v53, %v14702_v22  ;;  %v3673_v21 = vadd.f32 %v3672_v36, %v14702_v22  ;;  %v3725_v35 = vpop.f32.mrb[227].mxu1  ;;  %v8545_v12 = vpop.eup %8544 }
 0x323   : > { %v3774_v39 = vadd.f32 %v3742_v33, %v2234_v41  ;;  %v3745_v20 = vmul.f32 %v8529_v34, %v3722_v13  ;;  %v3750_v28 = vmul.f32 %v8531_v0, %v3671_v50  ;;  %v3726_v59 = vadd.f32 %v3725_v35, %v14702_v22  ;;  %v8547_v1 = vpop.eup %8546 }
 0x324   : > { %v3776_v32 = vadd.f32 %v3744_v8, %v2537_v18  ;;  %v3775_v43 = vadd.f32 %v3743_v25, %v2236_v57  ;;  %v3752_v3 = vmul.f32 %v8533_v60, %v3724_v31  ;;  %v3751_v10 = vmul.f32 %v8535_v58, %v3673_v21 }
 0x325   : > { %v3777_v23 = vadd.f32 %v3745_v20, %v2539_v56  ;;  %v3782_v4 = vadd.f32 %v3750_v28, %v2238_v63  ;;  %v3753_v30 = vmul.f32 %v8537_v46, %v3726_v59  ;;  %v2250_v41 = vadd.f32 %v14729_v14, %v11104_v37 }
 0x326   : > { %v3806_v47 = vmax.f32 %v3774_v39, 0.0  ;;  %v3784_v29 = vadd.f32 %v3752_v3, %v2541_v40  ;;  %v3783_v54 = vadd.f32 %v3751_v10, %v2240_v48  ;;  %v3676_v22 = vpop.f32.mrb[228].mxu0  ;;  %v3808_v18 = vmax.f32 %v3776_v32, 0.0  ;;  %v8549_v40 = vpop.eup %8548  ;;  %v14730_v10 = vld [vmem:[#allocation216_spill] sm:$0xff] }
 0x327   : > { %v3814_v57 = vmax.f32 %v3782_v4, 0.0  ;;  %v3785_v5 = vadd.f32 %v3753_v30, %v2543_v24  ;;  %v3677_v34 = vadd.f32 %v3676_v22, %v11070_v15  ;;  %v3729_v27 = vpop.f32.mrb[228].mxu1  ;;  %v3678_v9 = vpop.f32.mrb[229].mxu0  ;;  %v3807_v59 = vmax.f32 %v3775_v43, 0.0 }
 0x328   : > { %v3816_v56 = vmax.f32 %v3784_v29, 0.0  ;;  %v3815_v63 = vmax.f32 %v3783_v54, 0.0  ;;  %v3730_v0 = vadd.f32 %v3729_v27, %v11070_v15  ;;  %v3679_v26 = vadd.f32 %v3678_v9, %v11070_v15  ;;  %v3731_v61 = vpop.f32.mrb[229].mxu1  ;;  %v3680_v2 = vpop.f32.mrb[230].mxu0  ;;  %v14734_v9 = vld [vmem:[#allocation43_spill] sm:$0xff] }
 0x329   : > { %v3839_v48 = vpack.c.bf16 %v3814_v57, %v3806_v47  ;;  %v3817_v51 = vmax.f32 %v3785_v5, 0.0  ;;  %v3758_v49 = vmul.f32 %v8539_v45, %v3677_v34  ;;  %v3732_v60 = vadd.f32 %v3731_v61, %v11070_v15  ;;  %v3733_v24 = vpop.f32.mrb[230].mxu1  ;;  %v3682_v33 = vpop.f32.mrb[231].mxu0  ;;  %v14733_v34 = vld [vmem:[#allocation42_spill] sm:$0xff] }
 0x32a   : > { %v8551_v13 = vpop.eup %8550  ;;  %v3841_v50 = vpack.c.bf16 %v3816_v56, %v3808_v18  ;;  %v3760_v53 = vmul.f32 %v8541_v62, %v3730_v0  ;;  %v3759_v36 = vmul.f32 %v8543_v19, %v3679_v26  ;;  %v3681_v58 = vadd.f32 %v3680_v2, %v11068_v11  ;;  %v3735_v8 = vpop.f32.mrb[231].mxu1  ;;  %v14735_v56 = vld [vmem:[#allocation44_spill] sm:$0xff]  ;;  %v14736_v0 = vld [vmem:[#allocation227_spill] sm:$0xff]  ;;  %v14738_v2 = vld [vmem:[#allocation50_spill] sm:$0xff] }
 0x32b   : > { %v8553_v25 = vpop.eup %8552  ;;  %v3790_v31 = vadd.f32 %v3758_v49, %v11633_v42  ;;  %v3761_v21 = vmul.f32 %v8545_v12, %v3732_v60  ;;  %v3734_v35 = vadd.f32 %v3733_v24, %v11068_v11  ;;  %v3683_v46 = vadd.f32 %v3682_v33, %v11068_v11 }
 0x32c   : > { %v3792_v39 = vadd.f32 %v3760_v53, %v11637_v55  ;;  %v3791_v15 = vadd.f32 %v3759_v36, %v11641_v38  ;;  %v3766_v20 = vmul.f32 %v8547_v1, %v3681_v58  ;;  %v3736_v28 = vadd.f32 %v3735_v8, %v11068_v11  ;;  %v14740_v53 = vld [vmem:[#allocation52_spill] sm:$0xff]  ;;  %v14741_v58 = vld [vmem:[#allocation237_spill] sm:$0xff] }
 0x32d   : > { %v3793_v45 = vadd.f32 %v3761_v21, %v11645_v16  ;;  %v3768_v32 = vmul.f32 %v8549_v40, %v3734_v35  ;;  %v3767_v3 = vmul.f32 %v8551_v13, %v3683_v46  ;;  %v2553_v42 = vadd.f32 %v14730_v10, %v11104_v37  ;;  %v14742_v8 = vld [vmem:[#allocation53_spill] sm:$0xff]  ;;  %v14744_v46 = vld [vmem:[#allocation55_spill] sm:$0xff] }
 0x32e   : > { %v3809_v62 = vmax.f32 %v3777_v23, 0.0  ;;  %v3798_v7 = vadd.f32 %v3766_v20, %v11650_v6  ;;  %v3769_v4 = vmul.f32 %v8553_v25, %v3736_v28  ;;  %v3840_v55 = vpack.c.bf16 %v3815_v63, %v3807_v59  ;;  %v14731_v23 = vld [vmem:[#allocation218_spill] sm:$0xff]  ;;  %v14745_v20 = vld [vmem:[#allocation56_spill] sm:$0xff] }
 0x32f   : > { %v3800_v30 = vadd.f32 %v3768_v32, %v2551_v44  ;;  %v3799_v19 = vadd.f32 %v3767_v3, %v2250_v41  ;;  %v3822_v14 = vmax.f32 %v3790_v31, 0.0  ;;  %v3824_v11 = vmax.f32 %v3792_v39, 0.0  ;;  %v14732_v41 = vld [vmem:[#allocation41_spill] sm:$0xff]  ;;  %v14743_v31 = vld [vmem:[#allocation54_spill] sm:$0xff] }
 0x330   : > { %v3830_v38 = vmax.f32 %v3798_v7, 0.0  ;;  %v3801_v47 = vadd.f32 %v3769_v4, %v2553_v42  ;;  %v3842_v29 = vpack.c.bf16 %v3817_v51, %v3809_v62  ;;  %v3823_v43 = vmax.f32 %v3791_v15, 0.0  ;;  %3942 = vmatprep.subr.bf16.mxu0 %v3840_v55  ;;  %v14739_v51 = vld [vmem:[#allocation51_spill] sm:$0xff]  ;;  %v14747_v32 = vld [vmem:[#allocation57_spill] sm:$0xff] }
 0x331   : > { %v3832_v54 = vmax.f32 %v3800_v30, 0.0  ;;  %v3831_v16 = vmax.f32 %v3799_v19, 0.0  ;;  %v3825_v22 = vmax.f32 %v3793_v45, 0.0  ;;  %3943 = vmatpush1.bf16.msra.mxu0 %v3839_v48  ;;  %v1648_v57 = vadd.f32 %v14732_v41, %v14731_v23  ;;  %v14746_v45 = vld [vmem:[#allocation238_spill] sm:$0xff] }
 0x332   : > { %v3847_v12 = vpack.c.bf16 %v3830_v38, %v3822_v14  ;;  %v3833_v18 = vmax.f32 %v3801_v47, 0.0  ;;  %3983 = vmatprep.subr.bf16.mxu1 %v3842_v29  ;;  %v1951_v27 = vadd.f32 %v14733_v34, %v14731_v23  ;;  %v1650_v1 = vadd.f32 %v14734_v9, %v14731_v23  ;;  %v14751_v41 = vld [vmem:[#allocation246_spill] sm:$0xff] }
 0x333   : > { %v3849_v37 = vpack.c.bf16 %v3832_v54, %v3824_v11  ;;  %3984 = vmatpush1.bf16.msra.mxu1 %v3841_v50  ;;  %v3848_v6 = vpack.c.bf16 %v3831_v16, %v3823_v43  ;;  %v8002_v5 = vmul.f32 -1.442695, %v1648_v57  ;;  %v1953_v63 = vadd.f32 %v14735_v56, %v14731_v23  ;;  %v14748_v43 = vld [vmem:[#allocation58_spill] sm:$0xff]  ;;  %v14752_v57 = vld [vmem:[#allocation61_spill] sm:$0xff] }
 0x334   : > { %v3850_v44 = vpack.c.bf16 %v3833_v18, %v3825_v22  ;;  %v8004_v61 = vmul.f32 -1.442695, %v1951_v27  ;;  %v1961_v40 = vadd.f32 %v14738_v2, %v14736_v0  ;;  %v8003_v48 = vmul.f32 -1.442695, %v1650_v1  ;;  %v14749_v22 = vld [vmem:[#allocation59_spill] sm:$0xff]  ;;  %v14753_v27 = vld [vmem:[#allocation62_spill] sm:$0xff] }
 0x335   : > { %3944 = vmatprep.subr.bf16.mxu0 %v3848_v6  ;;  %8554 = vpow2.f32 %v8002_v5  ;;  %v1660_v49 = vadd.f32 %v14739_v51, %v14736_v0  ;;  %v8005_v60 = vmul.f32 -1.442695, %v1953_v63  ;;  %v1963_v36 = vadd.f32 %v14740_v53, %v14736_v0  ;;  %v14754_v63 = vld [vmem:[#allocation63_spill] sm:$0xff]  ;;  %v14755_v2 = vld [vmem:[#allocation64_spill] sm:$0xff] }
 0x336   : > { %3985 = vmatprep.subr.bf16.mxu1 %v3850_v44  ;;  %3945 = vmatpush1.bf16.msra.mxu0 %v3847_v12  ;;  %8556 = vpow2.f32 %v8004_v61  ;;  %v8034_v33 = vmul.f32 -1.442695, %v1961_v40  ;;  %v1662_v25 = vadd.f32 %v14742_v8, %v14741_v58  ;;  %v1965_v21 = vadd.f32 %v14743_v31, %v14741_v58  ;;  %v14757_v8 = vld [vmem:[#allocation220_spill] sm:$0xff] }
 0x337   : > { %3986 = vmatpush1.bf16.msra.mxu1 %v3849_v37  ;;  %8558 = vpow2.f32 %v8003_v48  ;;  %v8033_v13 = vmul.f32 -1.442695, %v1660_v49  ;;  %v1664_v39 = vadd.f32 %v14744_v46, %v14741_v58  ;;  %v8035_v15 = vmul.f32 -1.442695, %v1963_v36  ;;  %v14750_v37 = vld [vmem:[#allocation60_spill] sm:$0xff] }
 0x338   : > { %8560 = vpow2.f32 %v8005_v60  ;;  %v1967_v28 = vadd.f32 %v14745_v20, %v14741_v58  ;;  %v8040_v59 = vmul.f32 -1.442695, %v1662_v25  ;;  %v1668_v3 = vadd.f32 %v14747_v32, %v14746_v45 }
 0x339   : > { %8022 = vmatmul.mubr.msk.bf16.vlgmr.msra.gmra.mrb[236].mxu0 %vm1451_vm0, %v11575_v17  ;;  %v8042_v10 = vmul.f32 -1.442695, %v1965_v21  ;;  %v8041_v62 = vmul.f32 -1.442695, %v1664_v39  ;;  %v1971_v54 = vadd.f32 %v14748_v43, %v14746_v45  ;;  %v1670_v12 = vadd.f32 %v14749_v22, %v14746_v45  ;;  %v14758_v39 = vld [vmem:[#allocation221_spill] sm:$0xff] }
 0x33a   : > { %8023 = vmatmul.mubr.msk.bf16.vlgmr.msra.gmra.mrb[236].mxu1 %vm1451_vm0, %v11575_v17  ;;  %5144 = vmatprep.mubr.bf16.mxu0 %v14330_v52  ;;  %v14737_v17 = vld [vmem:[#allocation49_spill] sm:$0xff]  ;;  %v8043_v4 = vmul.f32 -1.442695, %v1967_v28  ;;  %v8048_v19 = vmul.f32 -1.442695, %v1668_v3  ;;  %v1973_v6 = vadd.f32 %v14750_v37, %v14746_v45  ;;  %v1672_v5 = vadd.f32 %v14752_v57, %v14751_v41 }
 0x33b   : > { %5197 = vmatprep.mubr.bf16.mxu1 %v14330_v52  ;;  %v1658_v26 = vadd.f32 %v14737_v17, %v14736_v0  ;;  %v8050_v34 = vmul.f32 -1.442695, %v1971_v54  ;;  %v1975_v9 = vadd.f32 %v14753_v27, %v14751_v41  ;;  %v8049_v56 = vmul.f32 -1.442695, %v1670_v12  ;;  %v14760_v57 = vld [vmem:[#allocation229_spill] sm:$0xff]  ;;  %v14800_v52 = vld [vmem:[#allocation86_spill] sm:$0xff] }
 0x33c   : > { %v1674_v17 = vadd.f32 %v14754_v63, %v14751_v41  ;;  %v8051_v61 = vmul.f32 -1.442695, %v1973_v6  ;;  %v1977_v40 = vadd.f32 %v14755_v2, %v14751_v41  ;;  %v8056_v51 = vmul.f32 -1.442695, %v1672_v5 }
 0x33d   : > { %v8032_v24 = vmul.f32 -1.442695, %v1658_v26  ;;  %v8058_v60 = vmul.f32 -1.442695, %v1975_v9  ;;  %v2557_v25 = vadd.f32 %v14757_v8, %v14731_v23  ;;  %v2264_v5 = vadd.f32 %v14760_v57, %v14736_v0  ;;  %v14766_v8 = vld [vmem:[#allocation47_spill] sm:$0xff] }
 0x33e   : > { %v8059_v36 = vmul.f32 -1.442695, %v1977_v40  ;;  %v14762_v40 = vld [vmem:[#allocation231_spill] sm:$0xff] }
 0x33f   : > { %v8555_v50 = vpop.eup %8554  ;;  %8562 = vpow2.f32 %v8032_v24  ;;  %v8036_v2 = vmul.f32 -1.442695, %v2264_v5 }
 0x340   : > { %8564 = vpow2.f32 %v8034_v33  ;;  %v3158_v35 = vadd.f32 1.0, %v8555_v50  ;;  %v8557_v42 = vpop.eup %8556  ;;  %v8057_v33 = vmul.f32 -1.442695, %v1674_v17  ;;  %v14761_v17 = vld [vmem:[#allocation230_spill] sm:$0xff] }
 0x341   : > { %8566 = vpow2.f32 %v8033_v13  ;;  %v8559_v7 = vpop.eup %8558  ;;  %v3160_v14 = vadd.f32 1.0, %v8557_v42  ;;  %v14756_v13 = vld [vmem:[#allocation219_spill] sm:$0xff] }
 0x342   : > { %8568 = vrcp.f32 %v3158_v35  ;;  %v8561_v30 = vpop.eup %8560  ;;  %v3159_v47 = vadd.f32 1.0, %v8559_v7  ;;  %v2254_v50 = vadd.f32 %v14756_v13, %v14731_v23 }
 0x343   : > { %8570 = vpow2.f32 %v8035_v15  ;;  %v3161_v11 = vadd.f32 1.0, %v8561_v30  ;;  %v2256_v15 = vadd.f32 %v14758_v39, %v14731_v23 }
 0x344   : > { %8572 = vpow2.f32 %v8040_v59  ;;  %v8006_v28 = vmul.f32 -1.442695, %v2254_v50  ;;  %v14759_v59 = vld [vmem:[#allocation222_spill] sm:$0xff] }
 0x345   : > { %8574 = vpow2.f32 %v8042_v10  ;;  %v2559_v32 = vadd.f32 %v14759_v59, %v14731_v23  ;;  %v8008_v10 = vmul.f32 -1.442695, %v2557_v25  ;;  %v14768_v59 = vld [vmem:[#allocation232_spill] sm:$0xff] }
 0x346   : > { %8576 = vpow2.f32 %v8041_v62 }
 0x347   : > { %8578 = vpow2.f32 %v8043_v4  ;;  %v8007_v4 = vmul.f32 -1.442695, %v2256_v15  ;;  %v11770_v15 = vpop.permute.xlu0 %4779 }
 0x348   : > { %8580 = vpow2.f32 %v8048_v19  ;;  %v8009_v19 = vmul.f32 -1.442695, %v2559_v32  ;;  %v2569_v32 = vadd.f32 %v14768_v59, %v14736_v0 }
 0x349   : > { %v8563_v55 = vpop.eup %8562  ;;  %8582 = vrcp.f32 %v3160_v14 }
 0x34a   : > { %v8565_v38 = vpop.eup %8564  ;;  %v4432_v16 = vadd.f32 1.0, %v8563_v55  ;;  %8584 = vrcp.f32 %v3159_v47 }
 0x34b   : > { %v8567_v29 = vpop.eup %8566  ;;  %v4434_v18 = vadd.f32 1.0, %v8565_v38  ;;  %8586 = vrcp.f32 %v3161_v11 }
 0x34c   : > { %v4433_v44 = vadd.f32 1.0, %v8567_v29  ;;  %v11720_v1 = vpop.eup %8568  ;;  %8588 = vrcp.f32 %v4432_v16 }
 0x34d   : > { %v8571_v26 = vpop.eup %8570  ;;  %8590 = vrcp.f32 %v4434_v18 }
 0x34e   : > { %v8573_v48 = vpop.eup %8572  ;;  %8592 = vrcp.f32 %v4433_v44  ;;  %v4435_v21 = vadd.f32 1.0, %v8571_v26  ;;  %v2567_v26 = vadd.f32 %v14761_v17, %v14736_v0  ;;  %v8039_v17 = vmul.f32 -1.442695, %v2569_v32 }
 0x34f   : > { %v8575_v49 = vpop.eup %8574  ;;  %8594 = vpow2.f32 %v8050_v34  ;;  %v4440_v46 = vadd.f32 1.0, %v8573_v48  ;;  %v2266_v48 = vadd.f32 %v14762_v40, %v14736_v0 }
 0x350   : > { %v8577_v24 = vpop.eup %8576  ;;  %8596 = vpow2.f32 %v8049_v56  ;;  %v4442_v62 = vadd.f32 1.0, %v8575_v49  ;;  %v14763_v49 = vld [vmem:[#allocation228_spill] sm:$0xff] }
 0x351   : > { %v8579_v53 = vpop.eup %8578  ;;  %8598 = vpow2.f32 %v8051_v61  ;;  %v4441_v14 = vadd.f32 1.0, %v8577_v24  ;;  %v1654_v25 = vadd.f32 %v14766_v8, %v14763_v49 }
 0x352   : > { %v8581_v31 = vpop.eup %8580  ;;  %8600 = vpow2.f32 %v8056_v51  ;;  %v4443_v38 = vadd.f32 1.0, %v8579_v53 }
 0x353   : > { %v11730_v35 = vpop.eup %8582  ;;  %8602 = vpow2.f32 %v8058_v60  ;;  %v4448_v29 = vadd.f32 1.0, %v8581_v31  ;;  %v14764_v60 = vld [vmem:[#allocation45_spill] sm:$0xff]  ;;  %v14767_v31 = vld [vmem:[#allocation48_spill] sm:$0xff] }
 0x354   : > { %v11734_v20 = vpop.eup %8584  ;;  %8604 = vpow2.f32 %v8057_v33  ;;  %v1652_v24 = vadd.f32 %v14764_v60, %v14763_v49  ;;  %v14765_v33 = vld [vmem:[#allocation46_spill] sm:$0xff] }
 0x355   : > { %v11738_v3 = vpop.eup %8586  ;;  %8606 = vpow2.f32 %v8059_v36  ;;  %v1955_v13 = vadd.f32 %v14765_v33, %v14763_v49  ;;  %v11762_v36 = vpop.permute.xlu1 %4774 }
 0x356   : > { %v11740_v42 = vpop.eup %8588  ;;  %8608 = vrcp.f32 %v4435_v21  ;;  %v1957_v21 = vadd.f32 %v14767_v31, %v14763_v49 }
 0x357   : > { %v11742_v7 = vpop.eup %8590  ;;  %8610 = vrcp.f32 %v4440_v46 }
 0x358   : > { %v11744_v30 = vpop.eup %8592  ;;  %8612 = vpow2.f32 %v8006_v28  ;;  %v8038_v28 = vmul.f32 -1.442695, %v2567_v26 }
 0x359   : > { %v8595_v55 = vpop.eup %8594  ;;  %8614 = vpow2.f32 %v8008_v10  ;;  %v14769_v10 = vld [vmem:[#allocation233_spill] sm:$0xff] }
 0x35a   : > { %v8597_v23 = vpop.eup %8596  ;;  %8616 = vrcp.f32 %v4442_v62  ;;  %v4450_v43 = vadd.f32 1.0, %v8595_v55  ;;  %v2268_v62 = vadd.f32 %v14769_v10, %v14741_v58  ;;  %v11821_v10 = vpop.permute.xlu0 %4911 }
 0x35b   : > { %v8599_v47 = vpop.eup %8598  ;;  %8618 = vpow2.f32 %v8007_v4  ;;  %v4449_v16 = vadd.f32 1.0, %v8597_v23  ;;  %v14770_v4 = vld [vmem:[#allocation234_spill] sm:$0xff] }
 0x35c   : > { %v8601_v11 = vpop.eup %8600  ;;  %8620 = vpow2.f32 %v8009_v19  ;;  %v4451_v12 = vadd.f32 1.0, %v8599_v47  ;;  %v2571_v19 = vadd.f32 %v14770_v4, %v14741_v58  ;;  %v14771_v47 = vld [vmem:[#allocation217_spill] sm:$0xff] }
 0x35d   : > { %v8603_v54 = vpop.eup %8602  ;;  %8622 = vrcp.f32 %v4441_v14  ;;  %v4456_v37 = vadd.f32 1.0, %v8601_v11 }
 0x35e   : > { %v8605_v22 = vpop.eup %8604  ;;  %8624 = vrcp.f32 %v4443_v38  ;;  %v4458_v44 = vadd.f32 1.0, %v8603_v54  ;;  %v8037_v38 = vmul.f32 -1.442695, %v2266_v48 }
 0x35f   : > { %v8607_v18 = vpop.eup %8606  ;;  %8626 = vrcp.f32 %v4448_v29  ;;  %v4457_v27 = vadd.f32 1.0, %v8605_v22 }
 0x360   : > { %v11746_v6 = vpop.eup %8608  ;;  %8628 = vrcp.f32 %v4450_v43  ;;  %v4459_v56 = vadd.f32 1.0, %v8607_v18 }
 0x361   : > { %v11750_v34 = vpop.eup %8610  ;;  %8630 = vrcp.f32 %v4449_v16 }
 0x362   : > { %v8613_v9 = vpop.eup %8612  ;;  %8632 = vrcp.f32 %v4451_v12 }
 0x363   : > { %v8615_v63 = vpop.eup %8614  ;;  %8634 = vrcp.f32 %v4456_v37  ;;  %v3162_v50 = vadd.f32 1.0, %v8613_v9 }
 0x364   : > { %v11754_v61 = vpop.eup %8616  ;;  %8636 = vrcp.f32 %v4458_v44  ;;  %v3164_v46 = vadd.f32 1.0, %v8615_v63  ;;  %v14774_v44 = vld [vmem:[#allocation235_spill] sm:$0xff] }
 0x365   : > { %v8619_v51 = vpop.eup %8618  ;;  %8638 = vrcp.f32 %v4457_v27  ;;  %v2270_v57 = vadd.f32 %v14774_v44, %v14741_v58 }
 0x366   : > { %v8621_v53 = vpop.eup %8620  ;;  %8640 = vrcp.f32 %v4459_v56  ;;  %v3163_v23 = vadd.f32 1.0, %v8619_v51  ;;  %v8044_v51 = vmul.f32 -1.442695, %v2268_v62  ;;  %v14782_v62 = vld [vmem:[#allocation239_spill] sm:$0xff] }
 0x367   : > { %v11768_v39 = vpop.eup %8622  ;;  %8642 = vpow2.f32 %v8036_v2  ;;  %v3165_v0 = vadd.f32 1.0, %v8621_v53  ;;  %v8046_v53 = vmul.f32 -1.442695, %v2571_v19  ;;  %v8045_v31 = vmul.f32 -1.442695, %v2270_v57  ;;  %v14784_v57 = vld [vmem:[#allocation240_spill] sm:$0xff] }
 0x368   : > { %v11778_v14 = vpop.eup %8624  ;;  %8644 = vrcp.f32 %v3162_v50  ;;  %v11802_v50 = vpop.permute.xlu1 %4906  ;;  %v2274_v4 = vadd.f32 %v14782_v62, %v14746_v45 }
 0x369   : > { %v11781_v54 = vpop.eup %8626  ;;  %8646 = vrcp.f32 %v3164_v46 }
 0x36a   : > { %14772 = vst [vmem:[#allocation212_spill] sm:$0xff] %v11781_v54  ;;  %v11785_v37 = vpop.eup %8628  ;;  %8648 = vpow2.f32 %v8038_v28 }
 0x36b   : > { %14773 = vst [vmem:[#allocation25_spill] sm:$0xff] %v11785_v37  ;;  %v11791_v63 = vpop.eup %8630  ;;  %8650 = vrcp.f32 %v3163_v23 }
 0x36c   : > { %14775 = vst [vmem:[#allocation26_spill] sm:$0xff] %v11791_v63  ;;  %v11795_v48 = vpop.eup %8632  ;;  %8652 = vrcp.f32 %v3165_v0 }
 0x36d   : > { %14776 = vst [vmem:[#allocation27_spill] sm:$0xff] %v11795_v48  ;;  %v11800_v33 = vpop.eup %8634  ;;  %8654 = vpow2.f32 %v8037_v38 }
 0x36e   : > { %14777 = vst [vmem:[#allocation28_spill] sm:$0xff] %v11800_v33  ;;  %8656 = vpow2.f32 %v8039_v17 }
 0x36f   : > { %8658 = vpow2.f32 %v8044_v51 }
 0x370   : > { %8660 = vpow2.f32 %v8046_v53  ;;  %v14788_v53 = vld [vmem:[#allocation242_spill] sm:$0xff] }
 0x371   : > { %8662 = vpow2.f32 %v8045_v31  ;;  %v8054_v31 = vmul.f32 -1.442695, %v14788_v53 }
 0x3c6   : > { %v3894_v55 = vpop.f32.mrb[232].mxu0 }
 0x3c7   : > { %v3895_v29 = vadd.f32 %v3894_v55, %v14771_v47  ;;  %v3935_v11 = vpop.f32.mrb[232].mxu1  ;;  %v3896_v43 = vpop.f32.mrb[233].mxu0 }
 0x3c8   : > { %v3936_v16 = vadd.f32 %v3935_v11, %v14771_v47  ;;  %v3897_v22 = vadd.f32 %v3896_v43, %v14771_v47  ;;  %v3937_v12 = vpop.f32.mrb[233].mxu1  ;;  %v3898_v18 = vpop.f32.mrb[234].mxu0 }
 0x3c9   : > { %v4024_v5 = vmul.f32 %v11720_v1, %v3895_v29  ;;  %v3938_v27 = vadd.f32 %v3937_v12, %v14771_v47  ;;  %v3939_v9 = vpop.f32.mrb[234].mxu1  ;;  %v3899_v56 = vpop.f32.mrb[235].mxu0 }
 0x3ca   : > { %v4026_v26 = vmul.f32 %v11730_v35, %v3936_v16  ;;  %v4025_v2 = vmul.f32 %v11734_v20, %v3897_v22  ;;  %v3940_v40 = vpop.f32.mrb[235].mxu1  ;;  %v11808_v20 = vpop.eup %8636  ;;  %v8052_v9 = vmul.f32 -1.442695, %v2274_v4 }
 0x3cb   : > { %v11797_v60 = vadd.f32 %v4024_v5, %v1652_v24  ;;  %v4027_v1 = vmul.f32 %v11738_v3, %v3938_v27  ;;  %14778 = vst [vmem:[#allocation211_spill] sm:$0xff] %v11808_v20  ;;  %v11813_v28 = vpop.eup %8638  ;;  %v14780_v3 = vld [vmem:[#allocation236_spill] sm:$0xff]  ;;  %v11832_v43 = vpop.permute.xlu1 %1098  ;;  %v2276_v5 = vadd.f32 %v14784_v57, %v14746_v45  ;;  %v14786_v40 = vld [vmem:[#allocation241_spill] sm:$0xff] }
 0x3cc   : > { %v11804_v8 = vadd.f32 %v4026_v26, %v1955_v13  ;;  %v11806_v35 = vadd.f32 %v4025_v2, %v1654_v25  ;;  %14779 = vst [vmem:[#allocation29_spill] sm:$0xff] %v11813_v28  ;;  %v2573_v59 = vadd.f32 %v14780_v3, %v14741_v58  ;;  %v11819_v25 = vpop.eup %8640  ;;  %14783 = vst [vmem:[#allocation31_spill] sm:$0xff] %v11832_v43  ;;  %v11844_v26 = vpop.permute.xlu0 %1103 }
 0x3cd   : > { %v4040_v46 = vand.u32 2147483647, %v11797_v60  ;;  %v11811_v24 = vadd.f32 %v4027_v1, %v1957_v21  ;;  %14781 = vst [vmem:[#allocation30_spill] sm:$0xff] %v11819_v25  ;;  %v8643_v38 = vpop.eup %8642  ;;  %14785 = vst [vmem:[#allocation32_spill] sm:$0xff] %v11844_v26  ;;  %v2579_v51 = vadd.f32 %v14786_v40, %v14746_v45  ;;  %v11899_v20 = vadd.f32 %v14800_v52, %v11844_v26  ;;  %v14806_v25 = vld [vmem:[#allocation90_spill] sm:$0xff] }
 0x3ce   : > { %v4042_v32 = vand.u32 2147483647, %v11804_v8  ;;  %v4041_v13 = vand.u32 2147483647, %v11806_v35  ;;  %v11827_v19 = vcombine.low %v11797_v60, %v11806_v35  ;;  %v11830_v11 = vpop.eup %8644  ;;  %v8047_v44 = vmul.f32 -1.442695, %v2573_v59 }
 0x3cf   : > { %v4048_v21 = vsub.f32 0.0, %v4040_v46  ;;  %v4043_v23 = vand.u32 2147483647, %v11811_v24  ;;  %v11836_v12 = vcombine.low %v11804_v8, %v11811_v24  ;;  %v11838_v18 = vpop.eup %8646  ;;  %v4436_v2 = vadd.f32 1.0, %v8643_v38  ;;  %v14789_v46 = vld [vmem:[#allocation243_spill] sm:$0xff]  ;;  %v11853_v62 = vpop.permute.xlu1 %4784 }
 0x3d0   : > { %v4050_v55 = vsub.f32 0.0, %v4042_v32  ;;  %v4049_v58 = vsub.f32 0.0, %v4041_v13  ;;  %v8649_v27 = vpop.eup %8648  ;;  %v2278_v3 = vadd.f32 %v14789_v46, %v14751_v41  ;;  %v8053_v32 = vmul.f32 -1.442695, %v2276_v5  ;;  %v11855_v38 = vpop.permute.xlu0 %4789 }
 0x3d1   : > { %v4056_v29 = vmul.f32 1.442695, %v4048_v21  ;;  %v4051_v22 = vsub.f32 0.0, %v4043_v23  ;;  %v11842_v17 = vpop.eup %8650  ;;  %v4438_v4 = vadd.f32 1.0, %v8649_v27  ;;  %v8055_v45 = vmul.f32 -1.442695, %v2579_v51 }
 0x3d2   : > { %v4060_v0 = vmul.f32 1.442695, %v4050_v55  ;;  %v4058_v16 = vmul.f32 1.442695, %v4049_v58  ;;  %v11848_v1 = vpop.eup %8652  ;;  %v8060_v58 = vmul.f32 -1.442695, %v2278_v3 }
 0x3d3   : > { %8664 = vpow2.f32 %v4056_v29  ;;  %v4062_v56 = vmul.f32 1.442695, %v4051_v22  ;;  %14787 = vst [vmem:[#allocation210_spill] sm:$0xff] %v11848_v1  ;;  %v8655_v59 = vpop.eup %8654  ;;  %14790 = vst [vmem:[#allocation209_spill] sm:$0xff] %v11855_v38  ;;  %v11861_v22 = vpop.permute.xlu1 %4916  ;;  %v14793_v51 = vld [vmem:[#allocation81_spill] sm:$0xff]  ;;  %vm4177_vm2 = vcmp.ge.f32.partialorder %v11797_v60, 0.0 }
 0x3d4   : > { %8666 = vpow2.f32 %v4060_v0  ;;  %v8657_v13 = vpop.eup %8656  ;;  %v4437_v29 = vadd.f32 1.0, %v8655_v59  ;;  %14791 = vst [vmem:[#allocation33_spill] sm:$0xff] %v11861_v22  ;;  %v11874_v53 = vadd.f32 %v14793_v51, %v11832_v43  ;;  %vm4179_vm3 = vcmp.ge.f32.partialorder %v11804_v8, 0.0 }
 0x3d5   : > { %8668 = vpow2.f32 %v4058_v16  ;;  %v8659_v21 = vpop.eup %8658  ;;  %v4439_v37 = vadd.f32 1.0, %v8657_v13  ;;  %v14808_v13 = vld [vmem:[#allocation91_spill] sm:$0xff]  ;;  %vm4178_vm4 = vcmp.ge.f32.partialorder %v11806_v35, 0.0  ;;  %vm4180_vm5 = vcmp.ge.f32.partialorder %v11811_v24, 0.0 }
 0x3d6   : > { %8670 = vpow2.f32 %v4062_v56  ;;  %v8661_v55 = vpop.eup %8660  ;;  %v4444_v54 = vadd.f32 1.0, %v8659_v21 }
 0x3d7   : > { %8672 = vpow2.f32 %v8047_v44  ;;  %v8663_v23 = vpop.eup %8662  ;;  %v4446_v28 = vadd.f32 1.0, %v8661_v55  ;;  %v14818_v55 = vld [vmem:[#allocation94_spill] sm:$0xff] }
 0x3d8   : > { %8674 = vpow2.f32 %v8052_v9 }
 0x3d9   : > { %8676 = vrcp.f32 %v4436_v2  ;;  %v11870_v2 = vpop.permute.xlu0 %4921 }
 0x3da   : > { %8678 = vpow2.f32 %v8054_v31  ;;  %14792 = vst [vmem:[#allocation34_spill] sm:$0xff] %v11870_v2  ;;  %v14794_v31 = vld [vmem:[#allocation82_spill] sm:$0xff] }
 0x3db   : > { %8680 = vpow2.f32 %v8053_v32  ;;  %v11878_v46 = vadd.f32 %v14794_v31, %v11832_v43  ;;  %v14796_v32 = vld [vmem:[#allocation83_spill] sm:$0xff]  ;;  %v11895_v31 = vpop.permute.xlu1 %1108 }
 0x3dc   : > { %8682 = vrcp.f32 %v4438_v4  ;;  %v11885_v4 = vadd.f32 %v14796_v32, %v11832_v43  ;;  %14799 = vst [vmem:[#allocation36_spill] sm:$0xff] %v11895_v31  ;;  %v11923_v48 = vadd.f32 %v14808_v13, %v11895_v31  ;;  %v14816_v13 = vld [vmem:[#allocation93_spill] sm:$0xff] }
 0x3dd   : > { %v11857_v0 = vpop.eup %8664  ;;  %8684 = vpow2.f32 %v8055_v45  ;;  %v14797_v45 = vld [vmem:[#allocation84_spill] sm:$0xff] }
 0x3de   : > { %v11859_v16 = vpop.eup %8666  ;;  %8686 = vpow2.f32 %v8060_v58  ;;  %v4080_v44 = vadd.f32 1.0, %v11857_v0  ;;  %v11889_v58 = vadd.f32 %v14797_v45, %v11832_v43  ;;  %v14802_v43 = vld [vmem:[#allocation88_spill] sm:$0xff]  ;;  %14809 = vst [vmem:[#allocation40_spill] sm:$0xff] %v11923_v48 }
 0x3df   : > { %v11864_v57 = vpop.eup %8668  ;;  %8688 = vrcp.f32 %v4437_v29  ;;  %v4082_v5 = vadd.f32 1.0, %v11859_v16  ;;  %v14798_v29 = vld [vmem:[#allocation85_spill] sm:$0xff] }
 0x3e0   : > { %v11867_v27 = vpop.eup %8670  ;;  %8690 = vlog2.f32 %v4080_v44  ;;  %v4081_v9 = vadd.f32 1.0, %v11864_v57 }
 0x3e1   : > { %v8673_v56 = vpop.eup %8672  ;;  %8692 = vrcp.f32 %v4080_v44  ;;  %v4083_v3 = vadd.f32 1.0, %v11867_v27  ;;  %v11893_v44 = vadd.f32 %v14798_v29, %v11844_v26  ;;  %v11909_v29 = vadd.f32 %v14802_v43, %v11844_v26 }
 0x3e2   : > { %v8675_v40 = vpop.eup %8674  ;;  %8694 = vlog2.f32 %v4082_v5  ;;  %v4447_v48 = vadd.f32 1.0, %v8673_v56  ;;  %v14828_v56 = vld [vmem:[#allocation225_spill] sm:$0xff] }
 0x3e3   : > { %v11881_v59 = vpop.eup %8676  ;;  %8696 = vrcp.f32 %v4082_v5  ;;  %v14803_v5 = vld [vmem:[#allocation89_spill] sm:$0xff] }
 0x3e4   : > { %14795 = vst [vmem:[#allocation35_spill] sm:$0xff] %v11881_v59  ;;  %v8679_v51 = vpop.eup %8678  ;;  %v14801_v59 = vld [vmem:[#allocation87_spill] sm:$0xff]  ;;  %8698 = vlog2.f32 %v4081_v9  ;;  %v11913_v33 = vadd.f32 %v14803_v5, %v11895_v31  ;;  %v14812_v5 = vld [vmem:[#allocation92_spill] sm:$0xff] }
 0x3e5   : > { %v11903_v32 = vadd.f32 %v14801_v59, %v11844_v26  ;;  %v11905_v45 = vpop.eup %8680  ;;  %8700 = vrcp.f32 %v4081_v9  ;;  %v11919_v59 = vadd.f32 %v14806_v25, %v11895_v31  ;;  %v11927_v26 = vpop.permute.xlu0 %1113  ;;  %v11931_v21 = vadd.f32 %v14812_v5, %v11895_v31  ;;  %v14825_v31 = vld [vmem:[#allocation223_spill] sm:$0xff] }
 0x3e6   : > { %14804 = vst [vmem:[#allocation37_spill] sm:$0xff] %v11913_v33  ;;  %v11915_v52 = vpop.eup %8682  ;;  %8702 = vlog2.f32 %v4083_v3  ;;  %14811 = vst [vmem:[#allocation194_spill] sm:$0xff] %v11927_v26  ;;  %v4445_v9 = vadd.f32 1.0, %v8663_v23  ;;  %v14821_v23 = vld [vmem:[#allocation95_spill] sm:$0xff] }
 0x3e7   : > { %14805 = vst [vmem:[#allocation38_spill] sm:$0xff] %v11915_v52  ;;  %14807 = vst [vmem:[#allocation39_spill] sm:$0xff] %v11919_v59  ;;  %v11925_v43 = vpop.eup %8684  ;;  %v14814_v52 = vld [vmem:[#allocation244_spill] sm:$0xff]  ;;  %8704 = vrcp.f32 %v4083_v3  ;;  %v11939_v59 = vadd.f32 %v14816_v13, %v11927_v26  ;;  %v11949_v5 = vadd.f32 %v14821_v23, %v11927_v26  ;;  %v11957_v13 = vadd.f32 %v14825_v31, %v14763_v49  ;;  %v14830_v23 = vld [vmem:[#allocation247_spill] sm:$0xff] }
 0x3e8   : > { %14810 = vst [vmem:[#allocation193_spill] sm:$0xff] %v11925_v43  ;;  %14813 = vst [vmem:[#allocation195_spill] sm:$0xff] %v11931_v21  ;;  %v2280_v33 = vadd.f32 %v14814_v52, %v14751_v41  ;;  %v11935_v25 = vpop.eup %8686  ;;  %v11943_v43 = vadd.f32 %v14818_v55, %v11927_v26  ;;  %8706 = vrcp.f32 %v4439_v37  ;;  %v14823_v3 = vld [vmem:[#allocation96_spill] sm:$0xff]  ;;  %v11968_v41 = vmul.f32 -1.442695, %v14830_v23 }
 0x3e9   : > { %14815 = vst [vmem:[#allocation196_spill] sm:$0xff] %v11935_v25  ;;  %14817 = vst [vmem:[#allocation197_spill] sm:$0xff] %v11939_v59  ;;  %v11945_v63 = vpop.eup %8688  ;;  %v11953_v52 = vadd.f32 %v14823_v3, %v11927_v26  ;;  %8708 = vrcp.f32 %v4444_v54  ;;  %v14826_v55 = vld [vmem:[#allocation224_spill] sm:$0xff]  ;;  %v4072_v31 = vmin.f32 %v11797_v60, 0.0  ;;  %v4452_v59 = vadd.f32 1.0, %v8675_v40 }
 0x3ea   : > { %14819 = vst [vmem:[#allocation198_spill] sm:$0xff] %v11943_v43  ;;  %14820 = vst [vmem:[#allocation199_spill] sm:$0xff] %v11945_v63  ;;  %v8691_v25 = vpop.eup %8690  ;;  %v11961_v37 = vadd.f32 %v14826_v55, %v14763_v49  ;;  %v11965_v63 = vadd.f32 %v14828_v56, %v14763_v49  ;;  %8710 = vrcp.f32 %v4446_v28  ;;  %v11970_v26 = vmul.f32 -1.442695, %v2280_v33 }
 0x3eb   : > { %14822 = vst [vmem:[#allocation200_spill] sm:$0xff] %v11949_v5  ;;  %14824 = vst [vmem:[#allocation201_spill] sm:$0xff] %v11953_v52  ;;  %v8693_v3 = vpop.eup %8692  ;;  %8712 = vrcp.f32 %v4445_v9  ;;  %v4089_v54 = vmul.f32 0.6931472, %v8691_v25  ;;  %v11974_v56 = vadd.f32 1.0, %v8679_v51  ;;  %v4074_v23 = vmin.f32 %v11804_v8, 0.0 }
 0x3ec   : > { %14827 = vst [vmem:[#allocation202_spill] sm:$0xff] %v11961_v37  ;;  %14829 = vst [vmem:[#allocation203_spill] sm:$0xff] %v11965_v63  ;;  %v8695_v43 = vpop.eup %8694  ;;  %8714 = vrcp.f32 %v4447_v48  ;;  %v4185_v55 = vmul.f32 %v8693_v3, %v11857_v0  ;;  %v14831_v9 = vld [vmem:[#allocation16_spill] sm:$0xff]  ;;  %v4073_v51 = vmin.f32 %v11806_v35, 0.0 }
 0x3ed   : > { %v8697_v52 = vpop.eup %8696  ;;  %v4104_v28 = vsub.f32 %v4072_v31, %v4089_v54  ;;  %v4093_v21 = vmul.f32 0.6931472, %v8695_v43  ;;  %v11981_v48 = vsub.s32 2, %v14831_v9  ;;  %v4075_v43 = vmin.f32 %v11811_v24, 0.0 }
 0x3ee   : > { %v8699_v5 = vpop.eup %8698  ;;  %v4187_v33 = vmul.f32 %v8697_v52, %v11859_v16  ;;  %v4193_v2 = vsel %vm4177_vm2, %v8693_v3, %v4185_v55  ;;  %8716 = vrcp.f32 %v4452_v59 }
 0x3ef   : > { %v8701_v40 = vpop.eup %8700  ;;  %v4113_v0 = vsel %vm4112_vm1, %v4104_v28, 0.0  ;;  %v4106_v25 = vsub.f32 %v4074_v23, %v4093_v21  ;;  %v4091_v31 = vmul.f32 0.6931472, %v8699_v5  ;;  %8718 = vpow2.f32 %v11968_v41 }
 0x3f0   : > { %v8703_v54 = vpop.eup %8702  ;;  %v4186_v60 = vmul.f32 %v8701_v40, %v11864_v57  ;;  %v4114_v16 = vrot.slane %v4113_v0, 4  ;;  %v4195_v5 = vsel %vm4179_vm3, %v8697_v52, %v4187_v33  ;;  %v9329_v33 = vld [vmem:[%s10182_s30] sm:$0x77]  ;;  %8720 = vrcp.f32 %v11974_v56 }
 0x3f1   : > { %v8705_v22 = vpop.eup %8704  ;;  %v4127_v63 = vsel %vm4112_vm1, %v4106_v25, 0.0  ;;  %v4105_v37 = vsub.f32 %v4073_v51, %v4091_v31  ;;  %v4095_v38 = vmul.f32 0.6931472, %v8703_v54  ;;  %v12001_v31 = vsub.s32 6, %v14831_v9 }
 0x3f2   : > { %v11989_v28 = vpop.eup %8706  ;;  %v4128_v21 = vrot.slane %v4127_v63, 4  ;;  %v4194_v3 = vsel %vm4178_vm4, %v8701_v40, %v4186_v60  ;;  %v4188_v35 = vmul.f32 %v8705_v22, %v11867_v27  ;;  %v8024_v40 = vrot.slane %v11827_v19, 10 }
 0x3f3   : > { %14832 = vst [vmem:[#allocation204_spill] sm:$0xff] %v11989_v28  ;;  %v11994_v55 = vpop.eup %8708  ;;  %v4120_v57 = vsel %vm4112_vm1, %v4105_v37, 0.0  ;;  %v4268_v23 = vcombine.low %v4193_v2, %v4194_v3  ;;  %v4107_v1 = vsub.f32 %v4075_v43, %v4095_v38  ;;  %v4115_v38 = vadd.f32 %v4114_v16, %v4113_v0 }
 0x3f4   : > { %14833 = vst [vmem:[#allocation205_spill] sm:$0xff] %v11994_v55  ;;  %v11998_v25 = vpop.eup %8710  ;;  %v4121_v51 = vrot.slane %v4120_v57, 4  ;;  %v4196_v8 = vsel %vm4180_vm5, %v8705_v22, %v4188_v35  ;;  %v4129_v24 = vadd.f32 %v4128_v21, %v4127_v63  ;;  %v8028_v60 = vrot.slane %v11827_v19, 9  ;;  %v9330_v22 = vld [vmem:[%s10182_s30 + $0x8] sm:$0x77] }
 0x3f5   : > { %14834 = vst [vmem:[#allocation206_spill] sm:$0xff] %v11998_v25  ;;  %v12003_v52 = vpop.eup %8712  ;;  %v4276_v27 = vmul.f32 %v9329_v33, %v4268_v23  ;;  %v4308_v54 = vrot.slane %v4268_v23, 7  ;;  %v4269_v37 = vcombine.low %v4195_v5, %v4196_v8  ;;  %v8025_v43 = vrot.slane %v11836_v12, 10 }
 0x3f6   : > { %14835 = vst [vmem:[#allocation207_spill] sm:$0xff] %v12003_v52  ;;  %v12007_v2 = vpop.eup %8714  ;;  %v4453_v55 = vadd.f32 1.0, %v11905_v45  ;;  %v4122_v52 = vadd.f32 %v4121_v51, %v4120_v57  ;;  %v8029_v5 = vrot.slane %v11836_v12, 9  ;;  %v4134_v63 = vsel %vm4112_vm1, %v4107_v1, 0.0  ;;  %v14840_v1 = vld [vmem:[#allocation226_spill] sm:$0xff] }
 0x3f7   : > { %v12011_v3 = vadd.f32 %v8024_v40, %v4276_v27  ;;  %v4316_v25 = vmul.f32 %v9329_v33, %v4308_v54  ;;  %v4277_v35 = vmul.f32 %v9330_v22, %v4269_v37  ;;  %v4309_v28 = vrot.slane %v4269_v37, 7 }
 0x3f8   : > { %v4116_v16 = vrot.slane %v4115_v38, 2  ;;  %v4130_v21 = vrot.slane %v4129_v24, 2  ;;  %v9434_v8 = vmov 1966171168   ;;  %8722 = vrcp.f32 %v4453_v55 }
 0x3f9   : > { %14836 = vst [vmem:[#allocation208_spill] sm:$0xff] %v12011_v3  ;;  %v12016_v23 = vadd.f32 %v8028_v60, %v4316_v25  ;;  %v12019_v0 = vadd.f32 %v8025_v43, %v4277_v35  ;;  %v4317_v19 = vmul.f32 %v9330_v22, %v4309_v28  ;;  %v12022_v33 = vunpack.c.l.s4 %v9434_v8 }
 0x3fa   : > { %v12033_v28 = vadd.f32 %v14840_v1, %v14763_v49  ;;  %v4123_v41 = vrot.slane %v4122_v52, 2  ;;  %v4135_v57 = vrot.slane %v4134_v63, 4  ;;  %8724 = vpow2.f32 %v11970_v26 }
 0x3fb   : > { %14837 = vst [vmem:[#allocation213_spill] sm:$0xff] %v12016_v23  ;;  %14838 = vst [vmem:[#allocation214_spill] sm:$0xff] %v12019_v0  ;;  %v4799_v45 = vrot.slane %v12016_v23, %v11981_v48  ;;  %v4803_v12 = vrot.slane %v12016_v23, %v12001_v31  ;;  %v12029_v59 = vadd.f32 %v8029_v5, %v4317_v19  ;;  %v4215_v55 = vunpack.c.0.s8 %v12022_v33 }
 0x3fc   : > { %v12046_v40 = vadd.f32 %v4116_v16, %v4115_v38  ;;  %v12048_v49 = vadd.f32 %v4130_v21, %v4129_v24  ;;  %v12061_v22 = vadd.f32 %v4123_v41, %v4122_v52  ;;  %v12063_v26 = vadd.f32 %v4135_v57, %v4134_v63  ;;  %v12075_v52 = vpop.eup %8716 }
 0x3fd   : > { %14839 = vst [vmem:[#allocation215_spill] sm:$0xff] %v12029_v59  ;;  %v12036_v25 = vrot.slane %v4799_v45, %v11981_v48  ;;  %v4807_v56 = vrot.slane %v12029_v59, %v11981_v48  ;;  %v4811_v51 = vrot.slane %v12029_v59, %v12001_v31  ;;  %v12043_v27 = vrot.slane %v4803_v12, %v11981_v48 }
 0x3ff   : > { %v12052_v54 = vrot.slane %v4807_v56, %v11981_v48  ;;  %v4869_v37 = vmul.f32 %v12043_v27, %v11762_v36  ;;  %v4877_v60 = vmul.f32 %v12043_v27, %v11770_v15  ;;  %v12059_v43 = vrot.slane %v4811_v51, %v11981_v48  ;;  %v12087_v56 = vpop.eup %8718 }
 0x400   : > { %v4868_v38 = vmul.f32 %v12036_v25, %v11762_v36  ;;  %v4876_v24 = vmul.f32 %v12036_v25, %v11770_v15 }
 0x401   : > { %v4925_v35 = vadd.f32 %v11802_v50, %v4869_v37  ;;  %v4933_v5 = vadd.f32 %v11821_v10, %v4877_v60  ;;  %v4871_v19 = vmul.f32 %v12059_v43, %v11762_v36  ;;  %v4879_v16 = vmul.f32 %v12059_v43, %v11770_v15 }
 0x402   : > { %v4924_v63 = vadd.f32 %v11802_v50, %v4868_v38  ;;  %v4932_v21 = vadd.f32 %v11821_v10, %v4876_v24  ;;  %v4870_v8 = vmul.f32 %v12052_v54, %v11762_v36  ;;  %v4878_v45 = vmul.f32 %v12052_v54, %v11770_v15  ;;  %v12093_v24 = vpop.eup %8720 }
 0x403   : > { %v4957_v12 = vmul.f32 %v11744_v30, %v4925_v35  ;;  %v4965_v1 = vmul.f32 %v11768_v39, %v4933_v5  ;;  %v4927_v41 = vadd.f32 %v11802_v50, %v4871_v19  ;;  %v4935_v57 = vadd.f32 %v11821_v10, %v4879_v16  ;;  %v12099_v19 = vpop.eup %8722 }
 0x404   : > { %v4956_v51 = vmul.f32 %v11740_v42, %v4924_v63  ;;  %v4964_v37 = vmul.f32 %v11750_v34, %v4932_v21  ;;  %v4926_v60 = vadd.f32 %v11802_v50, %v4870_v8  ;;  %v4934_v38 = vadd.f32 %v11821_v10, %v4878_v45 }
 0x405   : > { %v4989_v30 = vadd.f32 %v4957_v12, %v11885_v4  ;;  %v4997_v39 = vadd.f32 %v4965_v1, %v11903_v32  ;;  %v4959_v35 = vmul.f32 %v11746_v6, %v4927_v41  ;;  %v4967_v5 = vmul.f32 %v11778_v14, %v4935_v57  ;;  %v12107_v6 = vpop.eup %8724 }
 0x406   : > { %v4988_v42 = vadd.f32 %v4956_v51, %v11874_v53  ;;  %v4996_v34 = vadd.f32 %v4964_v37, %v11893_v44  ;;  %v4958_v16 = vmul.f32 %v11742_v7, %v4926_v60  ;;  %v4966_v63 = vmul.f32 %v11754_v61, %v4934_v38 }
 0x407   : > { %v5021_v8 = vmax.f32 %v4989_v30, 0.0  ;;  %v5029_v45 = vmax.f32 %v4997_v39, 0.0  ;;  %v4991_v4 = vadd.f32 %v4959_v35, %v11889_v58  ;;  %v4999_v32 = vadd.f32 %v4967_v5, %v11909_v29 }
 0x408   : > { %v5020_v53 = vmax.f32 %v4988_v42, 0.0  ;;  %v5028_v41 = vmax.f32 %v4996_v34, 0.0  ;;  %v4990_v44 = vadd.f32 %v4958_v16, %v11878_v46  ;;  %v4998_v34 = vadd.f32 %v4966_v63, %v11899_v20  ;;  %v14844_v20 = vld [vmem:[#allocation203_spill] sm:$0xff] }
 0x409   : > { %v5057_v37 = vpack.c.bf16 %v5029_v45, %v5021_v8  ;;  %v5023_v58 = vmax.f32 %v4991_v4, 0.0  ;;  %v5031_v39 = vmax.f32 %v4999_v32, 0.0  ;;  %v4885_v16 = vmul.f32 %v12043_v27, %v11853_v62  ;;  %v14842_v45 = vld [vmem:[#allocation209_spill] sm:$0xff]  ;;  %v14843_v32 = vld [vmem:[#allocation202_spill] sm:$0xff] }
 0x40a   : > { %v5056_v35 = vpack.c.bf16 %v5028_v41, %v5020_v53  ;;  %v4893_v4 = vmul.f32 %v12043_v27, %v14842_v45 }
 0x40b   : > { %5112 = vmatprep.subr.bf16.mxu0 %v5057_v37  ;;  %v5059_v8 = vpack.c.bf16 %v5031_v39, %v5023_v58  ;;  %v5030_v58 = vmax.f32 %v4998_v34, 0.0 }
 0x40c   : > { %v3976_v21 = vpop.f32.mrb[236].mxu0  ;;  %5113 = vmatpush1.bf16.msra.mxu0 %v5056_v35 }
 0x40d   : > { %v3977_v14 = vadd.f32 %v3976_v21, %v14771_v47  ;;  %v4017_v12 = vpop.f32.mrb[236].mxu1  ;;  %v3978_v1 = vpop.f32.mrb[237].mxu0  ;;  %5165 = vmatprep.subr.bf16.mxu1 %v5059_v8 }
 0x40e   : > { %v4018_v7 = vadd.f32 %v4017_v12, %v14771_v47  ;;  %v3979_v61 = vadd.f32 %v3978_v1, %v14771_v47  ;;  %v4019_v57 = vpop.f32.mrb[237].mxu1  ;;  %v3980_v51 = vpop.f32.mrb[238].mxu0  ;;  %v4125_v12 = vrot.slane %v12061_v22, 1 }
 0x40f   : > { %v4028_v29 = vmul.f32 %v11830_v11, %v3977_v14  ;;  %v4020_v60 = vadd.f32 %v4019_v57, %v14771_v47  ;;  %v4021_v38 = vpop.f32.mrb[238].mxu1  ;;  %v3981_v30 = vpop.f32.mrb[239].mxu0  ;;  %v14841_v11 = vld [vmem:[#allocation210_spill] sm:$0xff] }
 0x410   : > { %v4030_v5 = vmul.f32 %v11838_v18, %v4018_v7  ;;  %v4029_v46 = vmul.f32 %v11842_v17, %v3979_v61  ;;  %v4022_v42 = vpop.f32.mrb[239].mxu1  ;;  %v4118_v18 = vrot.slane %v12046_v40, 1  ;;  %v4137_v17 = vrot.slane %v12063_v26, 2  ;;  %v14845_v61 = vld [vmem:[#allocation33_spill] sm:$0xff] }
 0x411   : > { %v12121_v21 = vadd.f32 %v4028_v29, %v11957_v13  ;;  %v4031_v47 = vmul.f32 %v14841_v11, %v4020_v60  ;;  %v4132_v13 = vrot.slane %v12048_v49, 1  ;;  %v5022_v7 = vmax.f32 %v4990_v44, 0.0  ;;  %v14846_v29 = vld [vmem:[#allocation34_spill] sm:$0xff] }
 0x412   : > { %v12129_v14 = vadd.f32 %v4030_v5, %v14843_v32  ;;  %v12132_v63 = vadd.f32 %v4029_v46, %v14844_v20  ;;  %v4941_v57 = vadd.f32 %v14845_v61, %v4885_v16  ;;  %v4949_v60 = vadd.f32 %v14846_v29, %v4893_v4  ;;  %v14849_v4 = vld [vmem:[#allocation29_spill] sm:$0xff]  ;;  %v14851_v32 = vld [vmem:[#allocation200_spill] sm:$0xff] }
 0x413   : > { %v4044_v1 = vand.u32 2147483647, %v12121_v21  ;;  %v12138_v53 = vadd.f32 %v4031_v47, %v12033_v28  ;;  %v4138_v38 = vadd.f32 %v4137_v17, %v12063_v26  ;;  %v12153_v44 = vsub.s32 %v4215_v55, %v14831_v9  ;;  %v14848_v47 = vld [vmem:[#allocation26_spill] sm:$0xff] }
 0x414   : > { %v4046_v27 = vand.u32 2147483647, %v12129_v14  ;;  %v4045_v41 = vand.u32 2147483647, %v12132_v63  ;;  %v12145_v37 = vcombine.low %v12121_v21, %v12132_v63  ;;  %v4119_v5 = vadd.f32 %v4118_v18, %v12046_v40 }
 0x415   : > { %v4052_v51 = vsub.f32 0.0, %v4044_v1  ;;  %v4047_v39 = vand.u32 2147483647, %v12138_v53  ;;  %14847 = vst [vmem:[#allocation216_spill] sm:$0xff] %v12153_v44  ;;  %v4133_v46 = vadd.f32 %v4132_v13, %v12048_v49  ;;  %v12159_v26 = vcombine.low %v12129_v14, %v12138_v53  ;;  %v14850_v49 = vld [vmem:[#allocation40_spill] sm:$0xff] }
 0x416   : > { %v4054_v28 = vsub.f32 0.0, %v4046_v27  ;;  %v4053_v30 = vsub.f32 0.0, %v4045_v41  ;;  %v5058_v11 = vpack.c.bf16 %v5030_v58, %v5022_v7  ;;  %v4973_v8 = vmul.f32 %v14848_v47, %v4941_v57  ;;  %v14855_v47 = vld [vmem:[#allocation28_spill] sm:$0xff] }
 0x417   : > { %v4064_v35 = vmul.f32 1.442695, %v4052_v51  ;;  %v4055_v16 = vsub.f32 0.0, %v4047_v39  ;;  %v4981_v17 = vmul.f32 %v14849_v4, %v4949_v60  ;;  %v4139_v33 = vrot.slane %v4138_v38, 1 }
 0x418   : > { %v4068_v42 = vmul.f32 1.442695, %v4054_v28  ;;  %v4066_v34 = vmul.f32 1.442695, %v4053_v30  ;;  %v4126_v40 = vadd.f32 %v4125_v12, %v12061_v22  ;;  %5166 = vmatpush1.bf16.msra.mxu1 %v5058_v11  ;;  %v5005_v18 = vadd.f32 %v4973_v8, %v14850_v49  ;;  %v14852_v30 = vld [vmem:[#allocation27_spill] sm:$0xff]  ;;  %v14857_v49 = vld [vmem:[#allocation25_spill] sm:$0xff] }
 0x419   : > { %8726 = vpow2.f32 %v4064_v35  ;;  %v4070_v55 = vmul.f32 1.442695, %v4055_v16  ;;  %v5013_v20 = vadd.f32 %v4981_v17, %v14851_v32  ;;  %v4887_v13 = vmul.f32 %v12059_v43, %v11853_v62  ;;  %v14854_v16 = vld [vmem:[#allocation212_spill] sm:$0xff]  ;;  %v14856_v17 = vld [vmem:[#allocation195_spill] sm:$0xff] }
 0x41a   : > { %8728 = vpow2.f32 %v4068_v42  ;;  %v4895_v1 = vmul.f32 %v12059_v43, %v14842_v45  ;;  %v4884_v27 = vmul.f32 %v12036_v25, %v11853_v62  ;;  %v4892_v41 = vmul.f32 %v12036_v25, %v14842_v45  ;;  %v14853_v42 = vld [vmem:[#allocation30_spill] sm:$0xff] }
 0x41b   : > { %8730 = vpow2.f32 %v4066_v34  ;;  %v5037_v22 = vmax.f32 %v5005_v18, 0.0  ;;  %v5045_v12 = vmax.f32 %v5013_v20, 0.0  ;;  %v4943_v7 = vadd.f32 %v14845_v61, %v4887_v13  ;;  %v14858_v20 = vld [vmem:[#allocation201_spill] sm:$0xff] }
 0x41c   : > { %8732 = vpow2.f32 %v4070_v55  ;;  %v4886_v57 = vmul.f32 %v12052_v54, %v11853_v62  ;;  %v4951_v51 = vadd.f32 %v14846_v29, %v4895_v1  ;;  %v4940_v58 = vadd.f32 %v14845_v61, %v4884_v27  ;;  %v14859_v1 = vld [vmem:[#allocation37_spill] sm:$0xff] }
 0x41d   : > { %v4948_v60 = vadd.f32 %v14846_v29, %v4892_v41  ;;  %v4894_v43 = vmul.f32 %v12052_v54, %v14842_v45  ;;  %v5065_v28 = vpack.c.bf16 %v5045_v12, %v5037_v22  ;;  %v4975_v39 = vmul.f32 %v14852_v30, %v4943_v7  ;;  %v14861_v41 = vld [vmem:[#allocation211_spill] sm:$0xff] }
 0x41e   : > { %v4942_v25 = vadd.f32 %v14845_v61, %v4886_v57  ;;  %v4140_v35 = vadd.f32 %v4139_v33, %v4138_v38  ;;  %v4983_v34 = vmul.f32 %v14853_v42, %v4951_v51  ;;  %v4972_v11 = vmul.f32 %v14854_v16, %v4940_v58  ;;  %v14860_v38 = vld [vmem:[#allocation197_spill] sm:$0xff]  ;;  %v14862_v57 = vld [vmem:[#allocation39_spill] sm:$0xff] }
 0x41f   : > { %v4980_v8 = vmul.f32 %v14855_v47, %v4948_v60  ;;  %v4950_v4 = vadd.f32 %v14846_v29, %v4894_v43  ;;  %5114 = vmatprep.subr.bf16.mxu0 %v5065_v28  ;;  %v5007_v55 = vadd.f32 %v4975_v39, %v14856_v17  ;;  %v4209_v54 = vcombine.low %v4119_v5, %v4126_v40  ;;  %v14867_v17 = vld [vmem:[#allocation245_spill] sm:$0xff] }
 0x420   : > { %v4974_v18 = vmul.f32 %v14857_v49, %v4942_v25  ;;  %v4210_v32 = vcombine.low %v4133_v46, %v4140_v35  ;;  %v5015_v13 = vadd.f32 %v4983_v34, %v14858_v20  ;;  %v5004_v27 = vadd.f32 %v4972_v11, %v14859_v1  ;;  %v14865_v25 = vld [vmem:[#allocation198_spill] sm:$0xff]  ;;  %v14869_v20 = vld [vmem:[#allocation193_spill] sm:$0xff]  ;;  %v14870_v1 = vld [vmem:[#allocation196_spill] sm:$0xff] }
 0x421   : > { %v5012_v33 = vadd.f32 %v4980_v8, %v14860_v38  ;;  %v4982_v22 = vmul.f32 %v14861_v41, %v4950_v4  ;;  %v5039_v7 = vmax.f32 %v5007_v55, 0.0  ;;  %v12198_v58 = vrot.slane %v4209_v54, %v12153_v44  ;;  %v14866_v4 = vld [vmem:[#allocation246_spill] sm:$0xff]  ;;  %v14872_v41 = vld [vmem:[#allocation264_spill] sm:$0xff] }
 0x422   : > { %v5006_v51 = vadd.f32 %v4974_v18, %v14862_v57  ;;  %v12201_v60 = vrot.slane %v4210_v32, %v12153_v44  ;;  %v5047_v40 = vmax.f32 %v5015_v13, 0.0  ;;  %v5036_v43 = vmax.f32 %v5004_v27, 0.0  ;;  %v12220_v18 = vld [vmem:[%s14208_s13] sm:$0xff]  }
 0x423   : > { %v12194_v12 = vpop.eup %8726  ;;  %14863 = vst [vmem:[#allocation218_spill] sm:$0xff] %v12198_v58  ;;  %v5044_v28 = vmax.f32 %v5012_v33, 0.0  ;;  %v5014_v35 = vadd.f32 %v4982_v22, %v14865_v25  ;;  %v2583_v55 = vadd.f32 %v14867_v17, %v14866_v4  ;;  %14868 = vst [vmem:[#allocation42_spill] sm:$0xff] %v12220_v18  ;;  %v4455_v13 = vadd.f32 1.0, %v14869_v20  ;;  %v14871_v33 = vld [vmem:[#allocation31_spill] sm:$0xff]  ;;  %v14877_v25 = vld [vmem:[#allocation32_spill] sm:$0xff] }
 0x424   : > { %14864 = vst [vmem:[#allocation41_spill] sm:$0xff] %v12201_v60  ;;  %v12203_v5 = vpop.eup %8728  ;;  %v4084_v46 = vadd.f32 1.0, %v12194_v12  ;;  %v5038_v42 = vmax.f32 %v5006_v51, 0.0  ;;  %v5067_v47 = vpack.c.bf16 %v5047_v40, %v5039_v7  ;;  %v4460_v27 = vadd.f32 1.0, %v14870_v1  ;;  %v14873_v7 = vld [vmem:[#allocation265_spill] sm:$0xff]  ;;  %v14874_v51 = vld [vmem:[#allocation266_spill] sm:$0xff] }
 0x425   : > { %v12206_v30 = vpop.eup %8730  ;;  %v4086_v39 = vadd.f32 1.0, %v12203_v5  ;;  %v5064_v8 = vpack.c.bf16 %v5044_v28, %v5036_v43  ;;  %v5046_v49 = vmax.f32 %v5014_v35, 0.0  ;;  %v8063_v38 = vmul.f32 -1.442695, %v2583_v55  ;;  %v14876_v28 = vld [vmem:[#allocation267_spill] sm:$0xff]  ;;  %v14878_v35 = vld [vmem:[#allocation268_spill] sm:$0xff] }
 0x426   : > { %v12212_v16 = vpop.eup %8732  ;;  %8734 = vlog2.f32 %v4084_v46  ;;  %v4085_v11 = vadd.f32 1.0, %v12206_v30  ;;  %5167 = vmatprep.subr.bf16.mxu1 %v5067_v47  ;;  %v12229_v22 = vadd.f32 %v14872_v41, %v14871_v33  ;;  %v12233_v57 = vadd.f32 %v14873_v7, %v14871_v33  ;;  %v14882_v55 = vld [vmem:[#allocation36_spill] sm:$0xff]  ;;  %v14888_v41 = vld [vmem:[#allocation275_spill] sm:$0xff] }
 0x427   : > { %8736 = vrcp.f32 %v4084_v46  ;;  %v4087_v54 = vadd.f32 1.0, %v12212_v16  ;;  %5115 = vmatpush1.bf16.msra.mxu0 %v5064_v8  ;;  %v5066_v32 = vpack.c.bf16 %v5046_v49, %v5038_v42  ;;  %v12237_v46 = vadd.f32 %v14874_v51, %v14871_v33  ;;  %v14880_v8 = vld [vmem:[#allocation270_spill] sm:$0xff]  ;;  %v14883_v49 = vld [vmem:[#allocation272_spill] sm:$0xff] }
 0x428   : > { %8738 = vlog2.f32 %v4086_v39  ;;  %v14875_v40 = vmov 0   ;;  %v4462_v43 = vadd.f32 1.0, %v12087_v56  ;;  %v12247_v42 = vadd.f32 %v14878_v35, %v14877_v25  ;;  %v14881_v56 = vld [vmem:[#allocation271_spill] sm:$0xff]  ;;  %v14889_v51 = vld [vmem:[#allocation194_spill] sm:$0xff]  ;;  %v14891_v35 = vld [vmem:[#allocation277_spill] sm:$0xff] }
 0x429   : > { %8740 = vrcp.f32 %v4086_v39  ;;  %5168 = vmatpush1.bf16.msra.mxu1 %v5066_v32  ;;  %v12243_v39 = vadd.f32 %v14876_v28, %v14871_v33  ;;  %v12255_v4 = vadd.f32 %v14880_v8, %v14877_v25  ;;  %v12259_v17 = vadd.f32 %v14881_v56, %v14877_v25  ;;  %v14884_v32 = vld [vmem:[#allocation273_spill] sm:$0xff]  ;;  %v12279_v33 = vld [vmem:[%s14208_s13 + $0x8] sm:$0xff]   ;;  %v14890_v28 = vld [vmem:[#allocation276_spill] sm:$0xff] }
 0x42a   : > { %8742 = vlog2.f32 %v4085_v11  ;;  %8106 = vmatmul.mubr.msk.bf16.vlgmr.msra.gmra.mrb[240].mxu0 %vm1451_vm0, %v12220_v18  ;;  %v12269_v20 = vadd.f32 %v14884_v32, %v14882_v55  ;;  %14887 = vst [vmem:[#allocation44_spill] sm:$0xff] %v12279_v33  ;;  %v12283_v7 = vadd.f32 %v14888_v41, %v14882_v55  ;;  %v14893_v56 = vld [vmem:[#allocation278_spill] sm:$0xff]  ;;  %vm4181_vm6 = vcmp.ge.f32.partialorder %v12121_v21, 0.0 }
 0x42b   : > { %8744 = vrcp.f32 %v4085_v11  ;;  %5154 = vmatprep.mubr.bf16.mxu0 %v14875_v40  ;;  %v14879_v11 = vld [vmem:[#allocation269_spill] sm:$0xff]  ;;  %vm4183_vm7 = vcmp.ge.f32.partialorder %v12129_v14, 0.0  ;;  %vm4182_vm8 = vcmp.ge.f32.partialorder %v12132_v63, 0.0  ;;  %v8026_v59 = vrot.slane %v12145_v37, 10 }
 0x42c   : > { %8746 = vlog2.f32 %v4087_v54  ;;  %v12251_v47 = vadd.f32 %v14879_v11, %v14877_v25  ;;  %8108 = vmatmul.mubr.msk.bf16.vlgmr.msra.gmra.mrb[240].mxu1 %vm1451_vm0, %v12220_v18  ;;  %14885 = vst [vmem:[#allocation43_spill] sm:$0xff] %v12269_v20  ;;  %v12287_v25 = vadd.f32 %v14890_v28, %v14889_v51  ;;  %v12291_v11 = vadd.f32 %v14891_v35, %v14889_v51 }
 0x42d   : > { %8748 = vrcp.f32 %v4087_v54  ;;  %v12265_v54 = vadd.f32 %v14883_v49, %v14882_v55  ;;  %5207 = vmatprep.mubr.bf16.mxu1 %v14875_v40  ;;  %v12295_v49 = vadd.f32 %v14893_v56, %v14889_v51  ;;  %v4078_v28 = vmin.f32 %v12129_v14, 0.0 }
 0x42e   : > { %8750 = vrcp.f32 %v4455_v13  ;;  %v14886_v13 = vld [vmem:[#allocation274_spill] sm:$0xff]  ;;  %14892 = vst [vmem:[#allocation227_spill] sm:$0xff] %v12291_v11  ;;  %v4077_v56 = vmin.f32 %v12132_v63, 0.0  ;;  %v8030_v0 = vrot.slane %v12145_v37, 9  ;;  %vm4184_vm9 = vcmp.ge.f32.partialorder %v12138_v53, 0.0 }
 0x42f   : > { %8752 = vrcp.f32 %v4460_v27  ;;  %v12273_v1 = vadd.f32 %v14886_v13, %v14882_v55  ;;  %v12299_v55 = vadd.f32 1.0, %v12107_v6 }
 0x430   : > { %v8735_v27 = vpop.eup %8734  ;;  %8754 = vpow2.f32 %v8063_v38  ;;  %v4076_v38 = vmin.f32 %v12121_v21, 0.0 }
 0x431   : > { %v8737_v8 = vpop.eup %8736  ;;  %8756 = vrcp.f32 %v4462_v43  ;;  %v4097_v32 = vmul.f32 0.6931472, %v8735_v27 }
 0x432   : > { %v8739_v13 = vpop.eup %8738  ;;  %v4189_v41 = vmul.f32 %v8737_v8, %v12194_v12  ;;  %8107 = vmatmul.mubr.msk.bf16.gmra.mrb[244].mxu0 %vm1451_vm0, %v12279_v33  ;;  %v4079_v12 = vmin.f32 %v12138_v53, 0.0  ;;  %8758 = vrcp.f32 %v12299_v55 }
 0x433   : > { %v8741_v35 = vpop.eup %8740  ;;  %v4108_v34 = vsub.f32 %v4076_v38, %v4097_v32  ;;  %v4101_v43 = vmul.f32 0.6931472, %v8739_v13  ;;  %5250 = vmatprep.mubr.bf16.mxu0 %v14875_v40 }
 0x434   : > { %v8743_v27 = vpop.eup %8742  ;;  %v4191_v6 = vmul.f32 %v8741_v35, %v12203_v5  ;;  %v4197_v5 = vsel %vm4181_vm6, %v8737_v8, %v4189_v41  ;;  %8109 = vmatmul.mubr.msk.bf16.gmra.mrb[244].mxu1 %vm1451_vm0, %v12279_v33 }
 0x435   : > { %v8745_v38 = vpop.eup %8744  ;;  %v4141_v32 = vsel %vm4112_vm1, %v4108_v34, 0.0  ;;  %v4110_v13 = vsub.f32 %v4078_v28, %v4101_v43  ;;  %v4099_v23 = vmul.f32 0.6931472, %v8743_v27  ;;  %5303 = vmatprep.mubr.bf16.mxu1 %v14875_v40 }
 0x436   : > { %v8747_v3 = vpop.eup %8746  ;;  %v4142_v9 = vrot.slane %v4141_v32, 4  ;;  %v4190_v18 = vmul.f32 %v8745_v38, %v12206_v30  ;;  %v4199_v34 = vsel %vm4183_vm7, %v8741_v35, %v4191_v6 }
 0x437   : > { %v8749_v60 = vpop.eup %8748  ;;  %v4155_v58 = vsel %vm4112_vm1, %v4110_v13, 0.0  ;;  %v4109_v28 = vsub.f32 %v4077_v56, %v4099_v23  ;;  %v4103_v37 = vmul.f32 0.6931472, %v8747_v3  ;;  %v8027_v3 = vrot.slane %v12159_v26, 10 }
 0x438   : > { %v12325_v43 = vpop.eup %8750  ;;  %v4143_v21 = vadd.f32 %v4142_v9, %v4141_v32  ;;  %v4156_v30 = vrot.slane %v4155_v58, 4  ;;  %v4198_v8 = vsel %vm4182_vm8, %v8745_v38, %v4190_v18  ;;  %v4192_v41 = vmul.f32 %v8749_v60, %v12212_v16  ;;  %v9331_v18 = vld [vmem:[%s10182_s30 + $0x10] sm:$0x77] }
 0x439   : > { %v12330_v27 = vpop.eup %8752  ;;  %v4148_v13 = vsel %vm4112_vm1, %v4109_v28, 0.0  ;;  %v4270_v14 = vcombine.low %v4197_v5, %v4198_v8  ;;  %v4111_v35 = vsub.f32 %v4079_v12, %v4103_v37 }
 0x43a   : > { %v8755_v23 = vpop.eup %8754  ;;  %v4144_v56 = vrot.slane %v4143_v21, 2  ;;  %v4157_v6 = vadd.f32 %v4156_v30, %v4155_v58  ;;  %v4149_v33 = vrot.slane %v4148_v13, 4  ;;  %v4200_v9 = vsel %vm4184_vm9, %v8749_v60, %v4192_v41  ;;  %v9332_v58 = vld [vmem:[%s10182_s30 + $0x18] sm:$0x77] }
 0x43b   : > { %v12336_v63 = vpop.eup %8756  ;;  %v4278_v16 = vmul.f32 %v9331_v18, %v4270_v14  ;;  %v4310_v38 = vrot.slane %v4270_v14, 7  ;;  %v4162_v32 = vsel %vm4112_vm1, %v4111_v35, 0.0  ;;  %v4271_v28 = vcombine.low %v4199_v34, %v4200_v9 }
 0x43c   : > { %14894 = vst [vmem:[#allocation49_spill] sm:$0xff] %v12336_v63  ;;  %v4145_v5 = vadd.f32 %v4144_v56, %v4143_v21  ;;  %v4158_v12 = vrot.slane %v4157_v6, 2  ;;  %v4150_v37 = vadd.f32 %v4149_v33, %v4148_v13  ;;  %v4163_v8 = vrot.slane %v4162_v32, 4 }
 0x43d   : > { %v12340_v40 = vadd.f32 %v8026_v59, %v4278_v16  ;;  %v4318_v44 = vmul.f32 %v9331_v18, %v4310_v38  ;;  %v4279_v30 = vmul.f32 %v9332_v58, %v4271_v28  ;;  %v4311_v11 = vrot.slane %v4271_v28, 7 }
 0x43e   : > { %v4463_v53 = vadd.f32 1.0, %v8755_v23  ;;  %v4159_v60 = vadd.f32 %v4158_v12, %v4157_v6  ;;  %v4151_v41 = vrot.slane %v4150_v37, 2  ;;  %v4164_v20 = vadd.f32 %v4163_v8, %v4162_v32 }
 0x43f   : > { %14895 = vst [vmem:[#allocation50_spill] sm:$0xff] %v12340_v40  ;;  %v12343_v63 = vadd.f32 %v8030_v0, %v4318_v44  ;;  %v12345_v14 = vadd.f32 %v8027_v3, %v4279_v30  ;;  %v4319_v35 = vmul.f32 %v9332_v58, %v4311_v11  ;;  %v8031_v34 = vrot.slane %v12159_v26, 9  ;;  %v14899_v0 = vld [vmem:[#allocation279_spill] sm:$0xff] }
 0x440   : > { %v4146_v21 = vrot.slane %v4145_v5, 1  ;;  %v4160_v33 = vrot.slane %v4159_v60, 1  ;;  %v4152_v13 = vadd.f32 %v4151_v41, %v4150_v37  ;;  %v4165_v59 = vrot.slane %v4164_v20, 2 }
 0x441   : > { %14896 = vst [vmem:[#allocation51_spill] sm:$0xff] %v12343_v63  ;;  %14897 = vst [vmem:[#allocation52_spill] sm:$0xff] %v12345_v14  ;;  %v4815_v56 = vrot.slane %v12343_v63, %v11981_v48  ;;  %v4819_v23 = vrot.slane %v12343_v63, %v12001_v31  ;;  %v12353_v6 = vadd.f32 %v8031_v34, %v4319_v35  ;;  %8760 = vrcp.f32 %v4463_v53 }
 0x442   : > { %v12357_v44 = vadd.f32 %v14899_v0, %v14889_v51  ;;  %v4153_v26 = vrot.slane %v4152_v13, 1  ;;  %v12359_v11 = vadd.f32 %v4165_v59, %v4164_v20  ;;  %v12370_v38 = vadd.f32 %v4146_v21, %v4145_v5  ;;  %v14901_v59 = vld [vmem:[#allocation207_spill] sm:$0xff] }
 0x443   : > { %14898 = vst [vmem:[#allocation237_spill] sm:$0xff] %v12353_v6  ;;  %v12362_v3 = vrot.slane %v4815_v56, %v11981_v48  ;;  %v4823_v55 = vrot.slane %v12353_v6, %v11981_v48  ;;  %v4827_v9 = vrot.slane %v12353_v6, %v12001_v31  ;;  %v4859_v18 = vrot.slane %v4819_v23, %v11981_v48 }
 0x444   : > { %v4167_v16 = vrot.slane %v12359_v11, 1  ;;  %v12372_v51 = vadd.f32 %v4153_v26, %v4152_v13  ;;  %v12374_v32 = vadd.f32 %v4160_v33, %v4159_v60  ;;  %v14900_v33 = vld [vmem:[#allocation199_spill] sm:$0xff] }
 0x445   : > { %v12377_v20 = vrot.slane %v4823_v55, %v11981_v48  ;;  %v4873_v28 = vmul.f32 %v4859_v18, %v11762_v36  ;;  %v4881_v12 = vmul.f32 %v4859_v18, %v11770_v15  ;;  %v4867_v37 = vrot.slane %v4827_v9, %v11981_v48  ;;  %v14902_v26 = vld [vmem:[#allocation35_spill] sm:$0xff]  ;;  %v14903_v9 = vld [vmem:[#allocation205_spill] sm:$0xff] }
 0x446   : > { %v4872_v31 = vmul.f32 %v12362_v3, %v11762_v36  ;;  %v4880_v5 = vmul.f32 %v12362_v3, %v11770_v15  ;;  %v4889_v8 = vmul.f32 %v4859_v18, %v11853_v62  ;;  %v4897_v58 = vmul.f32 %v4859_v18, %v14842_v45 }
 0x447   : > { %v4929_v30 = vadd.f32 %v11802_v50, %v4873_v28  ;;  %v4937_v53 = vadd.f32 %v11821_v10, %v4881_v12  ;;  %v4875_v60 = vmul.f32 %v4867_v37, %v11762_v36  ;;  %v4883_v41 = vmul.f32 %v4867_v37, %v11770_v15 }
 0x448   : > { %v4928_v48 = vadd.f32 %v11802_v50, %v4872_v31  ;;  %v4936_v35 = vadd.f32 %v11821_v10, %v4880_v5  ;;  %v4874_v34 = vmul.f32 %v12377_v20, %v11762_v36  ;;  %v4882_v21 = vmul.f32 %v12377_v20, %v11770_v15  ;;  %v8759_v36 = vpop.eup %8758  ;;  %v14904_v5 = vld [vmem:[#allocation204_spill] sm:$0xff] }
 0x449   : > { %v4961_v13 = vmul.f32 %v14900_v33, %v4929_v30  ;;  %v4969_v56 = vmul.f32 %v14901_v59, %v4937_v53  ;;  %v4931_v23 = vadd.f32 %v11802_v50, %v4875_v60  ;;  %v4939_v0 = vadd.f32 %v11821_v10, %v4883_v41  ;;  %v14905_v33 = vld [vmem:[#allocation38_spill] sm:$0xff] }
 0x44a   : > { %v4960_v55 = vmul.f32 %v14902_v26, %v4928_v48  ;;  %v4968_v18 = vmul.f32 %v14903_v9, %v4936_v35  ;;  %v4930_v28 = vadd.f32 %v11802_v50, %v4874_v34  ;;  %v4938_v12 = vadd.f32 %v11821_v10, %v4882_v21  ;;  %v14906_v59 = vld [vmem:[#allocation206_spill] sm:$0xff] }
 0x44b   : > { %v4993_v31 = vadd.f32 %v4961_v13, %v12237_v46  ;;  %v5001_v15 = vadd.f32 %v4969_v56, %v12255_v4  ;;  %v4963_v30 = vmul.f32 %v14904_v5, %v4931_v23  ;;  %v4971_v53 = vmul.f32 %v12007_v2, %v4939_v0  ;;  %v8761_v60 = vpop.eup %8760 }
 0x44c   : > { %v4992_v41 = vadd.f32 %v4960_v55, %v12229_v22  ;;  %v5000_v48 = vadd.f32 %v4968_v18, %v12247_v42  ;;  %v4962_v35 = vmul.f32 %v14905_v33, %v4930_v28  ;;  %v4970_v50 = vmul.f32 %v14906_v59, %v4938_v12 }
 0x44d   : > { %v5025_v34 = vmax.f32 %v4993_v31, 0.0  ;;  %v5033_v10 = vmax.f32 %v5001_v15, 0.0  ;;  %v4995_v21 = vadd.f32 %v4963_v30, %v12243_v39  ;;  %v5003_v46 = vadd.f32 %v4971_v53, %v12259_v17 }
 0x44e   : > { %v5024_v4 = vmax.f32 %v4992_v41, 0.0  ;;  %v5032_v13 = vmax.f32 %v5000_v48, 0.0  ;;  %v4994_v56 = vadd.f32 %v4962_v35, %v12233_v57  ;;  %v5002_v2 = vadd.f32 %v4970_v50, %v12251_v47 }
 0x44f   : > { %v5061_v23 = vpack.c.bf16 %v5033_v10, %v5025_v34  ;;  %v5027_v22 = vmax.f32 %v4995_v21, 0.0  ;;  %v5035_v0 = vmax.f32 %v5003_v46, 0.0  ;;  %v4945_v42 = vadd.f32 %v14845_v61, %v4889_v8  ;;  %v14909_v46 = vld [vmem:[#allocation227_spill] sm:$0xff] }
 0x450   : > { %v5060_v26 = vpack.c.bf16 %v5032_v13, %v5024_v4  ;;  %v5026_v55 = vmax.f32 %v4994_v56, 0.0  ;;  %v5034_v9 = vmax.f32 %v5002_v2, 0.0  ;;  %v4953_v18 = vadd.f32 %v14846_v29, %v4897_v58  ;;  %v14910_v13 = vld [vmem:[#allocation216_spill] sm:$0xff] }
 0x451   : > { %5218 = vmatprep.subr.bf16.mxu0 %v5061_v23  ;;  %v5063_v39 = vpack.c.bf16 %v5035_v0, %v5027_v22  ;;  %v4977_v17 = vmul.f32 %v12099_v19, %v4945_v42  ;;  %v4891_v28 = vmul.f32 %v4867_v37, %v11853_v62  ;;  %v4899_v57 = vmul.f32 %v4867_v37, %v14842_v45 }
 0x452   : > { %5219 = vmatpush1.bf16.msra.mxu0 %v5060_v26  ;;  %v5062_v47 = vpack.c.bf16 %v5034_v9, %v5026_v55  ;;  %v4985_v12 = vmul.f32 %v8759_v36, %v4953_v18  ;;  %v4888_v31 = vmul.f32 %v12362_v3, %v11853_v62  ;;  %v4896_v8 = vmul.f32 %v12362_v3, %v14842_v45  ;;  %v14916_v55 = vld [vmem:[#allocation42_spill] sm:$0xff] }
 0x453   : > { %5271 = vmatprep.subr.bf16.mxu1 %v5063_v39  ;;  %v5009_v58 = vadd.f32 %v4977_v17, %v12273_v1  ;;  %v4947_v15 = vadd.f32 %v14845_v61, %v4891_v28  ;;  %v4955_v19 = vadd.f32 %v14846_v29, %v4899_v57  ;;  %v4890_v5 = vmul.f32 %v12377_v20, %v11853_v62  ;;  %v14918_v39 = vld [vmem:[#allocation44_spill] sm:$0xff]  ;;  %v12481_v17 = vpop.permute.xlu1 %1078  ;;  %v12483_v28 = vpop.permute.xlu0 %1083  ;;  %v14919_v57 = vld [vmem:[#allocation65_spill] sm:$0xff] }
 0x454   : > { %5272 = vmatpush1.bf16.msra.mxu1 %v5062_v47  ;;  %v5017_v37 = vadd.f32 %v4985_v12, %v12295_v49  ;;  %v4944_v36 = vadd.f32 %v14845_v61, %v4888_v31  ;;  %v4952_v30 = vadd.f32 %v14846_v29, %v4896_v8  ;;  %v4898_v3 = vmul.f32 %v12377_v20, %v14842_v45  ;;  %v14920_v12 = vld [vmem:[#allocation66_spill] sm:$0xff]  ;;  %v14921_v8 = vld [vmem:[#allocation67_spill] sm:$0xff] }
 0x455   : > { %v5041_v53 = vmax.f32 %v5009_v58, 0.0  ;;  %v4979_v1 = vmul.f32 %v12325_v43, %v4947_v15  ;;  %v4987_v41 = vmul.f32 %v8761_v60, %v4955_v19  ;;  %v4946_v48 = vadd.f32 %v14845_v61, %v4890_v5  ;;  %v14922_v15 = vld [vmem:[#allocation69_spill] sm:$0xff] }
 0x456   : > { %v5049_v33 = vmax.f32 %v5017_v37, 0.0  ;;  %v4976_v35 = vmul.f32 %v12075_v52, %v4944_v36  ;;  %v4984_v62 = vmul.f32 %v12330_v27, %v4952_v30  ;;  %v4954_v49 = vadd.f32 %v14846_v29, %v4898_v3  ;;  %v14907_v52 = vld [vmem:[#allocation49_spill] sm:$0xff]  ;;  %v14908_v29 = vld [vmem:[#allocation43_spill] sm:$0xff] }
 0x457   : > { %v5011_v59 = vadd.f32 %v4979_v1, %v12283_v7  ;;  %v5019_v50 = vadd.f32 %v4987_v41, %v12357_v44  ;;  %v4978_v34 = vmul.f32 %v12093_v24, %v4946_v48  ;;  %v4168_v45 = vadd.f32 %v4167_v16, %v12359_v11  ;;  %v14923_v37 = vld [vmem:[#allocation71_spill] sm:$0xff]  ;;  %v12495_v30 = vpop.permute.xlu1 %1088  ;;  %v14925_v48 = vld [vmem:[#allocation70_spill] sm:$0xff] }
 0x458   : > { %v5069_v43 = vpack.c.bf16 %v5049_v33, %v5041_v53  ;;  %v5008_v61 = vadd.f32 %v4976_v35, %v12265_v54  ;;  %v5016_v20 = vadd.f32 %v4984_v62, %v12287_v25  ;;  %v4986_v60 = vmul.f32 %v14907_v52, %v4954_v49  ;;  %v14924_v53 = vld [vmem:[#allocation68_spill] sm:$0xff] }
 0x459   : > { %v5043_v27 = vmax.f32 %v5011_v59, 0.0  ;;  %v5051_v10 = vmax.f32 %v5019_v50, 0.0  ;;  %v5010_v21 = vadd.f32 %v4978_v34, %v14908_v29  ;;  %v4211_v7 = vcombine.low %v12370_v38, %v12372_v51  ;;  %v14911_v38 = vld [vmem:[#allocation218_spill] sm:$0xff]  ;;  %v14912_v51 = vld [vmem:[#allocation41_spill] sm:$0xff]  ;;  %v14926_v62 = vld [vmem:[#allocation72_spill] sm:$0xff] }
 0x45a   : > { %5220 = vmatprep.subr.bf16.mxu0 %v5069_v43  ;;  %v5040_v24 = vmax.f32 %v5008_v61, 0.0  ;;  %v5048_v44 = vmax.f32 %v5016_v20, 0.0  ;;  %v5018_v4 = vadd.f32 %v4986_v60, %v14909_v46  ;;  %v4212_v11 = vcombine.low %v12374_v32, %v4168_v45  ;;  %v14927_v50 = vld [vmem:[#allocation73_spill] sm:$0xff]  ;;  %v12505_v45 = vpop.permute.xlu0 %1093  ;;  %v14928_v61 = vld [vmem:[#allocation74_spill] sm:$0xff]  ;;  %v14929_v60 = vld [vmem:[#allocation75_spill] sm:$0xff] }
 0x45b   : > { %v5071_v16 = vpack.c.bf16 %v5051_v10, %v5043_v27  ;;  %v5042_v54 = vmax.f32 %v5010_v21, 0.0  ;;  %v4233_v25 = vrot.slane %v4211_v7, %v14910_v13  ;;  %v14913_v42 = vcombine.low %v14911_v38, %v14912_v51  ;;  %v14930_v29 = vld [vmem:[#allocation76_spill] sm:$0xff]  ;;  %v12515_v46 = vpop.permute.xlu1 %5078 }
 0x45c   : > { %v5068_v56 = vpack.c.bf16 %v5048_v44, %v5040_v24  ;;  %v5050_v2 = vmax.f32 %v5018_v4, 0.0  ;;  %v4240_v23 = vrot.slane %v4212_v11, %v14910_v13  ;;  %v14917_v9 = vmov 0   ;;  %v14931_v24 = vld [vmem:[#allocation77_spill] sm:$0xff]  ;;  %v14932_v11 = vld [vmem:[#allocation79_spill] sm:$0xff] }
 0x45d   : > { %5273 = vmatprep.subr.bf16.mxu1 %v5071_v16  ;;  %v12462_v26 = vrot.slane %v14913_v42, %v14910_v13  ;;  %v1678_v47 = vadd.f32 %v14919_v57, %v12481_v17  ;;  %v1981_v31 = vadd.f32 %v14920_v12, %v12481_v17  ;;  %v1680_v58 = vadd.f32 %v14921_v8, %v12481_v17 }
 0x45e   : > { %5221 = vmatpush1.bf16.msra.mxu0 %v5068_v56  ;;  %v5070_v22 = vpack.c.bf16 %v5050_v2, %v5042_v54  ;;  %v4242_v0 = vcombine.low %v4233_v25, %v4240_v23  ;;  %v1682_v19 = vadd.f32 %v14922_v15, %v12483_v28  ;;  %v1684_v36 = vadd.f32 %v14923_v37, %v12483_v28  ;;  %v14933_v25 = vld [vmem:[#allocation78_spill] sm:$0xff]  ;;  %v12521_v2 = vpop.permute.xlu0 %5083 }
 0x45f   : > { %14914 = vst [vmem:[#allocation53_spill] sm:$0xff] %v12462_v26  ;;  %v8064_v5 = vmul.f32 -1.442695, %v1678_v47  ;;  %v8066_v3 = vmul.f32 -1.442695, %v1981_v31  ;;  %v1983_v1 = vadd.f32 %v14924_v53, %v12481_v17  ;;  %v1985_v33 = vadd.f32 %v14925_v48, %v12483_v28  ;;  %v12525_v57 = vpop.permute.xlu1 %1118 }
 0x460   : > { %5274 = vmatpush1.bf16.msra.mxu1 %v5070_v22  ;;  %v12465_v32 = vrot.slane %v4242_v0, %v14910_v13  ;;  %v8065_v41 = vmul.f32 -1.442695, %v1680_v58  ;;  %v8072_v35 = vmul.f32 -1.442695, %v1682_v19  ;;  %v1987_v49 = vadd.f32 %v14926_v62, %v12483_v28  ;;  %v14934_v0 = vld [vmem:[#allocation80_spill] sm:$0xff] }
 0x461   : > { %8110 = vmatmul.mubr.msk.bf16.vlgmr.msra.gmra.mrb[248].mxu0 %vm1451_vm0, %v14916_v55  ;;  %8762 = vpow2.f32 %v8064_v5  ;;  %v8073_v59 = vmul.f32 -1.442695, %v1684_v36  ;;  %v1688_v34 = vadd.f32 %v14927_v50, %v12495_v30  ;;  %v8067_v43 = vmul.f32 -1.442695, %v1983_v1 }
 0x462   : > { %14915 = vst [vmem:[#allocation54_spill] sm:$0xff] %v12465_v32  ;;  %5260 = vmatprep.mubr.bf16.mxu0 %v14917_v9  ;;  %8764 = vpow2.f32 %v8066_v3  ;;  %v1991_v20 = vadd.f32 %v14928_v61, %v12495_v30  ;;  %v8074_v52 = vmul.f32 -1.442695, %v1985_v33  ;;  %v1690_v27 = vadd.f32 %v14929_v60, %v12495_v30  ;;  %v12527_v8 = vpop.permute.xlu0 %1123  ;;  %v15047_v32 = vld [vmem:[#allocation157_spill] sm:$0xff] }
 0x463   : > { %8112 = vmatmul.mubr.msk.bf16.vlgmr.msra.gmra.mrb[248].mxu1 %vm1451_vm0, %v14916_v55  ;;  %8766 = vpow2.f32 %v8065_v41  ;;  %v8075_v10 = vmul.f32 -1.442695, %v1987_v49  ;;  %v1993_v21 = vadd.f32 %v14930_v29, %v12495_v30  ;;  %v8080_v7 = vmul.f32 -1.442695, %v1688_v34  ;;  %v12529_v1 = vpop.permute.xlu1 %5088  ;;  %v14935_v34 = vld [vmem:[#allocation97_spill] sm:$0xff] }
 0x464   : > { %5313 = vmatprep.mubr.bf16.mxu1 %v14917_v9  ;;  %8768 = vpow2.f32 %v8072_v35  ;;  %v1692_v44 = vadd.f32 %v14931_v24, %v12505_v45  ;;  %v8082_v4 = vmul.f32 -1.442695, %v1991_v20  ;;  %v1694_v16 = vadd.f32 %v14932_v11, %v12505_v45 }
 0x465   : > { %8770 = vpow2.f32 %v8073_v59  ;;  %v8081_v54 = vmul.f32 -1.442695, %v1690_v27  ;;  %v1995_v56 = vadd.f32 %v14933_v25, %v12505_v45  ;;  %v8083_v23 = vmul.f32 -1.442695, %v1993_v21  ;;  %v14937_v27 = vld [vmem:[#allocation99_spill] sm:$0xff]  ;;  %v14940_v25 = vld [vmem:[#allocation102_spill] sm:$0xff] }
 0x466   : > { %8772 = vpow2.f32 %v8067_v43  ;;  %v8088_v22 = vmul.f32 -1.442695, %v1692_v44  ;;  %v1997_v38 = vadd.f32 %v14934_v0, %v12505_v45  ;;  %v8089_v51 = vmul.f32 -1.442695, %v1694_v16  ;;  %v12531_v62 = vpop.permute.xlu0 %5093  ;;  %v14939_v44 = vld [vmem:[#allocation101_spill] sm:$0xff] }
 0x467   : > { %8774 = vpow2.f32 %v8074_v52  ;;  %v8090_v55 = vmul.f32 -1.442695, %v1995_v56  ;;  %v1718_v43 = vadd.f32 %v14935_v34, %v12525_v57  ;;  %v14936_v52 = vld [vmem:[#allocation98_spill] sm:$0xff]  ;;  %v12549_v16 = vpop.permute.xlu1 %1128  ;;  %v12553_v56 = vadd.f32 %v14940_v25, %v12527_v8 }
 0x468   : > { %8776 = vpow2.f32 %v8075_v10  ;;  %v8091_v12 = vmul.f32 -1.442695, %v1997_v38  ;;  %v12537_v60 = vadd.f32 %v14936_v52, %v12525_v57  ;;  %v1720_v10 = vadd.f32 %v14937_v27, %v12525_v57  ;;  %v14950_v27 = vld [vmem:[#allocation112_spill] sm:$0xff] }
 0x469   : > { %8111 = vmatmul.mubr.msk.bf16.gmra.mrb[252].mxu0 %vm1451_vm0, %v14918_v39  ;;  %8778 = vpow2.f32 %v8080_v7  ;;  %v14938_v7 = vld [vmem:[#allocation100_spill] sm:$0xff] }
 0x46a   : > { %5478 = vmatprep.mubr.bf16.mxu0 %v14917_v9  ;;  %8780 = vpow2.f32 %v8082_v4  ;;  %v12543_v24 = vadd.f32 %v14938_v7, %v12525_v57  ;;  %v12547_v4 = vadd.f32 %v14939_v44, %v12527_v8 }
 0x46b   : > { %8113 = vmatmul.mubr.msk.bf16.gmra.mrb[252].mxu1 %vm1451_vm0, %v14918_v39  ;;  %v8763_v42 = vpop.eup %8762  ;;  %8782 = vpow2.f32 %v8081_v54 }
 0x46c   : > { %5519 = vmatprep.mubr.bf16.mxu1 %v14917_v9  ;;  %v8765_v39 = vpop.eup %8764  ;;  %8784 = vpow2.f32 %v8083_v23  ;;  %v4624_v58 = vadd.f32 1.0, %v8763_v42  ;;  %v14941_v23 = vld [vmem:[#allocation103_spill] sm:$0xff] }
 0x46d   : > { %v8767_v47 = vpop.eup %8766  ;;  %8786 = vpow2.f32 %v8088_v22  ;;  %v4626_v19 = vadd.f32 1.0, %v8765_v39  ;;  %v12557_v22 = vadd.f32 %v14941_v23, %v12527_v8 }
 0x46e   : > { %v8769_v31 = vpop.eup %8768  ;;  %8788 = vpow2.f32 %v8089_v51  ;;  %v4625_v37 = vadd.f32 1.0, %v8767_v47  ;;  %v14942_v51 = vld [vmem:[#allocation104_spill] sm:$0xff]  ;;  %v12567_v47 = vpop.permute.xlu0 %1133 }
 0x46f   : > { %v8771_v15 = vpop.eup %8770  ;;  %8790 = vpow2.f32 %v8090_v55  ;;  %v4632_v3 = vadd.f32 1.0, %v8769_v31  ;;  %v12561_v42 = vadd.f32 %v14942_v51, %v12527_v8  ;;  %v14943_v55 = vld [vmem:[#allocation105_spill] sm:$0xff]  ;;  %v14944_v31 = vld [vmem:[#allocation106_spill] sm:$0xff] }
 0x470   : > { %v8773_v5 = vpop.eup %8772  ;;  %8792 = vpow2.f32 %v8091_v12  ;;  %v4633_v41 = vadd.f32 1.0, %v8771_v15  ;;  %v12565_v39 = vadd.f32 %v14943_v55, %v12549_v16  ;;  %v14945_v15 = vld [vmem:[#allocation107_spill] sm:$0xff] }
 0x471   : > { %v8775_v36 = vpop.eup %8774  ;;  %8794 = vrcp.f32 %v4624_v58  ;;  %v4627_v33 = vadd.f32 1.0, %v8773_v5  ;;  %v12571_v58 = vadd.f32 %v14944_v31, %v12549_v16 }
 0x472   : > { %v8777_v53 = vpop.eup %8776  ;;  %8796 = vrcp.f32 %v4626_v19  ;;  %v4634_v49 = vadd.f32 1.0, %v8775_v36  ;;  %v12575_v19 = vadd.f32 %v14945_v15, %v12549_v16  ;;  %v14946_v36 = vld [vmem:[#allocation108_spill] sm:$0xff] }
 0x473   : > { %v8779_v48 = vpop.eup %8778  ;;  %8798 = vrcp.f32 %v4625_v37  ;;  %v4635_v50 = vadd.f32 1.0, %v8777_v53  ;;  %v14947_v53 = vld [vmem:[#allocation109_spill] sm:$0xff] }
 0x474   : > { %v8781_v35 = vpop.eup %8780  ;;  %8800 = vrcp.f32 %v4632_v3  ;;  %v4640_v20 = vadd.f32 1.0, %v8779_v48  ;;  %v12579_v3 = vadd.f32 %v14946_v36, %v12549_v16 }
 0x475   : > { %v8783_v59 = vpop.eup %8782  ;;  %8802 = vrcp.f32 %v4633_v41  ;;  %v4642_v21 = vadd.f32 1.0, %v8781_v35  ;;  %v12583_v41 = vadd.f32 %v14947_v53, %v12567_v47 }
 0x476   : > { %v8785_v61 = vpop.eup %8784  ;;  %8804 = vrcp.f32 %v4627_v33  ;;  %v4641_v54 = vadd.f32 1.0, %v8783_v59 }
 0x477   : > { %v8787_v29 = vpop.eup %8786  ;;  %8806 = vrcp.f32 %v4634_v49  ;;  %v4643_v38 = vadd.f32 1.0, %v8785_v61  ;;  %v14948_v49 = vld [vmem:[#allocation110_spill] sm:$0xff] }
 0x478   : > { %v8789_v11 = vpop.eup %8788  ;;  %8808 = vrcp.f32 %v4635_v50  ;;  %v4648_v12 = vadd.f32 1.0, %v8787_v29  ;;  %v12587_v59 = vadd.f32 %v14948_v49, %v12567_v47  ;;  %v12596_v29 = vadd.f32 %v14950_v27, %v12567_v47 }
 0x479   : > { %v8791_v0 = vpop.eup %8790  ;;  %8810 = vrcp.f32 %v4640_v20  ;;  %v4649_v37 = vadd.f32 1.0, %v8789_v11  ;;  %v14949_v20 = vld [vmem:[#allocation111_spill] sm:$0xff] }
 0x47a   : > { %v8793_v5 = vpop.eup %8792  ;;  %8812 = vrcp.f32 %v4642_v21  ;;  %v4650_v35 = vadd.f32 1.0, %v8791_v0  ;;  %v12592_v52 = vadd.f32 %v14949_v20, %v12567_v47 }
 0x47b   : > { %v8795_v33 = vpop.eup %8794  ;;  %8814 = vrcp.f32 %v4641_v54  ;;  %v4651_v11 = vadd.f32 1.0, %v8793_v5 }
 0x47c   : > { %v8797_v61 = vpop.eup %8796  ;;  %8816 = vrcp.f32 %v4643_v38 }
 0x47d   : > { %v8799_v44 = vpop.eup %8798  ;;  %8818 = vrcp.f32 %v4648_v12 }
 0x47e   : > { %v8801_v38 = vpop.eup %8800  ;;  %8820 = vrcp.f32 %v4649_v37 }
 0x47f   : > { %v8803_v36 = vpop.eup %8802  ;;  %8822 = vrcp.f32 %v4650_v35 }
 0x480   : > { %8824 = vrcp.f32 %v4651_v11 }
 0x4fd   : > { %v5146_v48 = vpop.f32.mrb[240].mxu0 }
 0x4fe   : > { %v5147_v50 = vadd.f32 %v5146_v48, %v12515_v46  ;;  %v5148_v34 = vpop.f32.mrb[241].mxu0 }
 0x4ff   : > { %v5149_v21 = vadd.f32 %v5148_v34, %v12515_v46  ;;  %v5150_v7 = vpop.f32.mrb[242].mxu0  ;;  %v5199_v25 = vpop.f32.mrb[240].mxu1 }
 0x500   : > { %v5324_v54 = vmul.f32 %v8795_v33, %v5147_v50  ;;  %v5151_v23 = vadd.f32 %v5150_v7, %v12521_v2  ;;  %v5152_v0 = vpop.f32.mrb[243].mxu0  ;;  %v5200_v51 = vadd.f32 %v5199_v25, %v12515_v46  ;;  %v5201_v31 = vpop.f32.mrb[241].mxu1 }
 0x501   : > { %v5325_v55 = vmul.f32 %v8799_v44, %v5149_v21  ;;  %v5153_v15 = vadd.f32 %v5152_v0, %v12521_v2  ;;  %v5202_v48 = vadd.f32 %v5201_v31, %v12515_v46  ;;  %v5203_v5 = vpop.f32.mrb[242].mxu1  ;;  %v8805_v33 = vpop.eup %8804 }
 0x502   : > { %v5356_v53 = vadd.f32 %v5324_v54, %v1718_v43  ;;  %v5332_v12 = vmul.f32 %v8801_v38, %v5151_v23  ;;  %v5326_v49 = vmul.f32 %v8797_v61, %v5200_v51  ;;  %v5204_v34 = vadd.f32 %v5203_v5, %v12521_v2  ;;  %v5205_v20 = vpop.f32.mrb[243].mxu1  ;;  %v8807_v27 = vpop.eup %8806 }
 0x503   : > { %v12603_v50 = vadd.f32 %v5325_v55, %v1720_v10  ;;  %v5333_v37 = vmul.f32 %v8803_v36, %v5153_v15  ;;  %v5327_v21 = vmul.f32 %v8805_v33, %v5202_v48  ;;  %v5206_v35 = vadd.f32 %v5205_v20, %v12521_v2  ;;  %v8809_v43 = vpop.eup %8808 }
 0x504   : > { %v5364_v7 = vadd.f32 %v5332_v12, %v12547_v4  ;;  %v5388_v44 = vmax.f32 %v5356_v53, 0.0  ;;  %v5358_v54 = vadd.f32 %v5326_v49, %v12537_v60  ;;  %v5334_v25 = vmul.f32 %v8807_v27, %v5204_v34  ;;  %v8811_v23 = vpop.eup %8810  ;;  %v14951_v4 = vld [vmem:[#allocation248_spill] sm:$0xff] }
 0x505   : > { %v5365_v61 = vadd.f32 %v5333_v37, %v12557_v22  ;;  %v5156_v10 = vpop.f32.mrb[244].mxu0  ;;  %v5359_v0 = vadd.f32 %v5327_v21, %v12543_v24  ;;  %v5335_v51 = vmul.f32 %v8809_v43, %v5206_v35  ;;  %v8813_v31 = vpop.eup %8812  ;;  %v12614_v15 = vadd.f32 %v14951_v4, %v12481_v17 }
 0x506   : > { %v5396_v38 = vmax.f32 %v5364_v7, 0.0  ;;  %v5157_v11 = vadd.f32 %v5156_v10, %v12529_v1  ;;  %v5158_v55 = vpop.f32.mrb[245].mxu0  ;;  %v5390_v36 = vmax.f32 %v5358_v54, 0.0  ;;  %v5366_v60 = vadd.f32 %v5334_v25, %v12553_v56  ;;  %v8815_v48 = vpop.eup %8814 }
 0x507   : > { %v5159_v53 = vadd.f32 %v5158_v55, %v12529_v1  ;;  %v5160_v22 = vpop.f32.mrb[246].mxu0  ;;  %v5397_v5 = vmax.f32 %v5365_v61, 0.0  ;;  %v5367_v24 = vadd.f32 %v5335_v51, %v12561_v42  ;;  %v5209_v49 = vpop.f32.mrb[244].mxu1  ;;  %v5389_v4 = vmax.f32 %v12603_v50, 0.0 }
 0x508   : > { %v5421_v12 = vpack.c.bf16 %v5396_v38, %v5388_v44  ;;  %v5340_v33 = vmul.f32 %v8811_v23, %v5157_v11  ;;  %v5162_v34 = vpop.f32.mrb[247].mxu0  ;;  %v8817_v37 = vpop.eup %8816  ;;  %v5398_v20 = vmax.f32 %v5366_v60, 0.0  ;;  %v5210_v27 = vadd.f32 %v5209_v49, %v12529_v1 }
 0x509   : > { %v5341_v21 = vmul.f32 %v8815_v48, %v5159_v53  ;;  %v5211_v7 = vpop.f32.mrb[245].mxu1  ;;  %v5161_v35 = vadd.f32 %v5160_v22, %v12531_v62  ;;  %v8819_v56 = vpop.eup %8818  ;;  %v5399_v43 = vmax.f32 %v5367_v24, 0.0  ;;  %v5163_v42 = vadd.f32 %v5162_v34, %v12531_v62 }
 0x50a   : > { %v5372_v54 = vadd.f32 %v5340_v33, %v12565_v39  ;;  %v5212_v44 = vadd.f32 %v5211_v7, %v12529_v1  ;;  %v5213_v25 = vpop.f32.mrb[246].mxu1  ;;  %v8821_v61 = vpop.eup %8820  ;;  %v5423_v10 = vpack.c.bf16 %v5398_v20, %v5390_v36  ;;  %v5342_v23 = vmul.f32 %v8813_v31, %v5210_v27 }
 0x50b   : > { %v5373_v38 = vadd.f32 %v5341_v21, %v12575_v19  ;;  %v5348_v51 = vmul.f32 %v8819_v56, %v5161_v35  ;;  %v5215_v11 = vpop.f32.mrb[247].mxu1  ;;  %v8823_v55 = vpop.eup %8822  ;;  %v5214_v53 = vadd.f32 %v5213_v25, %v12531_v62  ;;  %v5349_v22 = vmul.f32 %v8821_v61, %v5163_v42  ;;  %v14952_v21 = vld [vmem:[#allocation249_spill] sm:$0xff]  ;;  %v14953_v35 = vld [vmem:[#allocation250_spill] sm:$0xff] }
 0x50c   : > { %v5343_v60 = vmul.f32 %v8817_v37, %v5212_v44  ;;  %v5391_v39 = vmax.f32 %v5359_v0, 0.0  ;;  %v5374_v48 = vadd.f32 %v5342_v23, %v12571_v58  ;;  %v5216_v33 = vadd.f32 %v5215_v11, %v12531_v62  ;;  %v8825_v36 = vpop.eup %8824  ;;  %v14956_v11 = vld [vmem:[#allocation253_spill] sm:$0xff] }
 0x50d   : > { %v5380_v24 = vadd.f32 %v5348_v51, %v12583_v41  ;;  %v5350_v19 = vmul.f32 %v8823_v55, %v5214_v53  ;;  %v5381_v49 = vadd.f32 %v5349_v22, %v12592_v52  ;;  %v5422_v34 = vpack.c.bf16 %v5397_v5, %v5389_v4  ;;  %v14954_v52 = vld [vmem:[#allocation251_spill] sm:$0xff] }
 0x50e   : > { %v5375_v31 = vadd.f32 %v5343_v60, %v12579_v3  ;;  %v5404_v20 = vmax.f32 %v5372_v54, 0.0  ;;  %v5351_v37 = vmul.f32 %v8825_v36, %v5216_v33  ;;  %v5424_v27 = vpack.c.bf16 %v5399_v43, %v5391_v39  ;;  %v14958_v53 = vld [vmem:[#allocation255_spill] sm:$0xff]  ;;  %v14960_v36 = vld [vmem:[#allocation257_spill] sm:$0xff] }
 0x50f   : > { %v5412_v50 = vmax.f32 %v5380_v24, 0.0  ;;  %v2587_v0 = vadd.f32 %v14952_v21, %v12481_v17  ;;  %v5405_v7 = vmax.f32 %v5373_v38, 0.0  ;;  %v5382_v58 = vadd.f32 %v5350_v19, %v12587_v59  ;;  %5446 = vmatprep.subr.bf16.mxu0 %v5422_v34  ;;  %v14955_v59 = vld [vmem:[#allocation252_spill] sm:$0xff] }
 0x510   : > { %v5413_v41 = vmax.f32 %v5381_v49, 0.0  ;;  %v2286_v56 = vadd.f32 %v14953_v35, %v12481_v17  ;;  %v5383_v44 = vadd.f32 %v5351_v37, %v12596_v29  ;;  %5487 = vmatprep.subr.bf16.mxu1 %v5424_v27  ;;  %5447 = vmatpush1.bf16.msra.mxu0 %v5421_v12  ;;  %v2589_v5 = vadd.f32 %v14954_v52, %v12481_v17  ;;  %v14957_v17 = vld [vmem:[#allocation254_spill] sm:$0xff]  ;;  %v14963_v27 = vld [vmem:[#allocation260_spill] sm:$0xff] }
 0x511   : > { %v5429_v3 = vpack.c.bf16 %v5412_v50, %v5404_v20  ;;  %v5406_v43 = vmax.f32 %v5374_v48, 0.0  ;;  %v5414_v54 = vmax.f32 %v5382_v58, 0.0  ;;  %5488 = vmatpush1.bf16.msra.mxu1 %v5423_v10  ;;  %v8068_v42 = vmul.f32 -1.442695, %v12614_v15  ;;  %v12650_v15 = vld [vmem:[%s14210_s15] sm:$0x3] }
 0x512   : > { %v5430_v25 = vpack.c.bf16 %v5413_v41, %v5405_v7  ;;  %v2288_v61 = vadd.f32 %v14955_v59, %v12483_v28  ;;  %v5407_v23 = vmax.f32 %v5375_v31, 0.0  ;;  %v5415_v38 = vmax.f32 %v5383_v44, 0.0  ;;  %v14959_v48 = vld [vmem:[#allocation256_spill] sm:$0xff]  ;;  %v14961_v49 = vld [vmem:[#allocation258_spill] sm:$0xff]  ;;  %v14962_v20 = vld [vmem:[#allocation259_spill] sm:$0xff] }
 0x513   : > { %v8070_v51 = vmul.f32 -1.442695, %v2587_v0  ;;  %v2591_v29 = vadd.f32 %v14956_v11, %v12483_v28  ;;  %v5431_v55 = vpack.c.bf16 %v5414_v54, %v5406_v43  ;;  %v8069_v12 = vmul.f32 -1.442695, %v2286_v56  ;;  %v14964_v7 = vld [vmem:[#allocation261_spill] sm:$0xff]  ;;  %v14965_v35 = vld [vmem:[#allocation262_spill] sm:$0xff] }
 0x514   : > { %5448 = vmatprep.subr.bf16.mxu0 %v5430_v25  ;;  %v2290_v4 = vadd.f32 %v14957_v17, %v12483_v28  ;;  %v5432_v60 = vpack.c.bf16 %v5415_v38, %v5407_v23  ;;  %v8071_v10 = vmul.f32 -1.442695, %v2589_v5  ;;  %v2593_v22 = vadd.f32 %v14958_v53, %v12483_v28 }
 0x515   : > { %5449 = vmatpush1.bf16.msra.mxu0 %v5429_v3  ;;  %8826 = vpow2.f32 %v8068_v42  ;;  %v8076_v39 = vmul.f32 -1.442695, %v2288_v61  ;;  %v2294_v24 = vadd.f32 %v14959_v48, %v12495_v30  ;;  %v8078_v33 = vmul.f32 -1.442695, %v2591_v29  ;;  %v14966_v3 = vld [vmem:[#allocation263_spill] sm:$0xff] }
 0x516   : > { %5489 = vmatprep.subr.bf16.mxu1 %v5432_v60  ;;  %8828 = vpow2.f32 %v8070_v51  ;;  %v2597_v31 = vadd.f32 %v14960_v36, %v12495_v30  ;;  %v8077_v19 = vmul.f32 -1.442695, %v2290_v4  ;;  %v2296_v28 = vadd.f32 %v14961_v49, %v12495_v30 }
 0x517   : > { %5490 = vmatpush1.bf16.msra.mxu1 %v5431_v55  ;;  %8830 = vpow2.f32 %v8069_v12  ;;  %v8079_v34 = vmul.f32 -1.442695, %v2593_v22  ;;  %v2599_v50 = vadd.f32 %v14962_v20, %v12495_v30  ;;  %v8084_v37 = vmul.f32 -1.442695, %v2294_v24 }
 0x518   : > { %8114 = vmatmul.mubr.msk.bf16.vlgmr.msra.gmra.mrb[0].mxu0 %vm1451_vm0, %v12650_v15  ;;  %8832 = vpow2.f32 %v8071_v10  ;;  %v2298_v21 = vadd.f32 %v14963_v27, %v12505_v45  ;;  %v8086_v0 = vmul.f32 -1.442695, %v2597_v31  ;;  %v2601_v58 = vadd.f32 %v14964_v7, %v12505_v45  ;;  %v14968_v27 = vld [vmem:[#allocation281_spill] sm:$0xff] }
 0x519   : > { %5560 = vmatprep.mubr.bf16.mxu0 %v14917_v9  ;;  %8834 = vpow2.f32 %v8076_v39  ;;  %v8085_v41 = vmul.f32 -1.442695, %v2296_v28  ;;  %v2300_v30 = vadd.f32 %v14965_v35, %v12505_v45  ;;  %v8087_v56 = vmul.f32 -1.442695, %v2599_v50 }
 0x51a   : > { %8115 = vmatmul.mubr.msk.bf16.vlgmr.msra.gmra.mrb[0].mxu1 %vm1451_vm0, %v12650_v15  ;;  %8836 = vpow2.f32 %v8078_v33  ;;  %v2603_v44 = vadd.f32 %v14966_v3, %v12505_v45  ;;  %v8092_v52 = vmul.f32 -1.442695, %v2298_v21  ;;  %v8094_v5 = vmul.f32 -1.442695, %v2601_v58 }
 0x51b   : > { %5601 = vmatprep.mubr.bf16.mxu1 %v14917_v9  ;;  %8838 = vpow2.f32 %v8077_v19  ;;  %v8093_v54 = vmul.f32 -1.442695, %v2300_v30  ;;  %v2627_v21 = vadd.f32 %v14968_v27, %v12525_v57  ;;  %v14971_v30 = vld [vmem:[#allocation284_spill] sm:$0xff] }
 0x51c   : > { %8840 = vpow2.f32 %v8079_v34  ;;  %v8095_v42 = vmul.f32 -1.442695, %v2603_v44  ;;  %v14967_v34 = vld [vmem:[#allocation280_spill] sm:$0xff] }
 0x51d   : > { %8842 = vpow2.f32 %v8084_v37  ;;  %v2324_v20 = vadd.f32 %v14967_v34, %v12525_v57 }
 0x51e   : > { %8844 = vpow2.f32 %v8086_v0  ;;  %v14969_v0 = vld [vmem:[#allocation282_spill] sm:$0xff] }
 0x51f   : > { %v8827_v43 = vpop.eup %8826  ;;  %8846 = vpow2.f32 %v8085_v41  ;;  %v2326_v7 = vadd.f32 %v14969_v0, %v12525_v57  ;;  %v14970_v41 = vld [vmem:[#allocation283_spill] sm:$0xff] }
 0x520   : > { %v8829_v25 = vpop.eup %8828  ;;  %8848 = vpow2.f32 %v8087_v56  ;;  %v4628_v23 = vadd.f32 1.0, %v8827_v43  ;;  %v2629_v35 = vadd.f32 %v14970_v41, %v12525_v57  ;;  %v2328_v56 = vadd.f32 %v14971_v30, %v12527_v8  ;;  %v14973_v43 = vld [vmem:[#allocation286_spill] sm:$0xff]  ;;  %v14975_v57 = vld [vmem:[#allocation288_spill] sm:$0xff] }
 0x521   : > { %v8831_v59 = vpop.eup %8830  ;;  %8850 = vpow2.f32 %v8092_v52  ;;  %v4630_v51 = vadd.f32 1.0, %v8829_v25  ;;  %v14972_v52 = vld [vmem:[#allocation285_spill] sm:$0xff] }
 0x522   : > { %v8833_v61 = vpop.eup %8832  ;;  %8852 = vpow2.f32 %v8094_v5  ;;  %v4629_v45 = vadd.f32 1.0, %v8831_v59  ;;  %v2631_v5 = vadd.f32 %v14972_v52, %v12527_v8  ;;  %v14974_v59 = vld [vmem:[#allocation287_spill] sm:$0xff] }
 0x523   : > { %v8835_v38 = vpop.eup %8834  ;;  %8854 = vpow2.f32 %v8093_v54  ;;  %v4631_v55 = vadd.f32 1.0, %v8833_v61  ;;  %v2330_v54 = vadd.f32 %v14973_v43, %v12527_v8  ;;  %v2633_v61 = vadd.f32 %v14974_v59, %v12527_v8  ;;  %v14978_v8 = vld [vmem:[#allocation291_spill] sm:$0xff] }
 0x524   : > { %v8837_v11 = vpop.eup %8836  ;;  %8856 = vpow2.f32 %v8095_v42  ;;  %v4636_v17 = vadd.f32 1.0, %v8835_v38 }
 0x525   : > { %v8839_v29 = vpop.eup %8838  ;;  %8858 = vrcp.f32 %v4628_v23  ;;  %v4638_v60 = vadd.f32 1.0, %v8837_v11  ;;  %v12694_v23 = vadd.f32 %v14975_v57, %v12549_v16  ;;  %v14976_v11 = vld [vmem:[#allocation289_spill] sm:$0xff] }
 0x526   : > { %v8841_v12 = vpop.eup %8840  ;;  %8860 = vrcp.f32 %v4630_v51  ;;  %v4637_v53 = vadd.f32 1.0, %v8839_v29  ;;  %v14977_v29 = vld [vmem:[#allocation290_spill] sm:$0xff] }
 0x527   : > { %v8843_v4 = vpop.eup %8842  ;;  %8862 = vrcp.f32 %v4629_v45  ;;  %v4639_v39 = vadd.f32 1.0, %v8841_v12  ;;  %v12698_v45 = vadd.f32 %v14976_v11, %v12549_v16 }
 0x528   : > { %v8845_v10 = vpop.eup %8844  ;;  %8864 = vrcp.f32 %v4631_v55  ;;  %v4644_v24 = vadd.f32 1.0, %v8843_v4  ;;  %v12702_v55 = vadd.f32 %v14977_v29, %v12549_v16 }
 0x529   : > { %v8847_v22 = vpop.eup %8846  ;;  %8866 = vrcp.f32 %v4636_v17  ;;  %v4646_v36 = vadd.f32 1.0, %v8845_v10  ;;  %v14979_v10 = vld [vmem:[#allocation292_spill] sm:$0xff] }
 0x52a   : > { %v8849_v48 = vpop.eup %8848  ;;  %8868 = vrcp.f32 %v4638_v60  ;;  %v4645_v19 = vadd.f32 1.0, %v8847_v22  ;;  %v12707_v60 = vadd.f32 %v14978_v8, %v12549_v16 }
 0x52b   : > { %v8851_v33 = vpop.eup %8850  ;;  %8870 = vrcp.f32 %v4637_v53  ;;  %v4647_v28 = vadd.f32 1.0, %v8849_v48  ;;  %v12711_v53 = vadd.f32 %v14979_v10, %v12567_v47 }
 0x52c   : > { %v8853_v31 = vpop.eup %8852  ;;  %8872 = vrcp.f32 %v4639_v39  ;;  %v4652_v37 = vadd.f32 1.0, %v8851_v33 }
 0x52d   : > { %v8855_v49 = vpop.eup %8854  ;;  %8874 = vrcp.f32 %v4644_v24  ;;  %v4654_v58 = vadd.f32 1.0, %v8853_v31 }
 0x52e   : > { %v8857_v50 = vpop.eup %8856  ;;  %8876 = vrcp.f32 %v4646_v36  ;;  %v4653_v44 = vadd.f32 1.0, %v8855_v49 }
 0x52f   : > { %v8859_v3 = vpop.eup %8858  ;;  %8878 = vrcp.f32 %v4645_v19  ;;  %v4655_v42 = vadd.f32 1.0, %v8857_v50 }
 0x530   : > { %v8861_v25 = vpop.eup %8860  ;;  %8880 = vrcp.f32 %v4647_v28 }
 0x531   : > { %v8863_v51 = vpop.eup %8862  ;;  %8882 = vrcp.f32 %v4652_v37 }
 0x532   : > { %v8865_v4 = vpop.eup %8864  ;;  %8884 = vrcp.f32 %v4654_v58 }
 0x533   : > { %v8867_v24 = vpop.eup %8866  ;;  %8886 = vrcp.f32 %v4653_v44 }
 0x534   : > { %v5252_v38 = vpop.f32.mrb[248].mxu0  ;;  %v8869_v28 = vpop.eup %8868  ;;  %8888 = vrcp.f32 %v4655_v42 }
 0x535   : > { %v5253_v12 = vadd.f32 %v5252_v38, %v12515_v46  ;;  %v5254_v17 = vpop.f32.mrb[249].mxu0  ;;  %v8871_v27 = vpop.eup %8870 }
 0x536   : > { %v5305_v22 = vpop.f32.mrb[248].mxu1  ;;  %v5255_v39 = vadd.f32 %v5254_v17, %v12515_v46  ;;  %v5256_v48 = vpop.f32.mrb[250].mxu0 }
 0x537   : > { %v5328_v33 = vmul.f32 %v8859_v3, %v5253_v12  ;;  %v5306_v36 = vadd.f32 %v5305_v22, %v12515_v46  ;;  %v5307_v31 = vpop.f32.mrb[249].mxu1  ;;  %v5257_v19 = vadd.f32 %v5256_v48, %v12521_v2  ;;  %v5258_v49 = vpop.f32.mrb[251].mxu0 }
 0x538   : > { %v5329_v16 = vmul.f32 %v8863_v51, %v5255_v39  ;;  %v5308_v34 = vadd.f32 %v5307_v31, %v12515_v46  ;;  %v5309_v50 = vpop.f32.mrb[250].mxu1  ;;  %v5259_v37 = vadd.f32 %v5258_v49, %v12521_v2  ;;  %v8873_v44 = vpop.eup %8872  ;;  %v14980_v46 = vld [vmem:[#allocation293_spill] sm:$0xff] }
 0x539   : > { %v5360_v0 = vadd.f32 %v5328_v33, %v2324_v20  ;;  %v5330_v58 = vmul.f32 %v8861_v25, %v5306_v36  ;;  %v5336_v41 = vmul.f32 %v8867_v24, %v5257_v19  ;;  %v5310_v30 = vadd.f32 %v5309_v50, %v12521_v2  ;;  %v5311_v3 = vpop.f32.mrb[251].mxu1  ;;  %v8875_v57 = vpop.eup %8874  ;;  %v14981_v25 = vld [vmem:[#allocation294_spill] sm:$0xff] }
 0x53a   : > { %v12719_v52 = vadd.f32 %v5329_v16, %v2326_v7  ;;  %v5331_v43 = vmul.f32 %v8865_v4, %v5308_v34  ;;  %v5337_v59 = vmul.f32 %v8871_v27, %v5259_v37  ;;  %v5312_v42 = vadd.f32 %v5311_v3, %v12521_v2  ;;  %v8877_v20 = vpop.eup %8876 }
 0x53b   : > { %v2641_v38 = vadd.f32 %v14980_v46, %v12567_v47  ;;  %v5362_v51 = vadd.f32 %v5330_v58, %v2627_v21  ;;  %v5368_v11 = vadd.f32 %v5336_v41, %v2328_v56  ;;  %v5338_v29 = vmul.f32 %v8869_v28, %v5310_v30  ;;  %v8879_v22 = vpop.eup %8878 }
 0x53c   : > { %v2340_v12 = vadd.f32 %v14981_v25, %v12567_v47  ;;  %v5363_v17 = vadd.f32 %v5331_v43, %v2629_v35  ;;  %v5369_v8 = vadd.f32 %v5337_v59, %v2330_v54  ;;  %v5339_v10 = vmul.f32 %v8873_v44, %v5312_v42  ;;  %v5262_v7 = vpop.f32.mrb[252].mxu0  ;;  %v8881_v33 = vpop.eup %8880 }
 0x53d   : > { %v5392_v4 = vmax.f32 %v5360_v0, 0.0  ;;  %v5400_v39 = vmax.f32 %v5368_v11, 0.0  ;;  %v5370_v48 = vadd.f32 %v5338_v29, %v2631_v5  ;;  %v5263_v2 = vadd.f32 %v5262_v7, %v12529_v1  ;;  %v5264_v24 = vpop.f32.mrb[253].mxu0  ;;  %v8883_v28 = vpop.eup %8882 }
 0x53e   : > { %v5394_v36 = vmax.f32 %v5362_v51, 0.0  ;;  %v5401_v21 = vmax.f32 %v5369_v8, 0.0  ;;  %v5371_v56 = vadd.f32 %v5339_v10, %v2633_v61  ;;  %v5315_v31 = vpop.f32.mrb[252].mxu1  ;;  %v5265_v19 = vadd.f32 %v5264_v24, %v12529_v1  ;;  %v5266_v49 = vpop.f32.mrb[254].mxu0 }
 0x53f   : > { %v5425_v35 = vpack.c.bf16 %v5400_v39, %v5392_v4  ;;  %v5402_v54 = vmax.f32 %v5370_v48, 0.0  ;;  %v5344_v16 = vmul.f32 %v8875_v57, %v5263_v2  ;;  %v5316_v34 = vadd.f32 %v5315_v31, %v12529_v1  ;;  %v5317_v50 = vpop.f32.mrb[253].mxu1  ;;  %v5268_v37 = vpop.f32.mrb[255].mxu0  ;;  %v14982_v4 = vld [vmem:[#allocation295_spill] sm:$0xff] }
 0x540   : > { %v8885_v5 = vpop.eup %8884  ;;  %v5403_v27 = vmax.f32 %v5371_v56, 0.0  ;;  %v5345_v0 = vmul.f32 %v8879_v22, %v5265_v19  ;;  %v5318_v58 = vadd.f32 %v5317_v50, %v12529_v1  ;;  %v5267_v41 = vadd.f32 %v5266_v49, %v12531_v62  ;;  %v5319_v61 = vpop.f32.mrb[254].mxu1 }
 0x541   : > { %v8887_v30 = vpop.eup %8886  ;;  %v5427_v3 = vpack.c.bf16 %v5402_v54, %v5394_v36  ;;  %v5376_v44 = vadd.f32 %v5344_v16, %v12694_v23  ;;  %v5346_v43 = vmul.f32 %v8877_v20, %v5316_v34  ;;  %v5320_v59 = vadd.f32 %v5319_v61, %v12531_v62  ;;  %v5321_v42 = vpop.f32.mrb[255].mxu1  ;;  %v14984_v34 = vld [vmem:[#allocation114_spill] sm:$0xff] }
 0x542   : > { %v8889_v57 = vpop.eup %8888  ;;  %v5377_v46 = vadd.f32 %v5345_v0, %v12702_v55  ;;  %v5347_v51 = vmul.f32 %v8881_v33, %v5318_v58  ;;  %v5352_v11 = vmul.f32 %v8883_v28, %v5267_v41  ;;  %v5269_v29 = vadd.f32 %v5268_v37, %v12531_v62  ;;  %v14983_v28 = vld [vmem:[#allocation113_spill] sm:$0xff]  ;;  %v14985_v37 = vld [vmem:[#allocation115_spill] sm:$0xff] }
 0x543   : > { %v5393_v1 = vmax.f32 %v12719_v52, 0.0  ;;  %v5378_v25 = vadd.f32 %v5346_v43, %v12698_v45  ;;  %v5354_v8 = vmul.f32 %v8885_v5, %v5320_v59  ;;  %v5322_v10 = vadd.f32 %v5321_v42, %v12531_v62  ;;  %v14987_v58 = vld [vmem:[#allocation121_spill] sm:$0xff]  ;;  %v14989_v43 = vld [vmem:[#allocation123_spill] sm:$0xff] }
 0x544   : > { %v5395_v7 = vmax.f32 %v5363_v17, 0.0  ;;  %v5379_v23 = vadd.f32 %v5347_v51, %v12707_v60  ;;  %v5384_v20 = vadd.f32 %v5352_v11, %v12711_v53  ;;  %v5353_v22 = vmul.f32 %v8887_v30, %v5269_v29  ;;  %v14988_v30 = vld [vmem:[#allocation122_spill] sm:$0xff]  ;;  %v14991_v29 = vld [vmem:[#allocation125_spill] sm:$0xff] }
 0x545   : > { %v2643_v55 = vadd.f32 %v14982_v4, %v12567_v47  ;;  %v5386_v39 = vadd.f32 %v5354_v8, %v2641_v38  ;;  %v5355_v48 = vmul.f32 %v8889_v57, %v5322_v10  ;;  %v5426_v2 = vpack.c.bf16 %v5401_v21, %v5393_v1  ;;  %v12750_v21 = vpop.permute.xlu0 %5440  ;;  %v14992_v8 = vld [vmem:[#allocation126_spill] sm:$0xff] }
 0x546   : > { %v5408_v24 = vmax.f32 %v5376_v44, 0.0  ;;  %v5416_v33 = vmax.f32 %v5384_v20, 0.0  ;;  %v5385_v52 = vadd.f32 %v5353_v22, %v2340_v12  ;;  %v5428_v36 = vpack.c.bf16 %v5403_v27, %v5395_v7  ;;  %v12748_v12 = vpop.permute.xlu1 %1138  ;;  %v14986_v27 = vld [vmem:[#allocation116_spill] sm:$0xff] }
 0x547   : > { %v5410_v45 = vmax.f32 %v5378_v25, 0.0  ;;  %v5418_v56 = vmax.f32 %v5386_v39, 0.0  ;;  %v5387_v31 = vadd.f32 %v5355_v48, %v2643_v55  ;;  %5528 = vmatprep.subr.bf16.mxu0 %v5426_v2  ;;  %v5409_v62 = vmax.f32 %v5377_v46, 0.0  ;;  %v14990_v46 = vld [vmem:[#allocation124_spill] sm:$0xff]  ;;  %v14993_v55 = vld [vmem:[#allocation127_spill] sm:$0xff] }
 0x548   : > { %v5433_v17 = vpack.c.bf16 %v5416_v33, %v5408_v24  ;;  %v5417_v60 = vmax.f32 %v5385_v52, 0.0  ;;  %5569 = vmatprep.subr.bf16.mxu1 %v5428_v36  ;;  %5529 = vmatpush1.bf16.msra.mxu0 %v5425_v35  ;;  %v5411_v53 = vmax.f32 %v5379_v23, 0.0  ;;  %v1738_v35 = vadd.f32 %v14983_v28, %v12748_v12  ;;  %v14994_v2 = vld [vmem:[#allocation128_spill] sm:$0xff]  ;;  %v14995_v33 = vld [vmem:[#allocation129_spill] sm:$0xff] }
 0x549   : > { %v5435_v19 = vpack.c.bf16 %v5418_v56, %v5410_v45  ;;  %v5419_v49 = vmax.f32 %v5387_v31, 0.0  ;;  %5570 = vmatpush1.bf16.msra.mxu1 %v5427_v3  ;;  %v2041_v50 = vadd.f32 %v14984_v34, %v12748_v12  ;;  %v12760_v5 = vpop.permute.xlu0 %1148  ;;  %v2043_v0 = vadd.f32 %v14986_v27, %v12748_v12  ;;  %v14996_v27 = vld [vmem:[#allocation130_spill] sm:$0xff] }
 0x54a   : > { %v5434_v47 = vpack.c.bf16 %v5417_v60, %v5409_v62  ;;  %v12754_v54 = vpop.permute.xlu1 %1143  ;;  %v8096_v16 = vmul.f32 -1.442695, %v1738_v35  ;;  %v1748_v41 = vadd.f32 %v14987_v58, %v12760_v5  ;;  %v2051_v3 = vadd.f32 %v14988_v30, %v12760_v5 }
 0x54b   : > { %v5436_v38 = vpack.c.bf16 %v5419_v49, %v5411_v53  ;;  %v8098_v61 = vmul.f32 -1.442695, %v2041_v50  ;;  %v1750_v59 = vadd.f32 %v14989_v43, %v12760_v5  ;;  %v8099_v57 = vmul.f32 -1.442695, %v2043_v0 }
 0x54c   : > { %5530 = vmatprep.subr.bf16.mxu0 %v5434_v47  ;;  %8890 = vpow2.f32 %v8096_v16  ;;  %v2053_v51 = vadd.f32 %v14990_v46, %v12760_v5  ;;  %v8118_v11 = vmul.f32 -1.442695, %v1748_v41  ;;  %v8120_v25 = vmul.f32 -1.442695, %v2051_v3  ;;  %v14997_v41 = vld [vmem:[#allocation131_spill] sm:$0xff] }
 0x54d   : > { %5571 = vmatprep.subr.bf16.mxu1 %v5436_v38  ;;  %5531 = vmatpush1.bf16.msra.mxu0 %v5433_v17  ;;  %8892 = vpow2.f32 %v8098_v61  ;;  %v8119_v7 = vmul.f32 -1.442695, %v1750_v59  ;;  %v12780_v48 = vpop.permute.xlu0 %1158 }
 0x54e   : > { %5572 = vmatpush1.bf16.msra.mxu1 %v5435_v19  ;;  %v12770_v42 = vpop.permute.xlu1 %1153  ;;  %v8121_v23 = vmul.f32 -1.442695, %v2053_v51  ;;  %v1758_v52 = vadd.f32 %v14995_v33, %v12780_v48  ;;  %v2061_v0 = vadd.f32 %v14996_v27, %v12780_v48  ;;  %v1760_v61 = vadd.f32 %v14997_v41, %v12780_v48  ;;  %v15009_v27 = vld [vmem:[#allocation305_spill] sm:$0xff]  ;;  %v15010_v41 = vld [vmem:[#allocation306_spill] sm:$0xff] }
 0x54f   : > { %v1752_v1 = vadd.f32 %v14991_v29, %v12770_v42  ;;  %v2055_v10 = vadd.f32 %v14992_v8, %v12770_v42  ;;  %v1754_v39 = vadd.f32 %v14993_v55, %v12770_v42  ;;  %v2057_v24 = vadd.f32 %v14994_v2, %v12770_v42  ;;  %v15001_v8 = vld [vmem:[#allocation135_spill] sm:$0xff] }
 0x550   : > { %8116 = vmatmul.mubr.msk.bf16.vlgmr.msra.gmra.mrb[4].mxu0 %vm1451_vm0, %v12650_v15  ;;  %v8134_v60 = vmul.f32 -1.442695, %v1758_v52  ;;  %v8136_v51 = vmul.f32 -1.442695, %v2061_v0  ;;  %v2657_v0 = vadd.f32 %v15009_v27, %v12760_v5 }
 0x551   : > { %8117 = vmatmul.mubr.msk.bf16.vlgmr.msra.gmra.mrb[4].mxu1 %vm1451_vm0, %v12650_v15  ;;  %6709 = vmatprep.mubr.bf16.mxu0 %v14917_v9  ;;  %v1740_v15 = vadd.f32 %v14985_v37, %v12748_v12  ;;  %v8126_v20 = vmul.f32 -1.442695, %v1752_v1  ;;  %v8128_v22 = vmul.f32 -1.442695, %v2055_v10  ;;  %v8127_v56 = vmul.f32 -1.442695, %v1754_v39 }
 0x552   : > { %6762 = vmatprep.mubr.bf16.mxu1 %v14917_v9  ;;  %v8129_v62 = vmul.f32 -1.442695, %v2057_v24  ;;  %v12790_v30 = vpop.permute.xlu1 %1163  ;;  %v15003_v24 = vld [vmem:[#allocation296_spill] sm:$0xff]  ;;  %v15058_v9 = vld [vmem:[#allocation163_spill] sm:$0xff] }
 0x553   : > { %v8097_v44 = vmul.f32 -1.442695, %v1740_v15  ;;  %v1764_v10 = vadd.f32 %v15001_v8, %v12790_v30  ;;  %v2344_v33 = vadd.f32 %v15003_v24, %v12748_v12 }
 0x555   : > { %8894 = vpow2.f32 %v8097_v44  ;;  %v14998_v44 = vld [vmem:[#allocation132_spill] sm:$0xff] }
 0x556   : > { %8896 = vpow2.f32 %v8099_v57  ;;  %v8891_v4 = vpop.eup %8890  ;;  %v2063_v43 = vadd.f32 %v14998_v44, %v12780_v48  ;;  %v14999_v57 = vld [vmem:[#allocation133_spill] sm:$0xff] }
 0x557   : > { %8898 = vpow2.f32 %v8118_v11  ;;  %v4744_v36 = vadd.f32 1.0, %v8891_v4  ;;  %v8893_v45 = vpop.eup %8892  ;;  %v1762_v46 = vadd.f32 %v14999_v57, %v12790_v30  ;;  %v15000_v11 = vld [vmem:[#allocation134_spill] sm:$0xff]  ;;  %v15002_v4 = vld [vmem:[#allocation136_spill] sm:$0xff] }
 0x558   : > { %8900 = vpow2.f32 %v8120_v25  ;;  %v4746_v19 = vadd.f32 1.0, %v8893_v45  ;;  %v2065_v29 = vadd.f32 %v15000_v11, %v12790_v30  ;;  %v8135_v25 = vmul.f32 -1.442695, %v1760_v61  ;;  %v15004_v45 = vld [vmem:[#allocation297_spill] sm:$0xff] }
 0x559   : > { %8902 = vpow2.f32 %v8119_v7  ;;  %v2067_v55 = vadd.f32 %v15002_v4, %v12790_v30  ;;  %v2356_v61 = vadd.f32 %v15010_v41, %v12760_v5 }
 0x55a   : > { %8904 = vpow2.f32 %v8121_v23  ;;  %v8137_v23 = vmul.f32 -1.442695, %v2063_v43  ;;  %v8144_v2 = vmul.f32 -1.442695, %v2065_v29 }
 0x55b   : > { %8906 = vpow2.f32 %v8126_v20  ;;  %v8123_v11 = vmul.f32 -1.442695, %v2356_v61  ;;  %v15015_v61 = vld [vmem:[#allocation118_spill] sm:$0xff] }
 0x55c   : > { %8908 = vpow2.f32 %v8128_v22  ;;  %v8142_v22 = vmul.f32 -1.442695, %v1762_v46  ;;  %v8124_v46 = vmul.f32 -1.442695, %v2657_v0  ;;  %v12846_v0 = vpop.permute.xlu1 %6344 }
 0x55d   : > { %8910 = vrcp.f32 %v4744_v36  ;;  %v8143_v36 = vmul.f32 -1.442695, %v1764_v10 }
 0x55e   : > { %8912 = vpow2.f32 %v8127_v56  ;;  %v2647_v56 = vadd.f32 %v15004_v45, %v12748_v12 }
 0x55f   : > { %v8895_v31 = vpop.eup %8894  ;;  %8914 = vpow2.f32 %v8129_v62 }
 0x560   : > { %v8897_v17 = vpop.eup %8896  ;;  %v4745_v47 = vadd.f32 1.0, %v8895_v31  ;;  %8916 = vpow2.f32 %v8134_v60 }
 0x561   : > { %v8899_v53 = vpop.eup %8898  ;;  %v4747_v28 = vadd.f32 1.0, %v8897_v17  ;;  %8918 = vrcp.f32 %v4746_v19  ;;  %v15005_v17 = vld [vmem:[#allocation298_spill] sm:$0xff]  ;;  %v8145_v19 = vmul.f32 -1.442695, %v2067_v55 }
 0x562   : > { %v8901_v49 = vpop.eup %8900  ;;  %v5997_v16 = vadd.f32 1.0, %v8899_v53  ;;  %8920 = vrcp.f32 %v4745_v47  ;;  %v2346_v60 = vadd.f32 %v15005_v17, %v12748_v12 }
 0x563   : > { %v8903_v38 = vpop.eup %8902  ;;  %v5999_v50 = vadd.f32 1.0, %v8901_v49  ;;  %8922 = vrcp.f32 %v4747_v28  ;;  %v15006_v49 = vld [vmem:[#allocation299_spill] sm:$0xff]  ;;  %v8100_v28 = vmul.f32 -1.442695, %v2344_v33 }
 0x564   : > { %v8905_v35 = vpop.eup %8904  ;;  %v5998_v15 = vadd.f32 1.0, %v8903_v38  ;;  %8924 = vrcp.f32 %v5997_v16  ;;  %v2649_v47 = vadd.f32 %v15006_v49, %v12748_v12 }
 0x565   : > { %v8907_v34 = vpop.eup %8906  ;;  %v6000_v58 = vadd.f32 1.0, %v8905_v35  ;;  %8926 = vrcp.f32 %v5999_v50  ;;  %v15007_v35 = vld [vmem:[#allocation304_spill] sm:$0xff]  ;;  %v8102_v50 = vmul.f32 -1.442695, %v2647_v56 }
 0x566   : > { %v8909_v37 = vpop.eup %8908  ;;  %v6005_v3 = vadd.f32 1.0, %v8907_v34  ;;  %8928 = vrcp.f32 %v5998_v15  ;;  %v2354_v16 = vadd.f32 %v15007_v35, %v12760_v5  ;;  %v8101_v15 = vmul.f32 -1.442695, %v2346_v60 }
 0x567   : > { %v6007_v59 = vadd.f32 1.0, %v8909_v37  ;;  %v12798_v1 = vpop.eup %8910  ;;  %8930 = vrcp.f32 %v6000_v58  ;;  %v8103_v12 = vmul.f32 -1.442695, %v2649_v47 }
 0x568   : > { %v8913_v7 = vpop.eup %8912  ;;  %8932 = vrcp.f32 %v6005_v3  ;;  %v8122_v44 = vmul.f32 -1.442695, %v2354_v16 }
 0x569   : > { %v8915_v20 = vpop.eup %8914  ;;  %8934 = vrcp.f32 %v6007_v59  ;;  %v6006_v62 = vadd.f32 1.0, %v8913_v7 }
 0x56a   : > { %v8917_v39 = vpop.eup %8916  ;;  %8936 = vpow2.f32 %v8136_v51  ;;  %v6008_v59 = vadd.f32 1.0, %v8915_v20  ;;  %v15012_v20 = vld [vmem:[#allocation307_spill] sm:$0xff] }
 0x56b   : > { %v12806_v52 = vpop.eup %8918  ;;  %8938 = vpow2.f32 %v8135_v25  ;;  %v6013_v25 = vadd.f32 1.0, %v8917_v39  ;;  %v2659_v55 = vadd.f32 %v15012_v20, %v12760_v5 }
 0x56c   : > { %v12810_v31 = vpop.eup %8920  ;;  %8940 = vpow2.f32 %v8137_v23 }
 0x56d   : > { %v12814_v53 = vpop.eup %8922  ;;  %8942 = vpow2.f32 %v8142_v22 }
 0x56e   : > { %v12818_v38 = vpop.eup %8924  ;;  %8944 = vpow2.f32 %v8144_v2 }
 0x56f   : > { %v12822_v34 = vpop.eup %8926  ;;  %8946 = vpow2.f32 %v8143_v36 }
 0x570   : > { %15008 = vst [vmem:[#allocation55_spill] sm:$0xff] %v12822_v34  ;;  %v12824_v37 = vpop.eup %8928  ;;  %8948 = vrcp.f32 %v6006_v62  ;;  %v8125_v62 = vmul.f32 -1.442695, %v2659_v55 }
 0x571   : > { %v12828_v58 = vpop.eup %8930  ;;  %8950 = vpow2.f32 %v8145_v19 }
 0x572   : > { %v12832_v3 = vpop.eup %8932  ;;  %8952 = vpow2.f32 %v8100_v28  ;;  %v15013_v28 = vld [vmem:[#allocation308_spill] sm:$0xff] }
 0x573   : > { %v12834_v43 = vpop.eup %8934  ;;  %8954 = vpow2.f32 %v8102_v50  ;;  %v2358_v35 = vadd.f32 %v15013_v28, %v12770_v42  ;;  %v12844_v50 = vpop.permute.xlu0 %6339  ;;  %v15028_v28 = vld [vmem:[#allocation315_spill] sm:$0xff] }
 0x574   : > { %15011 = vst [vmem:[#allocation56_spill] sm:$0xff] %v12834_v43  ;;  %v8937_v57 = vpop.eup %8936  ;;  %8956 = vpow2.f32 %v8101_v15  ;;  %v15081_v43 = vld [vmem:[#allocation338_spill] sm:$0xff] }
 0x575   : > { %v8939_v51 = vpop.eup %8938  ;;  %8958 = vpow2.f32 %v8103_v12  ;;  %v6015_v10 = vadd.f32 1.0, %v8937_v57  ;;  %v15014_v12 = vld [vmem:[#allocation117_spill] sm:$0xff] }
 0x576   : > { %v8941_v29 = vpop.eup %8940  ;;  %8960 = vpow2.f32 %v8122_v44  ;;  %v6014_v23 = vadd.f32 1.0, %v8939_v51  ;;  %v1742_v41 = vadd.f32 %v15014_v12, %v12754_v54  ;;  %v12852_v44 = vadd.f32 %v15015_v61, %v12754_v54  ;;  %v12885_v61 = vpop.permute.xlu1 %6476 }
 0x577   : > { %v8943_v8 = vpop.eup %8942  ;;  %8962 = vrcp.f32 %v6008_v59  ;;  %v6016_v4 = vadd.f32 1.0, %v8941_v29  ;;  %v15017_v29 = vld [vmem:[#allocation309_spill] sm:$0xff] }
 0x578   : > { %v8945_v7 = vpop.eup %8944  ;;  %8964 = vpow2.f32 %v8124_v46  ;;  %v6021_v24 = vadd.f32 1.0, %v8943_v8  ;;  %v15016_v46 = vld [vmem:[#allocation119_spill] sm:$0xff] }
 0x579   : > { %v8947_v22 = vpop.eup %8946  ;;  %8966 = vpow2.f32 %v8123_v11  ;;  %v6023_v39 = vadd.f32 1.0, %v8945_v7  ;;  %v1744_v51 = vadd.f32 %v15016_v46, %v12754_v54  ;;  %v15019_v7 = vld [vmem:[#allocation310_spill] sm:$0xff] }
 0x57a   : > { %v12838_v2 = vpop.eup %8948  ;;  %8968 = vrcp.f32 %v6013_v25  ;;  %v6022_v45 = vadd.f32 1.0, %v8947_v22  ;;  %v2661_v25 = vadd.f32 %v15017_v29, %v12770_v42  ;;  %v15020_v22 = vld [vmem:[#allocation311_spill] sm:$0xff] }
 0x57b   : > { %v8951_v33 = vpop.eup %8950  ;;  %8970 = vrcp.f32 %v6015_v10  ;;  %v8130_v10 = vmul.f32 -1.442695, %v2358_v35  ;;  %v2669_v35 = vadd.f32 %v15028_v28, %v12780_v48 }
 0x57c   : > { %v8953_v36 = vpop.eup %8952  ;;  %8972 = vrcp.f32 %v6014_v23  ;;  %v6024_v60 = vadd.f32 1.0, %v8951_v33  ;;  %v2360_v23 = vadd.f32 %v15019_v7, %v12770_v42 }
 0x57d   : > { %v8955_v56 = vpop.eup %8954  ;;  %8974 = vrcp.f32 %v6016_v4  ;;  %v4748_v49 = vadd.f32 1.0, %v8953_v36  ;;  %v2663_v4 = vadd.f32 %v15020_v22, %v12770_v42 }
 0x57e   : > { %v8957_v17 = vpop.eup %8956  ;;  %8976 = vrcp.f32 %v6021_v24  ;;  %v4750_v47 = vadd.f32 1.0, %v8955_v56  ;;  %v15022_v24 = vld [vmem:[#allocation312_spill] sm:$0xff] }
 0x57f   : > { %v8959_v19 = vpop.eup %8958  ;;  %8978 = vrcp.f32 %v6023_v39  ;;  %v4749_v15 = vadd.f32 1.0, %v8957_v17  ;;  %v2364_v33 = vadd.f32 %v15022_v24, %v12780_v48  ;;  %v15023_v39 = vld [vmem:[#allocation313_spill] sm:$0xff]  ;;  %v15025_v56 = vld [vmem:[#allocation120_spill] sm:$0xff] }
 0x580   : > { %v8961_v5 = vpop.eup %8960  ;;  %8980 = vrcp.f32 %v6022_v45  ;;  %v4751_v59 = vadd.f32 1.0, %v8959_v19  ;;  %v2667_v36 = vadd.f32 %v15023_v39, %v12780_v48 }
 0x581   : > { %v12842_v16 = vpop.eup %8962  ;;  %8982 = vpow2.f32 %v8125_v62  ;;  %v6001_v11 = vadd.f32 1.0, %v8961_v5  ;;  %v2047_v62 = vadd.f32 %v15025_v56, %v12754_v54  ;;  %v12878_v5 = vpop.permute.xlu0 %6471 }
 0x582   : > { %v8965_v27 = vpop.eup %8964  ;;  %8984 = vrcp.f32 %v6024_v60  ;;  %v15026_v60 = vld [vmem:[#allocation314_spill] sm:$0xff] }
 0x583   : > { %v8967_v57 = vpop.eup %8966  ;;  %8986 = vrcp.f32 %v4748_v49  ;;  %v6003_v55 = vadd.f32 1.0, %v8965_v27  ;;  %v2366_v42 = vadd.f32 %v15026_v60, %v12780_v48 }
 0x584   : > { %v12858_v8 = vpop.eup %8968  ;;  %8988 = vrcp.f32 %v4750_v47  ;;  %v6002_v17 = vadd.f32 1.0, %v8967_v57  ;;  %v8132_v47 = vmul.f32 -1.442695, %v2661_v25  ;;  %v8133_v57 = vmul.f32 -1.442695, %v2663_v4 }
 0x585   : > { %15018 = vst [vmem:[#allocation238_spill] sm:$0xff] %v12858_v8  ;;  %v12864_v20 = vpop.eup %8970  ;;  %8990 = vrcp.f32 %v4749_v15  ;;  %v8140_v25 = vmul.f32 -1.442695, %v2667_v36  ;;  %v8139_v56 = vmul.f32 -1.442695, %v2366_v42  ;;  %v15033_v36 = vld [vmem:[#allocation316_spill] sm:$0xff] }
 0x586   : > { %15021 = vst [vmem:[#allocation57_spill] sm:$0xff] %v12864_v20  ;;  %v12870_v45 = vpop.eup %8972  ;;  %8992 = vrcp.f32 %v4751_v59  ;;  %v8131_v59 = vmul.f32 -1.442695, %v2360_v23 }
 0x587   : > { %15024 = vst [vmem:[#allocation58_spill] sm:$0xff] %v12870_v45  ;;  %v12876_v49 = vpop.eup %8974  ;;  %8994 = vrcp.f32 %v6001_v11  ;;  %v8138_v11 = vmul.f32 -1.442695, %v2364_v33 }
 0x588   : > { %15027 = vst [vmem:[#allocation59_spill] sm:$0xff] %v12876_v49  ;;  %v12883_v12 = vpop.eup %8976  ;;  %8996 = vpow2.f32 %v8130_v10 }
 0x589   : > { %15029 = vst [vmem:[#allocation60_spill] sm:$0xff] %v12883_v12  ;;  %v12888_v7 = vpop.eup %8978  ;;  %8998 = vrcp.f32 %v6003_v55 }
 0x58a   : > { %15030 = vst [vmem:[#allocation61_spill] sm:$0xff] %v12888_v7  ;;  %v12891_v39 = vpop.eup %8980  ;;  %9000 = vrcp.f32 %v6002_v17  ;;  %v2368_v17 = vadd.f32 %v15033_v36, %v12790_v30 }
 0x58b   : > { %15031 = vst [vmem:[#allocation62_spill] sm:$0xff] %v12891_v39  ;;  %v8983_v60 = vpop.eup %8982  ;;  %9002 = vpow2.f32 %v8132_v47  ;;  %v12907_v47 = vpop.permute.xlu0 %1188 }
 0x58c   : > { %9004 = vpow2.f32 %v8131_v59 }
 0x58d   : > { %9006 = vpow2.f32 %v8133_v57 }
 0x58e   : > { %9008 = vpow2.f32 %v8138_v11  ;;  %v15035_v11 = vld [vmem:[#allocation318_spill] sm:$0xff] }
 0x58f   : > { %9010 = vpow2.f32 %v8140_v25 }
 0x590   : > { %9012 = vpow2.f32 %v8139_v56 }
 0x5eb   : > { %v5480_v19 = vpop.f32.mrb[0].mxu0 }
 0x5ec   : > { %v5481_v15 = vadd.f32 %v5480_v19, %v12750_v21  ;;  %v5482_v27 = vpop.f32.mrb[1].mxu0  ;;  %v8141_v19 = vmul.f32 -1.442695, %v2669_v35 }
 0x5ed   : > { %v5483_v46 = vadd.f32 %v5482_v27, %v12750_v21  ;;  %v5484_v29 = vpop.f32.mrb[2].mxu0  ;;  %v5521_v22 = vpop.f32.mrb[0].mxu1 }
 0x5ee   : > { %v5610_v48 = vmul.f32 %v12798_v1, %v5481_v15  ;;  %v5485_v24 = vpop.f32.mrb[3].mxu0  ;;  %v5522_v10 = vadd.f32 %v5521_v22, %v12750_v21  ;;  %v5523_v4 = vpop.f32.mrb[1].mxu1  ;;  %9014 = vpow2.f32 %v8141_v19 }
 0x5ef   : > { %v5611_v23 = vmul.f32 %v12810_v31, %v5483_v46  ;;  %v5524_v55 = vadd.f32 %v5523_v4, %v12750_v21  ;;  %v5525_v33 = vpop.f32.mrb[2].mxu1  ;;  %v12898_v1 = vpop.eup %8984 }
 0x5f0   : > { %v12895_v28 = vadd.f32 %v5610_v48, %v1742_v41  ;;  %15032 = vst [vmem:[#allocation63_spill] sm:$0xff] %v12898_v1  ;;  %v5612_v42 = vmul.f32 %v12806_v52, %v5522_v10  ;;  %v5526_v31 = vpop.f32.mrb[3].mxu1  ;;  %v12905_v27 = vpop.eup %8986  ;;  %v15034_v41 = vld [vmem:[#allocation317_spill] sm:$0xff]  ;;  %v6004_v48 = vadd.f32 1.0, %v8983_v60  ;;  %v8146_v33 = vmul.f32 -1.442695, %v2368_v17 }
 0x5f1   : > { %v12903_v15 = vadd.f32 %v5611_v23, %v1744_v51  ;;  %v2671_v35 = vadd.f32 %v15034_v41, %v12790_v30  ;;  %v5613_v59 = vmul.f32 %v12814_v53, %v5524_v55  ;;  %v12913_v29 = vpop.eup %8988  ;;  %v12921_v24 = vpop.permute.xlu1 %1193 }
 0x5f2   : > { %v5626_v46 = vand.u32 2147483647, %v12895_v28  ;;  %v12916_v52 = vadd.f32 %v5612_v42, %v12852_v44  ;;  %v12919_v22 = vpop.eup %8990  ;;  %v2370_v44 = vadd.f32 %v15035_v11, %v12790_v30  ;;  %9016 = vrcp.f32 %v6004_v48 }
 0x5f3   : > { %v5627_v51 = vand.u32 2147483647, %v12903_v15  ;;  %v12925_v23 = vadd.f32 %v5613_v59, %v2047_v62  ;;  %v12927_v53 = vpop.eup %8992  ;;  %v15038_v59 = vld [vmem:[#allocation319_spill] sm:$0xff]  ;;  %vm5762_vm10 = vcmp.ge.f32.partialorder %v12895_v28, 0.0  ;;  %vm5763_vm12 = vcmp.ge.f32.partialorder %v12903_v15, 0.0 }
 0x5f4   : > { %v5634_v57 = vsub.f32 0.0, %v5626_v46  ;;  %v5628_v4 = vand.u32 2147483647, %v12916_v52  ;;  %v12932_v55 = vpop.eup %8994  ;;  %v12939_v46 = vpop.permute.xlu0 %6349  ;;  %v8147_v10 = vmul.f32 -1.442695, %v2370_v44  ;;  %vm5764_vm11 = vcmp.ge.f32.partialorder %v12916_v52, 0.0 }
 0x5f5   : > { %v5635_v60 = vsub.f32 0.0, %v5627_v51  ;;  %15036 = vst [vmem:[#allocation64_spill] sm:$0xff] %v12932_v55  ;;  %v5629_v36 = vand.u32 2147483647, %v12925_v23  ;;  %v8997_v42 = vpop.eup %8996  ;;  %v2673_v51 = vadd.f32 %v15038_v59, %v12790_v30  ;;  %vm5765_vm13 = vcmp.ge.f32.partialorder %v12925_v23, 0.0 }
 0x5f6   : > { %v5642_v25 = vmul.f32 1.442695, %v5634_v57  ;;  %v5636_v62 = vsub.f32 0.0, %v5628_v4  ;;  %v12937_v41 = vpop.eup %8998  ;;  %v8148_v57 = vmul.f32 -1.442695, %v2671_v35  ;;  %v12945_v4 = vpop.permute.xlu1 %6354 }
 0x5f7   : > { %v5644_v31 = vmul.f32 1.442695, %v5635_v60  ;;  %15037 = vst [vmem:[#allocation219_spill] sm:$0xff] %v12937_v41  ;;  %v5637_v19 = vsub.f32 0.0, %v5629_v36  ;;  %v12943_v17 = vpop.eup %9000  ;;  %v6009_v60 = vadd.f32 1.0, %v8997_v42 }
 0x5f8   : > { %9018 = vpow2.f32 %v5642_v25  ;;  %15039 = vst [vmem:[#allocation220_spill] sm:$0xff] %v12943_v17  ;;  %v5646_v11 = vmul.f32 1.442695, %v5636_v62  ;;  %v9003_v48 = vpop.eup %9002  ;;  %v8149_v63 = vmul.f32 -1.442695, %v2673_v51  ;;  %v12947_v59 = vpop.permute.xlu0 %6481  ;;  %v15042_v51 = vld [vmem:[#allocation153_spill] sm:$0xff] }
 0x5f9   : > { %9020 = vpow2.f32 %v5644_v31  ;;  %v5648_v18 = vmul.f32 1.442695, %v5637_v19  ;;  %v9005_v56 = vpop.eup %9004  ;;  %v6011_v25 = vadd.f32 1.0, %v9003_v48  ;;  %v15054_v17 = vld [vmem:[#allocation161_spill] sm:$0xff] }
 0x5fa   : > { %9022 = vpow2.f32 %v8146_v33  ;;  %v9007_v6 = vpop.eup %9006  ;;  %v6010_v35 = vadd.f32 1.0, %v9005_v56  ;;  %v12949_v33 = vpop.permute.xlu1 %6486 }
 0x5fb   : > { %9024 = vpow2.f32 %v5646_v11  ;;  %v9009_v30 = vpop.eup %9008  ;;  %v6012_v31 = vadd.f32 1.0, %v9007_v6  ;;  %15040 = vst [vmem:[#allocation221_spill] sm:$0xff] %v12949_v33  ;;  %v15043_v11 = vld [vmem:[#allocation154_spill] sm:$0xff] }
 0x5fc   : > { %9026 = vpow2.f32 %v5648_v18  ;;  %v9011_v36 = vpop.eup %9010  ;;  %v6017_v19 = vadd.f32 1.0, %v9009_v30  ;;  %v12961_v56 = vadd.f32 %v15043_v11, %v12907_v47  ;;  %v12976_v11 = vadd.f32 %v15047_v32, %v12921_v24 }
 0x5fd   : > { %9028 = vpow2.f32 %v8148_v57  ;;  %v9013_v62 = vpop.eup %9012  ;;  %v12957_v57 = vadd.f32 %v15042_v51, %v12907_v47  ;;  %v1199_v51 = vpop.permute.xlu0 %1198 }
 0x5fe   : > { %9030 = vrcp.f32 %v6009_v60  ;;  %v9015_v42 = vpop.eup %9014  ;;  %15044 = vst [vmem:[#allocation229_spill] sm:$0xff] %v12961_v56  ;;  %15048 = vst [vmem:[#allocation230_spill] sm:$0xff] %v12976_v11  ;;  %v12994_v32 = vadd.f32 %v15054_v17, %v1199_v51  ;;  %v13004_v7 = vadd.f32 %v15058_v9, %v1199_v51  ;;  %v15062_v17 = vld [vmem:[#allocation165_spill] sm:$0xff]  ;;  %v6018_v56 = vadd.f32 1.0, %v9013_v62  ;;  %v15083_v62 = vld [vmem:[#allocation339_spill] sm:$0xff] }
 0x5ff   : > { %9032 = vpow2.f32 %v8147_v10  ;;  %v12951_v44 = vpop.eup %9016  ;;  %v15045_v10 = vld [vmem:[#allocation155_spill] sm:$0xff] }
 0x600   : > { %9034 = vpow2.f32 %v8149_v63  ;;  %15041 = vst [vmem:[#allocation222_spill] sm:$0xff] %v12951_v44  ;;  %v12967_v48 = vadd.f32 %v15045_v10, %v12907_v47  ;;  %v15046_v63 = vld [vmem:[#allocation156_spill] sm:$0xff]  ;;  %15055 = vst [vmem:[#allocation45_spill] sm:$0xff] %v12994_v32 }
 0x601   : > { %9036 = vrcp.f32 %v6011_v25  ;;  %v12971_v60 = vadd.f32 %v15046_v63, %v12907_v47  ;;  %v15051_v63 = vld [vmem:[#allocation159_spill] sm:$0xff]  ;;  %v15052_v44 = vld [vmem:[#allocation160_spill] sm:$0xff]  ;;  %15059 = vst [vmem:[#allocation47_spill] sm:$0xff] %v13004_v7  ;;  %v6020_v7 = vadd.f32 1.0, %v9015_v42 }
 0x602   : > { %v12953_v18 = vpop.eup %9018  ;;  %9038 = vrcp.f32 %v6010_v35  ;;  %v15049_v35 = vld [vmem:[#allocation158_spill] sm:$0xff]  ;;  %v12991_v55 = vadd.f32 %v15052_v44, %v12921_v24  ;;  %v15060_v44 = vld [vmem:[#allocation164_spill] sm:$0xff] }
 0x603   : > { %v12963_v6 = vpop.eup %9020  ;;  %9040 = vrcp.f32 %v6012_v31  ;;  %v5666_v30 = vadd.f32 1.0, %v12953_v18  ;;  %v12980_v26 = vadd.f32 %v15049_v35, %v12921_v24  ;;  %v12987_v31 = vadd.f32 %v15051_v63, %v12921_v24  ;;  %v12998_v35 = vpop.permute.xlu1 %1203  ;;  %v15085_v42 = vld [vmem:[#allocation340_spill] sm:$0xff] }
 0x604   : > { %v9023_v25 = vpop.eup %9022  ;;  %9042 = vrcp.f32 %v6017_v19  ;;  %v5667_v10 = vadd.f32 1.0, %v12963_v6  ;;  %15053 = vst [vmem:[#allocation228_spill] sm:$0xff] %v12991_v55  ;;  %v15056_v19 = vld [vmem:[#allocation162_spill] sm:$0xff]  ;;  %v13008_v12 = vadd.f32 %v15060_v44, %v1199_v51  ;;  %v13012_v32 = vadd.f32 %v15062_v17, %v12998_v35  ;;  %v15069_v44 = vld [vmem:[#allocation168_spill] sm:$0xff] }
 0x605   : > { %15050 = vst [vmem:[#allocation231_spill] sm:$0xff] %v12980_v26  ;;  %v12983_v41 = vpop.eup %9024  ;;  %9044 = vlog2.f32 %v5666_v30  ;;  %v13001_v40 = vadd.f32 %v15056_v19, %v1199_v51  ;;  %v15065_v19 = vld [vmem:[#allocation166_spill] sm:$0xff] }
 0x606   : > { %v12996_v14 = vpop.eup %9026  ;;  %9046 = vrcp.f32 %v5666_v30  ;;  %v5668_v63 = vadd.f32 1.0, %v12983_v41  ;;  %15061 = vst [vmem:[#allocation48_spill] sm:$0xff] %v13008_v12  ;;  %15063 = vst [vmem:[#allocation232_spill] sm:$0xff] %v13012_v32  ;;  %v13019_v9 = vadd.f32 %v15065_v19, %v12998_v35  ;;  %v15067_v30 = vld [vmem:[#allocation167_spill] sm:$0xff]  ;;  %v13027_v12 = vadd.f32 %v15069_v44, %v12998_v35  ;;  %v15071_v32 = vld [vmem:[#allocation300_spill] sm:$0xff] }
 0x607   : > { %15057 = vst [vmem:[#allocation46_spill] sm:$0xff] %v13001_v40  ;;  %v9029_v20 = vpop.eup %9028  ;;  %9048 = vlog2.f32 %v5667_v10  ;;  %v5669_v8 = vadd.f32 1.0, %v12996_v14  ;;  %v13023_v40 = vadd.f32 %v15067_v30, %v12998_v35  ;;  %v13033_v49 = vadd.f32 %v15071_v32, %v12754_v54  ;;  %v15073_v30 = vld [vmem:[#allocation302_spill] sm:$0xff]  ;;  %v15074_v44 = vld [vmem:[#allocation303_spill] sm:$0xff] }
 0x608   : > { %v13015_v1 = vpop.eup %9030  ;;  %15066 = vst [vmem:[#allocation234_spill] sm:$0xff] %v13019_v9  ;;  %15070 = vst [vmem:[#allocation235_spill] sm:$0xff] %v13027_v12  ;;  %9050 = vlog2.f32 %v5668_v63  ;;  %v6019_v19 = vadd.f32 1.0, %v9011_v36  ;;  %v13047_v12 = vadd.f32 %v15074_v44, %v12754_v54  ;;  %v15078_v36 = vld [vmem:[#allocation337_spill] sm:$0xff]  ;;  %v13071_v44 = vadd.f32 %v15085_v42, %v12921_v24  ;;  %v15095_v42 = vld [vmem:[#allocation344_spill] sm:$0xff] }
 0x609   : > { %15064 = vst [vmem:[#allocation233_spill] sm:$0xff] %v13015_v1  ;;  %15068 = vst [vmem:[#allocation217_spill] sm:$0xff] %v13023_v40  ;;  %v13029_v17 = vpop.eup %9032  ;;  %v15072_v1 = vld [vmem:[#allocation301_spill] sm:$0xff]  ;;  %9052 = vrcp.f32 %v5668_v63  ;;  %v13043_v40 = vadd.f32 %v15073_v30, %v12754_v54  ;;  %v13057_v63 = vadd.f32 %v15078_v36, %v12907_v47 }
 0x60a   : > { %v13037_v26 = vadd.f32 %v15072_v1, %v12754_v54  ;;  %v13039_v9 = vpop.eup %9034  ;;  %9054 = vrcp.f32 %v5667_v10  ;;  %v15076_v1 = vld [vmem:[#allocation336_spill] sm:$0xff]  ;;  %v13063_v54 = vadd.f32 %v15081_v43, %v12907_v47  ;;  %v13067_v10 = vadd.f32 %v15083_v62, %v12907_v47  ;;  %15086 = vst [vmem:[#allocation81_spill] sm:$0xff] %v13071_v44  ;;  %v15088_v36 = vld [vmem:[#allocation341_spill] sm:$0xff]  ;;  %v15099_v44 = vld [vmem:[#allocation346_spill] sm:$0xff] }
 0x60b   : > { %v13049_v32 = vpop.eup %9036  ;;  %v13053_v39 = vadd.f32 %v15076_v1, %v12907_v47  ;;  %15079 = vst [vmem:[#allocation240_spill] sm:$0xff] %v13057_v63  ;;  %9056 = vlog2.f32 %v5669_v8  ;;  %v13077_v63 = vadd.f32 %v15088_v36, %v12921_v24  ;;  %v13096_v36 = vadd.f32 %v15099_v44, %v1199_v51 }
 0x60c   : > { %15075 = vst [vmem:[#allocation236_spill] sm:$0xff] %v13049_v32  ;;  %v13059_v30 = vpop.eup %9038  ;;  %15082 = vst [vmem:[#allocation242_spill] sm:$0xff] %v13063_v54  ;;  %9058 = vrcp.f32 %v5669_v8  ;;  %v15090_v32 = vld [vmem:[#allocation342_spill] sm:$0xff]  ;;  %v13090_v8 = vadd.f32 %v15095_v42, %v1199_v51  ;;  %v13107_v42 = vadd.f32 1.0, %v9029_v20  ;;  %v5658_v44 = vmin.f32 %v12895_v28, 0.0 }
 0x60d   : > { %15077 = vst [vmem:[#allocation239_spill] sm:$0xff] %v13053_v39  ;;  %15080 = vst [vmem:[#allocation241_spill] sm:$0xff] %v13059_v30  ;;  %v13073_v1 = vpop.eup %9040  ;;  %9060 = vrcp.f32 %v6019_v19  ;;  %v13081_v43 = vadd.f32 %v15090_v32, %v12921_v24  ;;  %v15092_v39 = vld [vmem:[#allocation343_spill] sm:$0xff]  ;;  %v13098_v32 = vadd.f32 1.0, %v9023_v25 }
 0x60e   : > { %15084 = vst [vmem:[#allocation243_spill] sm:$0xff] %v13067_v10  ;;  %15087 = vst [vmem:[#allocation82_spill] sm:$0xff] %v13073_v1  ;;  %v13085_v47 = vadd.f32 %v15092_v39, %v12921_v24  ;;  %v13087_v62 = vpop.eup %9042  ;;  %9062 = vrcp.f32 %v6018_v56  ;;  %v15097_v10 = vld [vmem:[#allocation345_spill] sm:$0xff]  ;;  %v15101_v1 = vld [vmem:[#allocation347_spill] sm:$0xff] }
 0x60f   : > { %15089 = vst [vmem:[#allocation83_spill] sm:$0xff] %v13077_v63  ;;  %15091 = vst [vmem:[#allocation84_spill] sm:$0xff] %v13081_v43  ;;  %v13093_v19 = vadd.f32 %v15097_v10, %v1199_v51  ;;  %v9045_v63 = vpop.eup %9044  ;;  %9064 = vrcp.f32 %v6020_v7  ;;  %v13101_v43 = vadd.f32 %v15101_v1, %v1199_v51  ;;  %v15103_v39 = vld [vmem:[#allocation348_spill] sm:$0xff]  ;;  %v15105_v10 = vld [vmem:[#allocation349_spill] sm:$0xff] }
 0x610   : > { %15093 = vst [vmem:[#allocation85_spill] sm:$0xff] %v13085_v47  ;;  %15094 = vst [vmem:[#allocation86_spill] sm:$0xff] %v13087_v62  ;;  %v13105_v24 = vadd.f32 %v15103_v39, %v12998_v35  ;;  %v9047_v56 = vpop.eup %9046  ;;  %v15107_v51 = vld [vmem:[#allocation16_spill] sm:$0xff]  ;;  %9066 = vrcp.f32 %v13098_v32  ;;  %v9334_v32 = vld [vmem:[%s10182_s30 + $0x8] sm:$0x77] }
 0x611   : > { %15096 = vst [vmem:[#allocation87_spill] sm:$0xff] %v13090_v8  ;;  %15098 = vst [vmem:[#allocation88_spill] sm:$0xff] %v13093_v19  ;;  %v13111_v19 = vadd.f32 %v15105_v10, %v12998_v35  ;;  %v5675_v8 = vmul.f32 0.6931472, %v9045_v63  ;;  %v9049_v7 = vpop.eup %9048  ;;  %v5770_v25 = vmul.f32 %v9047_v56, %v12953_v18  ;;  %v13117_v1 = vsub.s32 0, %v15107_v51 }
 0x612   : > { %15100 = vst [vmem:[#allocation89_spill] sm:$0xff] %v13096_v36  ;;  %15102 = vst [vmem:[#allocation90_spill] sm:$0xff] %v13101_v43  ;;  %v13120_v39 = vsub.s32 4, %v15107_v51  ;;  %v9051_v20 = vpop.eup %9050  ;;  %v5659_v43 = vmin.f32 %v12903_v15, 0.0  ;;  %v5677_v10 = vmul.f32 0.6931472, %v9049_v7  ;;  %9068 = vrcp.f32 %v13107_v42 }
 0x613   : > { %15104 = vst [vmem:[#allocation91_spill] sm:$0xff] %v13105_v24  ;;  %15106 = vst [vmem:[#allocation92_spill] sm:$0xff] %v13111_v19  ;;  %v5690_v24 = vsub.f32 %v5658_v44, %v5675_v8  ;;  %v15108_v19 = vcombine.low %v12895_v28, %v12903_v15  ;;  %v9053_v62 = vpop.eup %9052  ;;  %v5660_v36 = vmin.f32 %v12916_v52, 0.0  ;;  %v5679_v47 = vmul.f32 0.6931472, %v9051_v20 }
 0x614   : > { %v9055_v18 = vpop.eup %9054  ;;  %v5778_v8 = vsel %vm5762_vm10, %v9047_v56, %v5770_v25  ;;  %v5691_v44 = vsub.f32 %v5659_v43, %v5677_v10  ;;  %v5661_v7 = vmin.f32 %v12925_v23, 0.0  ;;  %v5772_v34 = vmul.f32 %v9053_v62, %v12983_v41 }
 0x615   : > { %v5877_v63 = vrot.slane %v15108_v19, 6  ;;  %v5698_v51 = vsel %vm4112_vm1, %v5690_v24, 0.0  ;;  %v9057_v54 = vpop.eup %9056  ;;  %v5692_v19 = vsub.f32 %v5660_v36, %v5679_v47  ;;  %v5771_v20 = vmul.f32 %v9055_v18, %v12963_v6 }
 0x616   : > { %v5699_v30 = vrot.slane %v5698_v51, 4  ;;  %v9059_v45 = vpop.eup %9058  ;;  %v5705_v33 = vsel %vm4112_vm1, %v5691_v44, 0.0  ;;  %v5681_v55 = vmul.f32 0.6931472, %v9057_v54  ;;  %v15111_v44 = vcombine.low %v12916_v52, %v12925_v23 }
 0x617   : > { %v5878_v11 = vrot.slane %v5877_v63, 4  ;;  %v13137_v24 = vpop.eup %9060  ;;  %v5712_v43 = vsel %vm4112_vm1, %v5692_v19, 0.0  ;;  %v5706_v56 = vrot.slane %v5705_v33, 4  ;;  %v5779_v47 = vsel %vm5763_vm12, %v9055_v18, %v5771_v20  ;;  %v15112_v18 = vld [vmem:[#allocation208_spill] sm:$0xff] }
 0x618   : > { %15109 = vst [vmem:[#allocation244_spill] sm:$0xff] %v13137_v24  ;;  %v5700_v28 = vadd.f32 %v5699_v30, %v5698_v51  ;;  %v13142_v41 = vpop.eup %9062  ;;  %v5713_v6 = vrot.slane %v5712_v43, 4  ;;  %v5853_v36 = vcombine.low %v5778_v8, %v5779_v47  ;;  %v5693_v25 = vsub.f32 %v5661_v7, %v5681_v55  ;;  %v9333_v24 = vld [vmem:[%s10182_s30] sm:$0x77] }
 0x619   : > { %15110 = vst [vmem:[#allocation93_spill] sm:$0xff] %v13142_v41  ;;  %v5773_v10 = vmul.f32 %v9059_v45, %v12996_v14  ;;  %v13145_v54 = vpop.eup %9064  ;;  %v5780_v30 = vsel %vm5764_vm11, %v9053_v62, %v5772_v34  ;;  %v5707_v51 = vadd.f32 %v5706_v56, %v5705_v33  ;;  %v5879_v19 = vrot.slane %v15111_v44, 6 }
 0x61a   : > { %v5701_v63 = vrot.slane %v5700_v28, 2  ;;  %v5714_v15 = vadd.f32 %v5713_v6, %v5712_v43  ;;  %v5861_v20 = vmul.f32 %v5853_v36, %v15112_v18  ;;  %v5893_v41 = vmul.f32 %v9333_v24, %v5853_v36 }
 0x61b   : > { %v5719_v55 = vsel %vm4112_vm1, %v5693_v25, 0.0  ;;  %v6026_v14 = vadd.f32 1.0, %v13029_v17  ;;  %v5781_v34 = vsel %vm5765_vm13, %v9059_v45, %v5773_v10  ;;  %v5708_v33 = vrot.slane %v5707_v51, 2  ;;  %v15114_v45 = vld [vmem:[#allocation214_spill] sm:$0xff] }
 0x61c   : > { %v5702_v8 = vadd.f32 %v5701_v63, %v5700_v28  ;;  %v5720_v7 = vrot.slane %v5719_v55, 4  ;;  %v13158_v62 = vadd.f32 %v5878_v11, %v5861_v20  ;;  %v13160_v52 = vadd.f32 %v5893_v41, %v5878_v11  ;;  %v15115_v11 = vld [vmem:[#allocation350_spill] sm:$0xff] }
 0x61d   : > { %v5854_v43 = vcombine.low %v5780_v30, %v5781_v34  ;;  %v6028_v24 = vadd.f32 1.0, %v13039_v9  ;;  %v5715_v56 = vrot.slane %v5714_v15, 2  ;;  %v5880_v47 = vrot.slane %v5879_v19, 4  ;;  %v15116_v30 = vld [vmem:[#allocation351_spill] sm:$0xff] }
 0x61e   : > { %15113 = vst [vmem:[#allocation94_spill] sm:$0xff] %v13160_v52  ;;  %v6364_v17 = vrot.slane %v13158_v62, %v13117_v1  ;;  %v6368_v23 = vrot.slane %v13158_v62, %v13120_v39  ;;  %v5721_v28 = vadd.f32 %v5720_v7, %v5719_v55  ;;  %v13172_v41 = vadd.f32 %v15115_v11, %v12998_v35 }
 0x61f   : > { %v5862_v6 = vmul.f32 %v5854_v43, %v15114_v45  ;;  %v5894_v36 = vmul.f32 %v9334_v32, %v5854_v43  ;;  %v5703_v9 = vrot.slane %v5702_v8, 1  ;;  %9070 = vrcp.f32 %v6026_v14 }
 0x620   : > { %v13175_v25 = vadd.f32 %v5708_v33, %v5707_v51  ;;  %v13180_v63 = vrot.slane %v6368_v23, %v13117_v1  ;;  %9072 = vrcp.f32 %v6028_v24  ;;  %v13184_v44 = vadd.f32 %v15116_v30, %v12998_v35 }
 0x621   : > { %v13177_v10 = vadd.f32 %v5880_v47, %v5862_v6  ;;  %v13186_v42 = vadd.f32 %v5715_v56, %v5714_v15  ;;  %v13188_v19 = vadd.f32 %v5894_v36, %v5880_v47  ;;  %v13191_v18 = vrot.slane %v6364_v17, %v13117_v1 }
 0x622   : > { %v5722_v20 = vrot.slane %v5721_v28, 2  ;;  %v6434_v55 = vmul.f32 %v13180_v63, %v12844_v50  ;;  %v6442_v14 = vmul.f32 %v13180_v63, %v12846_v0  ;;  %v13202_v43 = vadd.f32 %v5703_v9, %v5702_v8 }
 0x623   : > { %15117 = vst [vmem:[#allocation95_spill] sm:$0xff] %v13188_v19  ;;  %v5562_v51 = vpop.f32.mrb[4].mxu0  ;;  %v6376_v7 = vrot.slane %v13177_v10, %v13120_v39  ;;  %v6372_v6 = vrot.slane %v13177_v10, %v13117_v1 }
 0x624   : > { %v5563_v35 = vadd.f32 %v5562_v51, %v12750_v21  ;;  %v5603_v15 = vpop.f32.mrb[4].mxu1  ;;  %v5564_v34 = vpop.f32.mrb[5].mxu0  ;;  %v6490_v23 = vadd.f32 %v12878_v5, %v6434_v55  ;;  %v6498_v9 = vadd.f32 %v12885_v61, %v6442_v14 }
 0x625   : > { %v5604_v24 = vadd.f32 %v5603_v15, %v12750_v21  ;;  %v5565_v56 = vadd.f32 %v5564_v34, %v12750_v21  ;;  %v5605_v47 = vpop.f32.mrb[5].mxu1  ;;  %v5566_v17 = vpop.f32.mrb[6].mxu0  ;;  %v6433_v34 = vmul.f32 %v13191_v18, %v12844_v50  ;;  %v13226_v14 = vrot.slane %v6376_v7, %v13117_v1 }
 0x626   : > { %v5614_v11 = vmul.f32 %v12905_v27, %v5563_v35  ;;  %v5606_v32 = vadd.f32 %v5605_v47, %v12750_v21  ;;  %v5607_v36 = vpop.f32.mrb[6].mxu1  ;;  %v5567_v8 = vpop.f32.mrb[7].mxu0  ;;  %v6522_v55 = vmul.f32 %v12824_v37, %v6490_v23  ;;  %v6530_v35 = vmul.f32 %v12838_v2, %v6498_v9 }
 0x627   : > { %v5616_v30 = vmul.f32 %v12913_v29, %v5604_v24  ;;  %v5615_v51 = vmul.f32 %v12919_v22, %v5565_v56  ;;  %v5608_v15 = vpop.f32.mrb[7].mxu1  ;;  %v13218_v17 = vpop.eup %9066  ;;  %v13228_v29 = vadd.f32 %v5722_v20, %v5721_v28  ;;  %v6441_v2 = vmul.f32 %v13191_v18, %v12846_v0 }
 0x628   : > { %v13221_v27 = vadd.f32 %v5614_v11, %v13033_v49  ;;  %v5617_v21 = vmul.f32 %v12927_v53, %v5606_v32  ;;  %v6554_v24 = vadd.f32 %v6522_v55, %v12967_v48  ;;  %v13237_v56 = vpop.eup %9068  ;;  %v6450_v7 = vmul.f32 %v13180_v63, %v12939_v46 }
 0x629   : > { %v13231_v22 = vadd.f32 %v5616_v30, %v13037_v26  ;;  %v13234_v37 = vadd.f32 %v5615_v51, %v13043_v40  ;;  %v13246_v20 = vpop.eup %9070  ;;  %v13249_v26 = vrot.slane %v6372_v6, %v13117_v1  ;;  %v6436_v11 = vmul.f32 %v13226_v14, %v12844_v50 }
 0x62a   : > { %v5630_v49 = vand.u32 2147483647, %v13221_v27  ;;  %v13241_v53 = vadd.f32 %v5617_v21, %v13047_v12  ;;  %v13255_v47 = vpop.eup %9072  ;;  %v6489_v32 = vadd.f32 %v12878_v5, %v6433_v34  ;;  %v6444_v9 = vmul.f32 %v13226_v14, %v12846_v0 }
 0x62b   : > { %v5632_v40 = vand.u32 2147483647, %v13231_v22  ;;  %v5631_v48 = vand.u32 2147483647, %v13234_v37  ;;  %v5875_v23 = vcombine.low %v13221_v27, %v13234_v37  ;;  %v6562_v34 = vadd.f32 %v6530_v35, %v12987_v31 }
 0x62c   : > { %v5638_v12 = vsub.f32 0.0, %v5630_v49  ;;  %v5633_v8 = vand.u32 2147483647, %v13241_v53  ;;  %v5876_v55 = vcombine.low %v13231_v22, %v13241_v53  ;;  %v6586_v45 = vmax.f32 %v6554_v24, 0.0 }
 0x62d   : > { %v5640_v6 = vsub.f32 0.0, %v5632_v40  ;;  %v5639_v36 = vsub.f32 0.0, %v5631_v48  ;;  %v5663_v40 = vmin.f32 %v13234_v37, 0.0  ;;  %v5665_v48 = vmin.f32 %v13241_v53, 0.0 }
 0x62e   : > { %v5650_v30 = vmul.f32 1.442695, %v5638_v12  ;;  %v5641_v28 = vsub.f32 0.0, %v5633_v8  ;;  %v6594_v33 = vmax.f32 %v6562_v34, 0.0  ;;  %v6492_v51 = vadd.f32 %v12878_v5, %v6436_v11 }
 0x62f   : > { %v5654_v21 = vmul.f32 1.442695, %v5640_v6  ;;  %v5652_v49 = vmul.f32 1.442695, %v5639_v36  ;;  %v13273_v15 = vrot.slane %v5875_v23, 6  ;;  %v6500_v6 = vadd.f32 %v12885_v61, %v6444_v9 }
 0x630   : > { %9074 = vpow2.f32 %v5650_v30  ;;  %v5656_v12 = vmul.f32 1.442695, %v5641_v28  ;;  %v6497_v36 = vadd.f32 %v12885_v61, %v6441_v2  ;;  %v6622_v31 = vpack.c.bf16 %v6594_v33, %v6586_v45  ;;  %v15118_v33 = vld [vmem:[#allocation228_spill] sm:$0xff]  ;;  %v15119_v45 = vld [vmem:[#allocation230_spill] sm:$0xff] }
 0x631   : > { %9076 = vpow2.f32 %v5654_v21  ;;  %v6524_v35 = vmul.f32 %v12828_v58, %v6492_v51  ;;  %v6521_v8 = vmul.f32 %v12818_v38, %v6489_v32  ;;  %v6532_v24 = vmul.f32 %v12842_v16, %v6500_v6 }
 0x632   : > { %9078 = vpow2.f32 %v5652_v49  ;;  %v6529_v28 = vmul.f32 %v12832_v3, %v6497_v36  ;;  %v6435_v11 = vmul.f32 %v13249_v26, %v12844_v50  ;;  %v6443_v23 = vmul.f32 %v13249_v26, %v12846_v0  ;;  %6677 = vmatprep.subr.bf16.mxu0 %v6622_v31  ;;  %v15120_v49 = vld [vmem:[#allocation221_spill] sm:$0xff]  ;;  %v15122_v36 = vld [vmem:[#allocation55_spill] sm:$0xff]  ;;  %v15123_v31 = vld [vmem:[#allocation56_spill] sm:$0xff] }
 0x633   : > { %9080 = vpow2.f32 %v5656_v12  ;;  %v6556_v9 = vadd.f32 %v6524_v35, %v12971_v60  ;;  %v6553_v2 = vadd.f32 %v6521_v8, %v12957_v57  ;;  %v6458_v58 = vmul.f32 %v13180_v63, %v12945_v4  ;;  %v15121_v60 = vld [vmem:[#allocation58_spill] sm:$0xff] }
 0x634   : > { %v6506_v38 = vadd.f32 %v12947_v59, %v6450_v7  ;;  %v6564_v16 = vadd.f32 %v6532_v24, %v15118_v33  ;;  %v6561_v3 = vadd.f32 %v6529_v28, %v15119_v45  ;;  %v6491_v32 = vadd.f32 %v12878_v5, %v6435_v11  ;;  %v15124_v35 = vld [vmem:[#allocation62_spill] sm:$0xff]  ;;  %v15125_v24 = vld [vmem:[#allocation47_spill] sm:$0xff] }
 0x635   : > { %v6499_v30 = vadd.f32 %v12885_v61, %v6443_v23  ;;  %v6588_v51 = vmax.f32 %v6556_v9, 0.0  ;;  %v6585_v21 = vmax.f32 %v6553_v2, 0.0  ;;  %v6514_v34 = vadd.f32 %v15120_v49, %v6458_v58 }
 0x636   : > { %v6538_v12 = vmul.f32 %v15121_v60, %v6506_v38  ;;  %v6596_v57 = vmax.f32 %v6564_v16, 0.0  ;;  %v6593_v6 = vmax.f32 %v6561_v3, 0.0  ;;  %v6523_v63 = vmul.f32 %v15122_v36, %v6491_v32  ;;  %v15126_v38 = vld [vmem:[#allocation229_spill] sm:$0xff]  ;;  %v15127_v16 = vld [vmem:[#allocation231_spill] sm:$0xff] }
 0x637   : > { %v6531_v7 = vmul.f32 %v15123_v31, %v6499_v30  ;;  %v6546_v8 = vmul.f32 %v15124_v35, %v6514_v34  ;;  %v6452_v11 = vmul.f32 %v13226_v14, %v12939_v46  ;;  %v6460_v23 = vmul.f32 %v13226_v14, %v12945_v4  ;;  %v15128_v30 = vld [vmem:[#allocation217_spill] sm:$0xff] }
 0x638   : > { %v6570_v28 = vadd.f32 %v6538_v12, %v15125_v24  ;;  %v6624_v2 = vpack.c.bf16 %v6596_v57, %v6588_v51  ;;  %v6621_v58 = vpack.c.bf16 %v6593_v6, %v6585_v21  ;;  %v6555_v33 = vadd.f32 %v6523_v63, %v15126_v38 }
 0x639   : > { %v6563_v45 = vadd.f32 %v6531_v7, %v15127_v16  ;;  %v6578_v34 = vadd.f32 %v6546_v8, %v15128_v30  ;;  %v6508_v12 = vadd.f32 %v12947_v59, %v6452_v11  ;;  %v6516_v57 = vadd.f32 %v15120_v49, %v6460_v23  ;;  %v15129_v7 = vld [vmem:[#allocation59_spill] sm:$0xff] }
 0x63a   : > { %v13304_v9 = vpop.eup %9074  ;;  %v6602_v60 = vmax.f32 %v6570_v28, 0.0  ;;  %6730 = vmatprep.subr.bf16.mxu1 %v6624_v2  ;;  %6678 = vmatpush1.bf16.msra.mxu0 %v6621_v58  ;;  %v6587_v51 = vmax.f32 %v6555_v33, 0.0  ;;  %v15130_v28 = vld [vmem:[#allocation63_spill] sm:$0xff]  ;;  %v15131_v58 = vld [vmem:[#allocation48_spill] sm:$0xff]  ;;  %v6449_v23 = vmul.f32 %v13191_v18, %v12939_v46  ;;  %vm5766_vm14 = vcmp.ge.f32.partialorder %v13221_v27, 0.0 }
 0x63b   : > { %v13308_v3 = vpop.eup %9076  ;;  %v5670_v32 = vadd.f32 1.0, %v13304_v9  ;;  %v6595_v21 = vmax.f32 %v6563_v45, 0.0  ;;  %v6610_v31 = vmax.f32 %v6578_v34, 0.0  ;;  %v6540_v35 = vmul.f32 %v15129_v7, %v6508_v12  ;;  %v15132_v33 = vld [vmem:[#allocation235_spill] sm:$0xff] }
 0x63c   : > { %v13313_v36 = vpop.eup %9078  ;;  %v5672_v14 = vadd.f32 1.0, %v13308_v3  ;;  %v6548_v11 = vmul.f32 %v15130_v28, %v6516_v57  ;;  %v6457_v45 = vmul.f32 %v13191_v18, %v12945_v4  ;;  %v6505_v34 = vadd.f32 %v12947_v59, %v6449_v23  ;;  %v15136_v28 = vld [vmem:[#allocation45_spill] sm:$0xff] }
 0x63d   : > { %v13317_v6 = vpop.eup %9080  ;;  %9082 = vlog2.f32 %v5670_v32  ;;  %v5671_v63 = vadd.f32 1.0, %v13313_v36  ;;  %v6623_v24 = vpack.c.bf16 %v6595_v21, %v6587_v51  ;;  %v6630_v2 = vpack.c.bf16 %v6610_v31, %v6602_v60  ;;  %v15133_v21 = vld [vmem:[#allocation238_spill] sm:$0xff] }
 0x63e   : > { %9084 = vrcp.f32 %v5670_v32  ;;  %v5673_v8 = vadd.f32 1.0, %v13317_v6  ;;  %v6572_v38 = vadd.f32 %v6540_v35, %v15131_v58  ;;  %v6580_v16 = vadd.f32 %v6548_v11, %v15132_v33  ;;  %v15135_v35 = vld [vmem:[#allocation57_spill] sm:$0xff] }
 0x63f   : > { %9086 = vlog2.f32 %v5672_v14  ;;  %6731 = vmatpush1.bf16.msra.mxu1 %v6623_v24  ;;  %v6451_v32 = vmul.f32 %v13249_v26, %v12939_v46  ;;  %6679 = vmatprep.subr.bf16.mxu0 %v6630_v2  ;;  %v6459_v60 = vmul.f32 %v13249_v26, %v12945_v4  ;;  %v6537_v18 = vmul.f32 %v15133_v21, %v6505_v34  ;;  %v15137_v2 = vld [vmem:[#allocation61_spill] sm:$0xff] }
 0x640   : > { %9088 = vrcp.f32 %v5672_v14  ;;  %v6604_v30 = vmax.f32 %v6572_v38, 0.0  ;;  %v6612_v12 = vmax.f32 %v6580_v16, 0.0  ;;  %v6513_v14 = vadd.f32 %v15120_v49, %v6457_v45  ;;  %v15141_v45 = vld [vmem:[#allocation46_spill] sm:$0xff] }
 0x641   : > { %9090 = vlog2.f32 %v5671_v63  ;;  %v6507_v51 = vadd.f32 %v12947_v59, %v6451_v32  ;;  %v6515_v57 = vadd.f32 %v15120_v49, %v6459_v60  ;;  %v7483_v31 = vrot.slane %v13177_v10, %v14910_v13 }
 0x642   : > { %9092 = vrcp.f32 %v5671_v63  ;;  %vm5768_vm15 = vcmp.ge.f32.partialorder %v13231_v22, 0.0  ;;  %v6632_v26 = vpack.c.bf16 %v6612_v12, %v6604_v30  ;;  %v15134_v63 = vld [vmem:[#allocation60_spill] sm:$0xff]  ;;  %v6569_v11 = vadd.f32 %v6537_v18, %v15136_v28 }
 0x643   : > { %9094 = vlog2.f32 %v5673_v8  ;;  %v6545_v7 = vmul.f32 %v15134_v63, %v6513_v14  ;;  %v6539_v24 = vmul.f32 %v15135_v35, %v6507_v51  ;;  %v6547_v58 = vmul.f32 %v15137_v2, %v6515_v57  ;;  %v15143_v14 = vld [vmem:[#allocation234_spill] sm:$0xff] }
 0x644   : > { %9096 = vrcp.f32 %v5673_v8  ;;  %v15138_v38 = vrot.slane %v13158_v62, %v14910_v13  ;;  %v15139_v10 = vrot.slane %v13175_v25, 1  ;;  %vm5767_vm2 = vcmp.ge.f32.partialorder %v13234_v37, 0.0  ;;  %6732 = vmatprep.subr.bf16.mxu1 %v6632_v26  ;;  %v15140_v8 = vld [vmem:[#allocation232_spill] sm:$0xff]  ;;  %v15160_v37 = vld [vmem:[#allocation81_spill] sm:$0xff] }
 0x645   : > { %v6577_v16 = vadd.f32 %v6545_v7, %v15140_v8  ;;  %v6571_v32 = vadd.f32 %v6539_v24, %v15141_v45  ;;  %v15142_v30 = vrot.slane %v13186_v42, 1  ;;  %v5724_v60 = vrot.slane %v13228_v29, 1  ;;  %v13382_v8 = vld [vmem:[%s14214_s19] sm:$0xff]  }
 0x646   : > { %v13349_v23 = vcombine.low %v15138_v38, %v7483_v31  ;;  %v5711_v33 = vadd.f32 %v15139_v10, %v13175_v25  ;;  %v13364_v12 = vrot.slane %v5876_v55, 6  ;;  %v6601_v25 = vmax.f32 %v6569_v11, 0.0 }
 0x647   : > { %v5718_v34 = vadd.f32 %v15142_v30, %v13186_v42  ;;  %v9083_v62 = vpop.eup %9082  ;;  %v6579_v51 = vadd.f32 %v6547_v58, %v15143_v14  ;;  %v6609_v31 = vmax.f32 %v6577_v16, 0.0  ;;  %v6603_v26 = vmax.f32 %v6571_v32, 0.0 }
 0x648   : > { %v5794_v21 = vcombine.low %v13202_v43, %v5711_v33  ;;  %v9085_v18 = vpop.eup %9084  ;;  %v5683_v57 = vmul.f32 0.6931472, %v9083_v62  ;;  %v5725_v63 = vadd.f32 %v5724_v60, %v13228_v29  ;;  %vm5769_vm3 = vcmp.ge.f32.partialorder %v13241_v53, 0.0 }
 0x649   : > { %v9087_v42 = vpop.eup %9086  ;;  %v5774_v7 = vmul.f32 %v9085_v18, %v13304_v9  ;;  %v6611_v35 = vmax.f32 %v6579_v51, 0.0  ;;  %v15144_v28 = vmin.f32 %v13221_v27, 0.0  ;;  %v6629_v2 = vpack.c.bf16 %v6609_v31, %v6601_v25  ;;  %v15156_v31 = vld [vmem:[#allocation84_spill] sm:$0xff] }
 0x64a   : > { %v13372_v55 = vrot.slane %v5794_v21, %v14910_v13  ;;  %v9089_v24 = vpop.eup %9088  ;;  %v5687_v43 = vmul.f32 0.6931472, %v9087_v42  ;;  %v5795_v58 = vcombine.low %v5718_v34, %v5725_v63  ;;  %v5882_v29 = vrot.slane %v13273_v15, 4 }
 0x64b   : > { %v5694_v11 = vsub.f32 %v15144_v28, %v5683_v57  ;;  %v9091_v38 = vpop.eup %9090  ;;  %v5776_v10 = vmul.f32 %v9089_v24, %v13308_v3  ;;  %v5884_v9 = vrot.slane %v13364_v12, 4  ;;  %v6631_v33 = vpack.c.bf16 %v6611_v35, %v6603_v26  ;;  %6680 = vmatpush1.bf16.msra.mxu0 %v6629_v2  ;;  %v15147_v28 = vld [vmem:[#allocation50_spill] sm:$0xff] }
 0x64c   : > { %v9093_v16 = vpop.eup %9092  ;;  %v15145_v32 = vmin.f32 %v13231_v22, 0.0  ;;  %v5685_v34 = vmul.f32 0.6931472, %v9091_v38  ;;  %v13388_v3 = vrot.slane %v5795_v58, %v14910_v13  ;;  %v5782_v62 = vsel %vm5766_vm14, %v9085_v18, %v5774_v7 }
 0x64d   : > { %v5726_v45 = vsel %vm4112_vm1, %v5694_v11, 0.0  ;;  %v9095_v15 = vpop.eup %9094  ;;  %v5784_v12 = vsel %vm5768_vm15, %v9089_v24, %v5776_v10  ;;  %v5775_v25 = vmul.f32 %v9093_v16, %v13313_v36  ;;  %6733 = vmatpush1.bf16.msra.mxu1 %v6631_v33  ;;  %v15146_v42 = vmov 0  }
 0x64e   : > { %v5696_v30 = vsub.f32 %v15145_v32, %v5687_v43  ;;  %v5727_v60 = vrot.slane %v5726_v45, 4  ;;  %v9097_v14 = vpop.eup %9096  ;;  %v5695_v21 = vsub.f32 %v5663_v40, %v5685_v34  ;;  %v5689_v57 = vmul.f32 0.6931472, %v9095_v15  ;;  %8192 = vmatmul.mubr.msk.bf16.vlgmr.msra.gmra.mrb[8].mxu0 %vm1451_vm0, %v13382_v8  ;;  %v9336_v15 = vld [vmem:[%s10182_s30 + $0x18] sm:$0x77] }
 0x64f   : > { %v5783_v27 = vsel %vm5767_vm2, %v9093_v16, %v5775_v25  ;;  %v5777_v22 = vmul.f32 %v9097_v14, %v13317_v6  ;;  %6719 = vmatprep.mubr.bf16.mxu0 %v15146_v42 }
 0x650   : > { %v5740_v51 = vsel %vm4112_vm1, %v5696_v30, 0.0  ;;  %v5728_v26 = vadd.f32 %v5727_v60, %v5726_v45  ;;  %v5733_v36 = vsel %vm4112_vm1, %v5695_v21, 0.0  ;;  %v5855_v18 = vcombine.low %v5782_v62, %v5783_v27  ;;  %8194 = vmatmul.mubr.msk.bf16.vlgmr.msra.gmra.mrb[8].mxu1 %vm1451_vm0, %v13382_v8  ;;  %v13422_v45 = vld [vmem:[%s14214_s19 + $0x8] sm:$0xff]   ;;  %v15149_v30 = vld [vmem:[#allocation52_spill] sm:$0xff] }
 0x651   : > { %v5741_v63 = vrot.slane %v5740_v51, 4  ;;  %v5697_v40 = vsub.f32 %v5665_v48, %v5689_v57  ;;  %v5734_v6 = vrot.slane %v5733_v36, 4  ;;  %v5785_v24 = vsel %vm5769_vm3, %v9097_v14, %v5777_v22  ;;  %6772 = vmatprep.mubr.bf16.mxu1 %v15146_v42  ;;  %v9335_v48 = vld [vmem:[%s10182_s30 + $0x10] sm:$0x77]  ;;  %s7782_s30 = sshll.u32 %s9642_s7, 5 }
 0x652   : > { %v5729_v7 = vrot.slane %v5728_v26, 2  ;;  %v5863_v11 = vmul.f32 %v5855_v18, %v15147_v28  ;;  %v5895_v43 = vmul.f32 %v9335_v48, %v5855_v18  ;;  %v5856_v58 = vcombine.low %v5784_v12, %v5785_v24  ;;  %v15157_v24 = vld [vmem:[#allocation222_spill] sm:$0xff]  ;;  %s13561_s5 = scalar_lea.vmem [#allocation3], %s7782_s30 }
 0x653   : > { %v5742_v35 = vadd.f32 %v5741_v63, %v5740_v51  ;;  %v5747_v2 = vsel %vm4112_vm1, %v5697_v40, 0.0  ;;  %v5735_v33 = vadd.f32 %v5734_v6, %v5733_v36  ;;  %v15161_v6 = vld [vmem:[#allocation219_spill] sm:$0xff]  ;;  %s7642_s30 = sshll.u32 %s13561_s5, 4  ;;  %s14113_s30 = int_to_ptr.vmem [resolvable:$true] %s7642_s30 }
 0x654   : > { %v5730_v38 = vadd.f32 %v5729_v7, %v5728_v26  ;;  %v5748_v16 = vrot.slane %v5747_v2, 4  ;;  %v13424_v53 = vadd.f32 %v5882_v29, %v5863_v11  ;;  %v13426_v32 = vadd.f32 %v5895_v43, %v5882_v29  ;;  %s9337_s27 = scalar_lea.vmem %s14113_s30, 512  ;;  %p9344_p3 = scmp.lt.s32.totalorder %s14113_s30, %s9342_s0 }
 0x655   : > { %v5743_v10 = vrot.slane %v5742_v35, 2  ;;  %v5864_v34 = vmul.f32 %v5856_v58, %v15149_v30  ;;  %v5896_v60 = vmul.f32 %v9336_v15, %v5856_v58  ;;  %v5736_v12 = vrot.slane %v5735_v33, 2  ;;  %p9338_p0 = scmp.ne.s32.totalorder %s14113_s30, %s9337_s27 }
 0x656   : > { %15148 = vst [vmem:[#allocation96_spill] sm:$0xff] %v13426_v32  ;;  %v5749_v25 = vadd.f32 %v5748_v16, %v5747_v2  ;;  %v5731_v14 = vrot.slane %v5730_v38, 1  ;;  %v6380_v51 = vrot.slane %v13424_v53, %v13117_v1  ;;  %v6384_v21 = vrot.slane %v13424_v53, %v13120_v39  ;;  %8193 = vmatmul.mubr.msk.bf16.gmra.mrb[12].mxu0 %vm1451_vm0, %v13422_v45 }
 0x657   : > { %v13430_v62 = vadd.f32 %v5743_v10, %v5742_v35  ;;  %v13436_v57 = vadd.f32 %v5884_v9, %v5864_v34  ;;  %v13438_v26 = vadd.f32 %v5896_v60, %v5884_v9  ;;  %v13440_v29 = vadd.f32 %v5736_v12, %v5735_v33  ;;  %6815 = vmatprep.mubr.bf16.mxu0 %v15146_v42  ;;  %v15151_v12 = vld [vmem:[#allocation220_spill] sm:$0xff]  ;;  %p9339_p1 = pnand %p9338_p0, %p9601_p6 }
 0x658   : > { %v5750_v63 = vrot.slane %v5749_v25, 2  ;;  %v7490_v27 = vrot.slane %v13424_v53, %v14910_v13  ;;  %v13446_v22 = vadd.f32 %v5731_v14, %v5730_v38  ;;  %v13449_v36 = vrot.slane %v6380_v51, %v13117_v1  ;;  %8195 = vmatmul.mubr.msk.bf16.gmra.mrb[12].mxu1 %vm1451_vm0, %v13422_v45  ;;  %v15152_v14 = vld [vmem:[#allocation241_spill] sm:$0xff] }
 0x659   : > { %15150 = vst [vmem:[#allocation223_spill] sm:$0xff] %v13438_v26  ;;  %v6388_v18 = vrot.slane %v13436_v57, %v13117_v1  ;;  %v6392_v9 = vrot.slane %v13436_v57, %v13120_v39  ;;  %v6424_v40 = vrot.slane %v6384_v21, %v13117_v1  ;;  %6868 = vmatprep.mubr.bf16.mxu1 %v15146_v42  ;;  %v15176_v53 = vrot.slane %v13440_v29, 1  ;;  %p9340_p2 = pneg %p9339_p1 }
 0x65a   : > { %v13458_v7 = vadd.f32 %v5750_v63, %v5749_v25  ;;  %v7497_v35 = vrot.slane %v13436_v57, %v14910_v13  ;;  %v6437_v43 = vmul.f32 %v13449_v36, %v12844_v50  ;;  %v6445_v2 = vmul.f32 %v13449_v36, %v12846_v0 }
 0x65b   : > { %v13467_v39 = vrot.slane %v6388_v18, %v13117_v1  ;;  %v6438_v28 = vmul.f32 %v6424_v40, %v12844_v50  ;;  %v6446_v11 = vmul.f32 %v6424_v40, %v12846_v0  ;;  %v6432_v48 = vrot.slane %v6392_v9, %v13117_v1  ;;  %v15153_v18 = vld [vmem:[#allocation64_spill] sm:$0xff] }
 0x65c   : > { %v6454_v58 = vmul.f32 %v6424_v40, %v12939_v46  ;;  %v6462_v38 = vmul.f32 %v6424_v40, %v12945_v4  ;;  %v6493_v1 = vadd.f32 %v12878_v5, %v6437_v43  ;;  %v6501_v34 = vadd.f32 %v12885_v61, %v6445_v2  ;;  %v15154_v40 = vld [vmem:[#allocation233_spill] sm:$0xff] }
 0x65d   : > { %v6494_v10 = vadd.f32 %v12878_v5, %v6438_v28  ;;  %v6502_v33 = vadd.f32 %v12885_v61, %v6446_v11  ;;  %v6440_v16 = vmul.f32 %v6432_v48, %v12844_v50  ;;  %v6448_v30 = vmul.f32 %v6432_v48, %v12846_v0 }
 0x65e   : > { %v6439_v15 = vmul.f32 %v13467_v39, %v12844_v50  ;;  %v6447_v60 = vmul.f32 %v13467_v39, %v12846_v0  ;;  %v6525_v9 = vmul.f32 %v15153_v18, %v6493_v1  ;;  %v6533_v28 = vmul.f32 %v15154_v40, %v6501_v34  ;;  %v15155_v50 = vld [vmem:[#allocation242_spill] sm:$0xff]  ;;  %v15162_v18 = vld [vmem:[#allocation236_spill] sm:$0xff] }
 0x65f   : > { %v6526_v25 = vmul.f32 %v15151_v12, %v6494_v10  ;;  %v6534_v51 = vmul.f32 %v15152_v14, %v6502_v33  ;;  %v6496_v21 = vadd.f32 %v12878_v5, %v6440_v16  ;;  %v6504_v63 = vadd.f32 %v12885_v61, %v6448_v30  ;;  %v15158_v12 = vld [vmem:[#allocation82_spill] sm:$0xff]  ;;  %v15159_v14 = vld [vmem:[#allocation239_spill] sm:$0xff] }
 0x660   : > { %v6495_v11 = vadd.f32 %v12878_v5, %v6439_v15  ;;  %v6503_v43 = vadd.f32 %v12885_v61, %v6447_v60  ;;  %v6557_v16 = vadd.f32 %v6525_v9, %v15159_v14  ;;  %v6565_v30 = vadd.f32 %v6533_v28, %v15160_v37  ;;  %v15163_v15 = vld [vmem:[#allocation243_spill] sm:$0xff]  ;;  %v15164_v60 = vld [vmem:[#allocation85_spill] sm:$0xff] }
 0x661   : > { %v6558_v2 = vadd.f32 %v6526_v25, %v15155_v50  ;;  %v6566_v0 = vadd.f32 %v6534_v51, %v15156_v31  ;;  %v6528_v10 = vmul.f32 %v15157_v24, %v6496_v21  ;;  %v6536_v33 = vmul.f32 %v15158_v12, %v6504_v63  ;;  %v15165_v51 = vld [vmem:[#allocation240_spill] sm:$0xff]  ;;  %v15166_v21 = vld [vmem:[#allocation83_spill] sm:$0xff] }
 0x662   : > { %v6527_v1 = vmul.f32 %v15161_v6, %v6495_v11  ;;  %v6535_v34 = vmul.f32 %v15162_v18, %v6503_v43  ;;  %v6589_v50 = vmax.f32 %v6557_v16, 0.0  ;;  %v6597_v31 = vmax.f32 %v6565_v30, 0.0 }
 0x663   : > { %v6590_v40 = vmax.f32 %v6558_v2, 0.0  ;;  %v6598_v5 = vmax.f32 %v6566_v0, 0.0  ;;  %v6560_v61 = vadd.f32 %v6528_v10, %v15163_v15  ;;  %v6568_v25 = vadd.f32 %v6536_v33, %v15164_v60  ;;  %v15167_v0 = vld [vmem:[#allocation93_spill] sm:$0xff] }
 0x664   : > { %v6559_v24 = vadd.f32 %v6527_v1, %v15165_v51  ;;  %v6567_v63 = vadd.f32 %v6535_v34, %v15166_v21  ;;  %v6510_v37 = vadd.f32 %v12947_v59, %v6454_v58  ;;  %v6625_v6 = vpack.c.bf16 %v6597_v31, %v6589_v50 }
 0x665   : > { %v6626_v12 = vpack.c.bf16 %v6598_v5, %v6590_v40  ;;  %v6592_v9 = vmax.f32 %v6560_v61, 0.0  ;;  %v6600_v14 = vmax.f32 %v6568_v25, 0.0  ;;  %v6518_v43 = vadd.f32 %v15120_v49, %v6462_v38  ;;  %v15168_v38 = vld [vmem:[#allocation89_spill] sm:$0xff] }
 0x666   : > { %v6591_v28 = vmax.f32 %v6559_v24, 0.0  ;;  %v6599_v11 = vmax.f32 %v6567_v63, 0.0  ;;  %v6542_v10 = vmul.f32 %v15167_v0, %v6510_v37  ;;  %v6456_v33 = vmul.f32 %v6432_v48, %v12939_v46  ;;  %v15170_v63 = vld [vmem:[#allocation90_spill] sm:$0xff]  ;;  %v15175_v0 = vld [vmem:[#allocation92_spill] sm:$0xff] }
 0x667   : > { %6783 = vmatprep.subr.bf16.mxu0 %v6626_v12  ;;  %v6628_v2 = vpack.c.bf16 %v6600_v14, %v6592_v9  ;;  %v6464_v16 = vmul.f32 %v6432_v48, %v12945_v4  ;;  %v6550_v1 = vmul.f32 %v13246_v20, %v6518_v43  ;;  %v6453_v58 = vmul.f32 %v13449_v36, %v12939_v46  ;;  %v15171_v14 = vld [vmem:[#allocation244_spill] sm:$0xff] }
 0x668   : > { %6784 = vmatpush1.bf16.msra.mxu0 %v6625_v6  ;;  %v6627_v30 = vpack.c.bf16 %v6599_v11, %v6591_v28  ;;  %v6461_v18 = vmul.f32 %v13449_v36, %v12945_v4  ;;  %v6574_v34 = vadd.f32 %v6542_v10, %v15168_v38  ;;  %v6512_v40 = vadd.f32 %v12947_v59, %v6456_v33 }
 0x669   : > { %6836 = vmatprep.subr.bf16.mxu1 %v6628_v2  ;;  %v6520_v5 = vadd.f32 %v15120_v49, %v6464_v16  ;;  %v6455_v48 = vmul.f32 %v13467_v39, %v12939_v46  ;;  %v6582_v20 = vadd.f32 %v6550_v1, %v13172_v41  ;;  %v6509_v15 = vadd.f32 %v12947_v59, %v6453_v58  ;;  %v15169_v46 = vld [vmem:[#allocation86_spill] sm:$0xff] }
 0x66a   : > { %6837 = vmatpush1.bf16.msra.mxu1 %v6627_v30  ;;  %v6517_v61 = vadd.f32 %v15120_v49, %v6461_v18  ;;  %v6463_v36 = vmul.f32 %v13467_v39, %v12945_v4  ;;  %v6606_v60 = vmax.f32 %v6574_v34, 0.0  ;;  %v6544_v25 = vmul.f32 %v13145_v54, %v6512_v40 }
 0x66b   : > { %v6552_v50 = vmul.f32 %v13255_v47, %v6520_v5  ;;  %v6511_v31 = vadd.f32 %v12947_v59, %v6455_v48  ;;  %v6614_v51 = vmax.f32 %v6582_v20, 0.0  ;;  %v6541_v24 = vmul.f32 %v15169_v46, %v6509_v15  ;;  %v15172_v47 = vld [vmem:[#allocation87_spill] sm:$0xff]  ;;  %v2749_v5 = vld [vmem:[%s837_s8] sm:$0xff]  ;;  %s14111_s8 = scalar_lea.hbm %s14218_s23, %s8215_s2  ;;  %s9343_s2 = scalar_lea.vmem %s9342_s0, 1024 }
 0x66c   : > { %v6549_v21 = vmul.f32 %v13218_v17, %v6517_v61  ;;  %v6519_v41 = vadd.f32 %v15120_v49, %v6463_v36  ;;  %v6576_v12 = vadd.f32 %v6544_v25, %v15170_v63  ;;  %v7499_v59 = vcombine.low %v7490_v27, %v7497_v35  ;;  %v15173_v17 = vld [vmem:[#allocation91_spill] sm:$0xff]  ;;  %v15181_v61 = vld [vmem:[#allocation53_spill] sm:$0xff]  ;;  %v15182_v36 = vld [vmem:[#allocation54_spill] sm:$0xff]  ;;  %p9345_p4 = scmp.lt.s32.totalorder %s9343_s2, %s9337_s27 }
 0x66d   : > { %v6584_v9 = vadd.f32 %v6552_v50, %v13184_v44  ;;  %v6543_v4 = vmul.f32 %v15171_v14, %v6511_v31  ;;  %v6634_v54 = vpack.c.bf16 %v6614_v51, %v6606_v60  ;;  %v6573_v39 = vadd.f32 %v6541_v24, %v15172_v47  ;;  %v15174_v44 = vld [vmem:[#allocation88_spill] sm:$0xff]  ;;  %v15186_v51 = vld [vmem:[#allocation138_spill] sm:$0xff]  ;;  %v13599_v24 = vpop.permute.xlu1 %1173  ;;  %v15189_v14 = vld [vmem:[#allocation141_spill] sm:$0xff] }
 0x66e   : > { %v6581_v37 = vadd.f32 %v6549_v21, %v15173_v17  ;;  %v6551_v49 = vmul.f32 %v13237_v56, %v6519_v41  ;;  %v6608_v6 = vmax.f32 %v6576_v12, 0.0  ;;  %v7513_v43 = vrot.slane %v7499_v59, %v14910_v13  ;;  %v15187_v41 = vld [vmem:[#allocation139_spill] sm:$0xff]  ;;  %v15188_v12 = vld [vmem:[#allocation140_spill] sm:$0xff]  ;;  %p9346_p5 = por %p9345_p4, %p9344_p3 }
 0x66f   : > { %v6616_v28 = vmax.f32 %v6584_v9, 0.0  ;;  %v6575_v11 = vadd.f32 %v6543_v4, %v15174_v44  ;;  %6785 = vmatprep.subr.bf16.mxu0 %v6634_v54  ;;  %v6605_v2 = vmax.f32 %v6573_v39, 0.0  ;;  %v5739_v27 = vadd.f32 %v15176_v53, %v13440_v29  ;;  %v15190_v54 = vld [vmem:[#allocation142_spill] sm:$0xff]  ;;  %v15191_v17 = vld [vmem:[#allocation143_spill] sm:$0xff] }
 0x670   : > { %v6613_v57 = vmax.f32 %v6581_v37, 0.0  ;;  %v6583_v10 = vadd.f32 %v6551_v49, %v15175_v0  ;;  %v15177_v56 = vrot.slane %v13349_v23, %v14910_v13  ;;  %v15178_v30 = vrot.slane %v13430_v62, 1  ;;  %v15194_v0 = vld [vmem:[#allocation146_spill] sm:$0xff]  ;;  %p9347_p7 = pnand %p9346_p5, %p9340_p2 }
 0x671   : > { %v6636_v35 = vpack.c.bf16 %v6616_v28, %v6608_v6  ;;  %v6607_v33 = vmax.f32 %v6575_v11, 0.0  ;;  %v5752_v38 = vrot.slane %v13458_v7, 1  ;;  %v5796_v34 = vcombine.low %v13446_v22, %v5739_v27  ;;  %v15192_v6 = vld [vmem:[#allocation144_spill] sm:$0xff]  ;;  %v15193_v11 = vld [vmem:[#allocation145_spill] sm:$0xff]  ;;  %v15195_v27 = vld [vmem:[#allocation147_spill] sm:$0xff] }
 0x672   : > { %v7514_v16 = vcombine.low %v15177_v56, %v7513_v43  ;;  %v5746_v1 = vadd.f32 %v15178_v30, %v13430_v62  ;;  %v6633_v58 = vpack.c.bf16 %v6613_v57, %v6605_v2  ;;  %v6615_v18 = vmax.f32 %v6583_v10, 0.0  ;;  %v13617_v2 = vpop.permute.xlu1 %1183  ;;  %v15196_v56 = vld [vmem:[#allocation148_spill] sm:$0xff] }
 0x673   : > { %6838 = vmatprep.subr.bf16.mxu1 %v6636_v35  ;;  %v5753_v23 = vadd.f32 %v5752_v38, %v13458_v7  ;;  %v5818_v62 = vrot.slane %v5796_v34, %v14910_v13  ;;  %v15180_v48 = vcombine.low %v13372_v55, %v13388_v3  ;;  %v15183_v60 = vcombine.low %v15181_v61, %v15182_v36  ;;  %v13593_v55 = vpop.permute.xlu0 %1168  ;;  %v15185_v3 = vld [vmem:[#allocation137_spill] sm:$0xff]  ;;  %v15198_v34 = vld [vmem:[#allocation150_spill] sm:$0xff]  ;;  %v15200_v61 = vld [vmem:[#allocation152_spill] sm:$0xff] }
 0x674   : > { %7516 = vst [vmem:[%s13561_s5] ss:$4 sm:$0xff] %v7514_v16  ;;  %6786 = vmatpush1.bf16.msra.mxu0 %v6633_v58  ;;  %v6635_v29 = vpack.c.bf16 %v6615_v18, %v6607_v33  ;;  %v1768_v31 = vadd.f32 %v15185_v3, %v13593_v55  ;;  %v2071_v46 = vadd.f32 %v15186_v51, %v13593_v55 }
 0x675   : > { %v5797_v40 = vcombine.low %v5746_v1, %v5753_v23  ;;  %v5834_v20 = vrot.slane %v15180_v48, %v14910_v13  ;;  %v4259_v25 = vsub.f32 %v2749_v5, %v15183_v60  ;;  %v1770_v63 = vadd.f32 %v15187_v41, %v13593_v55  ;;  %v15197_v1 = vld [vmem:[#allocation149_spill] sm:$0xff]  ;;  %v15199_v5 = vld [vmem:[#allocation151_spill] sm:$0xff] }
 0x676   : > { %6839 = vmatpush1.bf16.msra.mxu1 %v6635_v29  ;;  %v8150_v21 = vmul.f32 -1.442695, %v1768_v31  ;;  %v2073_v9 = vadd.f32 %v15188_v12, %v13593_v55  ;;  %v1772_v4 = vadd.f32 %v15189_v14, %v13599_v24  ;;  %v2075_v47 = vadd.f32 %v15190_v54, %v13599_v24 }
 0x677   : > { %8196 = vmatmul.mubr.msk.bf16.vlgmr.msra.gmra.mrb[16].mxu0 %vm1451_vm0, %v13382_v8  ;;  %v5825_v22 = vrot.slane %v5797_v40, %v14910_v13  ;;  %v13607_v59 = vpop.permute.xlu0 %1178  ;;  %v8151_v39 = vmul.f32 -1.442695, %v1770_v63  ;;  %v1774_v37 = vadd.f32 %v15191_v17, %v13599_v24  ;;  %v2077_v28 = vadd.f32 %v15192_v6, %v13599_v24  ;;  %v13631_v40 = vpop.permute.xlu1 %6648 }
 0x678   : > { %6825 = vmatprep.mubr.bf16.mxu0 %v15146_v42  ;;  %9098 = vpow2.f32 %v8150_v21  ;;  %v8153_v49 = vmul.f32 -1.442695, %v2073_v9  ;;  %v8158_v44 = vmul.f32 -1.442695, %v1772_v4  ;;  %v1778_v43 = vadd.f32 %v15193_v11, %v13607_v59 }
 0x679   : > { %8198 = vmatmul.mubr.msk.bf16.vlgmr.msra.gmra.mrb[16].mxu1 %vm1451_vm0, %v13382_v8  ;;  %v5827_v7 = vcombine.low %v5818_v62, %v5825_v22  ;;  %v8160_v57 = vmul.f32 -1.442695, %v2075_v47  ;;  %v2081_v10 = vadd.f32 %v15194_v0, %v13607_v59  ;;  %v8159_v53 = vmul.f32 -1.442695, %v1774_v37  ;;  %v15202_v0 = vld [vmem:[#allocation169_spill] sm:$0xff] }
 0x67a   : > { %6878 = vmatprep.mubr.bf16.mxu1 %v15146_v42  ;;  %v1780_v35 = vadd.f32 %v15195_v27, %v13607_v59  ;;  %v8161_v33 = vmul.f32 -1.442695, %v2077_v28  ;;  %v2083_v16 = vadd.f32 %v15196_v56, %v13607_v59  ;;  %v8166_v30 = vmul.f32 -1.442695, %v1778_v43 }
 0x67b   : > { %v5841_v15 = vrot.slane %v5827_v7, %v14910_v13  ;;  %v1782_v58 = vadd.f32 %v15197_v1, %v13617_v2  ;;  %v13627_v18 = vpop.permute.xlu0 %6643  ;;  %v8168_v38 = vmul.f32 -1.442695, %v2081_v10  ;;  %v2085_v29 = vadd.f32 %v15198_v34, %v13617_v2  ;;  %v13639_v51 = vpop.permute.xlu1 %1213  ;;  %v15207_v34 = vld [vmem:[#allocation173_spill] sm:$0xff] }
 0x67c   : > { %v8167_v23 = vmul.f32 -1.442695, %v1780_v35  ;;  %v8169_v62 = vmul.f32 -1.442695, %v2083_v16  ;;  %v1784_v48 = vadd.f32 %v15199_v5, %v13617_v2  ;;  %v2087_v36 = vadd.f32 %v15200_v61, %v13617_v2  ;;  %15201 = vst [vmem:[#allocation225_spill] sm:$0xff] %v13639_v51  ;;  %v15205_v16 = vld [vmem:[#allocation171_spill] sm:$0xff] }
 0x67d   : > { %v5842_v50 = vcombine.low %v5834_v20, %v5841_v15  ;;  %v8174_v7 = vmul.f32 -1.442695, %v1782_v58  ;;  %v8176_v20 = vmul.f32 -1.442695, %v2085_v29  ;;  %v15206_v58 = vld [vmem:[#allocation172_spill] sm:$0xff]  ;;  %v13665_v29 = vadd.f32 %v15207_v34, %v13639_v51 }
 0x67e   : > { %v8175_v3 = vmul.f32 -1.442695, %v1784_v48  ;;  %v8177_v41 = vmul.f32 -1.442695, %v2087_v36  ;;  %v15210_v48 = vld [vmem:[#allocation175_spill] sm:$0xff]  ;;  %v15211_v36 = vld [vmem:[#allocation176_spill] sm:$0xff] }
 0x67f   : > { %8197 = vmatmul.mubr.msk.bf16.gmra.mrb[20].mxu0 %vm1451_vm0, %v13422_v45  ;;  %v13588_v8 = vsub.f32 %v4259_v25, %v5842_v50  ;;  %v13637_v60 = vpop.permute.xlu0 %1208  ;;  %v13643_v37 = vpop.permute.xlu1 %6658 }
 0x680   : > { %7043 = vmatprep.mubr.bf16.mxu0 %v15146_v42  ;;  %v13647_v10 = vadd.f32 %v15202_v0, %v13637_v60 }
 0x681   : > { %15184 = vst [vmem:[#allocation224_spill] sm:$0xff] %v13588_v8  ;;  %8199 = vmatmul.mubr.msk.bf16.gmra.mrb[20].mxu1 %vm1451_vm0, %v13422_v45  ;;  %v8152_v45 = vmul.f32 -1.442695, %v2071_v46 }
 0x682   : > { %7084 = vmatprep.mubr.bf16.mxu1 %v15146_v42  ;;  %v9099_v22 = vpop.eup %9098 }
 0x683   : > { %9100 = vpow2.f32 %v8152_v45  ;;  %v6189_v25 = vadd.f32 1.0, %v9099_v22  ;;  %v13641_v4 = vpop.permute.xlu0 %6653 }
 0x684   : > { %9102 = vpow2.f32 %v8151_v39 }
 0x685   : > { %9104 = vpow2.f32 %v8153_v49 }
 0x686   : > { %9106 = vpow2.f32 %v8158_v44 }
 0x687   : > { %9108 = vpow2.f32 %v8160_v57  ;;  %v13649_v27 = vpop.permute.xlu0 %1218 }
 0x688   : > { %9110 = vpow2.f32 %v8159_v53  ;;  %15203 = vst [vmem:[#allocation247_spill] sm:$0xff] %v13649_v27 }
 0x689   : > { %9112 = vpow2.f32 %v8161_v33  ;;  %v15204_v33 = vld [vmem:[#allocation170_spill] sm:$0xff] }
 0x68a   : > { %9114 = vpow2.f32 %v8166_v30  ;;  %v13653_v56 = vadd.f32 %v15204_v33, %v13637_v60  ;;  %v13657_v30 = vadd.f32 %v15205_v16, %v13637_v60  ;;  %v15222_v33 = vld [vmem:[#allocation323_spill] sm:$0xff] }
 0x68b   : > { %9116 = vpow2.f32 %v8168_v38  ;;  %v13661_v38 = vadd.f32 %v15206_v58, %v13637_v60  ;;  %v2679_v16 = vadd.f32 %v15222_v33, %v13593_v55 }
 0x68c   : > { %9118 = vpow2.f32 %v8167_v23 }
 0x68d   : > { %v9101_v15 = vpop.eup %9100  ;;  %9120 = vpow2.f32 %v8169_v62  ;;  %v13669_v62 = vpop.permute.xlu1 %1223 }
 0x68e   : > { %v9103_v50 = vpop.eup %9102  ;;  %9122 = vpow2.f32 %v8174_v7  ;;  %v6191_v46 = vadd.f32 1.0, %v9101_v15  ;;  %15208 = vst [vmem:[#allocation226_spill] sm:$0xff] %v13669_v62  ;;  %v15209_v7 = vld [vmem:[#allocation174_spill] sm:$0xff] }
 0x68f   : > { %v9105_v31 = vpop.eup %9104  ;;  %9124 = vpow2.f32 %v8176_v20  ;;  %v6190_v12 = vadd.f32 1.0, %v9103_v50  ;;  %v13673_v5 = vadd.f32 %v15209_v7, %v13639_v51  ;;  %v13677_v20 = vadd.f32 %v15210_v48, %v13639_v51  ;;  %v15212_v50 = vld [vmem:[#allocation177_spill] sm:$0xff] }
 0x690   : > { %v9107_v21 = vpop.eup %9106  ;;  %9126 = vrcp.f32 %v6189_v25  ;;  %v6192_v45 = vadd.f32 1.0, %v9105_v31  ;;  %v13681_v25 = vadd.f32 %v15211_v36, %v13639_v51  ;;  %v15224_v7 = vld [vmem:[#allocation325_spill] sm:$0xff] }
 0x691   : > { %v9109_v63 = vpop.eup %9108  ;;  %9128 = vpow2.f32 %v8175_v3  ;;  %v6197_v54 = vadd.f32 1.0, %v9107_v21  ;;  %v13685_v3 = vadd.f32 %v15212_v50, %v13649_v27  ;;  %v2681_v48 = vadd.f32 %v15224_v7, %v13599_v24 }
 0x692   : > { %v9111_v9 = vpop.eup %9110  ;;  %9130 = vrcp.f32 %v6191_v46  ;;  %v6199_v39 = vadd.f32 1.0, %v9109_v63  ;;  %v15213_v46 = vld [vmem:[#allocation178_spill] sm:$0xff] }
 0x693   : > { %v9113_v14 = vpop.eup %9112  ;;  %9132 = vpow2.f32 %v8177_v41  ;;  %v6198_v49 = vadd.f32 1.0, %v9111_v9  ;;  %v13691_v21 = vadd.f32 %v15213_v46, %v13649_v27  ;;  %v15214_v41 = vld [vmem:[#allocation179_spill] sm:$0xff] }
 0x694   : > { %v9115_v47 = vpop.eup %9114  ;;  %9134 = vrcp.f32 %v6190_v12  ;;  %v6200_v28 = vadd.f32 1.0, %v9113_v14  ;;  %v13695_v63 = vadd.f32 %v15214_v41, %v13649_v27  ;;  %v15215_v12 = vld [vmem:[#allocation180_spill] sm:$0xff]  ;;  %v15216_v14 = vld [vmem:[#allocation181_spill] sm:$0xff] }
 0x695   : > { %v9117_v17 = vpop.eup %9116  ;;  %9136 = vrcp.f32 %v6192_v45  ;;  %v6205_v11 = vadd.f32 1.0, %v9115_v47  ;;  %v13699_v9 = vadd.f32 %v15215_v12, %v13649_v27  ;;  %v15217_v47 = vld [vmem:[#allocation182_spill] sm:$0xff] }
 0x696   : > { %v9119_v6 = vpop.eup %9118  ;;  %9138 = vrcp.f32 %v6197_v54  ;;  %v6207_v57 = vadd.f32 1.0, %v9117_v17  ;;  %v13703_v54 = vadd.f32 %v15216_v14, %v13669_v62  ;;  %v15218_v17 = vld [vmem:[#allocation320_spill] sm:$0xff]  ;;  %v15228_v14 = vld [vmem:[#allocation329_spill] sm:$0xff] }
 0x697   : > { %v9121_v44 = vpop.eup %9120  ;;  %9140 = vrcp.f32 %v6199_v39  ;;  %v6206_v35 = vadd.f32 1.0, %v9119_v6  ;;  %v13707_v39 = vadd.f32 %v15217_v47, %v13669_v62  ;;  %v2687_v47 = vadd.f32 %v15228_v14, %v13607_v59 }
 0x698   : > { %v9123_v43 = vpop.eup %9122  ;;  %9142 = vrcp.f32 %v6198_v49  ;;  %v6208_v1 = vadd.f32 1.0, %v9121_v44  ;;  %v2374_v49 = vadd.f32 %v15218_v17, %v13593_v55  ;;  %v15219_v44 = vld [vmem:[#allocation183_spill] sm:$0xff] }
 0x699   : > { %v9125_v53 = vpop.eup %9124  ;;  %9144 = vrcp.f32 %v6200_v28  ;;  %v6213_v22 = vadd.f32 1.0, %v9123_v43  ;;  %v15220_v43 = vld [vmem:[#allocation321_spill] sm:$0xff] }
 0x69a   : > { %v13667_v23 = vpop.eup %9126  ;;  %9146 = vrcp.f32 %v6205_v11  ;;  %v6215_v61 = vadd.f32 1.0, %v9125_v53  ;;  %v13715_v11 = vadd.f32 %v15219_v44, %v13669_v62  ;;  %v15221_v53 = vld [vmem:[#allocation322_spill] sm:$0xff]  ;;  %v8154_v41 = vmul.f32 -1.442695, %v2374_v49 }
 0x69b   : > { %v9129_v15 = vpop.eup %9128  ;;  %9148 = vrcp.f32 %v6207_v57  ;;  %v2677_v57 = vadd.f32 %v15220_v43, %v13593_v55 }
 0x69c   : > { %v13687_v31 = vpop.eup %9130  ;;  %9150 = vrcp.f32 %v6206_v35  ;;  %v6214_v28 = vadd.f32 1.0, %v9129_v15  ;;  %v2376_v35 = vadd.f32 %v15221_v53, %v13593_v55  ;;  %v15225_v15 = vld [vmem:[#allocation326_spill] sm:$0xff]  ;;  %v15227_v55 = vld [vmem:[#allocation328_spill] sm:$0xff]  ;;  %v15230_v53 = vld [vmem:[#allocation331_spill] sm:$0xff] }
 0x69d   : > { %v9133_v45 = vpop.eup %9132  ;;  %9152 = vrcp.f32 %v6208_v1  ;;  %v15223_v1 = vld [vmem:[#allocation324_spill] sm:$0xff]  ;;  %v2380_v36 = vadd.f32 %v15225_v15, %v13599_v24  ;;  %v2384_v12 = vadd.f32 %v15227_v55, %v13607_v59  ;;  %v8156_v43 = vmul.f32 -1.442695, %v2677_v57  ;;  %v15232_v55 = vld [vmem:[#allocation333_spill] sm:$0xff] }
 0x69e   : > { %v13711_v6 = vpop.eup %9134  ;;  %9154 = vrcp.f32 %v6213_v22  ;;  %v2378_v58 = vadd.f32 %v15223_v1, %v13599_v24  ;;  %v6216_v22 = vadd.f32 1.0, %v9133_v45  ;;  %v15229_v45 = vld [vmem:[#allocation330_spill] sm:$0xff]  ;;  %v2689_v33 = vadd.f32 %v15230_v53, %v13607_v59 }
 0x69f   : > { %v13719_v0 = vpop.eup %9136  ;;  %9156 = vrcp.f32 %v6215_v61  ;;  %v15226_v61 = vld [vmem:[#allocation327_spill] sm:$0xff]  ;;  %v2386_v17 = vadd.f32 %v15229_v45, %v13607_v59  ;;  %v8155_v49 = vmul.f32 -1.442695, %v2376_v35  ;;  %v8157_v15 = vmul.f32 -1.442695, %v2679_v16 }
 0x6a0   : > { %v13727_v34 = vpop.eup %9138  ;;  %v2683_v50 = vadd.f32 %v15226_v61, %v13599_v24  ;;  %9158 = vrcp.f32 %v6214_v28  ;;  %v15231_v24 = vld [vmem:[#allocation332_spill] sm:$0xff]  ;;  %v8162_v61 = vmul.f32 -1.442695, %v2378_v58  ;;  %v2691_v8 = vadd.f32 %v15232_v55, %v13617_v2 }
 0x6a1   : > { %v13735_v46 = vpop.eup %9140  ;;  %v2388_v1 = vadd.f32 %v15231_v24, %v13617_v2  ;;  %9160 = vrcp.f32 %v6216_v22  ;;  %v8164_v45 = vmul.f32 -1.442695, %v2681_v48  ;;  %v8163_v26 = vmul.f32 -1.442695, %v2380_v36  ;;  %v15233_v58 = vld [vmem:[#allocation184_spill] sm:$0xff] }
 0x6a2   : > { %v9143_v44 = vpop.eup %9142  ;;  %v13751_v28 = vmul.f32 -1.442695, %v2683_v50  ;;  %9162 = vpow2.f32 %v8154_v41  ;;  %v13755_v59 = vmul.f32 -1.442695, %v2384_v12  ;;  %v13757_v53 = vmul.f32 -1.442695, %v2687_v47 }
 0x6a3   : > { %v9145_v7 = vpop.eup %9144  ;;  %v13759_v35 = vmul.f32 -1.442695, %v2386_v17  ;;  %v13765_v24 = vadd.f32 %v15233_v58, %v13669_v62  ;;  %9164 = vpow2.f32 %v8156_v43  ;;  %v13767_v22 = vmul.f32 -1.442695, %v2689_v33  ;;  %v15234_v12 = vld [vmem:[#allocation334_spill] sm:$0xff]  ;;  %v15235_v43 = vld [vmem:[#allocation335_spill] sm:$0xff] }
 0x6a4   : > { %v13749_v14 = vpop.eup %9146  ;;  %v13769_v48 = vmul.f32 -1.442695, %v2388_v1  ;;  %9166 = vpow2.f32 %v8155_v49  ;;  %v13773_v41 = vmul.f32 -1.442695, %v2691_v8  ;;  %v13777_v47 = vadd.f32 %v15234_v12, %v13617_v2 }
 0x6a5   : > { %v13753_v57 = vpop.eup %9148  ;;  %9168 = vpow2.f32 %v8157_v15  ;;  %v13784_v33 = vadd.f32 %v15235_v43, %v13617_v2 }
 0x6a6   : > { %v13761_v16 = vpop.eup %9150  ;;  %9170 = vpow2.f32 %v8162_v61 }
 0x6a7   : > { %v13771_v50 = vpop.eup %9152  ;;  %9172 = vpow2.f32 %v8164_v45 }
 0x6a8   : > { %v13780_v32 = vpop.eup %9154  ;;  %9174 = vpow2.f32 %v8163_v26 }
 0x6a9   : > { %v13788_v19 = vpop.eup %9156  ;;  %9176 = vpow2.f32 %v13751_v28 }
 0x6aa   : > { %9178 = vpow2.f32 %v13755_v59 }
 0x6ab   : > { %9180 = vpow2.f32 %v13757_v53 }
 0x6ac   : > { %9182 = vpow2.f32 %v13759_v35  ;;  %v13855_v35 = vld [vmem:[%s14216_s21] sm:$0x3] }
 0x6ad   : > { %9184 = vpow2.f32 %v13767_v22 }
 0x6ae   : > { %9186 = vpow2.f32 %v13769_v48 }
 0x6af   : > { %9188 = vpow2.f32 %v13773_v41 }
 0x721   : > { %v6711_v36 = vpop.f32.mrb[8].mxu0 }
 0x722   : > { %v6712_v17 = vadd.f32 %v6711_v36, %v13627_v18  ;;  %v6713_v58 = vpop.f32.mrb[9].mxu0 }
 0x723   : > { %v6764_v55 = vpop.f32.mrb[8].mxu1  ;;  %v6714_v8 = vadd.f32 %v6713_v58, %v13627_v18  ;;  %v6715_v13 = vpop.f32.mrb[10].mxu0 }
 0x724   : > { %v6765_v1 = vadd.f32 %v6764_v55, %v13627_v18  ;;  %v6766_v49 = vpop.f32.mrb[9].mxu1  ;;  %v6889_v36 = vmul.f32 %v13667_v23, %v6712_v17  ;;  %v6716_v52 = vadd.f32 %v6715_v13, %v13631_v40  ;;  %v6717_v62 = vpop.f32.mrb[11].mxu0 }
 0x725   : > { %v6767_v12 = vadd.f32 %v6766_v49, %v13627_v18  ;;  %v6768_v15 = vpop.f32.mrb[10].mxu1  ;;  %v6890_v43 = vmul.f32 %v13711_v6, %v6714_v8  ;;  %v6718_v58 = vadd.f32 %v6717_v62, %v13631_v40  ;;  %v9159_v13 = vpop.eup %9158 }
 0x726   : > { %v6891_v2 = vmul.f32 %v13687_v31, %v6765_v1  ;;  %v6769_v55 = vadd.f32 %v6768_v15, %v13631_v40  ;;  %v6770_v27 = vpop.f32.mrb[11].mxu1  ;;  %v6921_v51 = vadd.f32 %v6889_v36, %v13647_v10  ;;  %v6897_v23 = vmul.f32 %v13727_v34, %v6716_v52 }
 0x727   : > { %v6892_v61 = vmul.f32 %v13719_v0, %v6767_v12  ;;  %v6771_v17 = vadd.f32 %v6770_v27, %v13631_v40  ;;  %v6922_v31 = vadd.f32 %v6890_v43, %v13657_v30  ;;  %v6898_v1 = vmul.f32 %v9143_v44, %v6718_v58  ;;  %v9161_v0 = vpop.eup %9160 }
 0x728   : > { %v6923_v49 = vadd.f32 %v6891_v2, %v13653_v56  ;;  %v6899_v6 = vmul.f32 %v13735_v46, %v6769_v55  ;;  %v6929_v10 = vadd.f32 %v6897_v23, %v13665_v29  ;;  %v6953_v52 = vmax.f32 %v6921_v51, 0.0  ;;  %v13810_v36 = vpop.eup %9162 }
 0x729   : > { %v13805_v62 = vadd.f32 %v6892_v61, %v13661_v38  ;;  %v6900_v8 = vmul.f32 %v9145_v7, %v6771_v17  ;;  %v6930_v34 = vadd.f32 %v6898_v1, %v13677_v20  ;;  %v6721_v56 = vpop.f32.mrb[12].mxu0  ;;  %v13814_v29 = vpop.eup %9164  ;;  %v6193_v53 = vadd.f32 1.0, %v13810_v36 }
 0x72a   : > { %v6931_v27 = vadd.f32 %v6899_v6, %v13673_v5  ;;  %v6955_v30 = vmax.f32 %v6923_v49, 0.0  ;;  %v6961_v46 = vmax.f32 %v6929_v10, 0.0  ;;  %v6722_v38 = vadd.f32 %v6721_v56, %v13641_v4  ;;  %v6723_v12 = vpop.f32.mrb[13].mxu0  ;;  %v13818_v2 = vpop.eup %9166 }
 0x72b   : > { %v6932_v44 = vadd.f32 %v6900_v8, %v13681_v25  ;;  %v6774_v45 = vpop.f32.mrb[12].mxu1  ;;  %v6962_v26 = vmax.f32 %v6930_v34, 0.0  ;;  %v6724_v5 = vadd.f32 %v6723_v12, %v13641_v4  ;;  %v6725_v15 = vpop.f32.mrb[14].mxu0 }
 0x72c   : > { %v6963_v7 = vmax.f32 %v6931_v27, 0.0  ;;  %v6775_v51 = vadd.f32 %v6774_v45, %v13641_v4  ;;  %v6776_v20 = vpop.f32.mrb[13].mxu1  ;;  %v6986_v43 = vpack.c.bf16 %v6961_v46, %v6953_v52  ;;  %v6905_v25 = vmul.f32 %v13749_v14, %v6722_v38  ;;  %v6727_v23 = vpop.f32.mrb[15].mxu0 }
 0x72d   : > { %v6964_v55 = vmax.f32 %v6932_v44, 0.0  ;;  %v6777_v58 = vadd.f32 %v6776_v20, %v13641_v4  ;;  %v6778_v61 = vpop.f32.mrb[14].mxu1  ;;  %v13822_v17 = vpop.eup %9168  ;;  %v6906_v1 = vmul.f32 %v13761_v16, %v6724_v5  ;;  %v6726_v10 = vadd.f32 %v6725_v15, %v13643_v37 }
 0x72e   : > { %v6988_v49 = vpack.c.bf16 %v6963_v7, %v6955_v30  ;;  %v6907_v6 = vmul.f32 %v13753_v57, %v6775_v51  ;;  %v6780_v8 = vpop.f32.mrb[15].mxu1  ;;  %v9171_v27 = vpop.eup %9170  ;;  %v6937_v52 = vadd.f32 %v6905_v25, %v13685_v3  ;;  %v6779_v14 = vadd.f32 %v6778_v61, %v13643_v37 }
 0x72f   : > { %v6908_v34 = vmul.f32 %v13771_v50, %v6777_v58  ;;  %v6728_v56 = vadd.f32 %v6727_v23, %v13643_v37  ;;  %v6938_v30 = vadd.f32 %v6906_v1, %v13695_v63  ;;  %v6913_v57 = vmul.f32 %v13780_v32, %v6726_v10 }
 0x730   : > { %v6939_v46 = vadd.f32 %v6907_v6, %v13691_v21  ;;  %v6781_v16 = vadd.f32 %v6780_v8, %v13643_v37  ;;  %v6954_v44 = vmax.f32 %v6922_v31, 0.0  ;;  %v6915_v45 = vmul.f32 %v13788_v19, %v6779_v14  ;;  %v9173_v21 = vpop.eup %9172  ;;  %v15237_v14 = vld [vmem:[#allocation18_spill] sm:$0xff] }
 0x731   : > { %v6940_v38 = vadd.f32 %v6908_v34, %v13699_v9  ;;  %v6914_v3 = vmul.f32 %v9159_v13, %v6728_v56  ;;  %v6956_v50 = vmax.f32 %v13805_v62, 0.0  ;;  %v6945_v12 = vadd.f32 %v6913_v57, %v13703_v54  ;;  %v9175_v51 = vpop.eup %9174 }
 0x732   : > { %v6916_v7 = vmul.f32 %v9161_v0, %v6781_v16  ;;  %v6947_v32 = vadd.f32 %v6915_v45, %v13707_v39  ;;  %v6987_v31 = vpack.c.bf16 %v6962_v26, %v6954_v44  ;;  %v6969_v9 = vmax.f32 %v6937_v52, 0.0  ;;  %v9177_v22 = vpop.eup %9176  ;;  %v15239_v16 = vld [vmem:[#allocation352_spill] sm:$0xff]  ;;  %v15241_v45 = vld [vmem:[#allocation353_spill] sm:$0xff] }
 0x733   : > { %v6946_v63 = vadd.f32 %v6914_v3, %v13715_v11  ;;  %v6977_v5 = vmax.f32 %v6945_v12, 0.0  ;;  %v6989_v13 = vpack.c.bf16 %v6964_v55, %v6956_v50  ;;  %v6971_v28 = vmax.f32 %v6939_v46, 0.0  ;;  %v9179_v48 = vpop.eup %9178  ;;  %v15238_v46 = vld [vmem:[#allocation19_spill] sm:$0xff] }
 0x734   : > { %v6948_v19 = vadd.f32 %v6916_v7, %v13765_v24  ;;  %v6970_v20 = vmax.f32 %v6938_v30, 0.0  ;;  %v6979_v62 = vmax.f32 %v6947_v32, 0.0  ;;  %7011 = vmatprep.subr.bf16.mxu0 %v6987_v31  ;;  %v6972_v54 = vmax.f32 %v6940_v38, 0.0  ;;  %v15240_v38 = vld [vmem:[#allocation225_spill] sm:$0xff]  ;;  %v15242_v7 = vld [vmem:[#allocation354_spill] sm:$0xff]  ;;  %v15243_v32 = vld [vmem:[#allocation355_spill] sm:$0xff] }
 0x735   : > { %v6978_v15 = vmax.f32 %v6946_v63, 0.0  ;;  %v6994_v59 = vpack.c.bf16 %v6977_v5, %v6969_v9  ;;  %7052 = vmatprep.subr.bf16.mxu1 %v6989_v13  ;;  %7012 = vmatpush1.bf16.msra.mxu0 %v6986_v43  ;;  %v8179_v39 = vmul.f32 -1.442695, %v13777_v47  ;;  %v8181_v26 = vmul.f32 -1.442695, %v13784_v33  ;;  %v9181_v43 = vpop.eup %9180  ;;  %v15244_v9 = vld [vmem:[#allocation356_spill] sm:$0xff] }
 0x736   : > { %v6980_v0 = vmax.f32 %v6948_v19, 0.0  ;;  %v6996_v11 = vpack.c.bf16 %v6979_v62, %v6971_v28  ;;  %7053 = vmatpush1.bf16.msra.mxu1 %v6988_v49  ;;  %v6195_v47 = vadd.f32 1.0, %v13814_v29  ;;  %v6194_v33 = vadd.f32 1.0, %v13818_v2  ;;  %v9183_v25 = vpop.eup %9182  ;;  %v15245_v19 = vld [vmem:[#allocation247_spill] sm:$0xff]  ;;  %v15247_v62 = vld [vmem:[#allocation21_spill] sm:$0xff] }
 0x737   : > { %v6995_v24 = vpack.c.bf16 %v6978_v15, %v6970_v20  ;;  %9190 = vpow2.f32 %v8179_v39  ;;  %v6196_v36 = vadd.f32 1.0, %v13822_v17  ;;  %v6201_v41 = vadd.f32 1.0, %v9171_v27  ;;  %v9185_v61 = vpop.eup %9184 }
 0x738   : > { %v6997_v55 = vpack.c.bf16 %v6980_v0, %v6972_v54  ;;  %9192 = vpow2.f32 %v8181_v26  ;;  %v6203_v29 = vadd.f32 1.0, %v9173_v21  ;;  %v6202_v2 = vadd.f32 1.0, %v9175_v51  ;;  %v9187_v17 = vpop.eup %9186  ;;  %v15248_v54 = vld [vmem:[#allocation22_spill] sm:$0xff] }
 0x739   : > { %7013 = vmatprep.subr.bf16.mxu0 %v6995_v24  ;;  %9194 = vrcp.f32 %v6193_v53  ;;  %v6204_v58 = vadd.f32 1.0, %v9177_v22  ;;  %v6209_v23 = vadd.f32 1.0, %v9179_v48  ;;  %v6211_v49 = vadd.f32 1.0, %v9181_v43  ;;  %v9189_v6 = vpop.eup %9188  ;;  %v15249_v24 = vld [vmem:[#allocation23_spill] sm:$0xff]  ;;  %v15251_v53 = vld [vmem:[#allocation24_spill] sm:$0xff] }
 0x73a   : > { %7054 = vmatprep.subr.bf16.mxu1 %v6997_v55  ;;  %7014 = vmatpush1.bf16.msra.mxu0 %v6994_v59  ;;  %9196 = vrcp.f32 %v6195_v47  ;;  %v6210_v1 = vadd.f32 1.0, %v9183_v25  ;;  %v6212_v8 = vadd.f32 1.0, %v9185_v61  ;;  %v6217_v34 = vadd.f32 1.0, %v9187_v17  ;;  %v15250_v55 = vld [vmem:[#allocation226_spill] sm:$0xff] }
 0x73b   : > { %7055 = vmatpush1.bf16.msra.mxu1 %v6996_v11  ;;  %9198 = vrcp.f32 %v6194_v33  ;;  %v2717_v56 = vadd.f32 %v15237_v14, %v13637_v60  ;;  %v2416_v30 = vadd.f32 %v15238_v46, %v13637_v60  ;;  %v6219_v57 = vadd.f32 1.0, %v9189_v6 }
 0x73c   : > { %9200 = vrcp.f32 %v6196_v36  ;;  %v2719_v44 = vadd.f32 %v15239_v16, %v13637_v60  ;;  %v2418_v3 = vadd.f32 %v15241_v45, %v15240_v38  ;;  %v2721_v21 = vadd.f32 %v15242_v7, %v15240_v38 }
 0x73d   : > { %8200 = vmatmul.mubr.msk.bf16.vlgmr.msra.gmra.mrb[24].mxu0 %vm1451_vm0, %v13855_v35  ;;  %9202 = vrcp.f32 %v6201_v41  ;;  %v2420_v63 = vadd.f32 %v15243_v32, %v15240_v38  ;;  %v2723_v5 = vadd.f32 %v15244_v9, %v15240_v38  ;;  %v13888_v15 = vadd.f32 %v15247_v62, %v15245_v19  ;;  %v15253_v32 = vld [vmem:[#allocation358_spill] sm:$0xff] }
 0x73e   : > { %8201 = vmatmul.mubr.msk.bf16.vlgmr.msra.gmra.mrb[24].mxu1 %vm1451_vm0, %v13855_v35  ;;  %7125 = vmatprep.mubr.bf16.mxu0 %v15146_v42  ;;  %9204 = vrcp.f32 %v6203_v29  ;;  %v13892_v59 = vadd.f32 %v15248_v54, %v15245_v19  ;;  %v13897_v26 = vadd.f32 %v15249_v24, %v15245_v19  ;;  %v13901_v47 = vadd.f32 %v15251_v53, %v15250_v55 }
 0x73f   : > { %7166 = vmatprep.mubr.bf16.mxu1 %v15146_v42  ;;  %9206 = vrcp.f32 %v6202_v2  ;;  %v15236_v42 = vld [vmem:[#allocation17_spill] sm:$0xff] }
 0x740   : > { %9208 = vrcp.f32 %v6204_v58  ;;  %v2414_v27 = vadd.f32 %v15236_v42, %v13637_v60  ;;  %v15246_v60 = vld [vmem:[#allocation20_spill] sm:$0xff] }
 0x741   : > { %v9191_v10 = vpop.eup %9190  ;;  %9210 = vrcp.f32 %v6209_v23  ;;  %v13884_v13 = vadd.f32 %v15246_v60, %v15245_v19 }
 0x742   : > { %v9193_v52 = vpop.eup %9192  ;;  %9212 = vrcp.f32 %v6211_v49  ;;  %v6218_v12 = vadd.f32 1.0, %v9191_v10 }
 0x743   : > { %v9195_v50 = vpop.eup %9194  ;;  %9214 = vrcp.f32 %v6210_v1  ;;  %v6220_v51 = vadd.f32 1.0, %v9193_v52 }
 0x744   : > { %v9197_v31 = vpop.eup %9196  ;;  %9216 = vrcp.f32 %v6212_v8 }
 0x745   : > { %v9199_v20 = vpop.eup %9198  ;;  %9218 = vrcp.f32 %v6217_v34 }
 0x746   : > { %v9201_v11 = vpop.eup %9200  ;;  %9220 = vrcp.f32 %v6219_v57 }
 0x747   : > { %v9203_v36 = vpop.eup %9202  ;;  %9222 = vrcp.f32 %v6218_v12 }
 0x748   : > { %v9205_v58 = vpop.eup %9204  ;;  %9224 = vrcp.f32 %v6220_v51 }
 0x749   : > { %v9207_v6 = vpop.eup %9206 }
 0x74a   : > { %v6817_v28 = vpop.f32.mrb[16].mxu0  ;;  %v9209_v34 = vpop.eup %9208 }
 0x74b   : > { %v6818_v0 = vadd.f32 %v6817_v28, %v13627_v18  ;;  %v6819_v39 = vpop.f32.mrb[17].mxu0  ;;  %v9211_v38 = vpop.eup %9210 }
 0x74c   : > { %v6870_v22 = vpop.f32.mrb[16].mxu1  ;;  %v6820_v33 = vadd.f32 %v6819_v39, %v13627_v18  ;;  %v6821_v48 = vpop.f32.mrb[18].mxu0 }
 0x74d   : > { %v6893_v41 = vmul.f32 %v9195_v50, %v6818_v0  ;;  %v6871_v29 = vadd.f32 %v6870_v22, %v13627_v18  ;;  %v6872_v43 = vpop.f32.mrb[17].mxu1  ;;  %v6822_v2 = vadd.f32 %v6821_v48, %v13631_v40  ;;  %v6823_v25 = vpop.f32.mrb[19].mxu0 }
 0x74e   : > { %v6894_v61 = vmul.f32 %v9199_v20, %v6820_v33  ;;  %v6873_v23 = vadd.f32 %v6872_v43, %v13627_v18  ;;  %v6874_v17 = vpop.f32.mrb[18].mxu1  ;;  %v6824_v49 = vadd.f32 %v6823_v25, %v13631_v40  ;;  %v15252_v18 = vld [vmem:[#allocation357_spill] sm:$0xff] }
 0x74f   : > { %v6925_v1 = vadd.f32 %v6893_v41, %v2414_v27  ;;  %v6895_v10 = vmul.f32 %v9197_v31, %v6871_v29  ;;  %v6901_v8 = vmul.f32 %v9203_v36, %v6822_v2  ;;  %v6875_v42 = vadd.f32 %v6874_v17, %v13631_v40  ;;  %v6876_v52 = vpop.f32.mrb[19].mxu1  ;;  %v9213_v27 = vpop.eup %9212 }
 0x750   : > { %v13909_v14 = vadd.f32 %v6894_v61, %v2416_v30  ;;  %v6896_v46 = vmul.f32 %v9201_v11, %v6873_v23  ;;  %v6902_v57 = vmul.f32 %v9207_v6, %v6824_v49  ;;  %v6877_v16 = vadd.f32 %v6876_v52, %v13631_v40  ;;  %v9215_v60 = vpop.eup %9214 }
 0x751   : > { %v2731_v45 = vadd.f32 %v15252_v18, %v15250_v55  ;;  %v6927_v50 = vadd.f32 %v6895_v10, %v2717_v56  ;;  %v6933_v12 = vadd.f32 %v6901_v8, %v2418_v3  ;;  %v6903_v7 = vmul.f32 %v9205_v58, %v6875_v42  ;;  %v9217_v0 = vpop.eup %9216 }
 0x752   : > { %v2430_v31 = vadd.f32 %v15253_v32, %v15250_v55  ;;  %v6928_v51 = vadd.f32 %v6896_v46, %v2719_v44  ;;  %v6934_v9 = vadd.f32 %v6902_v57, %v2420_v63  ;;  %v6904_v19 = vmul.f32 %v9209_v34, %v6877_v16  ;;  %v6827_v30 = vpop.f32.mrb[20].mxu0  ;;  %v9219_v22 = vpop.eup %9218 }
 0x753   : > { %v6957_v28 = vmax.f32 %v6925_v1, 0.0  ;;  %v6965_v20 = vmax.f32 %v6933_v12, 0.0  ;;  %v6935_v62 = vadd.f32 %v6903_v7, %v2721_v21  ;;  %v6828_v40 = vadd.f32 %v6827_v30, %v13641_v4  ;;  %v6829_v54 = vpop.f32.mrb[21].mxu0  ;;  %v9221_v21 = vpop.eup %9220 }
 0x754   : > { %v6959_v39 = vmax.f32 %v6927_v50, 0.0  ;;  %v6966_v56 = vmax.f32 %v6934_v9, 0.0  ;;  %v6936_v3 = vadd.f32 %v6904_v19, %v2723_v5  ;;  %v6880_v11 = vpop.f32.mrb[20].mxu1  ;;  %v6830_v24 = vadd.f32 %v6829_v54, %v13641_v4  ;;  %v6831_v53 = vpop.f32.mrb[22].mxu0  ;;  %v15254_v50 = vld [vmem:[#allocation359_spill] sm:$0xff]  ;;  %v15256_v54 = vld [vmem:[#allocation186_spill] sm:$0xff] }
 0x755   : > { %v6990_v44 = vpack.c.bf16 %v6965_v20, %v6957_v28  ;;  %v6967_v63 = vmax.f32 %v6935_v62, 0.0  ;;  %v6909_v33 = vmul.f32 %v9211_v38, %v6828_v40  ;;  %v6881_v48 = vadd.f32 %v6880_v11, %v13641_v4  ;;  %v6882_v36 = vpop.f32.mrb[21].mxu1  ;;  %v6833_v41 = vpop.f32.mrb[23].mxu0  ;;  %v15255_v62 = vld [vmem:[#allocation185_spill] sm:$0xff] }
 0x756   : > { %v6968_v29 = vmax.f32 %v6936_v3, 0.0  ;;  %v6910_v43 = vmul.f32 %v9215_v60, %v6830_v24  ;;  %v6883_v2 = vadd.f32 %v6882_v36, %v13641_v4  ;;  %v6832_v25 = vadd.f32 %v6831_v53, %v13643_v37  ;;  %v6884_v5 = vpop.f32.mrb[22].mxu1  ;;  %v9223_v58 = vpop.eup %9222  ;;  %v15258_v3 = vld [vmem:[#allocation188_spill] sm:$0xff] }
 0x757   : > { %v6992_v61 = vpack.c.bf16 %v6967_v63, %v6959_v39  ;;  %v6941_v23 = vadd.f32 %v6909_v33, %v13884_v13  ;;  %v6911_v17 = vmul.f32 %v9213_v27, %v6881_v48  ;;  %v6885_v49 = vadd.f32 %v6884_v5, %v13643_v37  ;;  %v6886_v6 = vpop.f32.mrb[23].mxu1  ;;  %v9225_v1 = vpop.eup %9224  ;;  %v15257_v39 = vld [vmem:[#allocation187_spill] sm:$0xff] }
 0x758   : > { %v6942_v10 = vadd.f32 %v6910_v43, %v13892_v59  ;;  %v6912_v8 = vmul.f32 %v9217_v0, %v6883_v2  ;;  %v6917_v42 = vmul.f32 %v9219_v22, %v6832_v25  ;;  %v6834_v52 = vadd.f32 %v6833_v41, %v13643_v37  ;;  %v13946_v43 = vpop.permute.xlu1 %7005  ;;  %v15259_v25 = vld [vmem:[#allocation360_spill] sm:$0xff] }
 0x759   : > { %v6958_v4 = vmax.f32 %v13909_v14, 0.0  ;;  %v6943_v34 = vadd.f32 %v6911_v17, %v13888_v15  ;;  %v6919_v46 = vmul.f32 %v9221_v21, %v6885_v49  ;;  %v6887_v57 = vadd.f32 %v6886_v6, %v13643_v37 }
 0x75a   : > { %v6960_v16 = vmax.f32 %v6928_v51, 0.0  ;;  %v6944_v13 = vadd.f32 %v6912_v8, %v13897_v26  ;;  %v6949_v38 = vadd.f32 %v6917_v42, %v13901_v47  ;;  %v6918_v18 = vmul.f32 %v9223_v58, %v6834_v52 }
 0x75b   : > { %v2733_v59 = vadd.f32 %v15254_v50, %v15250_v55  ;;  %v6951_v12 = vadd.f32 %v6919_v46, %v2731_v45  ;;  %v6920_v7 = vmul.f32 %v9225_v1, %v6887_v57  ;;  %v6991_v27 = vpack.c.bf16 %v6966_v56, %v6958_v4  ;;  %v15260_v4 = vld [vmem:[#allocation189_spill] sm:$0xff]  ;;  %v15261_v46 = vld [vmem:[#allocation190_spill] sm:$0xff] }
 0x75c   : > { %v6973_v32 = vmax.f32 %v6941_v23, 0.0  ;;  %v6981_v9 = vmax.f32 %v6949_v38, 0.0  ;;  %v6950_v14 = vadd.f32 %v6918_v18, %v2430_v31  ;;  %v6993_v19 = vpack.c.bf16 %v6968_v29, %v6960_v16  ;;  %v13936_v31 = vpop.permute.xlu0 %1228 }
 0x75d   : > { %v6975_v15 = vmax.f32 %v6943_v34, 0.0  ;;  %v6983_v30 = vmax.f32 %v6951_v12, 0.0  ;;  %v6952_v60 = vadd.f32 %v6920_v7, %v2733_v59  ;;  %7093 = vmatprep.subr.bf16.mxu0 %v6991_v27  ;;  %v6974_v37 = vmax.f32 %v6942_v10, 0.0  ;;  %v15262_v59 = vld [vmem:[#allocation191_spill] sm:$0xff] }
 0x75e   : > { %v6998_v51 = vpack.c.bf16 %v6981_v9, %v6973_v32  ;;  %v6982_v26 = vmax.f32 %v6950_v14, 0.0  ;;  %7134 = vmatprep.subr.bf16.mxu1 %v6993_v19  ;;  %7094 = vmatpush1.bf16.msra.mxu0 %v6990_v44  ;;  %v6976_v47 = vmax.f32 %v6944_v13, 0.0  ;;  %v1828_v40 = vadd.f32 %v15255_v62, %v13936_v31  ;;  %v15263_v14 = vld [vmem:[#allocation192_spill] sm:$0xff] }
 0x75f   : > { %v7000_v28 = vpack.c.bf16 %v6983_v30, %v6975_v15  ;;  %v6984_v20 = vmax.f32 %v6952_v60, 0.0  ;;  %7135 = vmatpush1.bf16.msra.mxu1 %v6992_v61  ;;  %v2131_v0 = vadd.f32 %v15256_v54, %v13936_v31  ;;  %v1830_v56 = vadd.f32 %v15257_v39, %v13936_v31  ;;  %v15265_v39 = vld [vmem:[#allocation362_spill] sm:$0xff] }
 0x760   : > { %v6999_v55 = vpack.c.bf16 %v6982_v26, %v6974_v37  ;;  %v2133_v11 = vadd.f32 %v15258_v3, %v13936_v31  ;;  %v8182_v24 = vmul.f32 -1.442695, %v1828_v40  ;;  %v13948_v2 = vpop.permute.xlu0 %1233  ;;  %v2434_v5 = vadd.f32 %v15259_v25, %v13936_v31 }
 0x761   : > { %v7001_v45 = vpack.c.bf16 %v6984_v20, %v6976_v47  ;;  %v8184_v53 = vmul.f32 -1.442695, %v2131_v0  ;;  %v8183_v22 = vmul.f32 -1.442695, %v1830_v56  ;;  %v1832_v34 = vadd.f32 %v15260_v4, %v13948_v2 }
 0x762   : > { %7095 = vmatprep.subr.bf16.mxu0 %v6999_v55  ;;  %v8185_v44 = vmul.f32 -1.442695, %v2133_v11  ;;  %9226 = vpow2.f32 %v8182_v24  ;;  %v2135_v57 = vadd.f32 %v15261_v46, %v13948_v2  ;;  %v1834_v12 = vadd.f32 %v15262_v59, %v13948_v2  ;;  %v15266_v24 = vld [vmem:[#allocation363_spill] sm:$0xff] }
 0x763   : > { %7136 = vmatprep.subr.bf16.mxu1 %v7001_v45  ;;  %7096 = vmatpush1.bf16.msra.mxu0 %v6998_v51  ;;  %9228 = vpow2.f32 %v8184_v53  ;;  %v8186_v7 = vmul.f32 -1.442695, %v2434_v5  ;;  %v2137_v19 = vadd.f32 %v15263_v14, %v13948_v2  ;;  %v15264_v45 = vld [vmem:[#allocation361_spill] sm:$0xff]  ;;  %v2436_v56 = vadd.f32 %v15265_v39, %v13936_v31 }
 0x764   : > { %7137 = vmatpush1.bf16.msra.mxu1 %v7000_v28  ;;  %9230 = vpow2.f32 %v8183_v22  ;;  %v2737_v62 = vadd.f32 %v15264_v45, %v13936_v31  ;;  %v2739_v53 = vadd.f32 %v15266_v24, %v13936_v31 }
 0x765   : > { %9232 = vpow2.f32 %v8185_v44 }
 0x766   : > { %8202 = vmatmul.mubr.msk.bf16.vlgmr.msra.gmra.mrb[28].mxu0 %vm1451_vm0, %v13855_v35 }
 0x767   : > { %8203 = vmatmul.mubr.msk.bf16.vlgmr.msra.gmra.mrb[28].mxu1 %vm1451_vm0, %v13855_v35 }
 0x76c   : > { %v9227_v35 = vpop.eup %9226 }
 0x76d   : > { %v9229_v63 = vpop.eup %9228  ;;  %v6309_v36 = vadd.f32 1.0, %v9227_v35 }
 0x76e   : > { %v9231_v33 = vpop.eup %9230  ;;  %v6311_v41 = vadd.f32 1.0, %v9229_v63  ;;  %v8188_v63 = vmul.f32 -1.442695, %v2737_v62 }
 0x76f   : > { %v9233_v48 = vpop.eup %9232  ;;  %v6310_v21 = vadd.f32 1.0, %v9231_v33  ;;  %9234 = vrcp.f32 %v6309_v36  ;;  %v8189_v36 = vmul.f32 -1.442695, %v2739_v53 }
 0x770   : > { %v6312_v29 = vadd.f32 1.0, %v9233_v48  ;;  %9236 = vrcp.f32 %v6311_v41  ;;  %v8187_v48 = vmul.f32 -1.442695, %v2436_v56 }
 0x771   : > { %9238 = vrcp.f32 %v6310_v21 }
 0x772   : > { %9240 = vrcp.f32 %v6312_v29 }
 0x773   : > { %9242 = vpow2.f32 %v8186_v7 }
 0x779   : > { %v9235_v61 = vpop.eup %9234 }
 0x77a   : > { %v9237_v6 = vpop.eup %9236 }
 0x77b   : > { %v9239_v52 = vpop.eup %9238 }
 0x77c   : > { %v9241_v50 = vpop.eup %9240 }
 0x77d   : > { %v9243_v41 = vpop.eup %9242 }
 0x77e   : > { %v6313_v21 = vadd.f32 1.0, %v9243_v41 }
 0x810   : > { %v7045_v58 = vpop.f32.mrb[24].mxu0 }
 0x811   : > { %v7046_v23 = vadd.f32 %v7045_v58, %v13946_v43  ;;  %v7086_v17 = vpop.f32.mrb[24].mxu1  ;;  %v7047_v49 = vpop.f32.mrb[25].mxu0 }
 0x812   : > { %v7087_v1 = vadd.f32 %v7086_v17, %v13946_v43  ;;  %v7048_v10 = vadd.f32 %v7047_v49, %v13946_v43  ;;  %v7088_v8 = vpop.f32.mrb[25].mxu1  ;;  %v7049_v42 = vpop.f32.mrb[26].mxu0 }
 0x813   : > { %v7175_v16 = vmul.f32 %v9235_v61, %v7046_v23  ;;  %v7089_v13 = vadd.f32 %v7088_v8, %v13946_v43  ;;  %v7090_v38 = vpop.f32.mrb[26].mxu1  ;;  %v7050_v18 = vpop.f32.mrb[27].mxu0 }
 0x814   : > { %v7177_v27 = vmul.f32 %v9237_v6, %v7087_v1  ;;  %v7176_v32 = vmul.f32 %v9239_v52, %v7048_v10  ;;  %v7091_v9 = vpop.f32.mrb[27].mxu1  ;;  %v15269_v38 = vld [vmem:[#allocation366_spill] sm:$0xff] }
 0x815   : > { %v13964_v15 = vadd.f32 %v7175_v16, %v1832_v34  ;;  %v7178_v30 = vmul.f32 %v9241_v50, %v7089_v13  ;;  %v15267_v34 = vld [vmem:[#allocation364_spill] sm:$0xff]  ;;  %v13997_v18 = vadd.f32 %v15269_v38, %v13948_v2 }
 0x816   : > { %v13966_v60 = vadd.f32 %v7177_v27, %v2135_v57  ;;  %v13968_v37 = vadd.f32 %v7176_v32, %v1834_v12  ;;  %v2438_v46 = vadd.f32 %v15267_v34, %v13948_v2  ;;  %v15268_v57 = vld [vmem:[#allocation365_spill] sm:$0xff] }
 0x817   : > { %v7191_v51 = vand.u32 2147483647, %v13964_v15  ;;  %v13971_v26 = vadd.f32 %v7178_v30, %v2137_v19  ;;  %v13993_v16 = vadd.f32 %v15268_v57, %v13948_v2  ;;  %v7223_v50 = vmin.f32 %v13964_v15, 0.0  ;;  %v15270_v57 = vld [vmem:[#allocation367_spill] sm:$0xff] }
 0x818   : > { %v7193_v47 = vand.u32 2147483647, %v13966_v60  ;;  %v7192_v28 = vand.u32 2147483647, %v13968_v37  ;;  %v7442_v55 = vcombine.low %v13964_v15, %v13968_v37  ;;  %vm7327_vm0 = vcmp.ge.f32.partialorder %v13964_v15, 0.0 }
 0x819   : > { %v7199_v20 = vsub.f32 0.0, %v7191_v51  ;;  %v7194_v0 = vand.u32 2147483647, %v13971_v26  ;;  %v7443_v11 = vcombine.low %v13966_v60, %v13971_v26  ;;  %v7225_v27 = vmin.f32 %v13966_v60, 0.0 }
 0x81a   : > { %v7201_v40 = vsub.f32 0.0, %v7193_v47  ;;  %v7200_v54 = vsub.f32 0.0, %v7192_v28  ;;  %vm7329_vm4 = vcmp.ge.f32.partialorder %v13966_v60, 0.0  ;;  %v7224_v19 = vmin.f32 %v13968_v37, 0.0 }
 0x81b   : > { %v7207_v3 = vmul.f32 1.442695, %v7199_v20  ;;  %v7202_v35 = vsub.f32 0.0, %v7194_v0  ;;  %vm7328_vm5 = vcmp.ge.f32.partialorder %v13968_v37, 0.0  ;;  %v7446_v47 = vrot.slane %v7442_v55, 5 }
 0x81c   : > { %v7211_v22 = vmul.f32 1.442695, %v7201_v40  ;;  %v7209_v44 = vmul.f32 1.442695, %v7200_v54  ;;  %v7226_v28 = vmin.f32 %v13971_v26, 0.0  ;;  %vm7330_vm6 = vcmp.ge.f32.partialorder %v13971_v26, 0.0 }
 0x81d   : > { %9244 = vpow2.f32 %v7207_v3  ;;  %v7213_v33 = vmul.f32 1.442695, %v7202_v35 }
 0x81e   : > { %9246 = vpow2.f32 %v7211_v22  ;;  %v7448_v22 = vrot.slane %v7443_v11, 5 }
 0x81f   : > { %9248 = vpow2.f32 %v7209_v44 }
 0x820   : > { %9250 = vpow2.f32 %v7213_v33 }
 0x821   : > { %9252 = vpow2.f32 %v8188_v63 }
 0x822   : > { %9254 = vpow2.f32 %v8187_v48 }
 0x823   : > { %9256 = vpow2.f32 %v8189_v36 }
 0x824   : > { %9258 = vrcp.f32 %v6313_v21 }
 0x827   : > { %v9245_v29 = vpop.eup %9244 }
 0x828   : > { %v9247_v25 = vpop.eup %9246  ;;  %v7231_v5 = vadd.f32 1.0, %v9245_v29 }
 0x829   : > { %v9249_v31 = vpop.eup %9248  ;;  %v7233_v58 = vadd.f32 1.0, %v9247_v25 }
 0x82a   : > { %v13986_v61 = vpop.eup %9250  ;;  %9260 = vlog2.f32 %v7231_v5  ;;  %v7232_v23 = vadd.f32 1.0, %v9249_v31 }
 0x82b   : > { %9262 = vrcp.f32 %v7231_v5  ;;  %v9253_v17 = vpop.eup %9252  ;;  %v7234_v49 = vadd.f32 1.0, %v13986_v61 }
 0x82c   : > { %9264 = vlog2.f32 %v7233_v58  ;;  %v9255_v6 = vpop.eup %9254  ;;  %v6315_v10 = vadd.f32 1.0, %v9253_v17 }
 0x82d   : > { %9266 = vrcp.f32 %v7233_v58  ;;  %v9257_v1 = vpop.eup %9256  ;;  %v6314_v8 = vadd.f32 1.0, %v9255_v6 }
 0x82e   : > { %9268 = vlog2.f32 %v7232_v23  ;;  %v6316_v42 = vadd.f32 1.0, %v9257_v1  ;;  %v9259_v52 = vpop.eup %9258 }
 0x82f   : > { %9270 = vrcp.f32 %v7232_v23 }
 0x830   : > { %9272 = vlog2.f32 %v7234_v49 }
 0x831   : > { %9274 = vrcp.f32 %v7234_v49 }
 0x832   : > { %9276 = vrcp.f32 %v6315_v10 }
 0x833   : > { %9278 = vrcp.f32 %v6314_v8 }
 0x834   : > { %v9261_v4 = vpop.eup %9260  ;;  %9280 = vrcp.f32 %v6316_v42 }
 0x835   : > { %v9263_v13 = vpop.eup %9262  ;;  %v7240_v59 = vmul.f32 0.6931472, %v9261_v4 }
 0x836   : > { %v9265_v12 = vpop.eup %9264  ;;  %v7335_v7 = vmul.f32 %v9263_v13, %v9245_v29 }
 0x837   : > { %v9267_v32 = vpop.eup %9266  ;;  %v7255_v9 = vsub.f32 %v7223_v50, %v7240_v59  ;;  %v7244_v14 = vmul.f32 0.6931472, %v9265_v12  ;;  %v7449_v50 = vrot.slane %v7448_v22, 4  ;;  %v15271_v59 = vld [vmem:[#allocation94_spill] sm:$0xff] }
 0x838   : > { %v9269_v30 = vpop.eup %9268  ;;  %v7337_v51 = vmul.f32 %v9267_v32, %v9247_v25  ;;  %v7343_v53 = vsel %vm7327_vm0, %v9263_v13, %v7335_v7  ;;  %v2743_v13 = vadd.f32 %v15270_v57, %v13948_v2  ;;  %v15272_v7 = vld [vmem:[#allocation213_spill] sm:$0xff] }
 0x839   : > { %v7127_v20 = vpop.f32.mrb[28].mxu0  ;;  %v9271_v45 = vpop.eup %9270  ;;  %v7263_v62 = vsel %vm4112_vm1, %v7255_v9, 0.0  ;;  %v7257_v40 = vsub.f32 %v7225_v27, %v7244_v14  ;;  %v7242_v54 = vmul.f32 0.6931472, %v9269_v30 }
 0x83a   : > { %v7128_v0 = vadd.f32 %v7127_v20, %v13946_v43  ;;  %v7168_v39 = vpop.f32.mrb[28].mxu1  ;;  %v7129_v56 = vpop.f32.mrb[29].mxu0  ;;  %v7264_v24 = vrot.slane %v7263_v62, 4  ;;  %v7336_v55 = vmul.f32 %v9271_v45, %v9249_v31  ;;  %v7345_v25 = vsel %vm7329_vm4, %v9267_v32, %v7337_v51  ;;  %v15273_v20 = vld [vmem:[#allocation95_spill] sm:$0xff] }
 0x83b   : > { %v9273_v3 = vpop.eup %9272  ;;  %v7170_v44 = vpop.f32.mrb[29].mxu1  ;;  %v7277_v33 = vsel %vm4112_vm1, %v7257_v40, 0.0  ;;  %v7256_v48 = vsub.f32 %v7224_v19, %v7242_v54  ;;  %v7169_v11 = vadd.f32 %v7168_v39, %v13946_v43 }
 0x83c   : > { %v7131_v35 = vpop.f32.mrb[30].mxu0  ;;  %v9275_v63 = vpop.eup %9274  ;;  %v7246_v36 = vmul.f32 0.6931472, %v9273_v3  ;;  %v7179_v41 = vmul.f32 %v9259_v52, %v7128_v0  ;;  %v7344_v15 = vsel %vm7328_vm5, %v9271_v45, %v7336_v55  ;;  %v7265_v10 = vadd.f32 %v7264_v24, %v7263_v62  ;;  %v15274_v62 = vld [vmem:[#allocation215_spill] sm:$0xff] }
 0x83d   : > { %v7172_v21 = vpop.f32.mrb[30].mxu1  ;;  %v7132_v29 = vpop.f32.mrb[31].mxu0  ;;  %v7338_v5 = vmul.f32 %v9275_v63, %v13986_v61  ;;  %v7270_v23 = vsel %vm4112_vm1, %v7256_v48, 0.0  ;;  %v7418_v17 = vcombine.low %v7343_v53, %v7344_v15  ;;  %v7278_v8 = vrot.slane %v7277_v33, 4  ;;  %v15275_v53 = vld [vmem:[#allocation216_spill] sm:$0xff] }
 0x83e   : > { %v7173_v31 = vpop.f32.mrb[31].mxu1  ;;  %v9277_v58 = vpop.eup %9276  ;;  %v7258_v49 = vsub.f32 %v7226_v28, %v7246_v36  ;;  %v14025_v6 = vadd.f32 %v7179_v41, %v2438_v46  ;;  %v7271_v60 = vrot.slane %v7270_v23, 4  ;;  %v7447_v46 = vrot.slane %v7446_v47, 4 }
 0x83f   : > { %v9279_v1 = vpop.eup %9278  ;;  %v7346_v37 = vsel %vm7330_vm6, %v9275_v63, %v7338_v5  ;;  %v7422_v52 = vrot.slane %v7418_v17, 7  ;;  %v7266_v9 = vrot.slane %v7265_v10, 2  ;;  %v7279_v14 = vadd.f32 %v7278_v8, %v7277_v33 }
 0x840   : > { %v9281_v42 = vpop.eup %9280  ;;  %v7284_v61 = vsel %vm4112_vm1, %v7258_v49, 0.0  ;;  %v7419_v4 = vcombine.low %v7345_v25, %v7346_v37  ;;  %v7195_v34 = vand.u32 2147483647, %v14025_v6  ;;  %v7272_v38 = vadd.f32 %v7271_v60, %v7270_v23 }
 0x841   : > { %v7430_v12 = vmul.f32 %v7422_v52, %v15271_v59  ;;  %v7462_v27 = vmul.f32 %v7422_v52, %v15272_v7  ;;  %v7285_v19 = vrot.slane %v7284_v61, 4  ;;  %v7181_v30 = vmul.f32 %v9277_v58, %v7169_v11 }
 0x842   : > { %v7423_v32 = vrot.slane %v7419_v4, 7  ;;  %v7203_v26 = vsub.f32 0.0, %v7195_v34  ;;  %v7273_v2 = vrot.slane %v7272_v38, 2  ;;  %v7130_v0 = vadd.f32 %v7129_v56, %v13946_v43 }
 0x843   : > { %v7458_v51 = vadd.f32 %v7447_v46, %v7430_v12  ;;  %v7466_v28 = vadd.f32 %v7462_v27, %v7447_v46  ;;  %v14038_v47 = vadd.f32 %v7181_v30, %v13993_v16  ;;  %v7171_v24 = vadd.f32 %v7170_v44, %v13946_v43 }
 0x844   : > { %v7431_v45 = vmul.f32 %v7423_v32, %v15273_v20  ;;  %v7463_v40 = vmul.f32 %v7423_v32, %v15274_v62  ;;  %v7215_v54 = vmul.f32 1.442695, %v7203_v26  ;;  %v7280_v22 = vrot.slane %v7279_v14, 2 }
 0x845   : > { %v7527_v55 = vrot.slane %v7458_v51, %v15275_v53  ;;  %v7286_v35 = vadd.f32 %v7285_v19, %v7284_v61  ;;  %v7197_v63 = vand.u32 2147483647, %v14038_v47  ;;  %v7180_v33 = vmul.f32 %v9279_v1, %v7130_v0 }
 0x846   : > { %v7459_v39 = vadd.f32 %v7449_v50, %v7431_v45  ;;  %v7467_v3 = vadd.f32 %v7463_v40, %v7449_v50  ;;  %9282 = vpow2.f32 %v7215_v54  ;;  %v7182_v48 = vmul.f32 %v9281_v42, %v7171_v24 }
 0x847   : > { %v7579_v16 = vrot.slane %v7466_v28, %v15275_v53  ;;  %v7205_v41 = vsub.f32 0.0, %v7197_v63  ;;  %v7267_v21 = vadd.f32 %v7266_v9, %v7265_v10  ;;  %v7274_v29 = vadd.f32 %v7273_v2, %v7272_v38 }
 0x848   : > { %v7534_v36 = vrot.slane %v7459_v39, %v15275_v53  ;;  %v7586_v56 = vrot.slane %v7467_v3, %v15275_v53  ;;  %v14048_v43 = vadd.f32 %v7180_v33, %v13997_v18  ;;  %v14050_v44 = vadd.f32 %v7182_v48, %v2743_v13 }
 0x849   : > { %v7219_v15 = vmul.f32 1.442695, %v7205_v41  ;;  %v7268_v11 = vrot.slane %v7267_v21, 1  ;;  %v7275_v31 = vrot.slane %v7274_v29, 1  ;;  %v7281_v17 = vadd.f32 %v7280_v22, %v7279_v14 }
 0x84a   : > { %v14052_v25 = vcombine.high %v7527_v55, %v7534_v36  ;;  %v14054_v5 = vcombine.low %v7579_v16, %v7586_v56  ;;  %v7196_v58 = vand.u32 2147483647, %v14048_v43  ;;  %v7444_v23 = vcombine.low %v14025_v6, %v14048_v43 }
 0x84b   : > { %v7287_v49 = vrot.slane %v7286_v35, 2  ;;  %9284 = vpow2.f32 %v7219_v15  ;;  %v7198_v18 = vand.u32 2147483647, %v14050_v44  ;;  %v7445_v10 = vcombine.low %v14038_v47, %v14050_v44 }
 0x84c   : > { %v7204_v1 = vsub.f32 0.0, %v7196_v58  ;;  %v7269_v60 = vadd.f32 %v7268_v11, %v7267_v21  ;;  %v7276_v37 = vadd.f32 %v7275_v31, %v7274_v29  ;;  %v7282_v52 = vrot.slane %v7281_v17, 1 }
 0x84d   : > { %v7206_v8 = vsub.f32 0.0, %v7198_v18  ;;  %v7288_v34 = vadd.f32 %v7287_v49, %v7286_v35  ;;  %v7227_v28 = vmin.f32 %v14025_v6, 0.0  ;;  %v7229_v0 = vmin.f32 %v14038_v47, 0.0 }
 0x84e   : > { %v7217_v42 = vmul.f32 1.442695, %v7204_v1  ;;  %v7359_v57 = vcombine.low %v7269_v60, %v7276_v37  ;;  %v7283_v38 = vadd.f32 %v7282_v52, %v7281_v17  ;;  %vm7331_vm7 = vcmp.ge.f32.partialorder %v14025_v6, 0.0 }
 0x84f   : > { %v7221_v4 = vmul.f32 1.442695, %v7206_v8  ;;  %v7289_v46 = vrot.slane %v7288_v34, 1  ;;  %vm7333_vm8 = vcmp.ge.f32.partialorder %v14038_v47, 0.0  ;;  %v7228_v16 = vmin.f32 %v14048_v43, 0.0 }
 0x850   : > { %v9283_v61 = vpop.eup %9282  ;;  %9286 = vpow2.f32 %v7217_v42  ;;  %v14063_v7 = vrot.slane %v7359_v57, %v15275_v53  ;;  %vm7332_vm9 = vcmp.ge.f32.partialorder %v14048_v43, 0.0  ;;  %v7230_v11 = vmin.f32 %v14050_v44, 0.0 }
 0x851   : > { %v7235_v13 = vadd.f32 1.0, %v9283_v61  ;;  %9288 = vpow2.f32 %v7221_v4  ;;  %v7290_v50 = vadd.f32 %v7289_v46, %v7288_v34  ;;  %vm7334_vm10 = vcmp.ge.f32.partialorder %v14050_v44, 0.0 }
 0x852   : > { %v7450_v8 = vrot.slane %v7444_v23, 5  ;;  %v7452_v57 = vrot.slane %v7445_v10, 5  ;;  %v15276_v23 = vld [vmem:[#allocation96_spill] sm:$0xff]  ;;  %v15278_v10 = vld [vmem:[#allocation223_spill] sm:$0xff] }
 0x853   : > { %9290 = vlog2.f32 %v7235_v13  ;;  %v7360_v12 = vcombine.low %v7283_v38, %v7290_v50 }
 0x854   : > { %9292 = vrcp.f32 %v7235_v13 }
 0x855   : > { %v9285_v59 = vpop.eup %9284  ;;  %v14066_v32 = vrot.slane %v7360_v12, %v15275_v53 }
 0x856   : > { %v7237_v27 = vadd.f32 1.0, %v9285_v59 }
 0x857   : > { %v7391_v26 = vcombine.low %v14063_v7, %v14066_v32 }
 0x858   : > { %9294 = vlog2.f32 %v7237_v27 }
 0x859   : > { %9296 = vrcp.f32 %v7237_v27  ;;  %v7451_v27 = vrot.slane %v7450_v8, 4 }
 0x85a   : > { %v9287_v9 = vpop.eup %9286 }
 0x85b   : > { %v9289_v14 = vpop.eup %9288  ;;  %v7236_v19 = vadd.f32 1.0, %v9287_v9 }
 0x85c   : > { %v7238_v51 = vadd.f32 1.0, %v9289_v14 }
 0x85d   : > { %v9291_v30 = vpop.eup %9290  ;;  %9298 = vlog2.f32 %v7236_v19 }
 0x85e   : > { %v7248_v20 = vmul.f32 0.6931472, %v9291_v30  ;;  %9300 = vrcp.f32 %v7236_v19  ;;  %v9293_v62 = vpop.eup %9292 }
 0x85f   : > { %9302 = vlog2.f32 %v7238_v51  ;;  %v7339_v55 = vmul.f32 %v9293_v62, %v9283_v61 }
 0x860   : > { %v7259_v45 = vsub.f32 %v7227_v28, %v7248_v20  ;;  %9304 = vrcp.f32 %v7238_v51  ;;  %v7453_v28 = vrot.slane %v7452_v57, 4 }
 0x861   : > { %v7347_v29 = vsel %vm7331_vm7, %v9293_v62, %v7339_v55  ;;  %v15279_v62 = vld [vmem:[#allocation237_spill] sm:$0xff] }
 0x862   : > { %v7291_v40 = vsel %vm4112_vm1, %v7259_v45, 0.0  ;;  %v9295_v2 = vpop.eup %9294 }
 0x863   : > { %v7292_v54 = vrot.slane %v7291_v40, 4  ;;  %v7252_v39 = vmul.f32 0.6931472, %v9295_v2  ;;  %v9297_v3 = vpop.eup %9296 }
 0x864   : > { %v7341_v33 = vmul.f32 %v9297_v3, %v9285_v59 }
 0x865   : > { %v7293_v24 = vadd.f32 %v7292_v54, %v7291_v40  ;;  %v7261_v22 = vsub.f32 %v7229_v0, %v7252_v39 }
 0x866   : > { %v7349_v18 = vsel %vm7333_vm8, %v9297_v3, %v7341_v33 }
 0x867   : > { %v9299_v35 = vpop.eup %9298  ;;  %v7305_v63 = vsel %vm4112_vm1, %v7261_v22, 0.0  ;;  %v7294_v21 = vrot.slane %v7293_v24, 2 }
 0x868   : > { %v9301_v48 = vpop.eup %9300  ;;  %v7306_v36 = vrot.slane %v7305_v63, 4  ;;  %v7250_v41 = vmul.f32 0.6931472, %v9299_v35 }
 0x869   : > { %v9303_v56 = vpop.eup %9302  ;;  %v7340_v15 = vmul.f32 %v9301_v48, %v9287_v9  ;;  %v7295_v13 = vadd.f32 %v7294_v21, %v7293_v24  ;;  %v15277_v9 = vld [vmem:[#allocation51_spill] sm:$0xff] }
 0x86a   : > { %v9305_v31 = vpop.eup %9304  ;;  %v7307_v58 = vadd.f32 %v7306_v36, %v7305_v63  ;;  %v7260_v17 = vsub.f32 %v7228_v16, %v7250_v41  ;;  %v7254_v49 = vmul.f32 0.6931472, %v9303_v56 }
 0x86b   : > { %v7348_v1 = vsel %vm7332_vm9, %v9301_v48, %v7340_v15  ;;  %v7342_v60 = vmul.f32 %v9305_v31, %v9289_v14  ;;  %v7296_v20 = vrot.slane %v7295_v13, 1 }
 0x86c   : > { %v7308_v37 = vrot.slane %v7307_v58, 2  ;;  %v7298_v42 = vsel %vm4112_vm1, %v7260_v17, 0.0  ;;  %v7420_v52 = vcombine.low %v7347_v29, %v7348_v1  ;;  %v7262_v61 = vsub.f32 %v7230_v11, %v7254_v49 }
 0x86d   : > { %v7299_v4 = vrot.slane %v7298_v42, 4  ;;  %v7350_v34 = vsel %vm7334_vm10, %v9305_v31, %v7342_v60  ;;  %v7297_v22 = vadd.f32 %v7296_v20, %v7295_v13  ;;  %v7557_v11 = vrot.slane %v14052_v25, %v15275_v53 }
 0x86e   : > { %v7424_v38 = vrot.slane %v7420_v52, 7  ;;  %v7312_v46 = vsel %vm4112_vm1, %v7262_v61, 0.0  ;;  %v7421_v50 = vcombine.low %v7349_v18, %v7350_v34  ;;  %v7309_v43 = vadd.f32 %v7308_v37, %v7307_v58 }
 0x86f   : > { %v7300_v59 = vadd.f32 %v7299_v4, %v7298_v42  ;;  %v7313_v6 = vrot.slane %v7312_v46, 4  ;;  %v7609_v58 = vrot.slane %v14054_v5, %v15275_v53 }
 0x870   : > { %v7432_v12 = vmul.f32 %v7424_v38, %v15276_v23  ;;  %v7464_v14 = vmul.f32 %v7424_v38, %v15277_v9  ;;  %v7425_v19 = vrot.slane %v7421_v50, 7  ;;  %v7310_v0 = vrot.slane %v7309_v43, 1 }
 0x871   : > { %v7301_v30 = vrot.slane %v7300_v59, 2  ;;  %v7314_v51 = vadd.f32 %v7313_v6, %v7312_v46 }
 0x872   : > { %v7460_v47 = vadd.f32 %v7451_v27, %v7432_v12  ;;  %v7468_v44 = vadd.f32 %v7464_v14, %v7451_v27  ;;  %v7433_v45 = vmul.f32 %v7425_v19, %v15278_v10  ;;  %v7465_v40 = vmul.f32 %v7425_v19, %v15279_v62 }
 0x873   : > { %v7315_v2 = vrot.slane %v7314_v51, 2  ;;  %v7302_v54 = vadd.f32 %v7301_v30, %v7300_v59  ;;  %v7311_v16 = vadd.f32 %v7310_v0, %v7309_v43 }
 0x874   : > { %v7461_v39 = vadd.f32 %v7453_v28, %v7433_v45  ;;  %v7469_v3 = vadd.f32 %v7465_v40, %v7453_v28  ;;  %v7541_v24 = vrot.slane %v7460_v47, %v15275_v53  ;;  %v7593_v55 = vrot.slane %v7468_v44, %v15275_v53 }
 0x875   : > { %v7303_v35 = vrot.slane %v7302_v54, 1  ;;  %v7316_v63 = vadd.f32 %v7315_v2, %v7314_v51 }
 0x876   : > { %v7548_v33 = vrot.slane %v7461_v39, %v15275_v53  ;;  %v7600_v48 = vrot.slane %v7469_v3, %v15275_v53 }
 0x877   : > { %v7304_v36 = vadd.f32 %v7303_v35, %v7302_v54  ;;  %v7317_v41 = vrot.slane %v7316_v63, 1 }
 0x878   : > { %v7550_v56 = vcombine.high %v7541_v24, %v7548_v33  ;;  %v7602_v21 = vcombine.low %v7593_v55, %v7600_v48 }
 0x879   : > { %v7318_v29 = vadd.f32 %v7317_v41, %v7316_v63  ;;  %v7361_v15 = vcombine.low %v7297_v22, %v7304_v36 }
 0x87a   : > { %v7564_v31 = vrot.slane %v7550_v56, %v15275_v53  ;;  %v7616_v17 = vrot.slane %v7602_v21, %v15275_v53 }
 0x87b   : > { %v7362_v49 = vcombine.low %v7311_v16, %v7318_v29  ;;  %v7383_v18 = vrot.slane %v7361_v15, %v15275_v53 }
 0x87c   : > { %v7565_v1 = vcombine.low %v7557_v11, %v7564_v31  ;;  %v7617_v8 = vcombine.high %v7609_v58, %v7616_v17 }
 0x87d   : > { %v7390_v25 = vrot.slane %v7362_v49, %v15275_v53 }
 0x87e   : > { %8204 = vst [vmem:[%s13561_s5 + $0x1] ss:$4 sm:$0xff] %v7565_v1  ;;  %8205 = vst [vmem:[%s13561_s5 + $0x2] ss:$4 sm:$0xff] %v7617_v8 }
 0x87f   : > { %9350 = shalt.err (!%p9347_p7)
}
 0x880   : > { %s9351_s5 = scalar_lea.hbm %s14111_s8, 512  ;;  %s9355_s1 = scalar_lea.hbm %s14218_s23, 2048 }
 0x881   : > { %p9352_p9 = scmp.ne.s32.totalorder %s14111_s8, %s9351_s5  ;;  %p9356_p12 = scmp.lt.u32.totalorder %s14111_s8, %s14218_s23 }
 0x882   : > { %p9357_p13 = scmp.lt.u32.totalorder %s9355_s1, %s9351_s5  ;;  %p9359_p1 = scmp.lt.u32.totalorder %s9351_s5, %s14111_s8 }
 0x883   : > { %p9353_p10 = pnand %p9352_p9, %p9601_p6 }
 0x884   : > { %p9358_p0 = por %p9357_p13, %p9356_p12 }
 0x885   : > { %p9354_p11 = pneg %p9353_p10 }
 0x886   : > { %p9360_p2 = por %p9359_p1, %p9358_p0 }
 0x888   : > { %p9361_p3 = pnand %p9360_p2, %p9354_p11 }
 0x88a   : > { %9364 = shalt.err (!%p9361_p3)
}
 0x88b   : > { %8217 = dma.vmem_to_hbm [thread:$0]  (%p9601_p6), %s14113_s30, 512, %s14111_s8, %s7623_s28   ;;  %v7392_v5 = vcombine.low %v7383_v18, %v7390_v25  ;;  %v7399_v60 = vrot.slane %v7391_v26, %v15275_v53  ;;  %v15281_v52 = vld [vmem:[#allocation224_spill] sm:$0xff] }
 0x88c   : > { %s8216_s4 = sshll.u32 %s9583_s6, 7  ;;  %s15280_s27 = sshll.u32 %s9642_s7, 3 }
 0x88d   : > { %v7406_v37 = vrot.slane %v7392_v5, %v15275_v53  ;;  %s826_s2 = scalar_lea.vmem [#allocation5], %s15280_s27  ;;  %s15282_s1 = sld [smem:[#allocation377_spill]] }
 0x88e   : > { %s7656_s5 = sshll.u32 %s826_s2, 4  ;;  %s7628_s30 = scalar_lea.sflag [#allocation6], %s9642_s7  ;;  %s14154_s5 = int_to_ptr.vmem [resolvable:$true] %s7656_s5 }
 0x88f   : > { %v7407_v42 = vcombine.low %v7399_v60, %v7406_v37  ;;  %s9365_s8 = scalar_lea.vmem %s14154_s5, 128  ;;  %s9436_s6 = smov [#allocation5]  }
 0x890   : > { %p9366_p4 = scmp.ne.s32.totalorder %s14154_s5, %s9365_s8  ;;  %s9369_s28 = sshll.u32 %s9436_s6, 4  ;;  %s9370_s28 = int_to_ptr.vmem [resolvable:$false] %s9369_s28 }
 0x891   : > { %v7409_v61 = vsub.f32 %v15281_v52, %v7407_v42  ;;  %s9371_s27 = scalar_lea.vmem %s9370_s28, 256  ;;  %p9372_p9 = scmp.lt.s32.totalorder %s14154_s5, %s9370_s28 }
 0x892   : > { %p9367_p5 = pnand %p9366_p4, %p9601_p6  ;;  %p9373_p10 = scmp.lt.s32.totalorder %s9371_s27, %s9365_s8 }
 0x893   : > { %s14152_s0 = scalar_lea.hbm %s15282_s1, %s8216_s4  ;;  %7621 = vst [vmem:[%s826_s2] sm:$0xff] %v7409_v61 }
 0x894   : > { %p9368_p7 = pneg %p9367_p5  ;;  %p9374_p11 = por %p9373_p10, %p9372_p9 }
 0x896   : > { %p9375_p12 = pnand %p9374_p11, %p9368_p7 }
 0x898   : > { %9378 = shalt.err (!%p9375_p12)
}
 0x899   : > { %s9379_s7 = scalar_lea.hbm %s14152_s0, 128  ;;  %s9383_s26 = scalar_lea.hbm %s15282_s1, 512 }
 0x89a   : > { %p9380_p13 = scmp.ne.s32.totalorder %s14152_s0, %s9379_s7  ;;  %p9384_p2 = scmp.lt.u32.totalorder %s14152_s0, %s15282_s1 }
 0x89b   : > { %p9385_p3 = scmp.lt.u32.totalorder %s9383_s26, %s9379_s7  ;;  %p9387_p5 = scmp.lt.u32.totalorder %s9379_s7, %s14152_s0 }
 0x89c   : > { %p9381_p0 = pnand %p9380_p13, %p9601_p6 }
 0x89d   : > { %p9386_p4 = por %p9385_p3, %p9384_p2 }
 0x89e   : > { %p9382_p1 = pneg %p9381_p0 }
 0x89f   : > { %p9388_p7 = por %p9387_p5, %p9386_p4 }
 0x8a1   : > { %p9389_p9 = pnand %p9388_p7, %p9382_p1 }
 0x8a3   : > { %9392 = shalt.err (!%p9389_p9)
}
 0x8a4   : > { %8218 = dma.vmem_to_hbm [thread:$0]  (%p9601_p6), %s14154_s5, 128, %s14152_s0, %s7628_s30  }
 0x8a5 PF: > { %s15283_s8 = sld [smem:[#allocation12_spill]]  ;;  %s15284_s28 = sld [smem:[#allocation9_spill]] }
 0x8ab   : > { %p8228_p10 = scmp.ge.s32.totalorder %s15283_s8, 2  ;;  %s7668_s4 = sand.u32 1, %s15284_s28  }
 0x8ac   : > { %s7669_s2 = scalar_lea.sflag [#allocation4], %s7668_s4 }
 0x8ad   : > { %p8222_p11 = pnand %p8228_p10, %p9605_p8 }
 0x8af   : > { %9410 = dma.done.wait (!%p8222_p11), %s7669_s2, 512  }
 0x8b0   : > { %9412 = vsyncadd (!%p8222_p11), %s7669_s2, 4294966784  ;;  %s7678_s7 = scalar_lea.sflag [#allocation6], %s7668_s4 }
 0x8b1   : > { %9414 = dma.done.wait (!%p8222_p11), %s7678_s7, 128  }
 0x8b2   : > { %9416 = vsyncadd (!%p8222_p11), %s7678_s7, 4294967168  ;;  %s15286_s28 = sld [smem:[#allocation13_spill]]  ;;  %s15287_s5 = sld [smem:[#allocation10_spill]] }
 0x8b3   : > { %s15288_s26 = sld [smem:[#allocation11_spill]]  ;;  %s15289_s27 = sld [smem:[#allocation14_spill]] }
 0x8b8   : > { %p38_p6 = scmp.ge.s32.totalorder %s15286_s28, 6  }
 0x8ba   :  { %40 = sbr.rel (!%p38_p6) target bundleno = 16 (0x10), region = 200 }
 0x8c1   :  { %7683 = vsyncpa [#allocation4], 1 }
 0x8c2   :  { %7685 = vsyncpa [#allocation4 + $0x1], 1 }
 0x8c3   :  { %7686 = vsyncpa [#allocation6], 1 }
 0x8c4   :  { %7688 = vsyncpa [#allocation6 + $0x1], 1 }

</bundles_post_ra>
